<compile_context>
chip_gen: v7x
topology: tpu7x:2x2x1
jax: 0.10.0
libtpu: 0.0.40
codegen_flags: <defaults>
</compile_context>

<pallas_src>
import functools

import jax
import jax.numpy as jnp
from jax.experimental import pallas as pl
from jax.experimental.pallas import tpu as pltpu


def _round_up(x, m):
    return (x + m - 1) // m * m


# -----------------------------------------------------------------------------
# Pallas kernels
# -----------------------------------------------------------------------------
def _nt_mm_bias_act_kernel(w_ref, x_ref, b_ref, o_ref, *, activation):
    # (N, K) @ (K, tm) -> (N, tm); N/K small, tm lane-dense.
    acc = jnp.dot(w_ref[...], x_ref[...], preferred_element_type=jnp.float32)
    acc = acc + b_ref[...]                       # (N, 1) broadcast over lanes
    if activation == "relu":
        acc = jnp.maximum(acc, 0.0)
    o_ref[...] = acc.astype(o_ref.dtype)


def matmul_nt_bias_act(wm, xt, b, activation="none", out_dtype=jnp.bfloat16,
                       tm_cap=8192):
    """out (N, M) = wm (N, K) @ xt (K, M) + b with fused activation.

    M (the big spatial dim) is tiled on the lane axis; ragged edge blocks are
    handled by Pallas, so no pad copies of the patch matrix are needed."""
    N, K = wm.shape
    K2, M = xt.shape
    assert K == K2
    tm = min(tm_cap, _round_up(M, 128))
    b2 = b.reshape(N, 1).astype(jnp.float32)
    return pl.pallas_call(
        functools.partial(_nt_mm_bias_act_kernel, activation=activation),
        out_shape=jax.ShapeDtypeStruct((N, M), out_dtype),
        grid=(pl.cdiv(M, tm),),
        in_specs=[
            pl.BlockSpec((N, K), lambda i: (0, 0)),
            pl.BlockSpec((K, tm), lambda i: (0, i)),
            pl.BlockSpec((N, 1), lambda i: (0, 0)),
        ],
        out_specs=pl.BlockSpec((N, tm), lambda i: (0, i)),
        compiler_params=pltpu.CompilerParams(dimension_semantics=("parallel",)),
    )(wm, xt, b2)


def _max_over_wins_kernel(w_ref, o_ref):
    # (KK, 8, tn) -> (8, tn): elementwise max over the window axis (VPU only).
    o_ref[...] = jnp.max(w_ref[...], axis=0)


def _max_over_wins(wins, tn_cap=4096):
    KK, R8, NL = wins.shape
    tn = min(tn_cap, _round_up(NL, 128))
    return pl.pallas_call(
        _max_over_wins_kernel,
        out_shape=jax.ShapeDtypeStruct((R8, NL), wins.dtype),
        grid=(pl.cdiv(NL, tn),),
        in_specs=[pl.BlockSpec((KK, R8, tn), lambda i: (0, 0, i))],
        out_specs=pl.BlockSpec((R8, tn), lambda i: (0, i)),
        compiler_params=pltpu.CompilerParams(dimension_semantics=("parallel",)),
    )(wins)


def _fc_head_kernel(x_ref, w1_ref, b1_ref, w2_ref, b2_ref, o_ref):
    # fc1 + ReLU + fc2 + sigmoid fused into one call (fc2 as a lane reduction).
    h = jnp.dot(x_ref[...], w1_ref[...], preferred_element_type=jnp.float32)
    h = jnp.maximum(h + b1_ref[...], 0.0)                       # (B, c3) f32
    logit = jnp.sum(h * w2_ref[...], axis=1, keepdims=True) + b2_ref[...]
    o_ref[...] = 0.5 * (jnp.tanh(0.5 * logit) + 1.0)            # stable sigmoid


def fc_head(x, w1t, b1, w2, b2):
    B, Din = x.shape
    Dh = w1t.shape[1]
    return pl.pallas_call(
        _fc_head_kernel,
        out_shape=jax.ShapeDtypeStruct((B, 1), jnp.float32),
        grid=(1,),
        in_specs=[
            pl.BlockSpec((B, Din), lambda i: (0, 0)),
            pl.BlockSpec((Din, Dh), lambda i: (0, 0)),
            pl.BlockSpec((1, Dh), lambda i: (0, 0)),
            pl.BlockSpec((1, Dh), lambda i: (0, 0)),
            pl.BlockSpec((1, 1), lambda i: (0, 0)),
        ],
        out_specs=pl.BlockSpec((B, 1), lambda i: (0, 0)),
    )(x, w1t, b1, w2, b2)


# -----------------------------------------------------------------------------
# Layer wrappers (single-fusion im2col / window gather in JAX; compute in Pallas)
# -----------------------------------------------------------------------------
def conv2d_relu(x, w, b, stride, padding):
    """Conv2d + ReLU.  x is channel-major (CI, B, H, W); returns (CO, B, OH, OW).

    im2col patches are built once, in bf16, directly in the transposed (K, M)
    layout, then the MACs run in the lane-dense Pallas matmul."""
    CI, B, H, W = x.shape
    CO, CI2, KH, KW = w.shape
    assert CI == CI2
    sh, sw = stride
    ph, pw = padding
    OH = (H + 2 * ph - KH) // sh + 1
    OW = (W + 2 * pw - KW) // sw + 1
    xp = jnp.pad(x.astype(jnp.bfloat16), ((0, 0), (0, 0), (ph, ph), (pw, pw)))
    taps = [
        xp[:, :, kh: kh + sh * (OH - 1) + 1: sh, kw: kw + sw * (OW - 1) + 1: sw]
        for kh in range(KH) for kw in range(KW)
    ]
    # (CI, KH*KW, B, OH, OW) -> (K, M):  K index = ci*KH*KW + kh*KW + kw, which
    # matches w.reshape(CO, CI*KH*KW);  M index = b*OH*OW + oh*OW + ow.
    pat = jnp.stack(taps, axis=1).reshape(CI * KH * KW, B * OH * OW)
    wmat = w.reshape(CO, CI * KH * KW).astype(jnp.bfloat16)
    y = matmul_nt_bias_act(wmat, pat, b, activation="relu")   # (CO, B*OH*OW)
    return y.reshape(CO, B, OH, OW)


def maxpool2d(x, ksz, stride, pad):
    """MaxPool2d(ksz, stride, pad) on channel-major (C, B, H, W).

    stride == ksz here, so the window stack is a repartition (no expansion);
    windows are flattened so the Pallas reduce sees fully lane-dense blocks."""
    C, B, H, W = x.shape
    OH = (H + 2 * pad - ksz) // stride + 1
    OW = (W + 2 * pad - ksz) // stride + 1
    neg = -jnp.inf
    xp = jnp.pad(x, ((0, 0), (0, 0), (pad, pad), (pad, pad)),
                 constant_values=neg)
    wins = [
        xp[:, :, kh: kh + stride * (OH - 1) + 1: stride,
              kw: kw + stride * (OW - 1) + 1: stride]
        for kh in range(ksz) for kw in range(ksz)
    ]
    wins = jnp.stack(wins, axis=0).reshape(ksz * ksz, -1)     # (KK, C*B*OH*OW)
    n = wins.shape[1]
    n8 = _round_up(n, 8)
    if n8 != n:
        wins = jnp.pad(wins, ((0, 0), (0, n8 - n)), constant_values=neg)
    wins = wins.reshape(ksz * ksz, 8, n8 // 8)
    out = _max_over_wins(wins)                                # (8, n8//8)
    return out.reshape(-1)[:n].reshape(C, B, OH, OW)


# -----------------------------------------------------------------------------
# Lenet forward
# -----------------------------------------------------------------------------
def lenet_forward(x, p):
    # Channel-major activations (C, B, H, W); (B,1,H,W)->(1,B,H,W) is a bitcast.
    h = jnp.transpose(x, (1, 0, 2, 3))

    # Block 1: Conv2d(1->c1, 5, pad=(1,2), stride=(2,4)) + ReLU + MaxPool(3,3,1)
    h = conv2d_relu(h, p["conv1_w"], p["conv1_b"], stride=(2, 4), padding=(1, 2))
    h = maxpool2d(h, ksz=3, stride=3, pad=1)
    # Dropout(0.5): identity in eval mode.

    # Block 2: Conv2d(c1->c2, 5, pad=(1,2), stride=(2,4)) + ReLU + MaxPool(2,2,1)
    h = conv2d_relu(h, p["conv2_w"], p["conv2_b"], stride=(2, 4), padding=(1, 2))
    h = maxpool2d(h, ksz=2, stride=2, pad=1)

    # View(-1, c2*8*14): back to PyTorch's batch-major (c, h, w) feature order.
    B = h.shape[1]
    feat = jnp.transpose(h, (1, 0, 2, 3)).reshape(B, -1).astype(jnp.bfloat16)

    # Linear + ReLU (+ Dropout identity) + Linear + Sigmoid, fused in one call.
    w1t = p["fc1_w"].T.astype(jnp.bfloat16)               # (c2*8*14, c3)
    b1 = p["fc1_b"].reshape(1, -1).astype(jnp.float32)
    w2 = p["fc2_w"].reshape(1, -1).astype(jnp.bfloat16)   # (1, c3)
    b2 = p["fc2_b"].reshape(1, 1).astype(jnp.float32)
    return fc_head(feat, w1t, b1, w2, b2)


def init_params(key, c1=20, c2=50, c3=100):
    ks = jax.random.split(key, 8)

    def u(k, shape, fan_in):
        bound = 1.0 / float(fan_in) ** 0.5
        return jax.random.uniform(k, shape, jnp.float32, -bound, bound)

    p = {}
    p["conv1_w"] = u(ks[0], (c1, 1, 5, 5), 1 * 25)
    p["conv1_b"] = u(ks[1], (c1,), 1 * 25)
    p["conv2_w"] = u(ks[2], (c2, c1, 5, 5), c1 * 25)
    p["conv2_b"] = u(ks[3], (c2,), c1 * 25)
    p["fc1_w"] = u(ks[4], (c3, c2 * 8 * 14), c2 * 8 * 14)  # PyTorch Linear (out, in)
    p["fc1_b"] = u(ks[5], (c3,), c2 * 8 * 14)
    p["fc2_w"] = u(ks[6], (1, c3), c3)
    p["fc2_b"] = u(ks[7], (1,), c3)
    return p


if __name__ == "__main__":
    key = jax.random.PRNGKey(0)
    pkey, xkey = jax.random.split(key)
    params = init_params(pkey)

    # NCHW input: (B=2, C=1, H=192, W=1280) — the smallest "round" spatial size
    # consistent with the architecture's hard-coded View(c2*8*14).
    x = jax.random.normal(xkey, (2, 1, 192, 1280), jnp.float32)

    out = jax.jit(lenet_forward)(x, params)
    out = jax.block_until_ready(out)

    assert out.shape == (2, 1), out.shape
    assert bool(jnp.all(jnp.isfinite(out)))
    assert bool(jnp.all((out >= 0.0) & (out <= 1.0)))
    print("KERNEL_OK")
</pallas_src>

<mosaic_0001>
module attributes {stable_mosaic.version = 11 : i64} {
  func.func @_nt_mm_bias_act_kernel(%arg0: i32, %arg1: memref<20x25xbf16, #tpu.memory_space<vmem>>, %arg2: memref<25x8192xbf16, #tpu.memory_space<vmem>>, %arg3: memref<20x1xf32, #tpu.memory_space<vmem>>, %arg4: memref<20x8192xbf16, #tpu.memory_space<vmem>>) attributes {dimension_semantics = [#tpu.dimension_semantics<parallel>], iteration_bounds = array<i64: 8>, scalar_prefetch = 0 : i64, scratch_operands = 0 : i64, tpu.core_type = #tpu.core_type<tc>, window_params = [{pipeline_mode = #tpu.pipeline_mode<synchronous>, transform_indices = @transform_0, window_bounds = array<i64: 20, 25>}, {transform_indices = @transform_1, window_bounds = array<i64: 25, 8192>}, {pipeline_mode = #tpu.pipeline_mode<synchronous>, transform_indices = @transform_2, window_bounds = array<i64: 20, 1>}, {transform_indices = @transform_3, window_bounds = array<i64: 20, 8192>}]} {
    %c0 = arith.constant 0 : index
    %c0_0 = arith.constant 0 : index
    %0 = vector.load %arg1[%c0, %c0_0] : memref<20x25xbf16, #tpu.memory_space<vmem>>, vector<20x25xbf16>
    %c0_1 = arith.constant 0 : index
    %c0_2 = arith.constant 0 : index
    %1 = vector.load %arg2[%c0_1, %c0_2] : memref<25x8192xbf16, #tpu.memory_space<vmem>>, vector<25x8192xbf16>
    %cst = arith.constant dense<0.000000e+00> : vector<20x8192xf32>
    %2 = tpu.matmul %0, %1, %cst {dimension_numbers = #tpu.dot_dimension_numbers<[1], [0], [0], [1], [0, 0, 1, 1], [], []>} : vector<20x25xbf16>, vector<25x8192xbf16>, vector<20x8192xf32> -> vector<20x8192xf32>
    %c0_3 = arith.constant 0 : index
    %c0_4 = arith.constant 0 : index
    %3 = vector.load %arg3[%c0_3, %c0_4] : memref<20x1xf32, #tpu.memory_space<vmem>>, vector<20x1xf32>
    %4 = vector.broadcast %3 : vector<20x1xf32> to vector<20x8192xf32>
    %5 = arith.addf %2, %4 : vector<20x8192xf32>
    %cst_5 = arith.constant 0.000000e+00 : f32
    %6 = vector.broadcast %cst_5 : f32 to vector<20x8192xf32>
    %7 = arith.maximumf %5, %6 : vector<20x8192xf32>
    %8 = arith.truncf %7 : vector<20x8192xf32> to vector<20x8192xbf16>
    %c0_6 = arith.constant 0 : index
    %c0_7 = arith.constant 0 : index
    %9 = vector.load %arg4[%c0_6, %c0_7] : memref<20x8192xbf16, #tpu.memory_space<vmem>>, vector<20x8192xbf16>
    tpu.vector_store %arg4[%c0_6, %c0_7], %8 {strides = array<i32>} : memref<20x8192xbf16, #tpu.memory_space<vmem>>, vector<20x8192xbf16>,
    return
  }
  func.func @transform_0(%arg0: i32) -> (i32, i32) {
    %c0_i32 = arith.constant 0 : i32
    %c0_i32_0 = arith.constant 0 : i32
    %c0_i32_1 = arith.constant 0 : i32
    return %c0_i32, %c0_i32_0 : i32, i32
  }
  func.func @transform_1(%arg0: i32) -> (i32, i32) {
    %c0_i32 = arith.constant 0 : i32
    %c0_i32_0 = arith.constant 0 : i32
    return %c0_i32, %arg0 : i32, i32
  }
  func.func @transform_2(%arg0: i32) -> (i32, i32) {
    %c0_i32 = arith.constant 0 : i32
    %c0_i32_0 = arith.constant 0 : i32
    %c0_i32_1 = arith.constant 0 : i32
    return %c0_i32, %c0_i32_0 : i32, i32
  }
  func.func @transform_3(%arg0: i32) -> (i32, i32) {
    %c0_i32 = arith.constant 0 : i32
    %c0_i32_0 = arith.constant 0 : i32
    return %c0_i32, %arg0 : i32, i32
  }
}

module attributes {stable_mosaic.version = 11 : i64} {
  func.func @_max_over_wins_kernel(%arg0: i32, %arg1: memref<9x8x4096xbf16, #tpu.memory_space<vmem>>, %arg2: memref<8x4096xbf16, #tpu.memory_space<vmem>>) attributes {dimension_semantics = [#tpu.dimension_semantics<parallel>], iteration_bounds = array<i64: 5>, scalar_prefetch = 0 : i64, scratch_operands = 0 : i64, tpu.core_type = #tpu.core_type<tc>, window_params = [{transform_indices = @transform_0, window_bounds = array<i64: 9, 8, 4096>}, {transform_indices = @transform_1, window_bounds = array<i64: 8, 4096>}]} {
    %c0 = arith.constant 0 : index
    %c0_0 = arith.constant 0 : index
    %c0_1 = arith.constant 0 : index
    %0 = vector.load %arg1[%c0, %c0_0, %c0_1] : memref<9x8x4096xbf16, #tpu.memory_space<vmem>>, vector<9x8x4096xbf16>
    %cst = arith.constant dense<0xFF80> : vector<8x4096xbf16>
    %1 = vector.multi_reduction <maximumf>, %0, %cst [0] : vector<9x8x4096xbf16> to vector<8x4096xbf16>
    %c0_2 = arith.constant 0 : index
    %c0_3 = arith.constant 0 : index
    %2 = vector.load %arg2[%c0_2, %c0_3] : memref<8x4096xbf16, #tpu.memory_space<vmem>>, vector<8x4096xbf16>
    tpu.vector_store %arg2[%c0_2, %c0_3], %1 {strides = array<i32>} : memref<8x4096xbf16, #tpu.memory_space<vmem>>, vector<8x4096xbf16>,
    return
  }
  func.func @transform_0(%arg0: i32) -> (i32, i32, i32) {
    %c0_i32 = arith.constant 0 : i32
    %c0_i32_0 = arith.constant 0 : i32
    %c0_i32_1 = arith.constant 0 : i32
    return %c0_i32, %c0_i32_0, %arg0 : i32, i32, i32
  }
  func.func @transform_1(%arg0: i32) -> (i32, i32) {
    %c0_i32 = arith.constant 0 : i32
    %c0_i32_0 = arith.constant 0 : i32
    return %c0_i32, %arg0 : i32, i32
  }
}

module attributes {stable_mosaic.version = 11 : i64} {
  func.func @_nt_mm_bias_act_kernel(%arg0: i32, %arg1: memref<50x500xbf16, #tpu.memory_space<vmem>>, %arg2: memref<500x896xbf16, #tpu.memory_space<vmem>>, %arg3: memref<50x1xf32, #tpu.memory_space<vmem>>, %arg4: memref<50x896xbf16, #tpu.memory_space<vmem>>) attributes {dimension_semantics = [#tpu.dimension_semantics<parallel>], iteration_bounds = array<i64: 1>, scalar_prefetch = 0 : i64, scratch_operands = 0 : i64, tpu.core_type = #tpu.core_type<tc>, window_params = [{pipeline_mode = #tpu.pipeline_mode<synchronous>, transform_indices = @transform_0, window_bounds = array<i64: 50, 500>}, {transform_indices = @transform_1, window_bounds = array<i64: 500, 896>}, {pipeline_mode = #tpu.pipeline_mode<synchronous>, transform_indices = @transform_2, window_bounds = array<i64: 50, 1>}, {transform_indices = @transform_3, window_bounds = array<i64: 50, 896>}]} {
    %c0 = arith.constant 0 : index
    %c0_0 = arith.constant 0 : index
    %0 = vector.load %arg1[%c0, %c0_0] : memref<50x500xbf16, #tpu.memory_space<vmem>>, vector<50x500xbf16>
    %c0_1 = arith.constant 0 : index
    %c0_2 = arith.constant 0 : index
    %1 = vector.load %arg2[%c0_1, %c0_2] : memref<500x896xbf16, #tpu.memory_space<vmem>>, vector<500x896xbf16>
    %cst = arith.constant dense<0.000000e+00> : vector<50x896xf32>
    %2 = tpu.matmul %0, %1, %cst {dimension_numbers = #tpu.dot_dimension_numbers<[1], [0], [0], [1], [0, 0, 1, 1], [], []>} : vector<50x500xbf16>, vector<500x896xbf16>, vector<50x896xf32> -> vector<50x896xf32>
    %c0_3 = arith.constant 0 : index
    %c0_4 = arith.constant 0 : index
    %3 = vector.load %arg3[%c0_3, %c0_4] : memref<50x1xf32, #tpu.memory_space<vmem>>, vector<50x1xf32>
    %4 = vector.broadcast %3 : vector<50x1xf32> to vector<50x896xf32>
    %5 = arith.addf %2, %4 : vector<50x896xf32>
    %cst_5 = arith.constant 0.000000e+00 : f32
    %6 = vector.broadcast %cst_5 : f32 to vector<50x896xf32>
    %7 = arith.maximumf %5, %6 : vector<50x896xf32>
    %8 = arith.truncf %7 : vector<50x896xf32> to vector<50x896xbf16>
    %c0_6 = arith.constant 0 : index
    %c0_7 = arith.constant 0 : index
    %9 = vector.load %arg4[%c0_6, %c0_7] : memref<50x896xbf16, #tpu.memory_space<vmem>>, vector<50x896xbf16>
    tpu.vector_store %arg4[%c0_6, %c0_7], %8 {strides = array<i32>} : memref<50x896xbf16, #tpu.memory_space<vmem>>, vector<50x896xbf16>,
    return
  }
  func.func @transform_0(%arg0: i32) -> (i32, i32) {
    %c0_i32 = arith.constant 0 : i32
    %c0_i32_0 = arith.constant 0 : i32
    %c0_i32_1 = arith.constant 0 : i32
    return %c0_i32, %c0_i32_0 : i32, i32
  }
  func.func @transform_1(%arg0: i32) -> (i32, i32) {
    %c0_i32 = arith.constant 0 : i32
    %c0_i32_0 = arith.constant 0 : i32
    return %c0_i32, %arg0 : i32, i32
  }
  func.func @transform_2(%arg0: i32) -> (i32, i32) {
    %c0_i32 = arith.constant 0 : i32
    %c0_i32_0 = arith.constant 0 : i32
    %c0_i32_1 = arith.constant 0 : i32
    return %c0_i32, %c0_i32_0 : i32, i32
  }
  func.func @transform_3(%arg0: i32) -> (i32, i32) {
    %c0_i32 = arith.constant 0 : i32
    %c0_i32_0 = arith.constant 0 : i32
    return %c0_i32, %arg0 : i32, i32
  }
}

module attributes {stable_mosaic.version = 11 : i64} {
  func.func @_max_over_wins_kernel(%arg0: i32, %arg1: memref<4x8x1408xbf16, #tpu.memory_space<vmem>>, %arg2: memref<8x1408xbf16, #tpu.memory_space<vmem>>) attributes {dimension_semantics = [#tpu.dimension_semantics<parallel>], iteration_bounds = array<i64: 1>, scalar_prefetch = 0 : i64, scratch_operands = 0 : i64, tpu.core_type = #tpu.core_type<tc>, window_params = [{transform_indices = @transform_0, window_bounds = array<i64: 4, 8, 1408>}, {transform_indices = @transform_1, window_bounds = array<i64: 8, 1408>}]} {
    %c0 = arith.constant 0 : index
    %c0_0 = arith.constant 0 : index
    %c0_1 = arith.constant 0 : index
    %0 = vector.load %arg1[%c0, %c0_0, %c0_1] : memref<4x8x1408xbf16, #tpu.memory_space<vmem>>, vector<4x8x1408xbf16>
    %cst = arith.constant dense<0xFF80> : vector<8x1408xbf16>
    %1 = vector.multi_reduction <maximumf>, %0, %cst [0] : vector<4x8x1408xbf16> to vector<8x1408xbf16>
    %c0_2 = arith.constant 0 : index
    %c0_3 = arith.constant 0 : index
    %2 = vector.load %arg2[%c0_2, %c0_3] : memref<8x1408xbf16, #tpu.memory_space<vmem>>, vector<8x1408xbf16>
    tpu.vector_store %arg2[%c0_2, %c0_3], %1 {strides = array<i32>} : memref<8x1408xbf16, #tpu.memory_space<vmem>>, vector<8x1408xbf16>,
    return
  }
  func.func @transform_0(%arg0: i32) -> (i32, i32, i32) {
    %c0_i32 = arith.constant 0 : i32
    %c0_i32_0 = arith.constant 0 : i32
    %c0_i32_1 = arith.constant 0 : i32
    return %c0_i32, %c0_i32_0, %arg0 : i32, i32, i32
  }
  func.func @transform_1(%arg0: i32) -> (i32, i32) {
    %c0_i32 = arith.constant 0 : i32
    %c0_i32_0 = arith.constant 0 : i32
    return %c0_i32, %arg0 : i32, i32
  }
}

module attributes {stable_mosaic.version = 11 : i64} {
  func.func @_fc_head_kernel(%arg0: i32, %arg1: memref<2x5600xbf16, #tpu.memory_space<vmem>>, %arg2: memref<5600x100xbf16, #tpu.memory_space<vmem>>, %arg3: memref<1x100xf32, #tpu.memory_space<vmem>>, %arg4: memref<1x100xbf16, #tpu.memory_space<vmem>>, %arg5: memref<1x1xf32, #tpu.memory_space<vmem>>, %arg6: memref<2x1xf32, #tpu.memory_space<vmem>>) attributes {dimension_semantics = [#tpu.dimension_semantics<arbitrary>], iteration_bounds = array<i64: 1>, scalar_prefetch = 0 : i64, scratch_operands = 0 : i64, tpu.core_type = #tpu.core_type<tc>, window_params = [{pipeline_mode = #tpu.pipeline_mode<synchronous>, transform_indices = @transform_0, window_bounds = array<i64: 2, 5600>}, {pipeline_mode = #tpu.pipeline_mode<synchronous>, transform_indices = @transform_1, window_bounds = array<i64: 5600, 100>}, {pipeline_mode = #tpu.pipeline_mode<synchronous>, transform_indices = @transform_2, window_bounds = array<i64: 1, 100>}, {pipeline_mode = #tpu.pipeline_mode<synchronous>, transform_indices = @transform_3, window_bounds = array<i64: 1, 100>}, {pipeline_mode = #tpu.pipeline_mode<synchronous>, transform_indices = @transform_4, window_bounds = array<i64: 1, 1>}, {pipeline_mode = #tpu.pipeline_mode<synchronous>, transform_indices = @transform_5, window_bounds = array<i64: 2, 1>}]} {
    %c0 = arith.constant 0 : index
    %c0_0 = arith.constant 0 : index
    %0 = vector.load %arg1[%c0, %c0_0] : memref<2x5600xbf16, #tpu.memory_space<vmem>>, vector<2x5600xbf16>
    %c0_1 = arith.constant 0 : index
    %c0_2 = arith.constant 0 : index
    %1 = vector.load %arg2[%c0_1, %c0_2] : memref<5600x100xbf16, #tpu.memory_space<vmem>>, vector<5600x100xbf16>
    %cst = arith.constant dense<0.000000e+00> : vector<2x100xf32>
    %2 = tpu.matmul %0, %1, %cst {dimension_numbers = #tpu.dot_dimension_numbers<[1], [0], [0], [1], [0, 0, 1, 1], [], []>} : vector<2x5600xbf16>, vector<5600x100xbf16>, vector<2x100xf32> -> vector<2x100xf32>
    %c0_3 = arith.constant 0 : index
    %c0_4 = arith.constant 0 : index
    %3 = vector.load %arg3[%c0_3, %c0_4] : memref<1x100xf32, #tpu.memory_space<vmem>>, vector<1x100xf32>
    %4 = vector.broadcast %3 : vector<1x100xf32> to vector<2x100xf32>
    %5 = arith.addf %2, %4 : vector<2x100xf32>
    %cst_5 = arith.constant 0.000000e+00 : f32
    %6 = vector.broadcast %cst_5 : f32 to vector<2x100xf32>
    %7 = arith.maximumf %5, %6 : vector<2x100xf32>
    %c0_6 = arith.constant 0 : index
    %c0_7 = arith.constant 0 : index
    %8 = vector.load %arg4[%c0_6, %c0_7] : memref<1x100xbf16, #tpu.memory_space<vmem>>, vector<1x100xbf16>
    %9 = arith.extf %8 : vector<1x100xbf16> to vector<1x100xf32>
    %10 = vector.broadcast %9 : vector<1x100xf32> to vector<2x100xf32>
    %11 = arith.mulf %7, %10 : vector<2x100xf32>
    %cst_8 = arith.constant dense<0.000000e+00> : vector<2xf32>
    %12 = vector.multi_reduction <add>, %11, %cst_8 [1] : vector<2x100xf32> to vector<2xf32>
    %13 = vector.shape_cast %12 : vector<2xf32> to vector<2x1xf32>
    %c0_9 = arith.constant 0 : index
    %c0_10 = arith.constant 0 : index
    %14 = vector.load %arg5[%c0_9, %c0_10] : memref<1x1xf32, #tpu.memory_space<vmem>>, vector<1x1xf32>
    %15 = vector.broadcast %14 : vector<1x1xf32> to vector<2x1xf32>
    %16 = arith.addf %13, %15 : vector<2x1xf32>
    %cst_11 = arith.constant 5.000000e-01 : f32
    %17 = vector.broadcast %cst_11 : f32 to vector<2x1xf32>
    %18 = arith.mulf %17, %16 : vector<2x1xf32>
    %19 = math.tanh %18 : vector<2x1xf32>
    %cst_12 = arith.constant 1.000000e+00 : f32
    %20 = vector.broadcast %cst_12 : f32 to vector<2x1xf32>
    %21 = arith.addf %19, %20 : vector<2x1xf32>
    %cst_13 = arith.constant 5.000000e-01 : f32
    %22 = vector.broadcast %cst_13 : f32 to vector<2x1xf32>
    %23 = arith.mulf %22, %21 : vector<2x1xf32>
    %c0_14 = arith.constant 0 : index
    %c0_15 = arith.constant 0 : index
    %24 = vector.load %arg6[%c0_14, %c0_15] : memref<2x1xf32, #tpu.memory_space<vmem>>, vector<2x1xf32>
    tpu.vector_store %arg6[%c0_14, %c0_15], %23 {strides = array<i32>} : memref<2x1xf32, #tpu.memory_space<vmem>>, vector<2x1xf32>,
    return
  }
  func.func @transform_0(%arg0: i32) -> (i32, i32) {
    %c0_i32 = arith.constant 0 : i32
    %c0_i32_0 = arith.constant 0 : i32
    %c0_i32_1 = arith.constant 0 : i32
    return %c0_i32, %c0_i32_0 : i32, i32
  }
  func.func @transform_1(%arg0: i32) -> (i32, i32) {
    %c0_i32 = arith.constant 0 : i32
    %c0_i32_0 = arith.constant 0 : i32
    %c0_i32_1 = arith.constant 0 : i32
    return %c0_i32, %c0_i32_0 : i32, i32
  }
  func.func @transform_2(%arg0: i32) -> (i32, i32) {
    %c0_i32 = arith.constant 0 : i32
    %c0_i32_0 = arith.constant 0 : i32
    %c0_i32_1 = arith.constant 0 : i32
    return %c0_i32, %c0_i32_0 : i32, i32
  }
  func.func @transform_3(%arg0: i32) -> (i32, i32) {
    %c0_i32 = arith.constant 0 : i32
    %c0_i32_0 = arith.constant 0 : i32
    %c0_i32_1 = arith.constant 0 : i32
    return %c0_i32, %c0_i32_0 : i32, i32
  }
  func.func @transform_4(%arg0: i32) -> (i32, i32) {
    %c0_i32 = arith.constant 0 : i32
    %c0_i32_0 = arith.constant 0 : i32
    %c0_i32_1 = arith.constant 0 : i32
    return %c0_i32, %c0_i32_0 : i32, i32
  }
  func.func @transform_5(%arg0: i32) -> (i32, i32) {
    %c0_i32 = arith.constant 0 : i32
    %c0_i32_0 = arith.constant 0 : i32
    %c0_i32_1 = arith.constant 0 : i32
    return %c0_i32, %c0_i32_0 : i32, i32
  }
}

</mosaic_0001>

<bundles_post_ra>
// kernel: lenet_forward.5
= control target key start
LH: loop header
LB: loop body
LE: loop exit
PB: predicated region body
PF: predicated region fallthrough
CT: control target
= control target key end

     0   :  { %s5846_s12 = smov 0   ;;  %s5848_s13 = smov 0   ;;  %s7575_s0 = inlined_call_operand.vmem [shape: bf16[20,25], index: 0, kind: input, shape index: {}]   ;;  %s7576_s1 = inlined_call_operand.vmem [shape: bf16[25,60800], index: 1, kind: input, shape index: {}]   ;;  %s7577_s2 = inlined_call_operand.vmem [shape: f32[20,1], index: 2, kind: input, shape index: {}]   ;;  %s7578_s3 = inlined_call_operand.vmem [shape: bf16[20,60800], index: 3, kind: output, shape index: {}]  }
   0x1   :  { %s5850_s14 = smov 0  }
   0x2 LB: > { %s5862_s15 = sadd.s32 4294967295, %s5690_s14   ;;  %s5865_s16 = sadd.s32 1, %s5690_s14   ;;  %s5690_s14 = sphi %s5850_s14, %s7610_s14   ;;  %s5686_s13 = sphi %s5848_s13, %s7609_s13   ;;  %s5682_s12 = sphi %s5846_s12, %s7608_s12  }
   0x3   : > { %s38_s17 = ssub.s32 %s5690_s14, %s5865_s16  ;;  %s41_s18 = sadd.s32 1, %s5686_s13 }
   0x4   : > { %p39_p0 = scmp.eq.s32.totalorder %s38_s17, 0  ;;  %p48_p1 = scmp.ne.s32.totalorder %s5686_s13, %s5682_s12 }
   0x5   : > { %p49_p2 = scmp.eq.s32.totalorder %s5690_s14, 0  ;;  %p99_p3 = scmp.eq.s32.totalorder %s5862_s15, 7 }
   0x6   : > { %s5875_s19 = scalar_select %p39_p0, %s5686_s13, %s41_s18  }
   0x7   : > { %p50_p4 = por %p49_p2, %p48_p1  ;;  %p5877_p5 = por %p99_p3, %p48_p1 }
   0x8   : > { %p4794_p6 = scmp.ge.s32.totalorder %s5690_s14, 8 }
   0xa   : > { %127 = sbr.rel (%p4794_p6) target bundleno = 191 (0xbf), region = 24 }
  0x11   : > { %130 = sbr.rel (!%p50_p4) target bundleno = 191 (0xbf), region = 28  ;;  %s132_s21 = sand.u32 (%p50_p4), 1, %s5686_s13  }
  0x12   : > { %s4796_s22 = sshll.u32 (%p50_p4), %s5690_s14, 6  ;;  %s4795_s23 = sshll.u32 (%p50_p4), %s132_s21, 10 }
  0x13   : > { %s136_s24 = ssub.s32 (%p50_p4), 475, %s4796_s22  ;;  %s5135_s25 = sshll.u32 (%p50_p4), %s5690_s14, 8 }
  0x14   : > { %p137_p7 = scmp.lt.s32.totalorder (%p50_p4), %s136_s24, 64  ;;  %s5888_s28 = scalar_lea.vmem (%p50_p4), %s7576_s1, %s5135_s25  }
  0x15   : > { %s5892_s4 = scalar_lea.vmem (%p50_p4), [#allocation2], %s4795_s23  }
  0x18   : > { %s7612_s24 = smov (!%p137_p7, %s136_s24), 64 }
  0x19   : > { %s4797_s29 = sshll.u32 %s7612_s24, 8  ;;  %s5890_s30 = sshll.u32 %s7612_s24, 2 }
  0x1a   : > { %p4801_p8 = scmp.eq.s32.totalorder %s4797_s29, 0 }
  0x1b   : > { %p147_p9 = scmp.lt.u32.totalorder (!%p4801_p8), %s5890_s30, 8 }
  0x1c   : > { %146 = sbr.rel (%p4801_p8) target bundleno = 191 (0xbf), region = 32 }
  0x23   : > { %150 = sbr.rel (%p147_p9) target bundleno = 182 (0xb6), region = 36  ;;  %s5896_s5 = sand.u32 (!%p147_p9), 7, %s5890_s30  }
  0x24   : > { %p172_p10 = scmp.eq.s32.totalorder (!%p147_p9), %s5896_s5, 0  ;;  %p4802_p11 = scmp.ne.s32.totalorder (!%p147_p9), %s5896_s5, 0 }
  0x2a   : > { %175 = sbr.rel (%p4802_p11) target bundleno = 109 (0x6d), region = 51  ;;  %s176_s6 = sshrl.u32 (!%p4802_p11), %s5890_s30, 3 }
  0x2b   : > { %s5903_s7 = sshrl.u32 (!%p4802_p11), %s176_s6, 4 }
  0x2c   : > { %p4803_p12 = scmp.le.s32.totalorder (!%p4802_p11), %s5903_s7, 0 }
  0x31   : > { %4664 = sbr.rel (%p4803_p12) target bundleno = 89 (0x59), region = 229  ;;  %s7580_s8 = smov (!%p4803_p12), %s5892_s4 }
  0x32   : > { %s7581_s9 = smov (!%p4803_p12), %s5888_s28  ;;  %s5912_s10 = smov (!%p4803_p12), 0  }
  0x33   : > { %s5914_s11 = smov (!%p4803_p12), 0  }
  0x38 LB: >> { %v189_v0 = vld [vmem:[%s5698_s9] sm:$0xff]  ;;  %v191_v1 = vld [vmem:[%s5698_s9 + $0x8] sm:$0xff]  ;;  %v193_v2 = vld [vmem:[%s5698_s9 + $0x10] sm:$0xff]  ;;  %s317_s17 = sadd.s32 1, %s5702_s10  ;;  %s183_s11 = sadd.s32 1, %s5706_s11   ;;  %s5706_s11 = sphi %s5914_s11, %s183_s11   ;;  %s5702_s10 = sphi %s5912_s10, %s7584_s10   ;;  %s5698_s9 = sphi %s7581_s9, %s7583_s9   ;;  %s5694_s8 = sphi %s7580_s8, %s7582_s8  }
  0x39   : >> { %190 = vst [vmem:[%s5694_s8] sm:$0xff] %v189_v0  ;;  %192 = vst [vmem:[%s5694_s8 + $0x8] sm:$0xff] %v191_v1  ;;  %v195_v3 = vld [vmem:[%s5698_s9 + $0x18] sm:$0xff]  ;;  %v197_v4 = vld [vmem:[%s5698_s9 + $0x20] sm:$0xff]  ;;  %p318_p13 = scmp.ge.s32.totalorder %s317_s17, %s5903_s7  ;;  %p182_p0 = scmp.ge.s32.totalorder %s183_s11, %s5903_s7 }
  0x3a   : >> { %194 = vst [vmem:[%s5694_s8 + $0x10] sm:$0xff] %v193_v2  ;;  %v199_v5 = vld [vmem:[%s5698_s9 + $0x28] sm:$0xff]  ;;  %196 = vst [vmem:[%s5694_s8 + $0x18] sm:$0xff] %v195_v3  ;;  %v201_v6 = vld [vmem:[%s5698_s9 + $0x30] sm:$0xff] }
  0x3b   : >> { %198 = vst [vmem:[%s5694_s8 + $0x20] sm:$0xff] %v197_v4  ;;  %200 = vst [vmem:[%s5694_s8 + $0x28] sm:$0xff] %v199_v5  ;;  %v203_v7 = vld [vmem:[%s5698_s9 + $0x38] sm:$0xff]  ;;  %v205_v8 = vld [vmem:[%s5698_s9 + $0x40] sm:$0xff]  ;;  %s7614_s17 = smov (%p318_p13, %s317_s17), 0 }
  0x3c   : >> { %202 = vst [vmem:[%s5694_s8 + $0x30] sm:$0xff] %v201_v6  ;;  %204 = vst [vmem:[%s5694_s8 + $0x38] sm:$0xff] %v203_v7  ;;  %v207_v9 = vld [vmem:[%s5698_s9 + $0x48] sm:$0xff]  ;;  %v209_v10 = vld [vmem:[%s5698_s9 + $0x50] sm:$0xff]  ;;  %s4804_s18 = sshll.u32 %s7614_s17, 7  ;;  %s7584_s10 = smov %s7614_s17 }
  0x3d   : >> { %206 = vst [vmem:[%s5694_s8 + $0x40] sm:$0xff] %v205_v8  ;;  %v211_v11 = vld [vmem:[%s5698_s9 + $0x58] sm:$0xff]  ;;  %208 = vst [vmem:[%s5694_s8 + $0x48] sm:$0xff] %v207_v9  ;;  %v213_v12 = vld [vmem:[%s5698_s9 + $0x60] sm:$0xff]  ;;  %s5970_s21 = scalar_lea.vmem %s5888_s28, %s4804_s18   ;;  %s5973_s22 = scalar_lea.vmem %s5892_s4, %s4804_s18 [#allocation2]  }
  0x3e   : >> { %210 = vst [vmem:[%s5694_s8 + $0x50] sm:$0xff] %v209_v10  ;;  %212 = vst [vmem:[%s5694_s8 + $0x58] sm:$0xff] %v211_v11  ;;  %v215_v13 = vld [vmem:[%s5698_s9 + $0x68] sm:$0xff]  ;;  %v217_v14 = vld [vmem:[%s5698_s9 + $0x70] sm:$0xff] }
  0x3f   : >> { %214 = vst [vmem:[%s5694_s8 + $0x60] sm:$0xff] %v213_v12  ;;  %216 = vst [vmem:[%s5694_s8 + $0x68] sm:$0xff] %v215_v13  ;;  %v219_v15 = vld [vmem:[%s5698_s9 + $0x78] sm:$0xff]  ;;  %v221_v16 = vld [vmem:[%s5698_s9 + $0x76c] sm:$0xff] }
  0x40   : >> { %218 = vst [vmem:[%s5694_s8 + $0x70] sm:$0xff] %v217_v14  ;;  %v223_v17 = vld [vmem:[%s5698_s9 + $0x774] sm:$0xff]  ;;  %220 = vst [vmem:[%s5694_s8 + $0x78] sm:$0xff] %v219_v15  ;;  %v225_v18 = vld [vmem:[%s5698_s9 + $0x77c] sm:$0xff] }
  0x41   : >> { %222 = vst [vmem:[%s5694_s8 + $0x100] sm:$0xff] %v221_v16  ;;  %224 = vst [vmem:[%s5694_s8 + $0x108] sm:$0xff] %v223_v17  ;;  %v227_v19 = vld [vmem:[%s5698_s9 + $0x784] sm:$0xff]  ;;  %v229_v20 = vld [vmem:[%s5698_s9 + $0x78c] sm:$0xff] }
  0x42   : >> { %226 = vst [vmem:[%s5694_s8 + $0x110] sm:$0xff] %v225_v18  ;;  %228 = vst [vmem:[%s5694_s8 + $0x118] sm:$0xff] %v227_v19  ;;  %v231_v21 = vld [vmem:[%s5698_s9 + $0x794] sm:$0xff]  ;;  %v233_v22 = vld [vmem:[%s5698_s9 + $0x79c] sm:$0xff] }
  0x43   : >> { %230 = vst [vmem:[%s5694_s8 + $0x120] sm:$0xff] %v229_v20  ;;  %v235_v23 = vld [vmem:[%s5698_s9 + $0x7a4] sm:$0xff]  ;;  %232 = vst [vmem:[%s5694_s8 + $0x128] sm:$0xff] %v231_v21  ;;  %v237_v24 = vld [vmem:[%s5698_s9 + $0x7ac] sm:$0xff] }
  0x44   : >> { %234 = vst [vmem:[%s5694_s8 + $0x130] sm:$0xff] %v233_v22  ;;  %236 = vst [vmem:[%s5694_s8 + $0x138] sm:$0xff] %v235_v23  ;;  %v239_v25 = vld [vmem:[%s5698_s9 + $0x7b4] sm:$0xff]  ;;  %v241_v26 = vld [vmem:[%s5698_s9 + $0x7bc] sm:$0xff] }
  0x45   : >> { %238 = vst [vmem:[%s5694_s8 + $0x140] sm:$0xff] %v237_v24  ;;  %240 = vst [vmem:[%s5694_s8 + $0x148] sm:$0xff] %v239_v25  ;;  %v243_v27 = vld [vmem:[%s5698_s9 + $0x7c4] sm:$0xff]  ;;  %v245_v28 = vld [vmem:[%s5698_s9 + $0x7cc] sm:$0xff] }
  0x46   : >> { %242 = vst [vmem:[%s5694_s8 + $0x150] sm:$0xff] %v241_v26  ;;  %v247_v29 = vld [vmem:[%s5698_s9 + $0x7d4] sm:$0xff]  ;;  %244 = vst [vmem:[%s5694_s8 + $0x158] sm:$0xff] %v243_v27  ;;  %v249_v30 = vld [vmem:[%s5698_s9 + $0x7dc] sm:$0xff] }
  0x47   : >> { %246 = vst [vmem:[%s5694_s8 + $0x160] sm:$0xff] %v245_v28  ;;  %248 = vst [vmem:[%s5694_s8 + $0x168] sm:$0xff] %v247_v29  ;;  %v251_v31 = vld [vmem:[%s5698_s9 + $0x7e4] sm:$0xff]  ;;  %v253_v32 = vld [vmem:[%s5698_s9 + $0xed8] sm:$0xff] }
  0x48   : >> { %250 = vst [vmem:[%s5694_s8 + $0x170] sm:$0xff] %v249_v30  ;;  %252 = vst [vmem:[%s5694_s8 + $0x178] sm:$0xff] %v251_v31  ;;  %v255_v33 = vld [vmem:[%s5698_s9 + $0xee0] sm:$0xff]  ;;  %v257_v34 = vld [vmem:[%s5698_s9 + $0xee8] sm:$0xff] }
  0x49   : >> { %254 = vst [vmem:[%s5694_s8 + $0x200] sm:$0xff] %v253_v32  ;;  %v259_v35 = vld [vmem:[%s5698_s9 + $0xef0] sm:$0xff]  ;;  %256 = vst [vmem:[%s5694_s8 + $0x208] sm:$0xff] %v255_v33  ;;  %v261_v36 = vld [vmem:[%s5698_s9 + $0xef8] sm:$0xff] }
  0x4a   : >> { %258 = vst [vmem:[%s5694_s8 + $0x210] sm:$0xff] %v257_v34  ;;  %260 = vst [vmem:[%s5694_s8 + $0x218] sm:$0xff] %v259_v35  ;;  %v263_v37 = vld [vmem:[%s5698_s9 + $0xf00] sm:$0xff]  ;;  %v265_v38 = vld [vmem:[%s5698_s9 + $0xf08] sm:$0xff] }
  0x4b   : >> { %262 = vst [vmem:[%s5694_s8 + $0x220] sm:$0xff] %v261_v36  ;;  %264 = vst [vmem:[%s5694_s8 + $0x228] sm:$0xff] %v263_v37  ;;  %v267_v39 = vld [vmem:[%s5698_s9 + $0xf10] sm:$0xff]  ;;  %v269_v40 = vld [vmem:[%s5698_s9 + $0xf18] sm:$0xff] }
  0x4c   : >> { %266 = vst [vmem:[%s5694_s8 + $0x230] sm:$0xff] %v265_v38  ;;  %v271_v41 = vld [vmem:[%s5698_s9 + $0xf20] sm:$0xff]  ;;  %268 = vst [vmem:[%s5694_s8 + $0x238] sm:$0xff] %v267_v39  ;;  %v273_v42 = vld [vmem:[%s5698_s9 + $0xf28] sm:$0xff] }
  0x4d   : >> { %270 = vst [vmem:[%s5694_s8 + $0x240] sm:$0xff] %v269_v40  ;;  %272 = vst [vmem:[%s5694_s8 + $0x248] sm:$0xff] %v271_v41  ;;  %v275_v43 = vld [vmem:[%s5698_s9 + $0xf30] sm:$0xff]  ;;  %v277_v44 = vld [vmem:[%s5698_s9 + $0xf38] sm:$0xff] }
  0x4e   : >> { %274 = vst [vmem:[%s5694_s8 + $0x250] sm:$0xff] %v273_v42  ;;  %276 = vst [vmem:[%s5694_s8 + $0x258] sm:$0xff] %v275_v43  ;;  %v279_v45 = vld [vmem:[%s5698_s9 + $0xf40] sm:$0xff]  ;;  %v281_v46 = vld [vmem:[%s5698_s9 + $0xf48] sm:$0xff] }
  0x4f   : >> { %278 = vst [vmem:[%s5694_s8 + $0x260] sm:$0xff] %v277_v44  ;;  %v283_v47 = vld [vmem:[%s5698_s9 + $0xf50] sm:$0xff]  ;;  %280 = vst [vmem:[%s5694_s8 + $0x268] sm:$0xff] %v279_v45  ;;  %v285_v48 = vld [vmem:[%s5698_s9 + $0x1644] sm:$0xff] }
  0x50   : >> { %282 = vst [vmem:[%s5694_s8 + $0x270] sm:$0xff] %v281_v46  ;;  %284 = vst [vmem:[%s5694_s8 + $0x278] sm:$0xff] %v283_v47  ;;  %v287_v49 = vld [vmem:[%s5698_s9 + $0x164c] sm:$0xff]  ;;  %v289_v50 = vld [vmem:[%s5698_s9 + $0x1654] sm:$0xff] }
  0x51   : >> { %286 = vst [vmem:[%s5694_s8 + $0x300] sm:$0xff] %v285_v48  ;;  %288 = vst [vmem:[%s5694_s8 + $0x308] sm:$0xff] %v287_v49  ;;  %v291_v51 = vld [vmem:[%s5698_s9 + $0x165c] sm:$0xff]  ;;  %v293_v52 = vld [vmem:[%s5698_s9 + $0x1664] sm:$0xff] }
  0x52   : >> { %290 = vst [vmem:[%s5694_s8 + $0x310] sm:$0xff] %v289_v50  ;;  %v295_v53 = vld [vmem:[%s5698_s9 + $0x166c] sm:$0xff]  ;;  %292 = vst [vmem:[%s5694_s8 + $0x318] sm:$0xff] %v291_v51  ;;  %v297_v54 = vld [vmem:[%s5698_s9 + $0x1674] sm:$0xff]  ;;  %185 = sbr.rel (!%p182_p0) target bundleno = 56 (0x38), region = 235 }
  0x53   : >> { %294 = vst [vmem:[%s5694_s8 + $0x320] sm:$0xff] %v293_v52  ;;  %296 = vst [vmem:[%s5694_s8 + $0x328] sm:$0xff] %v295_v53  ;;  %v299_v55 = vld [vmem:[%s5698_s9 + $0x167c] sm:$0xff]  ;;  %v301_v56 = vld [vmem:[%s5698_s9 + $0x1684] sm:$0xff] }
  0x54   : >> { %298 = vst [vmem:[%s5694_s8 + $0x330] sm:$0xff] %v297_v54  ;;  %300 = vst [vmem:[%s5694_s8 + $0x338] sm:$0xff] %v299_v55  ;;  %v303_v57 = vld [vmem:[%s5698_s9 + $0x168c] sm:$0xff]  ;;  %v305_v58 = vld [vmem:[%s5698_s9 + $0x1694] sm:$0xff] }
  0x55   : >> { %302 = vst [vmem:[%s5694_s8 + $0x340] sm:$0xff] %v301_v56  ;;  %v307_v59 = vld [vmem:[%s5698_s9 + $0x169c] sm:$0xff]  ;;  %304 = vst [vmem:[%s5694_s8 + $0x348] sm:$0xff] %v303_v57  ;;  %v309_v60 = vld [vmem:[%s5698_s9 + $0x16a4] sm:$0xff] }
  0x56   : >> { %306 = vst [vmem:[%s5694_s8 + $0x350] sm:$0xff] %v305_v58  ;;  %308 = vst [vmem:[%s5694_s8 + $0x358] sm:$0xff] %v307_v59  ;;  %v311_v61 = vld [vmem:[%s5698_s9 + $0x16ac] sm:$0xff]  ;;  %v313_v62 = vld [vmem:[%s5698_s9 + $0x16b4] sm:$0xff] }
  0x57   : >> { %310 = vst [vmem:[%s5694_s8 + $0x360] sm:$0xff] %v309_v60  ;;  %312 = vst [vmem:[%s5694_s8 + $0x368] sm:$0xff] %v311_v61  ;;  %v315_v63 = vld [vmem:[%s5698_s9 + $0x16bc] sm:$0xff]  ;;  %s7583_s9 = smov %s5970_s21 }
  0x58   : >> { %314 = vst [vmem:[%s5694_s8 + $0x370] sm:$0xff] %v313_v62  ;;  %316 = vst [vmem:[%s5694_s8 + $0x378] sm:$0xff] %v315_v63  ;;  %s7582_s8 = smov %s5973_s22 }
  0x59 PF: > { %s6079_s23 = sand.u32 15, %s176_s6   ;;  %s5136_s24 = sshll.u32 %s5903_s7, 11 }
  0x5a   : > { %s328_s25 = sshra.s32 %s5136_s24, 4  ;;  %p4809_p1 = scmp.le.s32.totalorder %s6079_s23, 0 }
  0x5b   : > { %s6083_s26 = scalar_lea.vmem %s5888_s28, %s328_s25   ;;  %s6086_s27 = scalar_lea.vmem %s5892_s4, %s328_s25 [#allocation2]  }
  0x5c   : > { %4678 = sbr.rel (%p4809_p1) target bundleno = 109 (0x6d), region = 240  ;;  %s7585_s29 = smov (!%p4809_p1), %s6086_s27 }
  0x5d   : > { %s7586_s8 = smov (!%p4809_p1), %s6083_s26  ;;  %s6095_s9 = smov (!%p4809_p1), 0  }
  0x5e   : > { %s5720_s10 = smov (!%p4809_p1), 0  }
  0x63 LB: >> { %v344_v0 = vld [vmem:[%s5714_s8] sm:$0xff]  ;;  %v346_v1 = vld [vmem:[%s5714_s8 + $0x76c] sm:$0xff]  ;;  %v348_v2 = vld [vmem:[%s5714_s8 + $0xed8] sm:$0xff]  ;;  %s352_s6 = sadd.s32 1, %s5718_s9  ;;  %s338_s10 = sadd.s32 1, %s5722_s10   ;;  %s5722_s10 = sphi %s5720_s10, %s338_s10   ;;  %s5718_s9 = sphi %s6095_s9, %s7587_s9   ;;  %s5714_s8 = sphi %s7586_s8, %s357_s8   ;;  %s5710_s29 = sphi %s7585_s29, %s358_s29  }
  0x64   : >> { %345 = vst [vmem:[%s5710_s29] sm:$0xff] %v344_v0  ;;  %347 = vst [vmem:[%s5710_s29 + $0x100] sm:$0xff] %v346_v1  ;;  %v350_v3 = vld [vmem:[%s5714_s8 + $0x1644] sm:$0xff]  ;;  %p353_p2 = scmp.ge.s32.totalorder %s352_s6, %s6079_s23  ;;  %p337_p3 = scmp.ge.s32.totalorder %s338_s10, %s6079_s23 }
  0x65   : >> { %349 = vst [vmem:[%s5710_s29 + $0x200] sm:$0xff] %v348_v2  ;;  %351 = vst [vmem:[%s5710_s29 + $0x300] sm:$0xff] %v350_v3 }
  0x66   : >> { %s7616_s6 = smov (%p353_p2, %s352_s6), 0  ;;  %340 = sbr.rel (!%p337_p3) target bundleno = 99 (0x63), region = 246 }
  0x67   : >> { %s4810_s7 = sshll.u32 %s7616_s6, 3  ;;  %s7587_s9 = smov %s7616_s6 }
  0x68   : >> { %s357_s8 = scalar_lea.vmem %s6083_s26, %s4810_s7   ;;  %s358_s29 = scalar_lea.vmem %s6086_s27, %s4810_s7 [#allocation2]  }
  0x6d PF: > { %361 = sbr.rel (%p172_p10) target bundleno = 182 (0xb6), region = 69  ;;  %s363_s11 = ssub.s32 (!%p172_p10), %s5890_s30, %s5896_s5 }
  0x6e   : > { %s367_s17 = sshrl.u32 (!%p172_p10), %s5890_s30, 3  ;;  %s6116_s18 = scalar_lea.vmem (!%p172_p10), %s5888_s28, %s363_s11 }
  0x6f   : > { %s6119_s21 = scalar_lea.vmem (!%p172_p10), %s5892_s4, %s363_s11 [#allocation2]  ;;  %s6123_s22 = sshrl.u32 (!%p172_p10), %s367_s17, 4 }
  0x70   : > { %p4812_p4 = scmp.le.s32.totalorder (!%p172_p10), %s6123_s22, 0 }
  0x74   : > { %4692 = sbr.rel (%p4812_p4) target bundleno = 156 (0x9c), region = 251  ;;  %s7588_s23 = smov (!%p4812_p4), %s5892_s4 }
  0x75   : > { %s7589_s24 = smov (!%p4812_p4), %s5888_s28  ;;  %s6132_s25 = smov (!%p4812_p4), 0  }
  0x76   : > { %s6134_s26 = smov (!%p4812_p4), 0  }
  0x7b LB: >> { %v380_v4 = vld [vmem:[%s5730_s24] sm:$0xff]  ;;  %v382_v5 = vld [vmem:[%s5730_s24 + $0x8] sm:$0xff]  ;;  %v384_v6 = vld [vmem:[%s5730_s24 + $0x10] sm:$0xff]  ;;  %s508_s27 = sadd.s32 1, %s5734_s25  ;;  %s374_s26 = sadd.s32 1, %s5738_s26   ;;  %s5738_s26 = sphi %s6134_s26, %s374_s26   ;;  %s5734_s25 = sphi %s6132_s25, %s7592_s25   ;;  %s5730_s24 = sphi %s7589_s24, %s7591_s24   ;;  %s5726_s23 = sphi %s7588_s23, %s7590_s23  }
  0x7c   : >> { %381 = vst [vmem:[%s5726_s23] sm:$0xff] %v380_v4  ;;  %383 = vst [vmem:[%s5726_s23 + $0x8] sm:$0xff] %v382_v5  ;;  %v386_v7 = vld [vmem:[%s5730_s24 + $0x18] sm:$0xff]  ;;  %v388_v8 = vld [vmem:[%s5730_s24 + $0x20] sm:$0xff]  ;;  %p509_p6 = scmp.ge.s32.totalorder %s508_s27, %s6123_s22  ;;  %p373_p7 = scmp.ge.s32.totalorder %s374_s26, %s6123_s22 }
  0x7d   : >> { %385 = vst [vmem:[%s5726_s23 + $0x10] sm:$0xff] %v384_v6  ;;  %v390_v9 = vld [vmem:[%s5730_s24 + $0x28] sm:$0xff]  ;;  %387 = vst [vmem:[%s5726_s23 + $0x18] sm:$0xff] %v386_v7  ;;  %v392_v10 = vld [vmem:[%s5730_s24 + $0x30] sm:$0xff] }
  0x7e   : >> { %389 = vst [vmem:[%s5726_s23 + $0x20] sm:$0xff] %v388_v8  ;;  %391 = vst [vmem:[%s5726_s23 + $0x28] sm:$0xff] %v390_v9  ;;  %v394_v11 = vld [vmem:[%s5730_s24 + $0x38] sm:$0xff]  ;;  %v396_v12 = vld [vmem:[%s5730_s24 + $0x40] sm:$0xff]  ;;  %s7618_s27 = smov (%p509_p6, %s508_s27), 0 }
  0x7f   : >> { %393 = vst [vmem:[%s5726_s23 + $0x30] sm:$0xff] %v392_v10  ;;  %395 = vst [vmem:[%s5726_s23 + $0x38] sm:$0xff] %v394_v11  ;;  %v398_v13 = vld [vmem:[%s5730_s24 + $0x48] sm:$0xff]  ;;  %v400_v14 = vld [vmem:[%s5730_s24 + $0x50] sm:$0xff]  ;;  %s4813_s29 = sshll.u32 %s7618_s27, 7  ;;  %s7592_s25 = smov %s7618_s27 }
  0x80   : >> { %397 = vst [vmem:[%s5726_s23 + $0x40] sm:$0xff] %v396_v12  ;;  %v402_v15 = vld [vmem:[%s5730_s24 + $0x58] sm:$0xff]  ;;  %399 = vst [vmem:[%s5726_s23 + $0x48] sm:$0xff] %v398_v13  ;;  %v404_v16 = vld [vmem:[%s5730_s24 + $0x60] sm:$0xff]  ;;  %s6190_s8 = scalar_lea.vmem %s5888_s28, %s4813_s29   ;;  %s6193_s9 = scalar_lea.vmem %s5892_s4, %s4813_s29 [#allocation2]  }
  0x81   : >> { %401 = vst [vmem:[%s5726_s23 + $0x50] sm:$0xff] %v400_v14  ;;  %403 = vst [vmem:[%s5726_s23 + $0x58] sm:$0xff] %v402_v15  ;;  %v406_v17 = vld [vmem:[%s5730_s24 + $0x68] sm:$0xff]  ;;  %v408_v18 = vld [vmem:[%s5730_s24 + $0x70] sm:$0xff] }
  0x82   : >> { %405 = vst [vmem:[%s5726_s23 + $0x60] sm:$0xff] %v404_v16  ;;  %407 = vst [vmem:[%s5726_s23 + $0x68] sm:$0xff] %v406_v17  ;;  %v410_v19 = vld [vmem:[%s5730_s24 + $0x78] sm:$0xff]  ;;  %v412_v20 = vld [vmem:[%s5730_s24 + $0x76c] sm:$0xff] }
  0x83   : >> { %409 = vst [vmem:[%s5726_s23 + $0x70] sm:$0xff] %v408_v18  ;;  %v414_v21 = vld [vmem:[%s5730_s24 + $0x774] sm:$0xff]  ;;  %411 = vst [vmem:[%s5726_s23 + $0x78] sm:$0xff] %v410_v19  ;;  %v416_v22 = vld [vmem:[%s5730_s24 + $0x77c] sm:$0xff] }
  0x84   : >> { %413 = vst [vmem:[%s5726_s23 + $0x100] sm:$0xff] %v412_v20  ;;  %415 = vst [vmem:[%s5726_s23 + $0x108] sm:$0xff] %v414_v21  ;;  %v418_v23 = vld [vmem:[%s5730_s24 + $0x784] sm:$0xff]  ;;  %v420_v24 = vld [vmem:[%s5730_s24 + $0x78c] sm:$0xff] }
  0x85   : >> { %417 = vst [vmem:[%s5726_s23 + $0x110] sm:$0xff] %v416_v22  ;;  %419 = vst [vmem:[%s5726_s23 + $0x118] sm:$0xff] %v418_v23  ;;  %v422_v25 = vld [vmem:[%s5730_s24 + $0x794] sm:$0xff]  ;;  %v424_v26 = vld [vmem:[%s5730_s24 + $0x79c] sm:$0xff] }
  0x86   : >> { %421 = vst [vmem:[%s5726_s23 + $0x120] sm:$0xff] %v420_v24  ;;  %v426_v27 = vld [vmem:[%s5730_s24 + $0x7a4] sm:$0xff]  ;;  %423 = vst [vmem:[%s5726_s23 + $0x128] sm:$0xff] %v422_v25  ;;  %v428_v28 = vld [vmem:[%s5730_s24 + $0x7ac] sm:$0xff] }
  0x87   : >> { %425 = vst [vmem:[%s5726_s23 + $0x130] sm:$0xff] %v424_v26  ;;  %427 = vst [vmem:[%s5726_s23 + $0x138] sm:$0xff] %v426_v27  ;;  %v430_v29 = vld [vmem:[%s5730_s24 + $0x7b4] sm:$0xff]  ;;  %v432_v30 = vld [vmem:[%s5730_s24 + $0x7bc] sm:$0xff] }
  0x88   : >> { %429 = vst [vmem:[%s5726_s23 + $0x140] sm:$0xff] %v428_v28  ;;  %431 = vst [vmem:[%s5726_s23 + $0x148] sm:$0xff] %v430_v29  ;;  %v434_v31 = vld [vmem:[%s5730_s24 + $0x7c4] sm:$0xff]  ;;  %v436_v32 = vld [vmem:[%s5730_s24 + $0x7cc] sm:$0xff] }
  0x89   : >> { %433 = vst [vmem:[%s5726_s23 + $0x150] sm:$0xff] %v432_v30  ;;  %v438_v33 = vld [vmem:[%s5730_s24 + $0x7d4] sm:$0xff]  ;;  %435 = vst [vmem:[%s5726_s23 + $0x158] sm:$0xff] %v434_v31  ;;  %v440_v34 = vld [vmem:[%s5730_s24 + $0x7dc] sm:$0xff] }
  0x8a   : >> { %437 = vst [vmem:[%s5726_s23 + $0x160] sm:$0xff] %v436_v32  ;;  %439 = vst [vmem:[%s5726_s23 + $0x168] sm:$0xff] %v438_v33  ;;  %v442_v35 = vld [vmem:[%s5730_s24 + $0x7e4] sm:$0xff]  ;;  %v444_v36 = vld [vmem:[%s5730_s24 + $0xed8] sm:$0xff] }
  0x8b   : >> { %441 = vst [vmem:[%s5726_s23 + $0x170] sm:$0xff] %v440_v34  ;;  %443 = vst [vmem:[%s5726_s23 + $0x178] sm:$0xff] %v442_v35  ;;  %v446_v37 = vld [vmem:[%s5730_s24 + $0xee0] sm:$0xff]  ;;  %v448_v38 = vld [vmem:[%s5730_s24 + $0xee8] sm:$0xff] }
  0x8c   : >> { %445 = vst [vmem:[%s5726_s23 + $0x200] sm:$0xff] %v444_v36  ;;  %v450_v39 = vld [vmem:[%s5730_s24 + $0xef0] sm:$0xff]  ;;  %447 = vst [vmem:[%s5726_s23 + $0x208] sm:$0xff] %v446_v37  ;;  %v452_v40 = vld [vmem:[%s5730_s24 + $0xef8] sm:$0xff] }
  0x8d   : >> { %449 = vst [vmem:[%s5726_s23 + $0x210] sm:$0xff] %v448_v38  ;;  %451 = vst [vmem:[%s5726_s23 + $0x218] sm:$0xff] %v450_v39  ;;  %v454_v41 = vld [vmem:[%s5730_s24 + $0xf00] sm:$0xff]  ;;  %v456_v42 = vld [vmem:[%s5730_s24 + $0xf08] sm:$0xff] }
  0x8e   : >> { %453 = vst [vmem:[%s5726_s23 + $0x220] sm:$0xff] %v452_v40  ;;  %455 = vst [vmem:[%s5726_s23 + $0x228] sm:$0xff] %v454_v41  ;;  %v458_v43 = vld [vmem:[%s5730_s24 + $0xf10] sm:$0xff]  ;;  %v460_v44 = vld [vmem:[%s5730_s24 + $0xf18] sm:$0xff] }
  0x8f   : >> { %457 = vst [vmem:[%s5726_s23 + $0x230] sm:$0xff] %v456_v42  ;;  %v462_v45 = vld [vmem:[%s5730_s24 + $0xf20] sm:$0xff]  ;;  %459 = vst [vmem:[%s5726_s23 + $0x238] sm:$0xff] %v458_v43  ;;  %v464_v46 = vld [vmem:[%s5730_s24 + $0xf28] sm:$0xff] }
  0x90   : >> { %461 = vst [vmem:[%s5726_s23 + $0x240] sm:$0xff] %v460_v44  ;;  %463 = vst [vmem:[%s5726_s23 + $0x248] sm:$0xff] %v462_v45  ;;  %v466_v47 = vld [vmem:[%s5730_s24 + $0xf30] sm:$0xff]  ;;  %v468_v48 = vld [vmem:[%s5730_s24 + $0xf38] sm:$0xff] }
  0x91   : >> { %465 = vst [vmem:[%s5726_s23 + $0x250] sm:$0xff] %v464_v46  ;;  %467 = vst [vmem:[%s5726_s23 + $0x258] sm:$0xff] %v466_v47  ;;  %v470_v49 = vld [vmem:[%s5730_s24 + $0xf40] sm:$0xff]  ;;  %v472_v50 = vld [vmem:[%s5730_s24 + $0xf48] sm:$0xff] }
  0x92   : >> { %469 = vst [vmem:[%s5726_s23 + $0x260] sm:$0xff] %v468_v48  ;;  %v474_v51 = vld [vmem:[%s5730_s24 + $0xf50] sm:$0xff]  ;;  %471 = vst [vmem:[%s5726_s23 + $0x268] sm:$0xff] %v470_v49  ;;  %v476_v52 = vld [vmem:[%s5730_s24 + $0x1644] sm:$0xff] }
  0x93   : >> { %473 = vst [vmem:[%s5726_s23 + $0x270] sm:$0xff] %v472_v50  ;;  %475 = vst [vmem:[%s5726_s23 + $0x278] sm:$0xff] %v474_v51  ;;  %v478_v53 = vld [vmem:[%s5730_s24 + $0x164c] sm:$0xff]  ;;  %v480_v54 = vld [vmem:[%s5730_s24 + $0x1654] sm:$0xff] }
  0x94   : >> { %477 = vst [vmem:[%s5726_s23 + $0x300] sm:$0xff] %v476_v52  ;;  %479 = vst [vmem:[%s5726_s23 + $0x308] sm:$0xff] %v478_v53  ;;  %v482_v55 = vld [vmem:[%s5730_s24 + $0x165c] sm:$0xff]  ;;  %v484_v56 = vld [vmem:[%s5730_s24 + $0x1664] sm:$0xff] }
  0x95   : >> { %481 = vst [vmem:[%s5726_s23 + $0x310] sm:$0xff] %v480_v54  ;;  %v486_v57 = vld [vmem:[%s5730_s24 + $0x166c] sm:$0xff]  ;;  %483 = vst [vmem:[%s5726_s23 + $0x318] sm:$0xff] %v482_v55  ;;  %v488_v58 = vld [vmem:[%s5730_s24 + $0x1674] sm:$0xff]  ;;  %376 = sbr.rel (!%p373_p7) target bundleno = 123 (0x7b), region = 257 }
  0x96   : >> { %485 = vst [vmem:[%s5726_s23 + $0x320] sm:$0xff] %v484_v56  ;;  %487 = vst [vmem:[%s5726_s23 + $0x328] sm:$0xff] %v486_v57  ;;  %v490_v59 = vld [vmem:[%s5730_s24 + $0x167c] sm:$0xff]  ;;  %v492_v60 = vld [vmem:[%s5730_s24 + $0x1684] sm:$0xff] }
  0x97   : >> { %489 = vst [vmem:[%s5726_s23 + $0x330] sm:$0xff] %v488_v58  ;;  %491 = vst [vmem:[%s5726_s23 + $0x338] sm:$0xff] %v490_v59  ;;  %v494_v61 = vld [vmem:[%s5730_s24 + $0x168c] sm:$0xff]  ;;  %v496_v62 = vld [vmem:[%s5730_s24 + $0x1694] sm:$0xff] }
  0x98   : >> { %493 = vst [vmem:[%s5726_s23 + $0x340] sm:$0xff] %v492_v60  ;;  %v498_v63 = vld [vmem:[%s5730_s24 + $0x169c] sm:$0xff]  ;;  %495 = vst [vmem:[%s5726_s23 + $0x348] sm:$0xff] %v494_v61  ;;  %v500_v0 = vld [vmem:[%s5730_s24 + $0x16a4] sm:$0xff] }
  0x99   : >> { %497 = vst [vmem:[%s5726_s23 + $0x350] sm:$0xff] %v496_v62  ;;  %499 = vst [vmem:[%s5726_s23 + $0x358] sm:$0xff] %v498_v63  ;;  %v502_v1 = vld [vmem:[%s5730_s24 + $0x16ac] sm:$0xff]  ;;  %v504_v2 = vld [vmem:[%s5730_s24 + $0x16b4] sm:$0xff] }
  0x9a   : >> { %501 = vst [vmem:[%s5726_s23 + $0x360] sm:$0xff] %v500_v0  ;;  %503 = vst [vmem:[%s5726_s23 + $0x368] sm:$0xff] %v502_v1  ;;  %v506_v3 = vld [vmem:[%s5730_s24 + $0x16bc] sm:$0xff]  ;;  %s7591_s24 = smov %s6190_s8 }
  0x9b   : >> { %505 = vst [vmem:[%s5726_s23 + $0x370] sm:$0xff] %v504_v2  ;;  %507 = vst [vmem:[%s5726_s23 + $0x378] sm:$0xff] %v506_v3  ;;  %s7590_s23 = smov %s6193_s9 }
  0x9c PF: > { %s6299_s10 = sand.u32 15, %s367_s17   ;;  %s5138_s6 = sshll.u32 %s6123_s22, 11 }
  0x9d   : > { %s519_s7 = sshra.s32 %s5138_s6, 4  ;;  %p4818_p8 = scmp.le.s32.totalorder %s6299_s10, 0 }
  0x9e   : > { %s6303_s11 = scalar_lea.vmem %s5888_s28, %s519_s7   ;;  %s6306_s29 = scalar_lea.vmem %s5892_s4, %s519_s7 [#allocation2]  }
  0x9f   : > { %4706 = sbr.rel (%p4818_p8) target bundleno = 176 (0xb0), region = 262  ;;  %s7593_s23 = smov (!%p4818_p8), %s6306_s29 }
  0xa0   : > { %s7594_s24 = smov (!%p4818_p8), %s6303_s11  ;;  %s6315_s25 = smov (!%p4818_p8), 0  }
  0xa1   : > { %s5752_s26 = smov (!%p4818_p8), 0  }
  0xa6 LB: >> { %v535_v4 = vld [vmem:[%s5746_s24] sm:$0xff]  ;;  %v537_v5 = vld [vmem:[%s5746_s24 + $0x76c] sm:$0xff]  ;;  %v539_v6 = vld [vmem:[%s5746_s24 + $0xed8] sm:$0xff]  ;;  %s543_s17 = sadd.s32 1, %s5750_s25  ;;  %s529_s26 = sadd.s32 1, %s5754_s26   ;;  %s5754_s26 = sphi %s5752_s26, %s529_s26   ;;  %s5750_s25 = sphi %s6315_s25, %s7595_s25   ;;  %s5746_s24 = sphi %s7594_s24, %s548_s24   ;;  %s5742_s23 = sphi %s7593_s23, %s549_s23  }
  0xa7   : >> { %536 = vst [vmem:[%s5742_s23] sm:$0xff] %v535_v4  ;;  %538 = vst [vmem:[%s5742_s23 + $0x100] sm:$0xff] %v537_v5  ;;  %v541_v7 = vld [vmem:[%s5746_s24 + $0x1644] sm:$0xff]  ;;  %p544_p9 = scmp.ge.s32.totalorder %s543_s17, %s6299_s10  ;;  %p528_p10 = scmp.ge.s32.totalorder %s529_s26, %s6299_s10 }
  0xa8   : >> { %540 = vst [vmem:[%s5742_s23 + $0x200] sm:$0xff] %v539_v6  ;;  %542 = vst [vmem:[%s5742_s23 + $0x300] sm:$0xff] %v541_v7 }
  0xa9   : >> { %s7620_s17 = smov (%p544_p9, %s543_s17), 0  ;;  %531 = sbr.rel (!%p528_p10) target bundleno = 166 (0xa6), region = 268 }
  0xaa   : >> { %s4819_s22 = sshll.u32 %s7620_s17, 3  ;;  %s7595_s25 = smov %s7620_s17 }
  0xab   : >> { %s548_s24 = scalar_lea.vmem %s6303_s11, %s4819_s22   ;;  %s549_s23 = scalar_lea.vmem %s6306_s29, %s4819_s22 [#allocation2]  }
  0xb0 PF: > { %s5820_s27 = smov 0  }
  0xb1   : > { %s550_s8 = sshllo.u32 %s5820_s27, %s5896_s5 }
  0xb2   : > { %v559_v8 = vld [vmem:[%s6116_s18] sm:%s550_s8]  ;;  %v561_v9 = vld [vmem:[%s6116_s18 + $0x76c] sm:%s550_s8] }
  0xb3   : > { %560 = vst [vmem:[%s6119_s21] sm:%s550_s8] %v559_v8  ;;  %562 = vst [vmem:[%s6119_s21 + $0x100] sm:%s550_s8] %v561_v9 }
  0xb4   : > { %v563_v10 = vld [vmem:[%s6116_s18 + $0xed8] sm:%s550_s8]  ;;  %v565_v11 = vld [vmem:[%s6116_s18 + $0x1644] sm:%s550_s8] }
  0xb5   : > { %564 = vst [vmem:[%s6119_s21 + $0x200] sm:%s550_s8] %v563_v10  ;;  %566 = vst [vmem:[%s6119_s21 + $0x300] sm:%s550_s8] %v565_v11 }
  0xb6 PF: > { %p4821_p11 = scmp.ge.u32.totalorder %s5890_s30, 8 }
  0xb7   : > { %s5821_s9 = smov (!%p4821_p11), 0  }
  0xb8   : > { %153 = sbr.rel (%p4821_p11) target bundleno = 191 (0xbf), region = 40  ;;  %s154_s5 = sshllo.u32 (!%p4821_p11), %s5821_s9, %s5890_s30 }
  0xb9   : > { %v163_v12 = vld [vmem:[%s5888_s28] sm:%s154_s5] (!%p4821_p11)  ;;  %v165_v13 = vld [vmem:[%s5888_s28 + $0x76c] sm:%s154_s5] (!%p4821_p11) }
  0xba   : > { %164 = vst [vmem:[%s5892_s4] sm:%s154_s5] (!%p4821_p11), %v163_v12  ;;  %166 = vst [vmem:[%s5892_s4 + $0x100] sm:%s154_s5] (!%p4821_p11), %v165_v13 }
  0xbb   : > { %v167_v14 = vld [vmem:[%s5888_s28 + $0xed8] sm:%s154_s5] (!%p4821_p11)  ;;  %v169_v15 = vld [vmem:[%s5888_s28 + $0x1644] sm:%s154_s5] (!%p4821_p11) }
  0xbc   : > { %168 = vst [vmem:[%s5892_s4 + $0x200] sm:%s154_s5] (!%p4821_p11), %v167_v14  ;;  %170 = vst [vmem:[%s5892_s4 + $0x300] sm:%s154_s5] (!%p4821_p11), %v169_v15 }
  0xbf PF: > { %p4822_p12 = scmp.ge.s32.totalorder %s5690_s14, 1  ;;  %p569_p13 = scmp.lt.s32.totalorder %s5690_s14, 9 }
  0xc1   : > { %p570_p0 = pnand %p4822_p12, %p569_p13 }
  0xc2   : > { %s576_s30 = sand.u32 (!%p570_p0), 1, %s5682_s12   ;;  %vm1349_vm0 = vcmask (!%p570_p0), 1043456   ;;  %vm1350_vm1 = vcmask (!%p570_p0), 1044480   ;;  %v5822_v16 = vmov (!%p570_p0), 65535   ;;  %v5823_v18 = vmov (!%p570_p0), 0   ;;  %v740_v19 = vld [vmem:[%s7577_s2] sm:$0xff] (!%p570_p0) }
  0xc3   : > { %573 = sbr.rel (%p570_p0) target bundleno = 885 (0x375), region = 94  ;;  %s4823_s18 = sshll.u32 (!%p570_p0), %s576_s30, 10  ;;  %v1351_v17 = vsel (!%p570_p0), %vm1349_vm0, 4294967295, %v5822_v16  ;;  %1577 = vmatprep.mubr.bf16.mxu0 (!%p570_p0), %v5823_v18  ;;  %1628 = vmatprep.mubr.bf16.mxu1 (!%p570_p0), %v5823_v18  ;;  %v6389_v52 = vld [vmem:[%s7575_s0] sm:$0xff] (!%p570_p0)   ;;  %vm1342_vm2 = vcmask (!%p570_p0), 203776   ;;  %v741_v7 = vld [vmem:[%s7577_s2 + $0x8] sm:$0xff] (!%p570_p0) }
  0xc4   : > { %5526 = vset.pattern.permute.xlu0 (!%p570_p0), %v5823_v18  ;;  %5527 = vset.pattern.permute.xlu1 (!%p570_p0), %v5823_v18  ;;  %s6361_s4 = scalar_lea.vmem (!%p570_p0), [#allocation2], %s4823_s18  ;;  %v6370_v28 = vsel (!%p570_p0), %vm1350_vm1, %v1351_v17, 0  ;;  %v6408_v4 = vld [vmem:[%s7575_s0 + $0x8] ss:$0 sps:$4 sm:$0x33] (!%p570_p0)   ;;  %s6747_s25 = smul.u32 (!%p570_p0), 768, %s576_s30 }
  0xc5   : > { %v612_v20 = vld [vmem:[%s6361_s4] sm:$0xff] (!%p570_p0)  ;;  %v613_v22 = vld [vmem:[%s6361_s4 + $0x8] sm:$0xff] (!%p570_p0)  ;;  %745 = vperm.xlu0 (!%p570_p0), %5526, %v740_v19   ;;  %v614_v35 = vld [vmem:[%s6361_s4 + $0x10] sm:$0xff] (!%p570_p0) }
  0xc6   : > { %v644_v21 = vld [vmem:[%s6361_s4 + $0x100] sm:$0xff] (!%p570_p0)  ;;  %v645_v24 = vld [vmem:[%s6361_s4 + $0x108] sm:$0xff] (!%p570_p0)  ;;  %v646_v38 = vld [vmem:[%s6361_s4 + $0x110] sm:$0xff] (!%p570_p0)  ;;  %s6769_s12 = scalar_lea.vmem (!%p570_p0), [#allocation3], %s6747_s25  }
  0xc7   : > { %v4827_v23 = vcombine.high (!%p570_p0), %v612_v20, %v644_v21  ;;  %v4826_v25 = vcombine.low (!%p570_p0), %v612_v20, %v644_v21  ;;  %v676_v26 = vld [vmem:[%s6361_s4 + $0x200] sm:$0xff] (!%p570_p0)  ;;  %v4829_v29 = vcombine.high (!%p570_p0), %v613_v22, %v645_v24  ;;  %v4828_v30 = vcombine.low (!%p570_p0), %v613_v22, %v645_v24  ;;  %v677_v32 = vld [vmem:[%s6361_s4 + $0x208] sm:$0xff] (!%p570_p0)  ;;  %v615_v39 = vld [vmem:[%s6361_s4 + $0x18] sm:$0xff] (!%p570_p0) }
  0xc8   : > { %v708_v27 = vld [vmem:[%s6361_s4 + $0x300] sm:$0x11] (!%p570_p0)  ;;  %v709_v33 = vld [vmem:[%s6361_s4 + $0x308] sm:$0x11] (!%p570_p0)  ;;  %v647_v40 = vld [vmem:[%s6361_s4 + $0x118] sm:$0xff] (!%p570_p0)  ;;  %v4831_v47 = vcombine.high (!%p570_p0), %v614_v35, %v646_v38  ;;  %v4830_v54 = vcombine.low (!%p570_p0), %v614_v35, %v646_v38 }
  0xc9   : > { %v4891_v31 = vcombine.high (!%p570_p0), %v676_v26, %v708_v27  ;;  %v4890_v34 = vcombine.low (!%p570_p0), %v676_v26, %v708_v27  ;;  %1545 = vmatprep.subr.bf16.mxu0 (!%p570_p0), %v4827_v23  ;;  %v4893_v36 = vcombine.high (!%p570_p0), %v677_v32, %v709_v33  ;;  %v4892_v37 = vcombine.low (!%p570_p0), %v677_v32, %v709_v33  ;;  %v678_v43 = vld [vmem:[%s6361_s4 + $0x210] sm:$0xff] (!%p570_p0)  ;;  %v679_v48 = vld [vmem:[%s6361_s4 + $0x218] sm:$0xff] (!%p570_p0)  ;;  %v616_v59 = vld [vmem:[%s6361_s4 + $0x20] sm:$0xff] (!%p570_p0) }
  0xca   : > { %1596 = vmatprep.subr.bf16.mxu1 %v4829_v29  ;;  %1546 = vmatpush1.bf16.msra.mxu0 %v4826_v25  ;;  %v710_v44 = vld [vmem:[%s6361_s4 + $0x310] sm:$0x11]  ;;  %v711_v49 = vld [vmem:[%s6361_s4 + $0x318] sm:$0x11]  ;;  %v4833_v50 = vcombine.high %v615_v39, %v647_v40  ;;  %v4832_v56 = vcombine.low %v615_v39, %v647_v40  ;;  %v648_v60 = vld [vmem:[%s6361_s4 + $0x120] sm:$0xff]  ;;  %s5114_s8 = sshll.u32 (%p5877_p5), %s5862_s15, 6 }
  0xcb   : > { %v1357_v41 = vand.u32 %v4891_v31, %v6370_v28  ;;  %v1354_v42 = vand.u32 %v4890_v34, %v6370_v28  ;;  %1597 = vmatpush1.bf16.msra.mxu1 %v4828_v30  ;;  %v1363_v45 = vand.u32 %v4893_v36, %v6370_v28  ;;  %v1360_v46 = vand.u32 %v4892_v37, %v6370_v28  ;;  %v617_v62 = vld [vmem:[%s6361_s4 + $0x28] sm:$0xff]  ;;  %v680_v5 = vld [vmem:[%s6361_s4 + $0x220] sm:$0xff]  ;;  %v742_v10 = vld [vmem:[%s7577_s2 + $0x10] sm:$0xf]  ;;  %s5236_s9 = sshll.u32 (%p5877_p5), %s5862_s15, 8  ;;  %s4113_s5 = ssub.s32 (%p5877_p5), 475, %s5114_s8 }
  0xcc   : > { %v4895_v51 = vcombine.high %v678_v43, %v710_v44  ;;  %v4897_v53 = vcombine.high %v679_v48, %v711_v49  ;;  %v4894_v55 = vcombine.low %v678_v43, %v710_v44  ;;  %v4896_v57 = vcombine.low %v679_v48, %v711_v49  ;;  %v649_v63 = vld [vmem:[%s6361_s4 + $0x128] sm:$0xff]  ;;  %v712_v6 = vld [vmem:[%s6361_s4 + $0x320] sm:$0x11]  ;;  %750 = vperm.xlu0 %5526, %v741_v7   ;;  %v618_v19 = vld [vmem:[%s6361_s4 + $0x30] sm:$0xff]  ;;  %s7098_s28 = scalar_lea.vmem (%p5877_p5), %s7578_s3, %s5236_s9   ;;  %p4114_p1 = scmp.lt.s32.totalorder (%p5877_p5), %s4113_s5, 64 }
  0xcd   : > { %1547 = vmatprep.subr.bf16.mxu0 %v1357_v41  ;;  %1598 = vmatprep.subr.bf16.mxu1 %v1363_v45  ;;  %v4835_v2 = vcombine.high %v616_v59, %v648_v60  ;;  %v4837_v3 = vcombine.high %v617_v62, %v649_v63  ;;  %v681_v8 = vld [vmem:[%s6361_s4 + $0x228] sm:$0xff]  ;;  %v4899_v11 = vcombine.high %v680_v5, %v712_v6  ;;  %v650_v20 = vld [vmem:[%s6361_s4 + $0x130] sm:$0xff]  ;;  %v619_v22 = vld [vmem:[%s6361_s4 + $0x38] sm:$0xff] }
  0xce   : > { %1548 = vmatpush1.bf16.msra.mxu0 %v1354_v42  ;;  %v1369_v58 = vand.u32 %v4895_v51, %v6370_v28  ;;  %v1375_v61 = vand.u32 %v4897_v53, %v6370_v28  ;;  %v1366_v0 = vand.u32 %v4894_v55, %v6370_v28  ;;  %v1372_v1 = vand.u32 %v4896_v57, %v6370_v28  ;;  %v713_v9 = vld [vmem:[%s6361_s4 + $0x328] sm:$0x11]  ;;  %v651_v23 = vld [vmem:[%s6361_s4 + $0x138] sm:$0xff]  ;;  %v682_v29 = vld [vmem:[%s6361_s4 + $0x230] sm:$0xff] }
  0xcf   : > { %1599 = vmatpush1.bf16.msra.mxu1 %v1360_v46  ;;  %1647 = vmatprep.subr.bf16.mxu0 %v4831_v47  ;;  %v4901_v12 = vcombine.high %v681_v8, %v713_v9  ;;  %v4834_v13 = vcombine.low %v616_v59, %v648_v60  ;;  %v4898_v14 = vcombine.low %v680_v5, %v712_v6  ;;  %v714_v30 = vld [vmem:[%s6361_s4 + $0x330] sm:$0x11]  ;;  %v683_v31 = vld [vmem:[%s6361_s4 + $0x238] sm:$0xff]  ;;  %v620_v40 = vld [vmem:[%s6361_s4 + $0x40] sm:$0xff] }
  0xd0   : > { %1698 = vmatprep.subr.bf16.mxu1 %v4833_v50  ;;  %755 = vperm.xlu1 %5527, %v742_v10   ;;  %v4836_v15 = vcombine.low %v617_v62, %v649_v63  ;;  %v4900_v16 = vcombine.low %v681_v8, %v713_v9  ;;  %v1381_v17 = vand.u32 %v4899_v11, %v6370_v28  ;;  %v715_v32 = vld [vmem:[%s6361_s4 + $0x338] sm:$0x11]  ;;  %v652_v41 = vld [vmem:[%s6361_s4 + $0x140] sm:$0xff]  ;;  %v621_v43 = vld [vmem:[%s6361_s4 + $0x48] sm:$0xff] }
  0xd1   : > { %4954 = vmatmul.mubr.msk.bf16.vlgmr.msra.gmra.mrb[0].mxu0 %vm1342_vm2, %v6389_v52  ;;  %v1387_v21 = vand.u32 %v4901_v12, %v6370_v28  ;;  %v1378_v24 = vand.u32 %v4898_v14, %v6370_v28  ;;  %v4839_v26 = vcombine.high %v618_v19, %v650_v20  ;;  %v4841_v27 = vcombine.high %v619_v22, %v651_v23  ;;  %v653_v44 = vld [vmem:[%s6361_s4 + $0x148] sm:$0xff]  ;;  %v684_v49 = vld [vmem:[%s6361_s4 + $0x240] sm:$0xff]  ;;  %v654_v62 = vld [vmem:[%s6361_s4 + $0x150] sm:$0xff] }
  0xd2   : > { %4956 = vmatmul.mubr.msk.bf16.vlgmr.msra.gmra.mrb[0].mxu1 %vm1342_vm2, %v6389_v52  ;;  %1648 = vmatpush1.bf16.msra.mxu0 %v4830_v54  ;;  %v1384_v25 = vand.u32 %v4900_v16, %v6370_v28  ;;  %v4903_v33 = vcombine.high %v682_v29, %v714_v30  ;;  %v4905_v34 = vcombine.high %v683_v31, %v715_v32  ;;  %v716_v50 = vld [vmem:[%s6361_s4 + $0x340] sm:$0x11]  ;;  %v685_v51 = vld [vmem:[%s6361_s4 + $0x248] sm:$0xff]  ;;  %v686_v7 = vld [vmem:[%s6361_s4 + $0x250] sm:$0xff] }
  0xd3   : > { %1699 = vmatpush1.bf16.msra.mxu1 %v4832_v56  ;;  %1587 = vmatprep.mubr.bf16.mxu0 %v5823_v18  ;;  %v4838_v35 = vcombine.low %v618_v19, %v650_v20  ;;  %v4902_v36 = vcombine.low %v682_v29, %v714_v30  ;;  %v4840_v37 = vcombine.low %v619_v22, %v651_v23  ;;  %v717_v53 = vld [vmem:[%s6361_s4 + $0x348] sm:$0x11]  ;;  %v718_v8 = vld [vmem:[%s6361_s4 + $0x350] sm:$0x11]  ;;  %v687_v9 = vld [vmem:[%s6361_s4 + $0x258] sm:$0xff] }
  0xd4   : > { %1638 = vmatprep.mubr.bf16.mxu1 %v5823_v18  ;;  %1649 = vmatprep.subr.bf16.mxu0 %v1369_v58  ;;  %v4904_v38 = vcombine.low %v683_v31, %v715_v32  ;;  %v1393_v39 = vand.u32 %v4903_v33, %v6370_v28  ;;  %v1399_v42 = vand.u32 %v4905_v34, %v6370_v28  ;;  %v719_v10 = vld [vmem:[%s6361_s4 + $0x358] sm:$0x11]  ;;  %v624_v19 = vld [vmem:[%s6361_s4 + $0x60] sm:$0xff]  ;;  %v625_v22 = vld [vmem:[%s6361_s4 + $0x68] sm:$0xff] }
  0xd5   : > { %1700 = vmatprep.subr.bf16.mxu1 %v1375_v61  ;;  %v1390_v45 = vand.u32 %v4902_v36, %v6370_v28  ;;  %v4843_v47 = vcombine.high %v620_v40, %v652_v41  ;;  %v4845_v48 = vcombine.high %v621_v43, %v653_v44  ;;  %v4907_v54 = vcombine.high %v684_v49, %v716_v50  ;;  %v622_v61 = vld [vmem:[%s6361_s4 + $0x50] sm:$0xff]  ;;  %v656_v20 = vld [vmem:[%s6361_s4 + $0x160] sm:$0xff]  ;;  %v657_v23 = vld [vmem:[%s6361_s4 + $0x168] sm:$0xff] }
  0xd6   : > { %1650 = vmatpush1.bf16.msra.mxu0 %v1366_v0  ;;  %v1396_v46 = vand.u32 %v4904_v38, %v6370_v28  ;;  %v4909_v55 = vcombine.high %v685_v51, %v717_v53  ;;  %v4842_v56 = vcombine.low %v620_v40, %v652_v41  ;;  %v4906_v57 = vcombine.low %v684_v49, %v716_v50  ;;  %v623_v0 = vld [vmem:[%s6361_s4 + $0x58] sm:$0xff]  ;;  %v688_v29 = vld [vmem:[%s6361_s4 + $0x260] sm:$0xff]  ;;  %v689_v31 = vld [vmem:[%s6361_s4 + $0x268] sm:$0xff] }
  0xd7   : > { %1701 = vmatpush1.bf16.msra.mxu1 %v1372_v1  ;;  %1749 = vmatprep.subr.bf16.mxu0 %v4835_v2  ;;  %v4844_v58 = vcombine.low %v621_v43, %v653_v44  ;;  %v4908_v59 = vcombine.low %v685_v51, %v717_v53  ;;  %v1405_v60 = vand.u32 %v4907_v54, %v6370_v28  ;;  %v655_v1 = vld [vmem:[%s6361_s4 + $0x158] sm:$0xff]  ;;  %v720_v30 = vld [vmem:[%s6361_s4 + $0x360] sm:$0x11]  ;;  %v721_v32 = vld [vmem:[%s6361_s4 + $0x368] sm:$0x11] }
  0xd8   : > { %1800 = vmatprep.subr.bf16.mxu1 %v4837_v3  ;;  %v1411_v63 = vand.u32 %v4909_v55, %v6370_v28  ;;  %v1402_v2 = vand.u32 %v4906_v57, %v6370_v28  ;;  %v4847_v5 = vcombine.high %v622_v61, %v654_v62  ;;  %v4849_v6 = vcombine.high %v623_v0, %v655_v1  ;;  %v626_v40 = vld [vmem:[%s6361_s4 + $0x70] sm:$0xff]  ;;  %v627_v43 = vld [vmem:[%s6361_s4 + $0x78] sm:$0xff] }
  0xd9   : > { %4955 = vmatmul.mubr.msk.bf16.gmra.mrb[4].mxu0 %vm1342_vm2, %v6408_v4  ;;  %v1408_v3 = vand.u32 %v4908_v59, %v6370_v28  ;;  %v4911_v11 = vcombine.high %v686_v7, %v718_v8  ;;  %v4913_v12 = vcombine.high %v687_v9, %v719_v10  ;;  %v4910_v14 = vcombine.low %v686_v7, %v718_v8  ;;  %v658_v41 = vld [vmem:[%s6361_s4 + $0x170] sm:$0xff]  ;;  %v659_v44 = vld [vmem:[%s6361_s4 + $0x178] sm:$0xff]  ;;  %v692_v7 = vld [vmem:[%s6361_s4 + $0x280] sm:$0xff] }
  0xda   : > { %4957 = vmatmul.mubr.msk.bf16.gmra.mrb[4].mxu1 %vm1342_vm2, %v6408_v4  ;;  %1679 = vmatprep.mubr.bf16.mxu0 %v5823_v18  ;;  %v4912_v16 = vcombine.low %v687_v9, %v719_v10  ;;  %v4915_v33 = vcombine.high %v688_v29, %v720_v30  ;;  %v4917_v34 = vcombine.high %v689_v31, %v721_v32  ;;  %v690_v49 = vld [vmem:[%s6361_s4 + $0x270] sm:$0xff]  ;;  %v691_v51 = vld [vmem:[%s6361_s4 + $0x278] sm:$0xff]  ;;  %v724_v8 = vld [vmem:[%s6361_s4 + $0x380] sm:$0x11] }
  0xdb   : > { %1730 = vmatprep.mubr.bf16.mxu1 %v5823_v18  ;;  %v4914_v36 = vcombine.low %v688_v29, %v720_v30  ;;  %v4916_v38 = vcombine.low %v689_v31, %v721_v32  ;;  %v722_v50 = vld [vmem:[%s6361_s4 + $0x370] sm:$0x11]  ;;  %v723_v53 = vld [vmem:[%s6361_s4 + $0x378] sm:$0x11]  ;;  %v693_v9 = vld [vmem:[%s6361_s4 + $0x288] sm:$0xff] }
  0xdc   : > { %v4919_v54 = vcombine.high %v690_v49, %v722_v50  ;;  %v4921_v55 = vcombine.high %v691_v51, %v723_v53  ;;  %v4918_v57 = vcombine.low %v690_v49, %v722_v50  ;;  %v4920_v59 = vcombine.low %v691_v51, %v723_v53  ;;  %v725_v10 = vld [vmem:[%s6361_s4 + $0x388] sm:$0x11]  ;;  %v694_v29 = vld [vmem:[%s6361_s4 + $0x290] sm:$0xff]  ;;  %v695_v31 = vld [vmem:[%s6361_s4 + $0x298] sm:$0xff] }
  0xdd   : > { %v726_v30 = vld [vmem:[%s6361_s4 + $0x390] sm:$0x11]  ;;  %v727_v32 = vld [vmem:[%s6361_s4 + $0x398] sm:$0x11]  ;;  %v696_v49 = vld [vmem:[%s6361_s4 + $0x2a0] sm:$0xff] }
  0xde   : > { %v728_v50 = vld [vmem:[%s6361_s4 + $0x3a0] sm:$0x11]  ;;  %v697_v51 = vld [vmem:[%s6361_s4 + $0x2a8] sm:$0xff] }
  0xdf   : > { %v729_v53 = vld [vmem:[%s6361_s4 + $0x3a8] sm:$0x11] }
  0xe1   : > { %4958 = vmatmul.mubr.msk.bf16.vlgmr.msra.gmra.mrb[8].mxu0 %vm1342_vm2, %v6389_v52 }
  0xe2   : > { %4960 = vmatmul.mubr.msk.bf16.vlgmr.msra.gmra.mrb[8].mxu1 %vm1342_vm2, %v6389_v52  ;;  %1750 = vmatpush1.bf16.msra.mxu0 %v4834_v13  ;;  %v4846_v13 = vcombine.low %v622_v61, %v654_v62  ;;  %v628_v61 = vld [vmem:[%s6361_s4 + $0x80] sm:$0xff] }
  0xe3   : > { %1801 = vmatpush1.bf16.msra.mxu1 %v4836_v15  ;;  %1689 = vmatprep.mubr.bf16.mxu0 %v5823_v18  ;;  %v4848_v15 = vcombine.low %v623_v0, %v655_v1  ;;  %v660_v62 = vld [vmem:[%s6361_s4 + $0x180] sm:$0xff]  ;;  %v629_v0 = vld [vmem:[%s6361_s4 + $0x88] sm:$0xff] }
  0xe4   : > { %1740 = vmatprep.mubr.bf16.mxu1 %v5823_v18  ;;  %1751 = vmatprep.subr.bf16.mxu0 %v1381_v17  ;;  %v1417_v17 = vand.u32 %v4911_v11, %v6370_v28  ;;  %v661_v1 = vld [vmem:[%s6361_s4 + $0x188] sm:$0xff]  ;;  %v4923_v11 = vcombine.high %v692_v7, %v724_v8 }
  0xe5   : > { %1802 = vmatprep.subr.bf16.mxu1 %v1387_v21  ;;  %v1423_v21 = vand.u32 %v4913_v12, %v6370_v28  ;;  %v4925_v12 = vcombine.high %v693_v9, %v725_v10 }
  0xe6   : > { %1752 = vmatpush1.bf16.msra.mxu0 %v1378_v24  ;;  %v1414_v24 = vand.u32 %v4910_v14, %v6370_v28  ;;  %v4922_v14 = vcombine.low %v692_v7, %v724_v8  ;;  %v698_v7 = vld [vmem:[%s6361_s4 + $0x2b0] sm:$0xff] }
  0xe7   : > { %1803 = vmatpush1.bf16.msra.mxu1 %v1384_v25  ;;  %1851 = vmatprep.subr.bf16.mxu0 %v4839_v26  ;;  %v1420_v25 = vand.u32 %v4912_v16, %v6370_v28  ;;  %v4851_v26 = vcombine.high %v624_v19, %v656_v20  ;;  %v4924_v16 = vcombine.low %v693_v9, %v725_v10  ;;  %v730_v8 = vld [vmem:[%s6361_s4 + $0x3b0] sm:$0x11]  ;;  %v699_v9 = vld [vmem:[%s6361_s4 + $0x2b8] sm:$0xff] }
  0xe8   : > { %1902 = vmatprep.subr.bf16.mxu1 %v4841_v27  ;;  %v4853_v27 = vcombine.high %v625_v22, %v657_v23  ;;  %v731_v10 = vld [vmem:[%s6361_s4 + $0x3b8] sm:$0x11] }
  0xe9   : > { %4959 = vmatmul.mubr.msk.bf16.gmra.mrb[12].mxu0 %vm1342_vm2, %v6408_v4 }
  0xea   : > { %4961 = vmatmul.mubr.msk.bf16.gmra.mrb[12].mxu1 %vm1342_vm2, %v6408_v4  ;;  %1781 = vmatprep.mubr.bf16.mxu0 %v5823_v18 }
  0xeb   : > { %1832 = vmatprep.mubr.bf16.mxu1 %v5823_v18 }
  0xf1   : > { %4962 = vmatmul.mubr.msk.bf16.vlgmr.msra.gmra.mrb[16].mxu0 %vm1342_vm2, %v6389_v52 }
  0xf2   : > { %4964 = vmatmul.mubr.msk.bf16.vlgmr.msra.gmra.mrb[16].mxu1 %vm1342_vm2, %v6389_v52  ;;  %1852 = vmatpush1.bf16.msra.mxu0 %v4838_v35  ;;  %v4850_v35 = vcombine.low %v624_v19, %v656_v20  ;;  %v630_v19 = vld [vmem:[%s6361_s4 + $0x90] sm:$0xff] }
  0xf3   : > { %1903 = vmatpush1.bf16.msra.mxu1 %v4840_v37  ;;  %1791 = vmatprep.mubr.bf16.mxu0 %v5823_v18  ;;  %v4852_v37 = vcombine.low %v625_v22, %v657_v23  ;;  %v662_v20 = vld [vmem:[%s6361_s4 + $0x190] sm:$0xff]  ;;  %v631_v22 = vld [vmem:[%s6361_s4 + $0x98] sm:$0xff] }
  0xf4   : > { %1842 = vmatprep.mubr.bf16.mxu1 %v5823_v18  ;;  %1853 = vmatprep.subr.bf16.mxu0 %v1393_v39  ;;  %v1429_v39 = vand.u32 %v4915_v33, %v6370_v28  ;;  %v663_v23 = vld [vmem:[%s6361_s4 + $0x198] sm:$0xff]  ;;  %v4927_v33 = vcombine.high %v694_v29, %v726_v30 }
  0xf5   : > { %1904 = vmatprep.subr.bf16.mxu1 %v1399_v42  ;;  %v1435_v42 = vand.u32 %v4917_v34, %v6370_v28  ;;  %v4929_v34 = vcombine.high %v695_v31, %v727_v32 }
  0xf6   : > { %1854 = vmatpush1.bf16.msra.mxu0 %v1390_v45  ;;  %v1426_v45 = vand.u32 %v4914_v36, %v6370_v28  ;;  %v4926_v36 = vcombine.low %v694_v29, %v726_v30  ;;  %v700_v29 = vld [vmem:[%s6361_s4 + $0x2c0] sm:$0xff] }
  0xf7   : > { %1905 = vmatpush1.bf16.msra.mxu1 %v1396_v46  ;;  %1953 = vmatprep.subr.bf16.mxu0 %v4843_v47  ;;  %v1432_v46 = vand.u32 %v4916_v38, %v6370_v28  ;;  %v4855_v47 = vcombine.high %v626_v40, %v658_v41  ;;  %v4928_v38 = vcombine.low %v695_v31, %v727_v32  ;;  %v732_v30 = vld [vmem:[%s6361_s4 + $0x3c0] sm:$0x11]  ;;  %v701_v31 = vld [vmem:[%s6361_s4 + $0x2c8] sm:$0xff] }
  0xf8   : > { %2004 = vmatprep.subr.bf16.mxu1 %v4845_v48  ;;  %v4857_v48 = vcombine.high %v627_v43, %v659_v44  ;;  %v733_v32 = vld [vmem:[%s6361_s4 + $0x3c8] sm:$0x11] }
  0xf9   : > { %4963 = vmatmul.mubr.msk.bf16.gmra.mrb[20].mxu0 %vm1342_vm2, %v6408_v4 }
  0xfa   : > { %4965 = vmatmul.mubr.msk.bf16.gmra.mrb[20].mxu1 %vm1342_vm2, %v6408_v4  ;;  %1883 = vmatprep.mubr.bf16.mxu0 %v5823_v18 }
  0xfb   : > { %1934 = vmatprep.mubr.bf16.mxu1 %v5823_v18 }
 0x101   : > { %4966 = vmatmul.mubr.msk.bf16.vlgmr.msra.gmra.mrb[24].mxu0 %vm1342_vm2, %v6389_v52 }
 0x102   : > { %4968 = vmatmul.mubr.msk.bf16.vlgmr.msra.gmra.mrb[24].mxu1 %vm1342_vm2, %v6389_v52  ;;  %1954 = vmatpush1.bf16.msra.mxu0 %v4842_v56  ;;  %v4854_v56 = vcombine.low %v626_v40, %v658_v41  ;;  %v632_v40 = vld [vmem:[%s6361_s4 + $0xa0] sm:$0xff] }
 0x103   : > { %2005 = vmatpush1.bf16.msra.mxu1 %v4844_v58  ;;  %1893 = vmatprep.mubr.bf16.mxu0 %v5823_v18  ;;  %v4856_v58 = vcombine.low %v627_v43, %v659_v44  ;;  %v664_v41 = vld [vmem:[%s6361_s4 + $0x1a0] sm:$0xff]  ;;  %v633_v43 = vld [vmem:[%s6361_s4 + $0xa8] sm:$0xff] }
 0x104   : > { %1944 = vmatprep.mubr.bf16.mxu1 %v5823_v18  ;;  %1955 = vmatprep.subr.bf16.mxu0 %v1405_v60  ;;  %v1441_v60 = vand.u32 %v4919_v54, %v6370_v28  ;;  %v665_v44 = vld [vmem:[%s6361_s4 + $0x1a8] sm:$0xff]  ;;  %v4931_v54 = vcombine.high %v696_v49, %v728_v50 }
 0x105   : > { %2006 = vmatprep.subr.bf16.mxu1 %v1411_v63  ;;  %v1447_v63 = vand.u32 %v4921_v55, %v6370_v28  ;;  %v4933_v55 = vcombine.high %v697_v51, %v729_v53 }
 0x106   : > { %1956 = vmatpush1.bf16.msra.mxu0 %v1402_v2  ;;  %v1438_v2 = vand.u32 %v4918_v57, %v6370_v28  ;;  %v4930_v57 = vcombine.low %v696_v49, %v728_v50  ;;  %v702_v49 = vld [vmem:[%s6361_s4 + $0x2d0] sm:$0xff] }
 0x107   : > { %2007 = vmatpush1.bf16.msra.mxu1 %v1408_v3  ;;  %2055 = vmatprep.subr.bf16.mxu0 %v4847_v5  ;;  %v1444_v3 = vand.u32 %v4920_v59, %v6370_v28  ;;  %v4859_v5 = vcombine.high %v628_v61, %v660_v62  ;;  %v4932_v59 = vcombine.low %v697_v51, %v729_v53  ;;  %v734_v50 = vld [vmem:[%s6361_s4 + $0x3d0] sm:$0x11]  ;;  %v703_v51 = vld [vmem:[%s6361_s4 + $0x2d8] sm:$0xff] }
 0x108   : > { %2106 = vmatprep.subr.bf16.mxu1 %v4849_v6  ;;  %v4861_v6 = vcombine.high %v629_v0, %v661_v1  ;;  %v735_v53 = vld [vmem:[%s6361_s4 + $0x3d8] sm:$0x11] }
 0x109   : > { %4967 = vmatmul.mubr.msk.bf16.gmra.mrb[28].mxu0 %vm1342_vm2, %v6408_v4 }
 0x10a   : > { %4969 = vmatmul.mubr.msk.bf16.gmra.mrb[28].mxu1 %vm1342_vm2, %v6408_v4  ;;  %1985 = vmatprep.mubr.bf16.mxu0 %v5823_v18 }
 0x10b   : > { %2036 = vmatprep.mubr.bf16.mxu1 %v5823_v18 }
 0x111   : > { %4970 = vmatmul.mubr.msk.bf16.vlgmr.msra.gmra.mrb[32].mxu0 %vm1342_vm2, %v6389_v52 }
 0x112   : > { %4972 = vmatmul.mubr.msk.bf16.vlgmr.msra.gmra.mrb[32].mxu1 %vm1342_vm2, %v6389_v52  ;;  %2056 = vmatpush1.bf16.msra.mxu0 %v4846_v13  ;;  %v4858_v13 = vcombine.low %v628_v61, %v660_v62  ;;  %v634_v61 = vld [vmem:[%s6361_s4 + $0xb0] sm:$0xff] }
 0x113   : > { %2107 = vmatpush1.bf16.msra.mxu1 %v4848_v15  ;;  %1995 = vmatprep.mubr.bf16.mxu0 %v5823_v18  ;;  %v4860_v15 = vcombine.low %v629_v0, %v661_v1  ;;  %v666_v62 = vld [vmem:[%s6361_s4 + $0x1b0] sm:$0xff]  ;;  %v635_v0 = vld [vmem:[%s6361_s4 + $0xb8] sm:$0xff] }
 0x114   : > { %2046 = vmatprep.mubr.bf16.mxu1 %v5823_v18  ;;  %2057 = vmatprep.subr.bf16.mxu0 %v1417_v17  ;;  %v1453_v17 = vand.u32 %v4923_v11, %v6370_v28  ;;  %v667_v1 = vld [vmem:[%s6361_s4 + $0x1b8] sm:$0xff]  ;;  %v4935_v11 = vcombine.high %v698_v7, %v730_v8 }
 0x115   : > { %2108 = vmatprep.subr.bf16.mxu1 %v1423_v21  ;;  %v1459_v21 = vand.u32 %v4925_v12, %v6370_v28  ;;  %v4937_v12 = vcombine.high %v699_v9, %v731_v10 }
 0x116   : > { %2058 = vmatpush1.bf16.msra.mxu0 %v1414_v24  ;;  %v1450_v24 = vand.u32 %v4922_v14, %v6370_v28  ;;  %v4934_v14 = vcombine.low %v698_v7, %v730_v8  ;;  %v704_v7 = vld [vmem:[%s6361_s4 + $0x2e0] sm:$0xff] }
 0x117   : > { %2109 = vmatpush1.bf16.msra.mxu1 %v1420_v25  ;;  %2157 = vmatprep.subr.bf16.mxu0 %v4851_v26  ;;  %v1456_v25 = vand.u32 %v4924_v16, %v6370_v28  ;;  %v4863_v26 = vcombine.high %v630_v19, %v662_v20  ;;  %v4936_v16 = vcombine.low %v699_v9, %v731_v10  ;;  %v736_v8 = vld [vmem:[%s6361_s4 + $0x3e0] sm:$0x11]  ;;  %v705_v9 = vld [vmem:[%s6361_s4 + $0x2e8] sm:$0xff] }
 0x118   : > { %2208 = vmatprep.subr.bf16.mxu1 %v4853_v27  ;;  %v4865_v27 = vcombine.high %v631_v22, %v663_v23  ;;  %v737_v10 = vld [vmem:[%s6361_s4 + $0x3e8] sm:$0x11] }
 0x119   : > { %4971 = vmatmul.mubr.msk.bf16.gmra.mrb[36].mxu0 %vm1342_vm2, %v6408_v4 }
 0x11a   : > { %4973 = vmatmul.mubr.msk.bf16.gmra.mrb[36].mxu1 %vm1342_vm2, %v6408_v4  ;;  %2087 = vmatprep.mubr.bf16.mxu0 %v5823_v18 }
 0x11b   : > { %2138 = vmatprep.mubr.bf16.mxu1 %v5823_v18 }
 0x121   : > { %4974 = vmatmul.mubr.msk.bf16.vlgmr.msra.gmra.mrb[40].mxu0 %vm1342_vm2, %v6389_v52 }
 0x122   : > { %4976 = vmatmul.mubr.msk.bf16.vlgmr.msra.gmra.mrb[40].mxu1 %vm1342_vm2, %v6389_v52  ;;  %2158 = vmatpush1.bf16.msra.mxu0 %v4850_v35  ;;  %v4862_v35 = vcombine.low %v630_v19, %v662_v20  ;;  %v636_v19 = vld [vmem:[%s6361_s4 + $0xc0] sm:$0xff] }
 0x123   : > { %2209 = vmatpush1.bf16.msra.mxu1 %v4852_v37  ;;  %2097 = vmatprep.mubr.bf16.mxu0 %v5823_v18  ;;  %v4864_v37 = vcombine.low %v631_v22, %v663_v23  ;;  %v668_v20 = vld [vmem:[%s6361_s4 + $0x1c0] sm:$0xff]  ;;  %v637_v22 = vld [vmem:[%s6361_s4 + $0xc8] sm:$0xff] }
 0x124   : > { %2148 = vmatprep.mubr.bf16.mxu1 %v5823_v18  ;;  %2159 = vmatprep.subr.bf16.mxu0 %v1429_v39  ;;  %v1465_v39 = vand.u32 %v4927_v33, %v6370_v28  ;;  %v669_v23 = vld [vmem:[%s6361_s4 + $0x1c8] sm:$0xff]  ;;  %v4939_v33 = vcombine.high %v700_v29, %v732_v30 }
 0x125   : > { %2210 = vmatprep.subr.bf16.mxu1 %v1435_v42  ;;  %v1471_v42 = vand.u32 %v4929_v34, %v6370_v28  ;;  %v4941_v34 = vcombine.high %v701_v31, %v733_v32 }
 0x126   : > { %2160 = vmatpush1.bf16.msra.mxu0 %v1426_v45  ;;  %v1462_v45 = vand.u32 %v4926_v36, %v6370_v28  ;;  %v4938_v36 = vcombine.low %v700_v29, %v732_v30 }
 0x127   : > { %2211 = vmatpush1.bf16.msra.mxu1 %v1432_v46  ;;  %2259 = vmatprep.subr.bf16.mxu0 %v4855_v47  ;;  %v1468_v46 = vand.u32 %v4928_v38, %v6370_v28  ;;  %v4867_v47 = vcombine.high %v632_v40, %v664_v41  ;;  %v4940_v38 = vcombine.low %v701_v31, %v733_v32 }
 0x128   : > { %2310 = vmatprep.subr.bf16.mxu1 %v4857_v48  ;;  %v4869_v48 = vcombine.high %v633_v43, %v665_v44 }
 0x129   : > { %4975 = vmatmul.mubr.msk.bf16.gmra.mrb[44].mxu0 %vm1342_vm2, %v6408_v4 }
 0x12a   : > { %4977 = vmatmul.mubr.msk.bf16.gmra.mrb[44].mxu1 %vm1342_vm2, %v6408_v4  ;;  %2189 = vmatprep.mubr.bf16.mxu0 %v5823_v18 }
 0x12b   : > { %2240 = vmatprep.mubr.bf16.mxu1 %v5823_v18 }
 0x131   : > { %4978 = vmatmul.mubr.msk.bf16.vlgmr.msra.gmra.mrb[48].mxu0 %vm1342_vm2, %v6389_v52 }
 0x132   : > { %4980 = vmatmul.mubr.msk.bf16.vlgmr.msra.gmra.mrb[48].mxu1 %vm1342_vm2, %v6389_v52  ;;  %2260 = vmatpush1.bf16.msra.mxu0 %v4854_v56  ;;  %v4866_v56 = vcombine.low %v632_v40, %v664_v41  ;;  %v638_v40 = vld [vmem:[%s6361_s4 + $0xd0] sm:$0xff] }
 0x133   : > { %2311 = vmatpush1.bf16.msra.mxu1 %v4856_v58  ;;  %2199 = vmatprep.mubr.bf16.mxu0 %v5823_v18  ;;  %v4868_v58 = vcombine.low %v633_v43, %v665_v44  ;;  %v670_v41 = vld [vmem:[%s6361_s4 + $0x1d0] sm:$0xff]  ;;  %v639_v43 = vld [vmem:[%s6361_s4 + $0xd8] sm:$0xff] }
 0x134   : > { %2250 = vmatprep.mubr.bf16.mxu1 %v5823_v18  ;;  %2261 = vmatprep.subr.bf16.mxu0 %v1441_v60  ;;  %v1477_v60 = vand.u32 %v4931_v54, %v6370_v28  ;;  %v671_v44 = vld [vmem:[%s6361_s4 + $0x1d8] sm:$0xff]  ;;  %v4943_v54 = vcombine.high %v702_v49, %v734_v50 }
 0x135   : > { %2312 = vmatprep.subr.bf16.mxu1 %v1447_v63  ;;  %v1483_v63 = vand.u32 %v4933_v55, %v6370_v28  ;;  %v4945_v55 = vcombine.high %v703_v51, %v735_v53 }
 0x136   : > { %2262 = vmatpush1.bf16.msra.mxu0 %v1438_v2  ;;  %v1474_v2 = vand.u32 %v4930_v57, %v6370_v28  ;;  %v4942_v57 = vcombine.low %v702_v49, %v734_v50 }
 0x137   : > { %2313 = vmatpush1.bf16.msra.mxu1 %v1444_v3  ;;  %2361 = vmatprep.subr.bf16.mxu0 %v4859_v5  ;;  %v1480_v3 = vand.u32 %v4932_v59, %v6370_v28  ;;  %v4871_v5 = vcombine.high %v634_v61, %v666_v62  ;;  %v4944_v59 = vcombine.low %v703_v51, %v735_v53  ;;  %v706_v51 = vld [vmem:[%s6361_s4 + $0x2f0] sm:$0xff] }
 0x138   : > { %2412 = vmatprep.subr.bf16.mxu1 %v4861_v6  ;;  %v4873_v6 = vcombine.high %v635_v0, %v667_v1  ;;  %v738_v53 = vld [vmem:[%s6361_s4 + $0x3f0] sm:$0x11] }
 0x139   : > { %4979 = vmatmul.mubr.msk.bf16.gmra.mrb[52].mxu0 %vm1342_vm2, %v6408_v4 }
 0x13a   : > { %4981 = vmatmul.mubr.msk.bf16.gmra.mrb[52].mxu1 %vm1342_vm2, %v6408_v4  ;;  %2291 = vmatprep.mubr.bf16.mxu0 %v5823_v18 }
 0x13b   : > { %2342 = vmatprep.mubr.bf16.mxu1 %v5823_v18 }
 0x141   : > { %4982 = vmatmul.mubr.msk.bf16.vlgmr.msra.gmra.mrb[56].mxu0 %vm1342_vm2, %v6389_v52 }
 0x142   : > { %4984 = vmatmul.mubr.msk.bf16.vlgmr.msra.gmra.mrb[56].mxu1 %vm1342_vm2, %v6389_v52  ;;  %2362 = vmatpush1.bf16.msra.mxu0 %v4858_v13  ;;  %v4870_v13 = vcombine.low %v634_v61, %v666_v62  ;;  %v640_v61 = vld [vmem:[%s6361_s4 + $0xe0] sm:$0xff] }
 0x143   : > { %2413 = vmatpush1.bf16.msra.mxu1 %v4860_v15  ;;  %2301 = vmatprep.mubr.bf16.mxu0 %v5823_v18  ;;  %v4872_v15 = vcombine.low %v635_v0, %v667_v1  ;;  %v672_v62 = vld [vmem:[%s6361_s4 + $0x1e0] sm:$0xff]  ;;  %v641_v0 = vld [vmem:[%s6361_s4 + $0xe8] sm:$0xff] }
 0x144   : > { %2352 = vmatprep.mubr.bf16.mxu1 %v5823_v18  ;;  %2363 = vmatprep.subr.bf16.mxu0 %v1453_v17  ;;  %v1489_v17 = vand.u32 %v4935_v11, %v6370_v28  ;;  %v673_v1 = vld [vmem:[%s6361_s4 + $0x1e8] sm:$0xff]  ;;  %v4947_v11 = vcombine.high %v704_v7, %v736_v8 }
 0x145   : > { %2414 = vmatprep.subr.bf16.mxu1 %v1459_v21  ;;  %v1495_v21 = vand.u32 %v4937_v12, %v6370_v28  ;;  %v4949_v12 = vcombine.high %v705_v9, %v737_v10 }
 0x146   : > { %2364 = vmatpush1.bf16.msra.mxu0 %v1450_v24  ;;  %v1486_v24 = vand.u32 %v4934_v14, %v6370_v28  ;;  %v6714_v14 = vpop.permute.xlu0 %745 }
 0x147   : > { %2415 = vmatpush1.bf16.msra.mxu1 %v1456_v25  ;;  %2463 = vmatprep.subr.bf16.mxu0 %v4863_v26  ;;  %v1492_v25 = vand.u32 %v4936_v16, %v6370_v28  ;;  %v4875_v26 = vcombine.high %v636_v19, %v668_v20  ;;  %v4884_v16 = vcombine.low %v641_v0, %v673_v1 }
 0x148   : > { %2514 = vmatprep.subr.bf16.mxu1 %v4865_v27  ;;  %v4877_v27 = vcombine.high %v637_v22, %v669_v23 }
 0x149   : > { %4983 = vmatmul.mubr.msk.bf16.gmra.mrb[60].mxu0 %vm1342_vm2, %v6408_v4 }
 0x14a   : > { %4985 = vmatmul.mubr.msk.bf16.gmra.mrb[60].mxu1 %vm1342_vm2, %v6408_v4  ;;  %2393 = vmatprep.mubr.bf16.mxu0 %v5823_v18 }
 0x14b   : > { %2444 = vmatprep.mubr.bf16.mxu1 %v5823_v18  ;;  %v6739_v30 = vpop.permute.xlu0 %750 }
 0x151   : > { %4986 = vmatmul.mubr.msk.bf16.vlgmr.msra.gmra.mrb[64].mxu0 %vm1342_vm2, %v6389_v52 }
 0x152   : > { %4988 = vmatmul.mubr.msk.bf16.vlgmr.msra.gmra.mrb[64].mxu1 %vm1342_vm2, %v6389_v52  ;;  %2464 = vmatpush1.bf16.msra.mxu0 %v4862_v35  ;;  %v4874_v35 = vcombine.low %v636_v19, %v668_v20  ;;  %v1525_v19 = vand.u32 %v4947_v11, %v6370_v28  ;;  %v6718_v20 = vld [vmem:[%s6361_s4 + $0xf0] sm:$0xff]  ;;  %v4950_v11 = vcombine.low %v706_v51, %v738_v53 }
 0x153   : > { %2515 = vmatpush1.bf16.msra.mxu1 %v4864_v37  ;;  %2403 = vmatprep.mubr.bf16.mxu0 %v5823_v18  ;;  %v4876_v37 = vcombine.low %v637_v22, %v669_v23  ;;  %v1531_v22 = vand.u32 %v4949_v12, %v6370_v28  ;;  %v6727_v23 = vld [vmem:[%s6361_s4 + $0xf8] sm:$0xff] }
 0x154   : > { %2454 = vmatprep.mubr.bf16.mxu1 %v5823_v18  ;;  %2465 = vmatprep.subr.bf16.mxu0 %v1465_v39  ;;  %v1501_v39 = vand.u32 %v4939_v33, %v6370_v28 }
 0x155   : > { %2516 = vmatprep.subr.bf16.mxu1 %v1471_v42  ;;  %v1507_v42 = vand.u32 %v4941_v34, %v6370_v28 }
 0x156   : > { %2466 = vmatpush1.bf16.msra.mxu0 %v1462_v45  ;;  %v1498_v45 = vand.u32 %v4938_v36, %v6370_v28 }
 0x157   : > { %2517 = vmatpush1.bf16.msra.mxu1 %v1468_v46  ;;  %2565 = vmatprep.subr.bf16.mxu0 %v4867_v47  ;;  %v1504_v46 = vand.u32 %v4940_v38, %v6370_v28  ;;  %v4879_v47 = vcombine.high %v638_v40, %v670_v41 }
 0x158   : > { %2616 = vmatprep.subr.bf16.mxu1 %v4869_v48  ;;  %v4881_v48 = vcombine.high %v639_v43, %v671_v44 }
 0x159   : > { %4987 = vmatmul.mubr.msk.bf16.gmra.mrb[68].mxu0 %vm1342_vm2, %v6408_v4 }
 0x15a   : > { %4989 = vmatmul.mubr.msk.bf16.gmra.mrb[68].mxu1 %vm1342_vm2, %v6408_v4  ;;  %2495 = vmatprep.mubr.bf16.mxu0 %v5823_v18 }
 0x15b   : > { %2546 = vmatprep.mubr.bf16.mxu1 %v5823_v18 }
 0x161   : > { %4990 = vmatmul.mubr.msk.bf16.vlgmr.msra.gmra.mrb[72].mxu0 %vm1342_vm2, %v6389_v52 }
 0x162   : > { %4992 = vmatmul.mubr.msk.bf16.vlgmr.msra.gmra.mrb[72].mxu1 %vm1342_vm2, %v6389_v52  ;;  %2566 = vmatpush1.bf16.msra.mxu0 %v4866_v56  ;;  %v4878_v56 = vcombine.low %v638_v40, %v670_v41 }
 0x163   : > { %2617 = vmatpush1.bf16.msra.mxu1 %v4868_v58  ;;  %2505 = vmatprep.mubr.bf16.mxu0 %v5823_v18  ;;  %v4880_v58 = vcombine.low %v639_v43, %v671_v44 }
 0x164   : > { %2556 = vmatprep.mubr.bf16.mxu1 %v5823_v18  ;;  %2567 = vmatprep.subr.bf16.mxu0 %v1477_v60  ;;  %v1513_v60 = vand.u32 %v4943_v54, %v6370_v28 }
 0x165   : > { %2618 = vmatprep.subr.bf16.mxu1 %v1483_v63  ;;  %v1519_v63 = vand.u32 %v4945_v55, %v6370_v28 }
 0x166   : > { %2568 = vmatpush1.bf16.msra.mxu0 %v1474_v2  ;;  %v1510_v2 = vand.u32 %v4942_v57, %v6370_v28  ;;  %v6762_v57 = vpop.permute.xlu1 %755 }
 0x167   : > { %2619 = vmatpush1.bf16.msra.mxu1 %v1480_v3  ;;  %2667 = vmatprep.subr.bf16.mxu0 %v4871_v5  ;;  %v1516_v3 = vand.u32 %v4944_v59, %v6370_v28  ;;  %v4883_v5 = vcombine.high %v640_v61, %v672_v62  ;;  %v739_v59 = vld [vmem:[%s6361_s4 + $0x3f8] sm:$0x11] }
 0x168   : > { %2718 = vmatprep.subr.bf16.mxu1 %v4873_v6  ;;  %v4885_v6 = vcombine.high %v641_v0, %v673_v1 }
 0x169   : > { %4991 = vmatmul.mubr.msk.bf16.gmra.mrb[76].mxu0 %vm1342_vm2, %v6408_v4 }
 0x16a   : > { %4993 = vmatmul.mubr.msk.bf16.gmra.mrb[76].mxu1 %vm1342_vm2, %v6408_v4  ;;  %2597 = vmatprep.mubr.bf16.mxu0 %v5823_v18 }
 0x16b   : > { %2648 = vmatprep.mubr.bf16.mxu1 %v5823_v18 }
 0x171   : > { %4994 = vmatmul.mubr.msk.bf16.vlgmr.msra.gmra.mrb[80].mxu0 %vm1342_vm2, %v6389_v52 }
 0x172   : > { %4996 = vmatmul.mubr.msk.bf16.vlgmr.msra.gmra.mrb[80].mxu1 %vm1342_vm2, %v6389_v52  ;;  %2668 = vmatpush1.bf16.msra.mxu0 %v4870_v13  ;;  %v4882_v13 = vcombine.low %v640_v61, %v672_v62 }
 0x173   : > { %2719 = vmatpush1.bf16.msra.mxu1 %v4872_v15  ;;  %2607 = vmatprep.mubr.bf16.mxu0 %v5823_v18  ;;  %v4946_v15 = vcombine.low %v704_v7, %v736_v8 }
 0x174   : > { %2658 = vmatprep.mubr.bf16.mxu1 %v5823_v18  ;;  %2669 = vmatprep.subr.bf16.mxu0 %v1489_v17  ;;  %v4948_v17 = vcombine.low %v705_v9, %v737_v10 }
 0x175   : > { %2720 = vmatprep.subr.bf16.mxu1 %v1495_v21  ;;  %v6721_v21 = vld [vmem:[%s6361_s4 + $0x1f0] sm:$0xff] }
 0x176   : > { %2670 = vmatpush1.bf16.msra.mxu0 %v1486_v24  ;;  %v6730_v24 = vld [vmem:[%s6361_s4 + $0x1f8] sm:$0xff]  ;;  %v4886_v10 = vcombine.low %v6718_v20, %v6721_v21 }
 0x177   : > { %2721 = vmatpush1.bf16.msra.mxu1 %v1492_v25  ;;  %2769 = vmatprep.subr.bf16.mxu0 %v4875_v26  ;;  %v1522_v25 = vand.u32 %v4946_v15, %v6370_v28  ;;  %v1528_v26 = vand.u32 %v4948_v17, %v6370_v28  ;;  %v4888_v17 = vcombine.low %v6727_v23, %v6730_v24 }
 0x178   : > { %2820 = vmatprep.subr.bf16.mxu1 %v4877_v27  ;;  %v4887_v27 = vcombine.high %v6718_v20, %v6721_v21  ;;  %v6787_v20 = vld [vmem:[%s7575_s0] sm:$0xff]  }
 0x179   : > { %4995 = vmatmul.mubr.msk.bf16.gmra.mrb[84].mxu0 %vm1342_vm2, %v6408_v4 }
 0x17a   : > { %4997 = vmatmul.mubr.msk.bf16.gmra.mrb[84].mxu1 %vm1342_vm2, %v6408_v4  ;;  %2699 = vmatprep.mubr.bf16.mxu0 %v5823_v18 }
 0x17b   : > { %2750 = vmatprep.mubr.bf16.mxu1 %v5823_v18 }
 0x181   : > { %4998 = vmatmul.mubr.msk.bf16.vlgmr.msra.gmra.mrb[88].mxu0 %vm1342_vm2, %v6389_v52 }
 0x182   : > { %5000 = vmatmul.mubr.msk.bf16.vlgmr.msra.gmra.mrb[88].mxu1 %vm1342_vm2, %v6389_v52  ;;  %2770 = vmatpush1.bf16.msra.mxu0 %v4874_v35 }
 0x183   : > { %2821 = vmatpush1.bf16.msra.mxu1 %v4876_v37  ;;  %2709 = vmatprep.mubr.bf16.mxu0 %v5823_v18 }
 0x184   : > { %2760 = vmatprep.mubr.bf16.mxu1 %v5823_v18  ;;  %2771 = vmatprep.subr.bf16.mxu0 %v1501_v39 }
 0x185   : > { %2822 = vmatprep.subr.bf16.mxu1 %v1507_v42 }
 0x186   : > { %2772 = vmatpush1.bf16.msra.mxu0 %v1498_v45 }
 0x187   : > { %2823 = vmatpush1.bf16.msra.mxu1 %v1504_v46  ;;  %2871 = vmatprep.subr.bf16.mxu0 %v4879_v47 }
 0x188   : > { %2922 = vmatprep.subr.bf16.mxu1 %v4881_v48 }
 0x189   : > { %4999 = vmatmul.mubr.msk.bf16.gmra.mrb[92].mxu0 %vm1342_vm2, %v6408_v4 }
 0x18a   : > { %5001 = vmatmul.mubr.msk.bf16.gmra.mrb[92].mxu1 %vm1342_vm2, %v6408_v4  ;;  %2801 = vmatprep.mubr.bf16.mxu0 %v5823_v18 }
 0x18b   : > { %2852 = vmatprep.mubr.bf16.mxu1 %v5823_v18 }
 0x191   : > { %5002 = vmatmul.mubr.msk.bf16.vlgmr.msra.gmra.mrb[96].mxu0 %vm1342_vm2, %v6389_v52 }
 0x192   : > { %5004 = vmatmul.mubr.msk.bf16.vlgmr.msra.gmra.mrb[96].mxu1 %vm1342_vm2, %v6389_v52  ;;  %2872 = vmatpush1.bf16.msra.mxu0 %v4878_v56 }
 0x193   : > { %2923 = vmatpush1.bf16.msra.mxu1 %v4880_v58  ;;  %2811 = vmatprep.mubr.bf16.mxu0 %v5823_v18  ;;  %v707_v58 = vld [vmem:[%s6361_s4 + $0x2f8] sm:$0xff] }
 0x194   : > { %2862 = vmatprep.mubr.bf16.mxu1 %v5823_v18  ;;  %2873 = vmatprep.subr.bf16.mxu0 %v1513_v60 }
 0x195   : > { %2924 = vmatprep.subr.bf16.mxu1 %v1519_v63 }
 0x196   : > { %2874 = vmatpush1.bf16.msra.mxu0 %v1510_v2 }
 0x197   : > { %2925 = vmatpush1.bf16.msra.mxu1 %v1516_v3  ;;  %2973 = vmatprep.subr.bf16.mxu0 %v4883_v5  ;;  %v4953_v5 = vcombine.high %v707_v58, %v739_v59 }
 0x198   : > { %3024 = vmatprep.subr.bf16.mxu1 %v4885_v6 }
 0x199   : > { %5003 = vmatmul.mubr.msk.bf16.gmra.mrb[100].mxu0 %vm1342_vm2, %v6408_v4  ;;  %v1543_v21 = vand.u32 %v4953_v5, %v6370_v28 }
 0x19a   : > { %5005 = vmatmul.mubr.msk.bf16.gmra.mrb[100].mxu1 %vm1342_vm2, %v6408_v4  ;;  %2903 = vmatprep.mubr.bf16.mxu0 %v5823_v18 }
 0x19b   : > { %2954 = vmatprep.mubr.bf16.mxu1 %v5823_v18 }
 0x1a1   : > { %5006 = vmatmul.mubr.msk.bf16.vlgmr.msra.gmra.mrb[104].mxu0 %vm1342_vm2, %v6389_v52 }
 0x1a2   : > { %5008 = vmatmul.mubr.msk.bf16.vlgmr.msra.gmra.mrb[104].mxu1 %vm1342_vm2, %v6389_v52  ;;  %2974 = vmatpush1.bf16.msra.mxu0 %v4882_v13  ;;  %v4889_v52 = vcombine.high %v6727_v23, %v6730_v24  ;;  %v1534_v24 = vand.u32 %v4950_v11, %v6370_v28 }
 0x1a3   : > { %3025 = vmatpush1.bf16.msra.mxu1 %v4884_v16  ;;  %2913 = vmatprep.mubr.bf16.mxu0 %v5823_v18 }
 0x1a4   : > { %v1579_v29 = vpop.f32.mrb[0].mxu0  ;;  %2964 = vmatprep.mubr.bf16.mxu1 %v5823_v18  ;;  %2975 = vmatprep.subr.bf16.mxu0 %v1525_v19  ;;  %v4952_v19 = vcombine.low %v707_v58, %v739_v59 }
 0x1a5   : > { %v1580_v31 = vadd.f32 %v1579_v29, %v6714_v14  ;;  %v1630_v32 = vpop.f32.mrb[0].mxu1  ;;  %v1581_v33 = vpop.f32.mrb[1].mxu0  ;;  %3026 = vmatprep.subr.bf16.mxu1 %v1531_v22 }
 0x1a6   : > { %v1631_v34 = vadd.f32 %v1630_v32, %v6714_v14  ;;  %v1582_v35 = vadd.f32 %v1581_v33, %v6714_v14  ;;  %v1632_v36 = vpop.f32.mrb[1].mxu1  ;;  %v1583_v37 = vpop.f32.mrb[2].mxu0  ;;  %2976 = vmatpush1.bf16.msra.mxu0 %v1522_v25 }
 0x1a7   : > { %v3177_v38 = vmax.f32 %v1580_v31, 0.0  ;;  %v1633_v39 = vadd.f32 %v1632_v36, %v6714_v14  ;;  %v1584_v40 = vadd.f32 %v1583_v37, %v6739_v30  ;;  %v1634_v41 = vpop.f32.mrb[2].mxu1  ;;  %v1585_v42 = vpop.f32.mrb[3].mxu0  ;;  %3027 = vmatpush1.bf16.msra.mxu1 %v1528_v26  ;;  %3075 = vmatprep.subr.bf16.mxu0 %v4887_v27  ;;  %v1540_v31 = vand.u32 %v4952_v19, %v6370_v28 }
 0x1a8   : > { %v3179_v43 = vmax.f32 %v1631_v34, 0.0  ;;  %v3178_v44 = vmax.f32 %v1582_v35, 0.0  ;;  %v1635_v45 = vadd.f32 %v1634_v41, %v6739_v30  ;;  %v1586_v46 = vadd.f32 %v1585_v42, %v6739_v30  ;;  %v1636_v47 = vpop.f32.mrb[3].mxu1  ;;  %3126 = vmatprep.subr.bf16.mxu1 %v4889_v52 }
 0x1a9   : > { %v3180_v48 = vmax.f32 %v1633_v39, 0.0  ;;  %v3241_v49 = vmax.f32 %v1584_v40, 0.0  ;;  %v1637_v50 = vadd.f32 %v1636_v47, %v6739_v30  ;;  %5007 = vmatmul.mubr.msk.bf16.gmra.mrb[108].mxu0 %vm1342_vm2, %v6408_v4 }
 0x1aa   : > { %v5140_v54 = vpack.c.bf16 %v3178_v44, %v3177_v38  ;;  %v3243_v55 = vmax.f32 %v1635_v45, 0.0  ;;  %v3242_v56 = vmax.f32 %v1586_v46, 0.0  ;;  %5009 = vmatmul.mubr.msk.bf16.gmra.mrb[108].mxu1 %vm1342_vm2, %v6408_v4  ;;  %3005 = vmatprep.mubr.bf16.mxu0 %v5823_v18  ;;  %v4951_v4 = vcombine.high %v706_v51, %v738_v53  ;;  %v6811_v53 = vld [vmem:[%s7575_s0 + $0x8] ss:$0 sps:$4 sm:$0x33]  }
 0x1ab   : > { %v5141_v60 = vpack.c.bf16 %v3180_v48, %v3179_v43  ;;  %v3244_v61 = vmax.f32 %v1637_v50, 0.0  ;;  %3056 = vmatprep.mubr.bf16.mxu1 %v5823_v18 }
 0x1ac   : > { %4009 = vst [vmem:[%s6769_s12] sm:$0xff] %v5140_v54  ;;  %v5172_v62 = vpack.c.bf16 %v3242_v56, %v3241_v49  ;;  %v1589_v63 = vpop.f32.mrb[4].mxu0  ;;  %v1537_v27 = vand.u32 %v4951_v4, %v6370_v28 }
 0x1ad   : > { %4010 = vst [vmem:[%s6769_s12 + $0x8] sm:$0xff] %v5141_v60  ;;  %v5173_v0 = vpack.c.bf16 %v3244_v61, %v3243_v55  ;;  %v1640_v1 = vpop.f32.mrb[4].mxu1  ;;  %v1590_v2 = vadd.f32 %v1589_v63, %v6762_v57  ;;  %v1591_v3 = vpop.f32.mrb[5].mxu0 }
 0x1ae   : > { %4041 = vst [vmem:[%s6769_s12 + $0x100] sm:$0xff] %v5172_v62  ;;  %v1592_v6 = vadd.f32 %v1591_v3, %v6762_v57  ;;  %v1641_v7 = vadd.f32 %v1640_v1, %v6762_v57  ;;  %v1642_v8 = vpop.f32.mrb[5].mxu1  ;;  %v1593_v9 = vpop.f32.mrb[6].mxu0 }
 0x1af   : > { %4042 = vst [vmem:[%s6769_s12 + $0x108] sm:$0xff] %v5173_v0  ;;  %v3305_v12 = vmax.f32 %v1590_v2, 0.0  ;;  %v1643_v13 = vadd.f32 %v1642_v8, %v6762_v57  ;;  %v1644_v15 = vpop.f32.mrb[6].mxu1  ;;  %v1594_v16 = vpop.f32.mrb[7].mxu0 }
 0x1b0   : > { %v3306_v22 = vmax.f32 %v1592_v6, 0.0  ;;  %v3307_v25 = vmax.f32 %v1641_v7, 0.0  ;;  %v1645_v26 = vpop.f32.mrb[7].mxu1 }
 0x1b1   : > { %v3308_v29 = vmax.f32 %v1643_v13, 0.0  ;;  %5010 = vmatmul.mubr.msk.bf16.vlgmr.msra.gmra.mrb[112].mxu0 %vm1342_vm2, %v6787_v20 }
 0x1b2   : > { %v5204_v23 = vpack.c.bf16 %v3306_v22, %v3305_v12  ;;  %5012 = vmatmul.mubr.msk.bf16.vlgmr.msra.gmra.mrb[112].mxu1 %vm1342_vm2, %v6787_v20  ;;  %3076 = vmatpush1.bf16.msra.mxu0 %v4886_v10 }
 0x1b3   : > { %v5205_v52 = vpack.c.bf16 %v3308_v29, %v3307_v25  ;;  %3127 = vmatpush1.bf16.msra.mxu1 %v4888_v17  ;;  %3015 = vmatprep.mubr.bf16.mxu0 %v5823_v18 }
 0x1b4   : > { %4073 = vst [vmem:[%s6769_s12 + $0x200] sm:$0x33] %v5204_v23  ;;  %v1681_v32 = vpop.f32.mrb[8].mxu0  ;;  %3066 = vmatprep.mubr.bf16.mxu1 %v5823_v18  ;;  %3077 = vmatprep.subr.bf16.mxu0 %v1537_v27 }
 0x1b5   : > { %4074 = vst [vmem:[%s6769_s12 + $0x208] sm:$0x33] %v5205_v52  ;;  %v1682_v33 = vadd.f32 %v1681_v32, %v6714_v14  ;;  %v1732_v34 = vpop.f32.mrb[8].mxu1  ;;  %v1683_v35 = vpop.f32.mrb[9].mxu0  ;;  %3128 = vmatprep.subr.bf16.mxu1 %v1543_v21 }
 0x1b6   : > { %v1733_v36 = vadd.f32 %v1732_v34, %v6714_v14  ;;  %v1684_v37 = vadd.f32 %v1683_v35, %v6714_v14  ;;  %v1734_v38 = vpop.f32.mrb[9].mxu1  ;;  %v1685_v39 = vpop.f32.mrb[10].mxu0  ;;  %3078 = vmatpush1.bf16.msra.mxu0 %v1534_v24 }
 0x1b7   : > { %v3181_v40 = vmax.f32 %v1682_v33, 0.0  ;;  %v1735_v28 = vadd.f32 %v1734_v38, %v6714_v14  ;;  %v1686_v41 = vadd.f32 %v1685_v39, %v6739_v30  ;;  %v1736_v42 = vpop.f32.mrb[10].mxu1  ;;  %v1687_v43 = vpop.f32.mrb[11].mxu0  ;;  %3129 = vmatpush1.bf16.msra.mxu1 %v1540_v31 }
 0x1b8   : > { %v3183_v44 = vmax.f32 %v1733_v36, 0.0  ;;  %v3182_v45 = vmax.f32 %v1684_v37, 0.0  ;;  %v1737_v46 = vadd.f32 %v1736_v42, %v6739_v30  ;;  %v1688_v47 = vadd.f32 %v1687_v43, %v6739_v30  ;;  %v1738_v48 = vpop.f32.mrb[11].mxu1 }
 0x1b9   : > { %v3184_v49 = vmax.f32 %v1735_v28, 0.0  ;;  %v3245_v50 = vmax.f32 %v1686_v41, 0.0  ;;  %v1739_v51 = vadd.f32 %v1738_v48, %v6739_v30  ;;  %5011 = vmatmul.mubr.msk.bf16.gmra.mrb[116].mxu0 %vm1342_vm2, %v6811_v53 }
 0x1ba   : > { %v5142_v54 = vpack.c.bf16 %v3182_v45, %v3181_v40  ;;  %v3247_v55 = vmax.f32 %v1737_v46, 0.0  ;;  %v3246_v56 = vmax.f32 %v1688_v47, 0.0  ;;  %5013 = vmatmul.mubr.msk.bf16.gmra.mrb[116].mxu1 %vm1342_vm2, %v6811_v53  ;;  %3107 = vmatprep.mubr.bf16.mxu0 %v5823_v18 }
 0x1bb   : > { %v5143_v58 = vpack.c.bf16 %v3184_v49, %v3183_v44  ;;  %v3248_v59 = vmax.f32 %v1739_v51, 0.0  ;;  %3158 = vmatprep.mubr.bf16.mxu1 %v5823_v18 }
 0x1bc   : > { %4011 = vst [vmem:[%s6769_s12 + $0x10] sm:$0xff] %v5142_v54  ;;  %v5174_v60 = vpack.c.bf16 %v3246_v56, %v3245_v50  ;;  %v1691_v61 = vpop.f32.mrb[12].mxu0 }
 0x1bd   : > { %4012 = vst [vmem:[%s6769_s12 + $0x18] sm:$0xff] %v5143_v58  ;;  %v5175_v62 = vpack.c.bf16 %v3248_v59, %v3247_v55  ;;  %v1692_v63 = vadd.f32 %v1691_v61, %v6762_v57  ;;  %v1742_v4 = vpop.f32.mrb[12].mxu1  ;;  %v1693_v0 = vpop.f32.mrb[13].mxu0 }
 0x1be   : > { %4043 = vst [vmem:[%s6769_s12 + $0x110] sm:$0xff] %v5174_v60  ;;  %v1743_v1 = vadd.f32 %v1742_v4, %v6762_v57  ;;  %v1694_v2 = vadd.f32 %v1693_v0, %v6762_v57  ;;  %v1744_v3 = vpop.f32.mrb[13].mxu1  ;;  %v1695_v5 = vpop.f32.mrb[14].mxu0 }
 0x1bf   : > { %4044 = vst [vmem:[%s6769_s12 + $0x118] sm:$0xff] %v5175_v62  ;;  %v3309_v6 = vmax.f32 %v1692_v63, 0.0  ;;  %v1745_v7 = vadd.f32 %v1744_v3, %v6762_v57  ;;  %v1746_v8 = vpop.f32.mrb[14].mxu1  ;;  %v1696_v9 = vpop.f32.mrb[15].mxu0 }
 0x1c0   : > { %v3311_v10 = vmax.f32 %v1743_v1, 0.0  ;;  %v3310_v11 = vmax.f32 %v1694_v2, 0.0  ;;  %v1747_v12 = vpop.f32.mrb[15].mxu1 }
 0x1c1   : > { %v3312_v13 = vmax.f32 %v1745_v7, 0.0  ;;  %5014 = vmatmul.mubr.msk.bf16.vlgmr.msra.gmra.mrb[120].mxu0 %vm1342_vm2, %v6787_v20 }
 0x1c2   : > { %v5206_v15 = vpack.c.bf16 %v3310_v11, %v3309_v6  ;;  %5016 = vmatmul.mubr.msk.bf16.vlgmr.msra.gmra.mrb[120].mxu1 %vm1342_vm2, %v6787_v20  ;;  %3117 = vmatprep.mubr.bf16.mxu0 %v5823_v18 }
 0x1c3   : > { %v5207_v16 = vpack.c.bf16 %v3312_v13, %v3311_v10  ;;  %3168 = vmatprep.mubr.bf16.mxu1 %v5823_v18 }
 0x1c4   : > { %4075 = vst [vmem:[%s6769_s12 + $0x210] sm:$0x33] %v5206_v15  ;;  %v1783_v17 = vpop.f32.mrb[16].mxu0 }
 0x1c5   : > { %4076 = vst [vmem:[%s6769_s12 + $0x218] sm:$0x33] %v5207_v16  ;;  %v1784_v19 = vadd.f32 %v1783_v17, %v6714_v14  ;;  %v1834_v22 = vpop.f32.mrb[16].mxu1  ;;  %v1785_v25 = vpop.f32.mrb[17].mxu0 }
 0x1c6   : > { %v1835_v26 = vadd.f32 %v1834_v22, %v6714_v14  ;;  %v1786_v27 = vadd.f32 %v1785_v25, %v6714_v14  ;;  %v1836_v29 = vpop.f32.mrb[17].mxu1  ;;  %v1787_v21 = vpop.f32.mrb[18].mxu0 }
 0x1c7   : > { %v3185_v23 = vmax.f32 %v1784_v19, 0.0  ;;  %v1837_v20 = vadd.f32 %v1836_v29, %v6714_v14  ;;  %v1788_v24 = vadd.f32 %v1787_v21, %v6739_v30  ;;  %v1838_v52 = vpop.f32.mrb[18].mxu1  ;;  %v1789_v18 = vpop.f32.mrb[19].mxu0 }
 0x1c8   : > { %v3187_v31 = vmax.f32 %v1835_v26, 0.0  ;;  %v3186_v32 = vmax.f32 %v1786_v27, 0.0  ;;  %v1839_v33 = vadd.f32 %v1838_v52, %v6739_v30  ;;  %v1790_v34 = vadd.f32 %v1789_v18, %v6739_v30  ;;  %v1840_v35 = vpop.f32.mrb[19].mxu1 }
 0x1c9   : > { %v3188_v36 = vmax.f32 %v1837_v20, 0.0  ;;  %v3249_v37 = vmax.f32 %v1788_v24, 0.0  ;;  %v1841_v38 = vadd.f32 %v1840_v35, %v6739_v30  ;;  %5015 = vmatmul.mubr.msk.bf16.gmra.mrb[124].mxu0 %vm1342_vm2, %v6811_v53 }
 0x1ca   : > { %v5144_v39 = vpack.c.bf16 %v3186_v32, %v3185_v23  ;;  %v3251_v40 = vmax.f32 %v1839_v33, 0.0  ;;  %v3250_v28 = vmax.f32 %v1790_v34, 0.0  ;;  %5017 = vmatmul.mubr.msk.bf16.gmra.mrb[124].mxu1 %vm1342_vm2, %v6811_v53 }
 0x1cb   : > { %v5145_v41 = vpack.c.bf16 %v3188_v36, %v3187_v31  ;;  %v3252_v42 = vmax.f32 %v1841_v38, 0.0 }
 0x1cc   : > { %4013 = vst [vmem:[%s6769_s12 + $0x20] sm:$0xff] %v5144_v39  ;;  %v5176_v43 = vpack.c.bf16 %v3250_v28, %v3249_v37  ;;  %v1793_v44 = vpop.f32.mrb[20].mxu0 }
 0x1cd   : > { %4014 = vst [vmem:[%s6769_s12 + $0x28] sm:$0xff] %v5145_v41  ;;  %v5177_v45 = vpack.c.bf16 %v3252_v42, %v3251_v40  ;;  %v1794_v46 = vadd.f32 %v1793_v44, %v6762_v57  ;;  %v1844_v47 = vpop.f32.mrb[20].mxu1  ;;  %v1795_v48 = vpop.f32.mrb[21].mxu0 }
 0x1ce   : > { %4045 = vst [vmem:[%s6769_s12 + $0x120] sm:$0xff] %v5176_v43  ;;  %v1845_v49 = vadd.f32 %v1844_v47, %v6762_v57  ;;  %v1796_v50 = vadd.f32 %v1795_v48, %v6762_v57  ;;  %v1846_v51 = vpop.f32.mrb[21].mxu1  ;;  %v1797_v53 = vpop.f32.mrb[22].mxu0 }
 0x1cf   : > { %4046 = vst [vmem:[%s6769_s12 + $0x128] sm:$0xff] %v5177_v45  ;;  %v3313_v54 = vmax.f32 %v1794_v46, 0.0  ;;  %v1847_v55 = vadd.f32 %v1846_v51, %v6762_v57  ;;  %v1848_v56 = vpop.f32.mrb[22].mxu1  ;;  %v1798_v58 = vpop.f32.mrb[23].mxu0 }
 0x1d0   : > { %v3315_v59 = vmax.f32 %v1845_v49, 0.0  ;;  %v3314_v60 = vmax.f32 %v1796_v50, 0.0  ;;  %v1849_v61 = vpop.f32.mrb[23].mxu1 }
 0x1d1   : > { %v3316_v62 = vmax.f32 %v1847_v55, 0.0 }
 0x1d2   : > { %v5208_v63 = vpack.c.bf16 %v3314_v60, %v3313_v54 }
 0x1d3   : > { %v5209_v4 = vpack.c.bf16 %v3316_v62, %v3315_v59 }
 0x1d4   : > { %4077 = vst [vmem:[%s6769_s12 + $0x220] sm:$0x33] %v5208_v63  ;;  %v1885_v0 = vpop.f32.mrb[24].mxu0 }
 0x1d5   : > { %4078 = vst [vmem:[%s6769_s12 + $0x228] sm:$0x33] %v5209_v4  ;;  %v1886_v1 = vadd.f32 %v1885_v0, %v6714_v14  ;;  %v1936_v2 = vpop.f32.mrb[24].mxu1  ;;  %v1887_v3 = vpop.f32.mrb[25].mxu0 }
 0x1d6   : > { %v1937_v5 = vadd.f32 %v1936_v2, %v6714_v14  ;;  %v1888_v6 = vadd.f32 %v1887_v3, %v6714_v14  ;;  %v1938_v7 = vpop.f32.mrb[25].mxu1  ;;  %v1889_v8 = vpop.f32.mrb[26].mxu0 }
 0x1d7   : > { %v3189_v9 = vmax.f32 %v1886_v1, 0.0  ;;  %v1939_v10 = vadd.f32 %v1938_v7, %v6714_v14  ;;  %v1890_v11 = vadd.f32 %v1889_v8, %v6739_v30  ;;  %v1940_v12 = vpop.f32.mrb[26].mxu1  ;;  %v1891_v13 = vpop.f32.mrb[27].mxu0 }
 0x1d8   : > { %v3191_v15 = vmax.f32 %v1937_v5, 0.0  ;;  %v3190_v16 = vmax.f32 %v1888_v6, 0.0  ;;  %v1941_v17 = vadd.f32 %v1940_v12, %v6739_v30  ;;  %v1892_v19 = vadd.f32 %v1891_v13, %v6739_v30  ;;  %v1942_v22 = vpop.f32.mrb[27].mxu1 }
 0x1d9   : > { %v3192_v25 = vmax.f32 %v1939_v10, 0.0  ;;  %v3253_v26 = vmax.f32 %v1890_v11, 0.0  ;;  %v1943_v27 = vadd.f32 %v1942_v22, %v6739_v30 }
 0x1da   : > { %v5146_v29 = vpack.c.bf16 %v3190_v16, %v3189_v9  ;;  %v3255_v21 = vmax.f32 %v1941_v17, 0.0  ;;  %v3254_v23 = vmax.f32 %v1892_v19, 0.0 }
 0x1db   : > { %v5147_v20 = vpack.c.bf16 %v3192_v25, %v3191_v15  ;;  %v3256_v24 = vmax.f32 %v1943_v27, 0.0 }
 0x1dc   : > { %4015 = vst [vmem:[%s6769_s12 + $0x30] sm:$0xff] %v5146_v29  ;;  %v5178_v52 = vpack.c.bf16 %v3254_v23, %v3253_v26  ;;  %v1895_v18 = vpop.f32.mrb[28].mxu0 }
 0x1dd   : > { %4016 = vst [vmem:[%s6769_s12 + $0x38] sm:$0xff] %v5147_v20  ;;  %v5179_v31 = vpack.c.bf16 %v3256_v24, %v3255_v21  ;;  %v1896_v32 = vadd.f32 %v1895_v18, %v6762_v57  ;;  %v1946_v33 = vpop.f32.mrb[28].mxu1  ;;  %v1897_v34 = vpop.f32.mrb[29].mxu0 }
 0x1de   : > { %4047 = vst [vmem:[%s6769_s12 + $0x130] sm:$0xff] %v5178_v52  ;;  %v1947_v35 = vadd.f32 %v1946_v33, %v6762_v57  ;;  %v1898_v36 = vadd.f32 %v1897_v34, %v6762_v57  ;;  %v1948_v37 = vpop.f32.mrb[29].mxu1  ;;  %v1899_v38 = vpop.f32.mrb[30].mxu0 }
 0x1df   : > { %4048 = vst [vmem:[%s6769_s12 + $0x138] sm:$0xff] %v5179_v31  ;;  %v3317_v39 = vmax.f32 %v1896_v32, 0.0  ;;  %v1949_v40 = vadd.f32 %v1948_v37, %v6762_v57  ;;  %v1950_v28 = vpop.f32.mrb[30].mxu1  ;;  %v1900_v41 = vpop.f32.mrb[31].mxu0 }
 0x1e0   : > { %v3319_v42 = vmax.f32 %v1947_v35, 0.0  ;;  %v3318_v43 = vmax.f32 %v1898_v36, 0.0  ;;  %v1951_v44 = vpop.f32.mrb[31].mxu1 }
 0x1e1   : > { %v3320_v45 = vmax.f32 %v1949_v40, 0.0 }
 0x1e2   : > { %v5210_v46 = vpack.c.bf16 %v3318_v43, %v3317_v39 }
 0x1e3   : > { %v5211_v47 = vpack.c.bf16 %v3320_v45, %v3319_v42 }
 0x1e4   : > { %4079 = vst [vmem:[%s6769_s12 + $0x230] sm:$0x33] %v5210_v46  ;;  %v1987_v48 = vpop.f32.mrb[32].mxu0 }
 0x1e5   : > { %4080 = vst [vmem:[%s6769_s12 + $0x238] sm:$0x33] %v5211_v47  ;;  %v1988_v49 = vadd.f32 %v1987_v48, %v6714_v14  ;;  %v2038_v50 = vpop.f32.mrb[32].mxu1  ;;  %v1989_v51 = vpop.f32.mrb[33].mxu0 }
 0x1e6   : > { %v2039_v53 = vadd.f32 %v2038_v50, %v6714_v14  ;;  %v1990_v54 = vadd.f32 %v1989_v51, %v6714_v14  ;;  %v2040_v55 = vpop.f32.mrb[33].mxu1  ;;  %v1991_v56 = vpop.f32.mrb[34].mxu0 }
 0x1e7   : > { %v3193_v58 = vmax.f32 %v1988_v49, 0.0  ;;  %v2041_v59 = vadd.f32 %v2040_v55, %v6714_v14  ;;  %v1992_v60 = vadd.f32 %v1991_v56, %v6739_v30  ;;  %v2042_v61 = vpop.f32.mrb[34].mxu1  ;;  %v1993_v62 = vpop.f32.mrb[35].mxu0 }
 0x1e8   : > { %v3195_v63 = vmax.f32 %v2039_v53, 0.0  ;;  %v3194_v4 = vmax.f32 %v1990_v54, 0.0  ;;  %v2043_v0 = vadd.f32 %v2042_v61, %v6739_v30  ;;  %v1994_v1 = vadd.f32 %v1993_v62, %v6739_v30  ;;  %v2044_v2 = vpop.f32.mrb[35].mxu1 }
 0x1e9   : > { %v3196_v3 = vmax.f32 %v2041_v59, 0.0  ;;  %v3257_v5 = vmax.f32 %v1992_v60, 0.0  ;;  %v2045_v6 = vadd.f32 %v2044_v2, %v6739_v30 }
 0x1ea   : > { %v5148_v7 = vpack.c.bf16 %v3194_v4, %v3193_v58  ;;  %v3259_v8 = vmax.f32 %v2043_v0, 0.0  ;;  %v3258_v9 = vmax.f32 %v1994_v1, 0.0 }
 0x1eb   : > { %v5149_v10 = vpack.c.bf16 %v3196_v3, %v3195_v63  ;;  %v3260_v11 = vmax.f32 %v2045_v6, 0.0 }
 0x1ec   : > { %4017 = vst [vmem:[%s6769_s12 + $0x40] sm:$0xff] %v5148_v7  ;;  %v5180_v12 = vpack.c.bf16 %v3258_v9, %v3257_v5  ;;  %v1997_v13 = vpop.f32.mrb[36].mxu0 }
 0x1ed   : > { %4018 = vst [vmem:[%s6769_s12 + $0x48] sm:$0xff] %v5149_v10  ;;  %v5181_v15 = vpack.c.bf16 %v3260_v11, %v3259_v8  ;;  %v1998_v16 = vadd.f32 %v1997_v13, %v6762_v57  ;;  %v2048_v17 = vpop.f32.mrb[36].mxu1  ;;  %v1999_v19 = vpop.f32.mrb[37].mxu0 }
 0x1ee   : > { %4049 = vst [vmem:[%s6769_s12 + $0x140] sm:$0xff] %v5180_v12  ;;  %v2049_v22 = vadd.f32 %v2048_v17, %v6762_v57  ;;  %v2000_v25 = vadd.f32 %v1999_v19, %v6762_v57  ;;  %v2050_v26 = vpop.f32.mrb[37].mxu1  ;;  %v2001_v27 = vpop.f32.mrb[38].mxu0 }
 0x1ef   : > { %4050 = vst [vmem:[%s6769_s12 + $0x148] sm:$0xff] %v5181_v15  ;;  %v3321_v29 = vmax.f32 %v1998_v16, 0.0  ;;  %v2051_v21 = vadd.f32 %v2050_v26, %v6762_v57  ;;  %v2052_v23 = vpop.f32.mrb[38].mxu1  ;;  %v2002_v20 = vpop.f32.mrb[39].mxu0 }
 0x1f0   : > { %v3323_v24 = vmax.f32 %v2049_v22, 0.0  ;;  %v3322_v52 = vmax.f32 %v2000_v25, 0.0  ;;  %v2053_v18 = vpop.f32.mrb[39].mxu1 }
 0x1f1   : > { %v3324_v31 = vmax.f32 %v2051_v21, 0.0 }
 0x1f2   : > { %v5212_v32 = vpack.c.bf16 %v3322_v52, %v3321_v29 }
 0x1f3   : > { %v5213_v33 = vpack.c.bf16 %v3324_v31, %v3323_v24 }
 0x1f4   : > { %4081 = vst [vmem:[%s6769_s12 + $0x240] sm:$0x33] %v5212_v32  ;;  %v2089_v34 = vpop.f32.mrb[40].mxu0 }
 0x1f5   : > { %4082 = vst [vmem:[%s6769_s12 + $0x248] sm:$0x33] %v5213_v33  ;;  %v2090_v35 = vadd.f32 %v2089_v34, %v6714_v14  ;;  %v2140_v36 = vpop.f32.mrb[40].mxu1  ;;  %v2091_v37 = vpop.f32.mrb[41].mxu0 }
 0x1f6   : > { %v2141_v38 = vadd.f32 %v2140_v36, %v6714_v14  ;;  %v2092_v39 = vadd.f32 %v2091_v37, %v6714_v14  ;;  %v2142_v40 = vpop.f32.mrb[41].mxu1  ;;  %v2093_v28 = vpop.f32.mrb[42].mxu0 }
 0x1f7   : > { %v3197_v41 = vmax.f32 %v2090_v35, 0.0  ;;  %v2143_v42 = vadd.f32 %v2142_v40, %v6714_v14  ;;  %v2094_v43 = vadd.f32 %v2093_v28, %v6739_v30  ;;  %v2144_v44 = vpop.f32.mrb[42].mxu1  ;;  %v2095_v45 = vpop.f32.mrb[43].mxu0 }
 0x1f8   : > { %v3199_v46 = vmax.f32 %v2141_v38, 0.0  ;;  %v3198_v47 = vmax.f32 %v2092_v39, 0.0  ;;  %v2145_v48 = vadd.f32 %v2144_v44, %v6739_v30  ;;  %v2096_v49 = vadd.f32 %v2095_v45, %v6739_v30  ;;  %v2146_v50 = vpop.f32.mrb[43].mxu1 }
 0x1f9   : > { %v3200_v51 = vmax.f32 %v2143_v42, 0.0  ;;  %v3261_v53 = vmax.f32 %v2094_v43, 0.0  ;;  %v2147_v54 = vadd.f32 %v2146_v50, %v6739_v30 }
 0x1fa   : > { %v5150_v55 = vpack.c.bf16 %v3198_v47, %v3197_v41  ;;  %v3263_v56 = vmax.f32 %v2145_v48, 0.0  ;;  %v3262_v58 = vmax.f32 %v2096_v49, 0.0 }
 0x1fb   : > { %v5151_v59 = vpack.c.bf16 %v3200_v51, %v3199_v46  ;;  %v3264_v60 = vmax.f32 %v2147_v54, 0.0 }
 0x1fc   : > { %4019 = vst [vmem:[%s6769_s12 + $0x50] sm:$0xff] %v5150_v55  ;;  %v5182_v61 = vpack.c.bf16 %v3262_v58, %v3261_v53  ;;  %v2099_v62 = vpop.f32.mrb[44].mxu0 }
 0x1fd   : > { %4020 = vst [vmem:[%s6769_s12 + $0x58] sm:$0xff] %v5151_v59  ;;  %v5183_v63 = vpack.c.bf16 %v3264_v60, %v3263_v56  ;;  %v2100_v4 = vadd.f32 %v2099_v62, %v6762_v57  ;;  %v2150_v0 = vpop.f32.mrb[44].mxu1  ;;  %v2101_v1 = vpop.f32.mrb[45].mxu0 }
 0x1fe   : > { %4051 = vst [vmem:[%s6769_s12 + $0x150] sm:$0xff] %v5182_v61  ;;  %v2151_v2 = vadd.f32 %v2150_v0, %v6762_v57  ;;  %v2102_v3 = vadd.f32 %v2101_v1, %v6762_v57  ;;  %v2152_v5 = vpop.f32.mrb[45].mxu1  ;;  %v2103_v6 = vpop.f32.mrb[46].mxu0 }
 0x1ff   : > { %4052 = vst [vmem:[%s6769_s12 + $0x158] sm:$0xff] %v5183_v63  ;;  %v3325_v7 = vmax.f32 %v2100_v4, 0.0  ;;  %v2153_v8 = vadd.f32 %v2152_v5, %v6762_v57  ;;  %v2154_v9 = vpop.f32.mrb[46].mxu1  ;;  %v2104_v10 = vpop.f32.mrb[47].mxu0 }
 0x200   : > { %v3327_v11 = vmax.f32 %v2151_v2, 0.0  ;;  %v3326_v12 = vmax.f32 %v2102_v3, 0.0  ;;  %v2155_v13 = vpop.f32.mrb[47].mxu1 }
 0x201   : > { %v3328_v15 = vmax.f32 %v2153_v8, 0.0 }
 0x202   : > { %v5214_v16 = vpack.c.bf16 %v3326_v12, %v3325_v7 }
 0x203   : > { %v5215_v17 = vpack.c.bf16 %v3328_v15, %v3327_v11 }
 0x204   : > { %4083 = vst [vmem:[%s6769_s12 + $0x250] sm:$0x33] %v5214_v16  ;;  %v2191_v19 = vpop.f32.mrb[48].mxu0 }
 0x205   : > { %4084 = vst [vmem:[%s6769_s12 + $0x258] sm:$0x33] %v5215_v17  ;;  %v2192_v22 = vadd.f32 %v2191_v19, %v6714_v14  ;;  %v2242_v25 = vpop.f32.mrb[48].mxu1  ;;  %v2193_v26 = vpop.f32.mrb[49].mxu0 }
 0x206   : > { %v2243_v27 = vadd.f32 %v2242_v25, %v6714_v14  ;;  %v2194_v29 = vadd.f32 %v2193_v26, %v6714_v14  ;;  %v2244_v21 = vpop.f32.mrb[49].mxu1  ;;  %v2195_v23 = vpop.f32.mrb[50].mxu0 }
 0x207   : > { %v3201_v20 = vmax.f32 %v2192_v22, 0.0  ;;  %v2245_v24 = vadd.f32 %v2244_v21, %v6714_v14  ;;  %v2196_v52 = vadd.f32 %v2195_v23, %v6739_v30  ;;  %v2246_v18 = vpop.f32.mrb[50].mxu1  ;;  %v2197_v31 = vpop.f32.mrb[51].mxu0 }
 0x208   : > { %v3203_v32 = vmax.f32 %v2243_v27, 0.0  ;;  %v3202_v33 = vmax.f32 %v2194_v29, 0.0  ;;  %v2247_v34 = vadd.f32 %v2246_v18, %v6739_v30  ;;  %v2198_v35 = vadd.f32 %v2197_v31, %v6739_v30  ;;  %v2248_v36 = vpop.f32.mrb[51].mxu1 }
 0x209   : > { %v3204_v37 = vmax.f32 %v2245_v24, 0.0  ;;  %v3265_v38 = vmax.f32 %v2196_v52, 0.0  ;;  %v2249_v39 = vadd.f32 %v2248_v36, %v6739_v30 }
 0x20a   : > { %v5152_v40 = vpack.c.bf16 %v3202_v33, %v3201_v20  ;;  %v3267_v28 = vmax.f32 %v2247_v34, 0.0  ;;  %v3266_v41 = vmax.f32 %v2198_v35, 0.0 }
 0x20b   : > { %v5153_v42 = vpack.c.bf16 %v3204_v37, %v3203_v32  ;;  %v3268_v43 = vmax.f32 %v2249_v39, 0.0 }
 0x20c   : > { %4021 = vst [vmem:[%s6769_s12 + $0x60] sm:$0xff] %v5152_v40  ;;  %v5184_v44 = vpack.c.bf16 %v3266_v41, %v3265_v38  ;;  %v2201_v45 = vpop.f32.mrb[52].mxu0 }
 0x20d   : > { %4022 = vst [vmem:[%s6769_s12 + $0x68] sm:$0xff] %v5153_v42  ;;  %v5185_v46 = vpack.c.bf16 %v3268_v43, %v3267_v28  ;;  %v2202_v47 = vadd.f32 %v2201_v45, %v6762_v57  ;;  %v2252_v48 = vpop.f32.mrb[52].mxu1  ;;  %v2203_v49 = vpop.f32.mrb[53].mxu0 }
 0x20e   : > { %4053 = vst [vmem:[%s6769_s12 + $0x160] sm:$0xff] %v5184_v44  ;;  %v2253_v50 = vadd.f32 %v2252_v48, %v6762_v57  ;;  %v2204_v51 = vadd.f32 %v2203_v49, %v6762_v57  ;;  %v2254_v53 = vpop.f32.mrb[53].mxu1  ;;  %v2205_v54 = vpop.f32.mrb[54].mxu0 }
 0x20f   : > { %4054 = vst [vmem:[%s6769_s12 + $0x168] sm:$0xff] %v5185_v46  ;;  %v3329_v55 = vmax.f32 %v2202_v47, 0.0  ;;  %v2255_v56 = vadd.f32 %v2254_v53, %v6762_v57  ;;  %v2256_v58 = vpop.f32.mrb[54].mxu1  ;;  %v2206_v59 = vpop.f32.mrb[55].mxu0 }
 0x210   : > { %v3331_v60 = vmax.f32 %v2253_v50, 0.0  ;;  %v3330_v61 = vmax.f32 %v2204_v51, 0.0  ;;  %v2257_v62 = vpop.f32.mrb[55].mxu1 }
 0x211   : > { %v3332_v63 = vmax.f32 %v2255_v56, 0.0 }
 0x212   : > { %v5216_v4 = vpack.c.bf16 %v3330_v61, %v3329_v55 }
 0x213   : > { %v5217_v0 = vpack.c.bf16 %v3332_v63, %v3331_v60 }
 0x214   : > { %4085 = vst [vmem:[%s6769_s12 + $0x260] sm:$0x33] %v5216_v4  ;;  %v2293_v1 = vpop.f32.mrb[56].mxu0 }
 0x215   : > { %4086 = vst [vmem:[%s6769_s12 + $0x268] sm:$0x33] %v5217_v0  ;;  %v2294_v2 = vadd.f32 %v2293_v1, %v6714_v14  ;;  %v2344_v3 = vpop.f32.mrb[56].mxu1  ;;  %v2295_v5 = vpop.f32.mrb[57].mxu0 }
 0x216   : > { %v2345_v6 = vadd.f32 %v2344_v3, %v6714_v14  ;;  %v2296_v7 = vadd.f32 %v2295_v5, %v6714_v14  ;;  %v2346_v8 = vpop.f32.mrb[57].mxu1  ;;  %v2297_v9 = vpop.f32.mrb[58].mxu0 }
 0x217   : > { %v3205_v10 = vmax.f32 %v2294_v2, 0.0  ;;  %v2347_v11 = vadd.f32 %v2346_v8, %v6714_v14  ;;  %v2298_v12 = vadd.f32 %v2297_v9, %v6739_v30  ;;  %v2348_v13 = vpop.f32.mrb[58].mxu1  ;;  %v2299_v15 = vpop.f32.mrb[59].mxu0 }
 0x218   : > { %v3207_v16 = vmax.f32 %v2345_v6, 0.0  ;;  %v3206_v17 = vmax.f32 %v2296_v7, 0.0  ;;  %v2349_v19 = vadd.f32 %v2348_v13, %v6739_v30  ;;  %v2300_v22 = vadd.f32 %v2299_v15, %v6739_v30  ;;  %v2350_v25 = vpop.f32.mrb[59].mxu1 }
 0x219   : > { %v3208_v26 = vmax.f32 %v2347_v11, 0.0  ;;  %v3269_v27 = vmax.f32 %v2298_v12, 0.0  ;;  %v2351_v29 = vadd.f32 %v2350_v25, %v6739_v30 }
 0x21a   : > { %v5154_v21 = vpack.c.bf16 %v3206_v17, %v3205_v10  ;;  %v3271_v23 = vmax.f32 %v2349_v19, 0.0  ;;  %v3270_v20 = vmax.f32 %v2300_v22, 0.0 }
 0x21b   : > { %v5155_v24 = vpack.c.bf16 %v3208_v26, %v3207_v16  ;;  %v3272_v52 = vmax.f32 %v2351_v29, 0.0 }
 0x21c   : > { %4023 = vst [vmem:[%s6769_s12 + $0x70] sm:$0xff] %v5154_v21  ;;  %v5186_v18 = vpack.c.bf16 %v3270_v20, %v3269_v27  ;;  %v2303_v31 = vpop.f32.mrb[60].mxu0 }
 0x21d   : > { %4024 = vst [vmem:[%s6769_s12 + $0x78] sm:$0xff] %v5155_v24  ;;  %v5187_v32 = vpack.c.bf16 %v3272_v52, %v3271_v23  ;;  %v2304_v33 = vadd.f32 %v2303_v31, %v6762_v57  ;;  %v2354_v34 = vpop.f32.mrb[60].mxu1  ;;  %v2305_v35 = vpop.f32.mrb[61].mxu0 }
 0x21e   : > { %4055 = vst [vmem:[%s6769_s12 + $0x170] sm:$0xff] %v5186_v18  ;;  %v2355_v36 = vadd.f32 %v2354_v34, %v6762_v57  ;;  %v2306_v37 = vadd.f32 %v2305_v35, %v6762_v57  ;;  %v2356_v38 = vpop.f32.mrb[61].mxu1  ;;  %v2307_v39 = vpop.f32.mrb[62].mxu0 }
 0x21f   : > { %4056 = vst [vmem:[%s6769_s12 + $0x178] sm:$0xff] %v5187_v32  ;;  %v3333_v40 = vmax.f32 %v2304_v33, 0.0  ;;  %v2357_v28 = vadd.f32 %v2356_v38, %v6762_v57  ;;  %v2358_v41 = vpop.f32.mrb[62].mxu1  ;;  %v2308_v42 = vpop.f32.mrb[63].mxu0 }
 0x220   : > { %v3335_v43 = vmax.f32 %v2355_v36, 0.0  ;;  %v3334_v44 = vmax.f32 %v2306_v37, 0.0  ;;  %v2359_v45 = vpop.f32.mrb[63].mxu1 }
 0x221   : > { %v3336_v46 = vmax.f32 %v2357_v28, 0.0 }
 0x222   : > { %v5218_v47 = vpack.c.bf16 %v3334_v44, %v3333_v40 }
 0x223   : > { %v5219_v48 = vpack.c.bf16 %v3336_v46, %v3335_v43 }
 0x224   : > { %4087 = vst [vmem:[%s6769_s12 + $0x270] sm:$0x33] %v5218_v47  ;;  %v2395_v49 = vpop.f32.mrb[64].mxu0 }
 0x225   : > { %4088 = vst [vmem:[%s6769_s12 + $0x278] sm:$0x33] %v5219_v48  ;;  %v2396_v50 = vadd.f32 %v2395_v49, %v6714_v14  ;;  %v2446_v51 = vpop.f32.mrb[64].mxu1  ;;  %v2397_v53 = vpop.f32.mrb[65].mxu0 }
 0x226   : > { %v2447_v54 = vadd.f32 %v2446_v51, %v6714_v14  ;;  %v2398_v55 = vadd.f32 %v2397_v53, %v6714_v14  ;;  %v2448_v56 = vpop.f32.mrb[65].mxu1  ;;  %v2399_v58 = vpop.f32.mrb[66].mxu0 }
 0x227   : > { %v3209_v59 = vmax.f32 %v2396_v50, 0.0  ;;  %v2449_v60 = vadd.f32 %v2448_v56, %v6714_v14  ;;  %v2400_v61 = vadd.f32 %v2399_v58, %v6739_v30  ;;  %v2450_v62 = vpop.f32.mrb[66].mxu1  ;;  %v2401_v63 = vpop.f32.mrb[67].mxu0 }
 0x228   : > { %v3211_v4 = vmax.f32 %v2447_v54, 0.0  ;;  %v3210_v0 = vmax.f32 %v2398_v55, 0.0  ;;  %v2451_v1 = vadd.f32 %v2450_v62, %v6739_v30  ;;  %v2402_v2 = vadd.f32 %v2401_v63, %v6739_v30  ;;  %v2452_v3 = vpop.f32.mrb[67].mxu1 }
 0x229   : > { %v3212_v5 = vmax.f32 %v2449_v60, 0.0  ;;  %v3273_v6 = vmax.f32 %v2400_v61, 0.0  ;;  %v2453_v7 = vadd.f32 %v2452_v3, %v6739_v30 }
 0x22a   : > { %v5156_v8 = vpack.c.bf16 %v3210_v0, %v3209_v59  ;;  %v3275_v9 = vmax.f32 %v2451_v1, 0.0  ;;  %v3274_v10 = vmax.f32 %v2402_v2, 0.0 }
 0x22b   : > { %v5157_v11 = vpack.c.bf16 %v3212_v5, %v3211_v4  ;;  %v3276_v12 = vmax.f32 %v2453_v7, 0.0 }
 0x22c   : > { %4025 = vst [vmem:[%s6769_s12 + $0x80] sm:$0xff] %v5156_v8  ;;  %v5188_v13 = vpack.c.bf16 %v3274_v10, %v3273_v6  ;;  %v2405_v15 = vpop.f32.mrb[68].mxu0 }
 0x22d   : > { %4026 = vst [vmem:[%s6769_s12 + $0x88] sm:$0xff] %v5157_v11  ;;  %v5189_v16 = vpack.c.bf16 %v3276_v12, %v3275_v9  ;;  %v2406_v17 = vadd.f32 %v2405_v15, %v6762_v57  ;;  %v2456_v19 = vpop.f32.mrb[68].mxu1  ;;  %v2407_v22 = vpop.f32.mrb[69].mxu0 }
 0x22e   : > { %4057 = vst [vmem:[%s6769_s12 + $0x180] sm:$0xff] %v5188_v13  ;;  %v2457_v25 = vadd.f32 %v2456_v19, %v6762_v57  ;;  %v2408_v26 = vadd.f32 %v2407_v22, %v6762_v57  ;;  %v2458_v27 = vpop.f32.mrb[69].mxu1  ;;  %v2409_v29 = vpop.f32.mrb[70].mxu0 }
 0x22f   : > { %4058 = vst [vmem:[%s6769_s12 + $0x188] sm:$0xff] %v5189_v16  ;;  %v3337_v21 = vmax.f32 %v2406_v17, 0.0  ;;  %v2459_v23 = vadd.f32 %v2458_v27, %v6762_v57  ;;  %v2460_v20 = vpop.f32.mrb[70].mxu1  ;;  %v2410_v24 = vpop.f32.mrb[71].mxu0 }
 0x230   : > { %v3339_v52 = vmax.f32 %v2457_v25, 0.0  ;;  %v3338_v18 = vmax.f32 %v2408_v26, 0.0  ;;  %v2461_v31 = vpop.f32.mrb[71].mxu1 }
 0x231   : > { %v3340_v32 = vmax.f32 %v2459_v23, 0.0 }
 0x232   : > { %v5220_v33 = vpack.c.bf16 %v3338_v18, %v3337_v21 }
 0x233   : > { %v5221_v34 = vpack.c.bf16 %v3340_v32, %v3339_v52 }
 0x234   : > { %4089 = vst [vmem:[%s6769_s12 + $0x280] sm:$0x33] %v5220_v33  ;;  %v2497_v35 = vpop.f32.mrb[72].mxu0 }
 0x235   : > { %4090 = vst [vmem:[%s6769_s12 + $0x288] sm:$0x33] %v5221_v34  ;;  %v2498_v36 = vadd.f32 %v2497_v35, %v6714_v14  ;;  %v2548_v37 = vpop.f32.mrb[72].mxu1  ;;  %v2499_v38 = vpop.f32.mrb[73].mxu0 }
 0x236   : > { %v2549_v39 = vadd.f32 %v2548_v37, %v6714_v14  ;;  %v2500_v40 = vadd.f32 %v2499_v38, %v6714_v14  ;;  %v2550_v28 = vpop.f32.mrb[73].mxu1  ;;  %v2501_v41 = vpop.f32.mrb[74].mxu0 }
 0x237   : > { %v3213_v42 = vmax.f32 %v2498_v36, 0.0  ;;  %v2551_v43 = vadd.f32 %v2550_v28, %v6714_v14  ;;  %v2502_v44 = vadd.f32 %v2501_v41, %v6739_v30  ;;  %v2552_v45 = vpop.f32.mrb[74].mxu1  ;;  %v2503_v46 = vpop.f32.mrb[75].mxu0 }
 0x238   : > { %v3215_v47 = vmax.f32 %v2549_v39, 0.0  ;;  %v3214_v48 = vmax.f32 %v2500_v40, 0.0  ;;  %v2553_v49 = vadd.f32 %v2552_v45, %v6739_v30  ;;  %v2504_v50 = vadd.f32 %v2503_v46, %v6739_v30  ;;  %v2554_v51 = vpop.f32.mrb[75].mxu1 }
 0x239   : > { %v3216_v53 = vmax.f32 %v2551_v43, 0.0  ;;  %v3277_v54 = vmax.f32 %v2502_v44, 0.0  ;;  %v2555_v55 = vadd.f32 %v2554_v51, %v6739_v30 }
 0x23a   : > { %v5158_v56 = vpack.c.bf16 %v3214_v48, %v3213_v42  ;;  %v3279_v58 = vmax.f32 %v2553_v49, 0.0  ;;  %v3278_v59 = vmax.f32 %v2504_v50, 0.0 }
 0x23b   : > { %v5159_v60 = vpack.c.bf16 %v3216_v53, %v3215_v47  ;;  %v3280_v61 = vmax.f32 %v2555_v55, 0.0 }
 0x23c   : > { %4027 = vst [vmem:[%s6769_s12 + $0x90] sm:$0xff] %v5158_v56  ;;  %v5190_v62 = vpack.c.bf16 %v3278_v59, %v3277_v54  ;;  %v2507_v63 = vpop.f32.mrb[76].mxu0 }
 0x23d   : > { %4028 = vst [vmem:[%s6769_s12 + $0x98] sm:$0xff] %v5159_v60  ;;  %v5191_v4 = vpack.c.bf16 %v3280_v61, %v3279_v58  ;;  %v2508_v0 = vadd.f32 %v2507_v63, %v6762_v57  ;;  %v2558_v1 = vpop.f32.mrb[76].mxu1  ;;  %v2509_v2 = vpop.f32.mrb[77].mxu0 }
 0x23e   : > { %4059 = vst [vmem:[%s6769_s12 + $0x190] sm:$0xff] %v5190_v62  ;;  %v2559_v3 = vadd.f32 %v2558_v1, %v6762_v57  ;;  %v2510_v5 = vadd.f32 %v2509_v2, %v6762_v57  ;;  %v2560_v6 = vpop.f32.mrb[77].mxu1  ;;  %v2511_v7 = vpop.f32.mrb[78].mxu0 }
 0x23f   : > { %4060 = vst [vmem:[%s6769_s12 + $0x198] sm:$0xff] %v5191_v4  ;;  %v3341_v8 = vmax.f32 %v2508_v0, 0.0  ;;  %v2561_v9 = vadd.f32 %v2560_v6, %v6762_v57  ;;  %v2562_v10 = vpop.f32.mrb[78].mxu1  ;;  %v2512_v11 = vpop.f32.mrb[79].mxu0 }
 0x240   : > { %v3343_v12 = vmax.f32 %v2559_v3, 0.0  ;;  %v3342_v13 = vmax.f32 %v2510_v5, 0.0  ;;  %v2563_v15 = vpop.f32.mrb[79].mxu1 }
 0x241   : > { %v3344_v16 = vmax.f32 %v2561_v9, 0.0 }
 0x242   : > { %v5222_v17 = vpack.c.bf16 %v3342_v13, %v3341_v8 }
 0x243   : > { %v5223_v19 = vpack.c.bf16 %v3344_v16, %v3343_v12 }
 0x244   : > { %4091 = vst [vmem:[%s6769_s12 + $0x290] sm:$0x33] %v5222_v17  ;;  %v2599_v22 = vpop.f32.mrb[80].mxu0 }
 0x245   : > { %4092 = vst [vmem:[%s6769_s12 + $0x298] sm:$0x33] %v5223_v19  ;;  %v2600_v25 = vadd.f32 %v2599_v22, %v6714_v14  ;;  %v2650_v26 = vpop.f32.mrb[80].mxu1  ;;  %v2601_v27 = vpop.f32.mrb[81].mxu0 }
 0x246   : > { %v2651_v29 = vadd.f32 %v2650_v26, %v6714_v14  ;;  %v2602_v21 = vadd.f32 %v2601_v27, %v6714_v14  ;;  %v2652_v23 = vpop.f32.mrb[81].mxu1  ;;  %v2603_v20 = vpop.f32.mrb[82].mxu0 }
 0x247   : > { %v3217_v24 = vmax.f32 %v2600_v25, 0.0  ;;  %v2653_v52 = vadd.f32 %v2652_v23, %v6714_v14  ;;  %v2604_v18 = vadd.f32 %v2603_v20, %v6739_v30  ;;  %v2654_v31 = vpop.f32.mrb[82].mxu1  ;;  %v2605_v32 = vpop.f32.mrb[83].mxu0 }
 0x248   : > { %v3219_v33 = vmax.f32 %v2651_v29, 0.0  ;;  %v3218_v34 = vmax.f32 %v2602_v21, 0.0  ;;  %v2655_v35 = vadd.f32 %v2654_v31, %v6739_v30  ;;  %v2606_v36 = vadd.f32 %v2605_v32, %v6739_v30  ;;  %v2656_v37 = vpop.f32.mrb[83].mxu1 }
 0x249   : > { %v3220_v38 = vmax.f32 %v2653_v52, 0.0  ;;  %v3281_v39 = vmax.f32 %v2604_v18, 0.0  ;;  %v2657_v40 = vadd.f32 %v2656_v37, %v6739_v30 }
 0x24a   : > { %v5160_v28 = vpack.c.bf16 %v3218_v34, %v3217_v24  ;;  %v3283_v41 = vmax.f32 %v2655_v35, 0.0  ;;  %v3282_v42 = vmax.f32 %v2606_v36, 0.0 }
 0x24b   : > { %v5161_v43 = vpack.c.bf16 %v3220_v38, %v3219_v33  ;;  %v3284_v44 = vmax.f32 %v2657_v40, 0.0 }
 0x24c   : > { %4029 = vst [vmem:[%s6769_s12 + $0xa0] sm:$0xff] %v5160_v28  ;;  %v5192_v45 = vpack.c.bf16 %v3282_v42, %v3281_v39  ;;  %v2609_v46 = vpop.f32.mrb[84].mxu0 }
 0x24d   : > { %4030 = vst [vmem:[%s6769_s12 + $0xa8] sm:$0xff] %v5161_v43  ;;  %v5193_v47 = vpack.c.bf16 %v3284_v44, %v3283_v41  ;;  %v2610_v48 = vadd.f32 %v2609_v46, %v6762_v57  ;;  %v2660_v49 = vpop.f32.mrb[84].mxu1  ;;  %v2611_v50 = vpop.f32.mrb[85].mxu0 }
 0x24e   : > { %4061 = vst [vmem:[%s6769_s12 + $0x1a0] sm:$0xff] %v5192_v45  ;;  %v2661_v51 = vadd.f32 %v2660_v49, %v6762_v57  ;;  %v2612_v53 = vadd.f32 %v2611_v50, %v6762_v57  ;;  %v2662_v54 = vpop.f32.mrb[85].mxu1  ;;  %v2613_v55 = vpop.f32.mrb[86].mxu0 }
 0x24f   : > { %4062 = vst [vmem:[%s6769_s12 + $0x1a8] sm:$0xff] %v5193_v47  ;;  %v3345_v56 = vmax.f32 %v2610_v48, 0.0  ;;  %v2663_v58 = vadd.f32 %v2662_v54, %v6762_v57  ;;  %v2664_v59 = vpop.f32.mrb[86].mxu1  ;;  %v2614_v60 = vpop.f32.mrb[87].mxu0 }
 0x250   : > { %v3347_v61 = vmax.f32 %v2661_v51, 0.0  ;;  %v3346_v62 = vmax.f32 %v2612_v53, 0.0  ;;  %v2665_v63 = vpop.f32.mrb[87].mxu1 }
 0x251   : > { %v3348_v4 = vmax.f32 %v2663_v58, 0.0 }
 0x252   : > { %v5224_v0 = vpack.c.bf16 %v3346_v62, %v3345_v56 }
 0x253   : > { %v5225_v1 = vpack.c.bf16 %v3348_v4, %v3347_v61 }
 0x254   : > { %4093 = vst [vmem:[%s6769_s12 + $0x2a0] sm:$0x33] %v5224_v0  ;;  %v2701_v2 = vpop.f32.mrb[88].mxu0 }
 0x255   : > { %4094 = vst [vmem:[%s6769_s12 + $0x2a8] sm:$0x33] %v5225_v1  ;;  %v2702_v3 = vadd.f32 %v2701_v2, %v6714_v14  ;;  %v2752_v5 = vpop.f32.mrb[88].mxu1  ;;  %v2703_v6 = vpop.f32.mrb[89].mxu0 }
 0x256   : > { %v2753_v7 = vadd.f32 %v2752_v5, %v6714_v14  ;;  %v2704_v8 = vadd.f32 %v2703_v6, %v6714_v14  ;;  %v2754_v9 = vpop.f32.mrb[89].mxu1  ;;  %v2705_v10 = vpop.f32.mrb[90].mxu0 }
 0x257   : > { %v3221_v11 = vmax.f32 %v2702_v3, 0.0  ;;  %v2755_v12 = vadd.f32 %v2754_v9, %v6714_v14  ;;  %v2706_v13 = vadd.f32 %v2705_v10, %v6739_v30  ;;  %v2756_v15 = vpop.f32.mrb[90].mxu1  ;;  %v2707_v16 = vpop.f32.mrb[91].mxu0 }
 0x258   : > { %v3223_v17 = vmax.f32 %v2753_v7, 0.0  ;;  %v3222_v19 = vmax.f32 %v2704_v8, 0.0  ;;  %v2757_v22 = vadd.f32 %v2756_v15, %v6739_v30  ;;  %v2708_v25 = vadd.f32 %v2707_v16, %v6739_v30  ;;  %v2758_v26 = vpop.f32.mrb[91].mxu1 }
 0x259   : > { %v3224_v27 = vmax.f32 %v2755_v12, 0.0  ;;  %v3285_v29 = vmax.f32 %v2706_v13, 0.0  ;;  %v2759_v21 = vadd.f32 %v2758_v26, %v6739_v30 }
 0x25a   : > { %v5162_v23 = vpack.c.bf16 %v3222_v19, %v3221_v11  ;;  %v3287_v20 = vmax.f32 %v2757_v22, 0.0  ;;  %v3286_v24 = vmax.f32 %v2708_v25, 0.0 }
 0x25b   : > { %v5163_v52 = vpack.c.bf16 %v3224_v27, %v3223_v17  ;;  %v3288_v18 = vmax.f32 %v2759_v21, 0.0 }
 0x25c   : > { %4031 = vst [vmem:[%s6769_s12 + $0xb0] sm:$0xff] %v5162_v23  ;;  %v5194_v31 = vpack.c.bf16 %v3286_v24, %v3285_v29  ;;  %v2711_v32 = vpop.f32.mrb[92].mxu0 }
 0x25d   : > { %4032 = vst [vmem:[%s6769_s12 + $0xb8] sm:$0xff] %v5163_v52  ;;  %v5195_v33 = vpack.c.bf16 %v3288_v18, %v3287_v20  ;;  %v2712_v34 = vadd.f32 %v2711_v32, %v6762_v57  ;;  %v2762_v35 = vpop.f32.mrb[92].mxu1  ;;  %v2713_v36 = vpop.f32.mrb[93].mxu0 }
 0x25e   : > { %4063 = vst [vmem:[%s6769_s12 + $0x1b0] sm:$0xff] %v5194_v31  ;;  %v2763_v37 = vadd.f32 %v2762_v35, %v6762_v57  ;;  %v2714_v38 = vadd.f32 %v2713_v36, %v6762_v57  ;;  %v2764_v39 = vpop.f32.mrb[93].mxu1  ;;  %v2715_v40 = vpop.f32.mrb[94].mxu0 }
 0x25f   : > { %4064 = vst [vmem:[%s6769_s12 + $0x1b8] sm:$0xff] %v5195_v33  ;;  %v3349_v28 = vmax.f32 %v2712_v34, 0.0  ;;  %v2765_v41 = vadd.f32 %v2764_v39, %v6762_v57  ;;  %v2766_v42 = vpop.f32.mrb[94].mxu1  ;;  %v2716_v43 = vpop.f32.mrb[95].mxu0 }
 0x260   : > { %v3351_v44 = vmax.f32 %v2763_v37, 0.0  ;;  %v3350_v45 = vmax.f32 %v2714_v38, 0.0  ;;  %v2767_v46 = vpop.f32.mrb[95].mxu1 }
 0x261   : > { %v3352_v47 = vmax.f32 %v2765_v41, 0.0 }
 0x262   : > { %v5226_v48 = vpack.c.bf16 %v3350_v45, %v3349_v28 }
 0x263   : > { %v5227_v49 = vpack.c.bf16 %v3352_v47, %v3351_v44 }
 0x264   : > { %4095 = vst [vmem:[%s6769_s12 + $0x2b0] sm:$0x33] %v5226_v48  ;;  %v2803_v50 = vpop.f32.mrb[96].mxu0 }
 0x265   : > { %4096 = vst [vmem:[%s6769_s12 + $0x2b8] sm:$0x33] %v5227_v49  ;;  %v2804_v51 = vadd.f32 %v2803_v50, %v6714_v14  ;;  %v2854_v53 = vpop.f32.mrb[96].mxu1  ;;  %v2805_v54 = vpop.f32.mrb[97].mxu0 }
 0x266   : > { %v2855_v55 = vadd.f32 %v2854_v53, %v6714_v14  ;;  %v2806_v56 = vadd.f32 %v2805_v54, %v6714_v14  ;;  %v2856_v58 = vpop.f32.mrb[97].mxu1  ;;  %v2807_v59 = vpop.f32.mrb[98].mxu0 }
 0x267   : > { %v3225_v60 = vmax.f32 %v2804_v51, 0.0  ;;  %v2857_v61 = vadd.f32 %v2856_v58, %v6714_v14  ;;  %v2808_v62 = vadd.f32 %v2807_v59, %v6739_v30  ;;  %v2858_v63 = vpop.f32.mrb[98].mxu1  ;;  %v2809_v4 = vpop.f32.mrb[99].mxu0 }
 0x268   : > { %v3227_v0 = vmax.f32 %v2855_v55, 0.0  ;;  %v3226_v1 = vmax.f32 %v2806_v56, 0.0  ;;  %v2859_v2 = vadd.f32 %v2858_v63, %v6739_v30  ;;  %v2810_v3 = vadd.f32 %v2809_v4, %v6739_v30  ;;  %v2860_v5 = vpop.f32.mrb[99].mxu1 }
 0x269   : > { %v3228_v6 = vmax.f32 %v2857_v61, 0.0  ;;  %v3289_v7 = vmax.f32 %v2808_v62, 0.0  ;;  %v2861_v8 = vadd.f32 %v2860_v5, %v6739_v30 }
 0x26a   : > { %v5164_v9 = vpack.c.bf16 %v3226_v1, %v3225_v60  ;;  %v3291_v10 = vmax.f32 %v2859_v2, 0.0  ;;  %v3290_v11 = vmax.f32 %v2810_v3, 0.0 }
 0x26b   : > { %v5165_v12 = vpack.c.bf16 %v3228_v6, %v3227_v0  ;;  %v3292_v13 = vmax.f32 %v2861_v8, 0.0 }
 0x26c   : > { %4033 = vst [vmem:[%s6769_s12 + $0xc0] sm:$0xff] %v5164_v9  ;;  %v5196_v15 = vpack.c.bf16 %v3290_v11, %v3289_v7  ;;  %v2813_v16 = vpop.f32.mrb[100].mxu0 }
 0x26d   : > { %4034 = vst [vmem:[%s6769_s12 + $0xc8] sm:$0xff] %v5165_v12  ;;  %v5197_v17 = vpack.c.bf16 %v3292_v13, %v3291_v10  ;;  %v2814_v19 = vadd.f32 %v2813_v16, %v6762_v57  ;;  %v2864_v22 = vpop.f32.mrb[100].mxu1  ;;  %v2815_v25 = vpop.f32.mrb[101].mxu0 }
 0x26e   : > { %4065 = vst [vmem:[%s6769_s12 + $0x1c0] sm:$0xff] %v5196_v15  ;;  %v2865_v26 = vadd.f32 %v2864_v22, %v6762_v57  ;;  %v2816_v27 = vadd.f32 %v2815_v25, %v6762_v57  ;;  %v2866_v29 = vpop.f32.mrb[101].mxu1  ;;  %v2817_v21 = vpop.f32.mrb[102].mxu0 }
 0x26f   : > { %4066 = vst [vmem:[%s6769_s12 + $0x1c8] sm:$0xff] %v5197_v17  ;;  %v3353_v23 = vmax.f32 %v2814_v19, 0.0  ;;  %v2867_v20 = vadd.f32 %v2866_v29, %v6762_v57  ;;  %v2868_v24 = vpop.f32.mrb[102].mxu1  ;;  %v2818_v52 = vpop.f32.mrb[103].mxu0 }
 0x270   : > { %v3355_v18 = vmax.f32 %v2865_v26, 0.0  ;;  %v3354_v31 = vmax.f32 %v2816_v27, 0.0  ;;  %v2869_v32 = vpop.f32.mrb[103].mxu1 }
 0x271   : > { %v3356_v33 = vmax.f32 %v2867_v20, 0.0 }
 0x272   : > { %v5228_v34 = vpack.c.bf16 %v3354_v31, %v3353_v23 }
 0x273   : > { %v5229_v35 = vpack.c.bf16 %v3356_v33, %v3355_v18 }
 0x274   : > { %4097 = vst [vmem:[%s6769_s12 + $0x2c0] sm:$0x33] %v5228_v34  ;;  %v2905_v36 = vpop.f32.mrb[104].mxu0 }
 0x275   : > { %4098 = vst [vmem:[%s6769_s12 + $0x2c8] sm:$0x33] %v5229_v35  ;;  %v2906_v37 = vadd.f32 %v2905_v36, %v6714_v14  ;;  %v2956_v38 = vpop.f32.mrb[104].mxu1  ;;  %v2907_v39 = vpop.f32.mrb[105].mxu0 }
 0x276   : > { %v2957_v40 = vadd.f32 %v2956_v38, %v6714_v14  ;;  %v2908_v28 = vadd.f32 %v2907_v39, %v6714_v14  ;;  %v2958_v41 = vpop.f32.mrb[105].mxu1  ;;  %v2909_v42 = vpop.f32.mrb[106].mxu0 }
 0x277   : > { %v3229_v43 = vmax.f32 %v2906_v37, 0.0  ;;  %v2959_v44 = vadd.f32 %v2958_v41, %v6714_v14  ;;  %v2910_v45 = vadd.f32 %v2909_v42, %v6739_v30  ;;  %v2960_v46 = vpop.f32.mrb[106].mxu1  ;;  %v2911_v47 = vpop.f32.mrb[107].mxu0 }
 0x278   : > { %v3231_v48 = vmax.f32 %v2957_v40, 0.0  ;;  %v3230_v49 = vmax.f32 %v2908_v28, 0.0  ;;  %v2961_v50 = vadd.f32 %v2960_v46, %v6739_v30  ;;  %v2912_v51 = vadd.f32 %v2911_v47, %v6739_v30  ;;  %v2962_v53 = vpop.f32.mrb[107].mxu1 }
 0x279   : > { %v3232_v54 = vmax.f32 %v2959_v44, 0.0  ;;  %v3293_v55 = vmax.f32 %v2910_v45, 0.0  ;;  %v2963_v56 = vadd.f32 %v2962_v53, %v6739_v30 }
 0x27a   : > { %v5166_v58 = vpack.c.bf16 %v3230_v49, %v3229_v43  ;;  %v3295_v59 = vmax.f32 %v2961_v50, 0.0  ;;  %v3294_v60 = vmax.f32 %v2912_v51, 0.0 }
 0x27b   : > { %v5167_v61 = vpack.c.bf16 %v3232_v54, %v3231_v48  ;;  %v3296_v62 = vmax.f32 %v2963_v56, 0.0 }
 0x27c   : > { %4035 = vst [vmem:[%s6769_s12 + $0xd0] sm:$0xff] %v5166_v58  ;;  %v5198_v63 = vpack.c.bf16 %v3294_v60, %v3293_v55  ;;  %v2915_v4 = vpop.f32.mrb[108].mxu0 }
 0x27d   : > { %4036 = vst [vmem:[%s6769_s12 + $0xd8] sm:$0xff] %v5167_v61  ;;  %v5199_v0 = vpack.c.bf16 %v3296_v62, %v3295_v59  ;;  %v2916_v1 = vadd.f32 %v2915_v4, %v6762_v57  ;;  %v2966_v2 = vpop.f32.mrb[108].mxu1  ;;  %v2917_v3 = vpop.f32.mrb[109].mxu0 }
 0x27e   : > { %4067 = vst [vmem:[%s6769_s12 + $0x1d0] sm:$0xff] %v5198_v63  ;;  %v2967_v5 = vadd.f32 %v2966_v2, %v6762_v57  ;;  %v2918_v6 = vadd.f32 %v2917_v3, %v6762_v57  ;;  %v2968_v7 = vpop.f32.mrb[109].mxu1  ;;  %v2919_v8 = vpop.f32.mrb[110].mxu0 }
 0x27f   : > { %4068 = vst [vmem:[%s6769_s12 + $0x1d8] sm:$0xff] %v5199_v0  ;;  %v3357_v9 = vmax.f32 %v2916_v1, 0.0  ;;  %v2969_v10 = vadd.f32 %v2968_v7, %v6762_v57  ;;  %v2970_v11 = vpop.f32.mrb[110].mxu1  ;;  %v2920_v12 = vpop.f32.mrb[111].mxu0 }
 0x280   : > { %v3359_v13 = vmax.f32 %v2967_v5, 0.0  ;;  %v3358_v15 = vmax.f32 %v2918_v6, 0.0  ;;  %v2971_v16 = vpop.f32.mrb[111].mxu1 }
 0x281   : > { %v3360_v17 = vmax.f32 %v2969_v10, 0.0 }
 0x282   : > { %v5230_v19 = vpack.c.bf16 %v3358_v15, %v3357_v9 }
 0x283   : > { %v5231_v22 = vpack.c.bf16 %v3360_v17, %v3359_v13 }
 0x284   : > { %4099 = vst [vmem:[%s6769_s12 + $0x2d0] sm:$0x33] %v5230_v19  ;;  %v3007_v25 = vpop.f32.mrb[112].mxu0 }
 0x285   : > { %4100 = vst [vmem:[%s6769_s12 + $0x2d8] sm:$0x33] %v5231_v22  ;;  %v3008_v26 = vadd.f32 %v3007_v25, %v6714_v14  ;;  %v3058_v27 = vpop.f32.mrb[112].mxu1  ;;  %v3009_v29 = vpop.f32.mrb[113].mxu0 }
 0x286   : > { %v3059_v21 = vadd.f32 %v3058_v27, %v6714_v14  ;;  %v3010_v23 = vadd.f32 %v3009_v29, %v6714_v14  ;;  %v3060_v20 = vpop.f32.mrb[113].mxu1  ;;  %v3011_v24 = vpop.f32.mrb[114].mxu0 }
 0x287   : > { %v3233_v52 = vmax.f32 %v3008_v26, 0.0  ;;  %v3061_v18 = vadd.f32 %v3060_v20, %v6714_v14  ;;  %v3012_v31 = vadd.f32 %v3011_v24, %v6739_v30  ;;  %v3062_v32 = vpop.f32.mrb[114].mxu1  ;;  %v3013_v33 = vpop.f32.mrb[115].mxu0 }
 0x288   : > { %v3235_v34 = vmax.f32 %v3059_v21, 0.0  ;;  %v3234_v35 = vmax.f32 %v3010_v23, 0.0  ;;  %v3063_v36 = vadd.f32 %v3062_v32, %v6739_v30  ;;  %v3014_v37 = vadd.f32 %v3013_v33, %v6739_v30  ;;  %v3064_v38 = vpop.f32.mrb[115].mxu1 }
 0x289   : > { %v3236_v39 = vmax.f32 %v3061_v18, 0.0  ;;  %v3297_v40 = vmax.f32 %v3012_v31, 0.0  ;;  %v3065_v28 = vadd.f32 %v3064_v38, %v6739_v30 }
 0x28a   : > { %v5168_v41 = vpack.c.bf16 %v3234_v35, %v3233_v52  ;;  %v3299_v42 = vmax.f32 %v3063_v36, 0.0  ;;  %v3298_v43 = vmax.f32 %v3014_v37, 0.0 }
 0x28b   : > { %v5169_v44 = vpack.c.bf16 %v3236_v39, %v3235_v34  ;;  %v3300_v45 = vmax.f32 %v3065_v28, 0.0 }
 0x28c   : > { %4037 = vst [vmem:[%s6769_s12 + $0xe0] sm:$0xff] %v5168_v41  ;;  %v5200_v46 = vpack.c.bf16 %v3298_v43, %v3297_v40  ;;  %v3017_v47 = vpop.f32.mrb[116].mxu0 }
 0x28d   : > { %4038 = vst [vmem:[%s6769_s12 + $0xe8] sm:$0xff] %v5169_v44  ;;  %v5201_v48 = vpack.c.bf16 %v3300_v45, %v3299_v42  ;;  %v3018_v49 = vadd.f32 %v3017_v47, %v6762_v57  ;;  %v3068_v50 = vpop.f32.mrb[116].mxu1  ;;  %v3019_v51 = vpop.f32.mrb[117].mxu0 }
 0x28e   : > { %4069 = vst [vmem:[%s6769_s12 + $0x1e0] sm:$0xff] %v5200_v46  ;;  %v3069_v53 = vadd.f32 %v3068_v50, %v6762_v57  ;;  %v3020_v54 = vadd.f32 %v3019_v51, %v6762_v57  ;;  %v3070_v55 = vpop.f32.mrb[117].mxu1  ;;  %v3021_v56 = vpop.f32.mrb[118].mxu0 }
 0x28f   : > { %4070 = vst [vmem:[%s6769_s12 + $0x1e8] sm:$0xff] %v5201_v48  ;;  %v3361_v58 = vmax.f32 %v3018_v49, 0.0  ;;  %v3071_v59 = vadd.f32 %v3070_v55, %v6762_v57  ;;  %v3072_v60 = vpop.f32.mrb[118].mxu1  ;;  %v3022_v61 = vpop.f32.mrb[119].mxu0 }
 0x290   : > { %v3363_v62 = vmax.f32 %v3069_v53, 0.0  ;;  %v3362_v63 = vmax.f32 %v3020_v54, 0.0  ;;  %v3073_v4 = vpop.f32.mrb[119].mxu1 }
 0x291   : > { %v3364_v0 = vmax.f32 %v3071_v59, 0.0 }
 0x292   : > { %v5232_v1 = vpack.c.bf16 %v3362_v63, %v3361_v58 }
 0x293   : > { %v5233_v2 = vpack.c.bf16 %v3364_v0, %v3363_v62 }
 0x294   : > { %4101 = vst [vmem:[%s6769_s12 + $0x2e0] sm:$0x33] %v5232_v1  ;;  %v3109_v3 = vpop.f32.mrb[120].mxu0 }
 0x295   : > { %4102 = vst [vmem:[%s6769_s12 + $0x2e8] sm:$0x33] %v5233_v2  ;;  %v3110_v5 = vadd.f32 %v3109_v3, %v6714_v14  ;;  %v3160_v6 = vpop.f32.mrb[120].mxu1  ;;  %v3111_v7 = vpop.f32.mrb[121].mxu0 }
 0x296   : > { %v3161_v8 = vadd.f32 %v3160_v6, %v6714_v14  ;;  %v3112_v9 = vadd.f32 %v3111_v7, %v6714_v14  ;;  %v3162_v10 = vpop.f32.mrb[121].mxu1  ;;  %v3113_v11 = vpop.f32.mrb[122].mxu0 }
 0x297   : > { %v3237_v12 = vmax.f32 %v3110_v5, 0.0  ;;  %v3163_v13 = vadd.f32 %v3162_v10, %v6714_v14  ;;  %v3114_v15 = vadd.f32 %v3113_v11, %v6739_v30  ;;  %v3164_v16 = vpop.f32.mrb[122].mxu1  ;;  %v3115_v17 = vpop.f32.mrb[123].mxu0 }
 0x298   : > { %v3239_v19 = vmax.f32 %v3161_v8, 0.0  ;;  %v3238_v22 = vmax.f32 %v3112_v9, 0.0  ;;  %v3165_v25 = vadd.f32 %v3164_v16, %v6739_v30  ;;  %v3116_v26 = vadd.f32 %v3115_v17, %v6739_v30  ;;  %v3166_v27 = vpop.f32.mrb[123].mxu1 }
 0x299   : > { %v3240_v29 = vmax.f32 %v3163_v13, 0.0  ;;  %v3301_v21 = vmax.f32 %v3114_v15, 0.0  ;;  %v3167_v23 = vadd.f32 %v3166_v27, %v6739_v30 }
 0x29a   : > { %v5170_v20 = vpack.c.bf16 %v3238_v22, %v3237_v12  ;;  %v3303_v14 = vmax.f32 %v3165_v25, 0.0  ;;  %v3302_v24 = vmax.f32 %v3116_v26, 0.0 }
 0x29b   : > { %v5171_v52 = vpack.c.bf16 %v3240_v29, %v3239_v19  ;;  %v3304_v18 = vmax.f32 %v3167_v23, 0.0 }
 0x29c   : > { %4039 = vst [vmem:[%s6769_s12 + $0xf0] sm:$0xff] %v5170_v20  ;;  %v5202_v31 = vpack.c.bf16 %v3302_v24, %v3301_v21  ;;  %v3119_v32 = vpop.f32.mrb[124].mxu0 }
 0x29d   : > { %4040 = vst [vmem:[%s6769_s12 + $0xf8] sm:$0xff] %v5171_v52  ;;  %v5203_v33 = vpack.c.bf16 %v3304_v18, %v3303_v14  ;;  %v3120_v34 = vadd.f32 %v3119_v32, %v6762_v57  ;;  %v3170_v35 = vpop.f32.mrb[124].mxu1  ;;  %v3121_v36 = vpop.f32.mrb[125].mxu0 }
 0x29e   : > { %4071 = vst [vmem:[%s6769_s12 + $0x1f0] sm:$0xff] %v5202_v31  ;;  %v3171_v37 = vadd.f32 %v3170_v35, %v6762_v57  ;;  %v3122_v30 = vadd.f32 %v3121_v36, %v6762_v57  ;;  %v3172_v38 = vpop.f32.mrb[125].mxu1  ;;  %v3123_v39 = vpop.f32.mrb[126].mxu0 }
 0x29f   : > { %4072 = vst [vmem:[%s6769_s12 + $0x1f8] sm:$0xff] %v5203_v33  ;;  %v3365_v40 = vmax.f32 %v3120_v34, 0.0  ;;  %v3173_v28 = vadd.f32 %v3172_v38, %v6762_v57  ;;  %v3174_v41 = vpop.f32.mrb[126].mxu1  ;;  %v3124_v42 = vpop.f32.mrb[127].mxu0  ;;  %4111 = sbr.rel (!%p5877_p5) target bundleno = 885 (0x375), region = 102 }
 0x2a0   : > { %v3367_v43 = vmax.f32 %v3171_v37, 0.0  ;;  %v3366_v44 = vmax.f32 %v3122_v30, 0.0  ;;  %v3175_v45 = vpop.f32.mrb[127].mxu1 }
 0x2a1   : > { %v3368_v46 = vmax.f32 %v3173_v28, 0.0 }
 0x2a2   : > { %v5234_v47 = vpack.c.bf16 %v3366_v44, %v3365_v40 }
 0x2a3   : > { %v5235_v48 = vpack.c.bf16 %v3368_v46, %v3367_v43 }
 0x2a4   : > { %4103 = vst [vmem:[%s6769_s12 + $0x2f0] sm:$0x33] %v5234_v47 }
 0x2a5   : > { %4104 = vst [vmem:[%s6769_s12 + $0x2f8] sm:$0x33] %v5235_v48 }
 0x2a6   : > { %s7622_s5 = smov (!%p4114_p1, %s4113_s5), 64 }
 0x2a7   : > { %s4116_s14 = smul.u32 192, %s7622_s5  ;;  %s7100_s4 = sshll.u32 %s7622_s5, 2 }
 0x2a9   : > { %p5118_p2 = scmp.eq.s32.totalorder %s4116_s14, 0 }
 0x2aa   : > { %p4124_p3 = scmp.lt.u32.totalorder (!%p5118_p2), %s7100_s4, 8 }
 0x2ab   : > { %4123 = sbr.rel (%p5118_p2) target bundleno = 885 (0x375), region = 106 }
 0x2b2   : > { %4127 = sbr.rel (%p4124_p3) target bundleno = 876 (0x36c), region = 110  ;;  %s7104_s20 = sand.u32 (!%p4124_p3), 7, %s7100_s4  }
 0x2b3   : > { %p4147_p5 = scmp.eq.s32.totalorder (!%p4124_p3), %s7104_s20, 0  ;;  %p5119_p4 = scmp.ne.s32.totalorder (!%p4124_p3), %s7104_s20, 0 }
 0x2b9   : > { %4150 = sbr.rel (%p5119_p4) target bundleno = 783 (0x30f), region = 125  ;;  %s4151_s15 = sshrl.u32 (!%p5119_p4), %s7100_s4, 3 }
 0x2ba   : > { %5532 = sdivrem.u32 (!%p5119_p4), %s4151_s15, 24 }
 0x2c3   : > { %s7111_s21 = spop.drf %5532 }
 0x2c4   : > { %p5120_p6 = scmp.le.s32.totalorder %s7111_s21, 0 }
 0x2c5   : > { %s7596_s10 = smov (!%p5120_p6), %s7098_s28  ;;  %s7597_s6 = smov (!%p5120_p6), %s6769_s12 }
 0x2c6   : > { %4720 = sbr.rel (%p5120_p6) target bundleno = 754 (0x2f2), region = 273  ;;  %s7120_s7 = smov (!%p5120_p6), 0  }
 0x2c7   : > { %s7122_s11 = smov (!%p5120_p6), 0  }
 0x2cd LB: >> { %v4165_v57 = vld [vmem:[%s5762_s6] sm:$0xff]  ;;  %v4167_v49 = vld [vmem:[%s5762_s6 + $0x8] sm:$0xff]  ;;  %v4169_v50 = vld [vmem:[%s5762_s6 + $0x10] sm:$0xff]  ;;  %s4309_s29 = sadd.s32 1, %s5766_s7  ;;  %s4159_s11 = sadd.s32 1, %s5770_s11   ;;  %s5770_s11 = sphi %s7122_s11, %s4159_s11   ;;  %s5766_s7 = sphi %s7120_s7, %s7600_s7   ;;  %s5762_s6 = sphi %s7597_s6, %s7599_s6   ;;  %s5758_s10 = sphi %s7596_s10, %s7598_s10  }
 0x2ce   : >> { %4166 = vst [vmem:[%s5758_s10] sm:$0xff] %v4165_v57  ;;  %4168 = vst [vmem:[%s5758_s10 + $0x8] sm:$0xff] %v4167_v49  ;;  %v4171_v51 = vld [vmem:[%s5762_s6 + $0x18] sm:$0xff]  ;;  %v4173_v53 = vld [vmem:[%s5762_s6 + $0x20] sm:$0xff]  ;;  %p4310_p7 = scmp.ge.s32.totalorder %s4309_s29, %s7111_s21  ;;  %p4158_p8 = scmp.ge.s32.totalorder %s4159_s11, %s7111_s21 }
 0x2cf   : >> { %4170 = vst [vmem:[%s5758_s10 + $0x10] sm:$0xff] %v4169_v50  ;;  %v4175_v54 = vld [vmem:[%s5762_s6 + $0x28] sm:$0xff]  ;;  %4172 = vst [vmem:[%s5758_s10 + $0x18] sm:$0xff] %v4171_v51  ;;  %v4177_v55 = vld [vmem:[%s5762_s6 + $0x30] sm:$0xff] }
 0x2d0   : >> { %4174 = vst [vmem:[%s5758_s10 + $0x20] sm:$0xff] %v4173_v53  ;;  %4176 = vst [vmem:[%s5758_s10 + $0x28] sm:$0xff] %v4175_v54  ;;  %v4179_v56 = vld [vmem:[%s5762_s6 + $0x38] sm:$0xff]  ;;  %v4181_v58 = vld [vmem:[%s5762_s6 + $0x40] sm:$0xff]  ;;  %s7624_s29 = smov (%p4310_p7, %s4309_s29), 0 }
 0x2d1   : >> { %4178 = vst [vmem:[%s5758_s10 + $0x30] sm:$0xff] %v4177_v55  ;;  %4180 = vst [vmem:[%s5758_s10 + $0x38] sm:$0xff] %v4179_v56  ;;  %v4183_v59 = vld [vmem:[%s5762_s6 + $0x48] sm:$0xff]  ;;  %v4185_v60 = vld [vmem:[%s5762_s6 + $0x50] sm:$0xff]  ;;  %s4312_s23 = smul.u32 192, %s7624_s29  ;;  %s7600_s7 = smov %s7624_s29 }
 0x2d2   : >> { %4182 = vst [vmem:[%s5758_s10 + $0x40] sm:$0xff] %v4181_v58  ;;  %v4187_v61 = vld [vmem:[%s5762_s6 + $0x58] sm:$0xff]  ;;  %4184 = vst [vmem:[%s5758_s10 + $0x48] sm:$0xff] %v4183_v59  ;;  %v4189_v62 = vld [vmem:[%s5762_s6 + $0x60] sm:$0xff] }
 0x2d3   : >> { %4186 = vst [vmem:[%s5758_s10 + $0x50] sm:$0xff] %v4185_v60  ;;  %4188 = vst [vmem:[%s5758_s10 + $0x58] sm:$0xff] %v4187_v61  ;;  %v4191_v63 = vld [vmem:[%s5762_s6 + $0x68] sm:$0xff]  ;;  %v4193_v4 = vld [vmem:[%s5762_s6 + $0x70] sm:$0xff]  ;;  %s7184_s24 = scalar_lea.vmem %s6769_s12, %s4312_s23 [#allocation3]   ;;  %s7187_s25 = scalar_lea.vmem %s7098_s28, %s4312_s23  }
 0x2d4   : >> { %4190 = vst [vmem:[%s5758_s10 + $0x60] sm:$0xff] %v4189_v62  ;;  %4192 = vst [vmem:[%s5758_s10 + $0x68] sm:$0xff] %v4191_v63  ;;  %v4195_v0 = vld [vmem:[%s5762_s6 + $0x78] sm:$0xff]  ;;  %v4197_v1 = vld [vmem:[%s5762_s6 + $0x80] sm:$0xff] }
 0x2d5   : >> { %4194 = vst [vmem:[%s5758_s10 + $0x70] sm:$0xff] %v4193_v4  ;;  %v4199_v2 = vld [vmem:[%s5762_s6 + $0x88] sm:$0xff]  ;;  %4196 = vst [vmem:[%s5758_s10 + $0x78] sm:$0xff] %v4195_v0  ;;  %v4201_v3 = vld [vmem:[%s5762_s6 + $0x90] sm:$0xff] }
 0x2d6   : >> { %4198 = vst [vmem:[%s5758_s10 + $0x80] sm:$0xff] %v4197_v1  ;;  %4200 = vst [vmem:[%s5758_s10 + $0x88] sm:$0xff] %v4199_v2  ;;  %v4203_v5 = vld [vmem:[%s5762_s6 + $0x98] sm:$0xff]  ;;  %v4205_v6 = vld [vmem:[%s5762_s6 + $0xa0] sm:$0xff] }
 0x2d7   : >> { %4202 = vst [vmem:[%s5758_s10 + $0x90] sm:$0xff] %v4201_v3  ;;  %4204 = vst [vmem:[%s5758_s10 + $0x98] sm:$0xff] %v4203_v5  ;;  %v4207_v7 = vld [vmem:[%s5762_s6 + $0xa8] sm:$0xff]  ;;  %v4209_v8 = vld [vmem:[%s5762_s6 + $0xb0] sm:$0xff] }
 0x2d8   : >> { %4206 = vst [vmem:[%s5758_s10 + $0xa0] sm:$0xff] %v4205_v6  ;;  %v4211_v9 = vld [vmem:[%s5762_s6 + $0xb8] sm:$0xff]  ;;  %4208 = vst [vmem:[%s5758_s10 + $0xa8] sm:$0xff] %v4207_v7  ;;  %v4213_v10 = vld [vmem:[%s5762_s6 + $0x100] sm:$0xff] }
 0x2d9   : >> { %4210 = vst [vmem:[%s5758_s10 + $0xb0] sm:$0xff] %v4209_v8  ;;  %4212 = vst [vmem:[%s5758_s10 + $0xb8] sm:$0xff] %v4211_v9  ;;  %v4215_v11 = vld [vmem:[%s5762_s6 + $0x108] sm:$0xff]  ;;  %v4217_v12 = vld [vmem:[%s5762_s6 + $0x110] sm:$0xff] }
 0x2da   : >> { %4214 = vst [vmem:[%s5758_s10 + $0x76c] sm:$0xff] %v4213_v10  ;;  %4216 = vst [vmem:[%s5758_s10 + $0x774] sm:$0xff] %v4215_v11  ;;  %v4219_v13 = vld [vmem:[%s5762_s6 + $0x118] sm:$0xff]  ;;  %v4221_v15 = vld [vmem:[%s5762_s6 + $0x120] sm:$0xff] }
 0x2db   : >> { %4218 = vst [vmem:[%s5758_s10 + $0x77c] sm:$0xff] %v4217_v12  ;;  %v4223_v16 = vld [vmem:[%s5762_s6 + $0x128] sm:$0xff]  ;;  %4220 = vst [vmem:[%s5758_s10 + $0x784] sm:$0xff] %v4219_v13  ;;  %v4225_v17 = vld [vmem:[%s5762_s6 + $0x130] sm:$0xff] }
 0x2dc   : >> { %4222 = vst [vmem:[%s5758_s10 + $0x78c] sm:$0xff] %v4221_v15  ;;  %4224 = vst [vmem:[%s5758_s10 + $0x794] sm:$0xff] %v4223_v16  ;;  %v4227_v19 = vld [vmem:[%s5762_s6 + $0x138] sm:$0xff]  ;;  %v4229_v22 = vld [vmem:[%s5762_s6 + $0x140] sm:$0xff] }
 0x2dd   : >> { %4226 = vst [vmem:[%s5758_s10 + $0x79c] sm:$0xff] %v4225_v17  ;;  %4228 = vst [vmem:[%s5758_s10 + $0x7a4] sm:$0xff] %v4227_v19  ;;  %v4231_v25 = vld [vmem:[%s5762_s6 + $0x148] sm:$0xff]  ;;  %v4233_v26 = vld [vmem:[%s5762_s6 + $0x150] sm:$0xff] }
 0x2de   : >> { %4230 = vst [vmem:[%s5758_s10 + $0x7ac] sm:$0xff] %v4229_v22  ;;  %v4235_v27 = vld [vmem:[%s5762_s6 + $0x158] sm:$0xff]  ;;  %4232 = vst [vmem:[%s5758_s10 + $0x7b4] sm:$0xff] %v4231_v25  ;;  %v4237_v29 = vld [vmem:[%s5762_s6 + $0x160] sm:$0xff] }
 0x2df   : >> { %4234 = vst [vmem:[%s5758_s10 + $0x7bc] sm:$0xff] %v4233_v26  ;;  %4236 = vst [vmem:[%s5758_s10 + $0x7c4] sm:$0xff] %v4235_v27  ;;  %v4239_v21 = vld [vmem:[%s5762_s6 + $0x168] sm:$0xff]  ;;  %v4241_v23 = vld [vmem:[%s5762_s6 + $0x170] sm:$0xff] }
 0x2e0   : >> { %4238 = vst [vmem:[%s5758_s10 + $0x7cc] sm:$0xff] %v4237_v29  ;;  %4240 = vst [vmem:[%s5758_s10 + $0x7d4] sm:$0xff] %v4239_v21  ;;  %v4243_v20 = vld [vmem:[%s5762_s6 + $0x178] sm:$0xff]  ;;  %v4245_v14 = vld [vmem:[%s5762_s6 + $0x180] sm:$0xff] }
 0x2e1   : >> { %4242 = vst [vmem:[%s5758_s10 + $0x7dc] sm:$0xff] %v4241_v23  ;;  %v4247_v24 = vld [vmem:[%s5762_s6 + $0x188] sm:$0xff]  ;;  %4244 = vst [vmem:[%s5758_s10 + $0x7e4] sm:$0xff] %v4243_v20  ;;  %v4249_v52 = vld [vmem:[%s5762_s6 + $0x190] sm:$0xff] }
 0x2e2   : >> { %4246 = vst [vmem:[%s5758_s10 + $0x7ec] sm:$0xff] %v4245_v14  ;;  %4248 = vst [vmem:[%s5758_s10 + $0x7f4] sm:$0xff] %v4247_v24  ;;  %v4251_v18 = vld [vmem:[%s5762_s6 + $0x198] sm:$0xff]  ;;  %v4253_v31 = vld [vmem:[%s5762_s6 + $0x1a0] sm:$0xff] }
 0x2e3   : >> { %4250 = vst [vmem:[%s5758_s10 + $0x7fc] sm:$0xff] %v4249_v52  ;;  %4252 = vst [vmem:[%s5758_s10 + $0x804] sm:$0xff] %v4251_v18  ;;  %v4255_v32 = vld [vmem:[%s5762_s6 + $0x1a8] sm:$0xff]  ;;  %v4257_v33 = vld [vmem:[%s5762_s6 + $0x1b0] sm:$0xff] }
 0x2e4   : >> { %4254 = vst [vmem:[%s5758_s10 + $0x80c] sm:$0xff] %v4253_v31  ;;  %v4259_v34 = vld [vmem:[%s5762_s6 + $0x1b8] sm:$0xff]  ;;  %4256 = vst [vmem:[%s5758_s10 + $0x814] sm:$0xff] %v4255_v32  ;;  %v4261_v35 = vld [vmem:[%s5762_s6 + $0x200] sm:$0xff] }
 0x2e5   : >> { %4258 = vst [vmem:[%s5758_s10 + $0x81c] sm:$0xff] %v4257_v33  ;;  %4260 = vst [vmem:[%s5758_s10 + $0x824] sm:$0xff] %v4259_v34  ;;  %v4263_v36 = vld [vmem:[%s5762_s6 + $0x208] sm:$0xff]  ;;  %v4265_v37 = vld [vmem:[%s5762_s6 + $0x210] sm:$0xff] }
 0x2e6   : >> { %4262 = vst [vmem:[%s5758_s10 + $0xed8] sm:$0xff] %v4261_v35  ;;  %4264 = vst [vmem:[%s5758_s10 + $0xee0] sm:$0xff] %v4263_v36  ;;  %v4267_v30 = vld [vmem:[%s5762_s6 + $0x218] sm:$0xff]  ;;  %v4269_v38 = vld [vmem:[%s5762_s6 + $0x220] sm:$0xff] }
 0x2e7   : >> { %4266 = vst [vmem:[%s5758_s10 + $0xee8] sm:$0xff] %v4265_v37  ;;  %v4271_v39 = vld [vmem:[%s5762_s6 + $0x228] sm:$0xff]  ;;  %4268 = vst [vmem:[%s5758_s10 + $0xef0] sm:$0xff] %v4267_v30  ;;  %v4273_v40 = vld [vmem:[%s5762_s6 + $0x230] sm:$0xff] }
 0x2e8   : >> { %4270 = vst [vmem:[%s5758_s10 + $0xef8] sm:$0xff] %v4269_v38  ;;  %4272 = vst [vmem:[%s5758_s10 + $0xf00] sm:$0xff] %v4271_v39  ;;  %v4275_v28 = vld [vmem:[%s5762_s6 + $0x238] sm:$0xff]  ;;  %v4277_v41 = vld [vmem:[%s5762_s6 + $0x240] sm:$0xff] }
 0x2e9   : >> { %4274 = vst [vmem:[%s5758_s10 + $0xf08] sm:$0xff] %v4273_v40  ;;  %4276 = vst [vmem:[%s5758_s10 + $0xf10] sm:$0xff] %v4275_v28  ;;  %v4279_v42 = vld [vmem:[%s5762_s6 + $0x248] sm:$0xff]  ;;  %v4281_v43 = vld [vmem:[%s5762_s6 + $0x250] sm:$0xff] }
 0x2ea   : >> { %4278 = vst [vmem:[%s5758_s10 + $0xf18] sm:$0xff] %v4277_v41  ;;  %v4283_v44 = vld [vmem:[%s5762_s6 + $0x258] sm:$0xff]  ;;  %4280 = vst [vmem:[%s5758_s10 + $0xf20] sm:$0xff] %v4279_v42  ;;  %v4285_v45 = vld [vmem:[%s5762_s6 + $0x260] sm:$0xff] }
 0x2eb   : >> { %4282 = vst [vmem:[%s5758_s10 + $0xf28] sm:$0xff] %v4281_v43  ;;  %4284 = vst [vmem:[%s5758_s10 + $0xf30] sm:$0xff] %v4283_v44  ;;  %v4287_v46 = vld [vmem:[%s5762_s6 + $0x268] sm:$0xff]  ;;  %v4289_v47 = vld [vmem:[%s5762_s6 + $0x270] sm:$0xff]  ;;  %4161 = sbr.rel (!%p4158_p8) target bundleno = 717 (0x2cd), region = 279 }
 0x2ec   : >> { %4286 = vst [vmem:[%s5758_s10 + $0xf38] sm:$0xff] %v4285_v45  ;;  %4288 = vst [vmem:[%s5758_s10 + $0xf40] sm:$0xff] %v4287_v46  ;;  %v4291_v48 = vld [vmem:[%s5762_s6 + $0x278] sm:$0xff]  ;;  %v4293_v57 = vld [vmem:[%s5762_s6 + $0x280] sm:$0xff] }
 0x2ed   : >> { %4290 = vst [vmem:[%s5758_s10 + $0xf48] sm:$0xff] %v4289_v47  ;;  %v4295_v49 = vld [vmem:[%s5762_s6 + $0x288] sm:$0xff]  ;;  %4292 = vst [vmem:[%s5758_s10 + $0xf50] sm:$0xff] %v4291_v48  ;;  %v4297_v50 = vld [vmem:[%s5762_s6 + $0x290] sm:$0xff] }
 0x2ee   : >> { %4294 = vst [vmem:[%s5758_s10 + $0xf58] sm:$0xff] %v4293_v57  ;;  %4296 = vst [vmem:[%s5758_s10 + $0xf60] sm:$0xff] %v4295_v49  ;;  %v4299_v51 = vld [vmem:[%s5762_s6 + $0x298] sm:$0xff]  ;;  %v4301_v53 = vld [vmem:[%s5762_s6 + $0x2a0] sm:$0xff] }
 0x2ef   : >> { %4298 = vst [vmem:[%s5758_s10 + $0xf68] sm:$0xff] %v4297_v50  ;;  %4300 = vst [vmem:[%s5758_s10 + $0xf70] sm:$0xff] %v4299_v51  ;;  %v4303_v54 = vld [vmem:[%s5762_s6 + $0x2a8] sm:$0xff]  ;;  %v4305_v55 = vld [vmem:[%s5762_s6 + $0x2b0] sm:$0xff] }
 0x2f0   : >> { %4302 = vst [vmem:[%s5758_s10 + $0xf78] sm:$0xff] %v4301_v53  ;;  %v4307_v56 = vld [vmem:[%s5762_s6 + $0x2b8] sm:$0xff]  ;;  %4304 = vst [vmem:[%s5758_s10 + $0xf80] sm:$0xff] %v4303_v54  ;;  %s7599_s6 = smov %s7184_s24 }
 0x2f1   : >> { %4306 = vst [vmem:[%s5758_s10 + $0xf88] sm:$0xff] %v4305_v55  ;;  %4308 = vst [vmem:[%s5758_s10 + $0xf90] sm:$0xff] %v4307_v56  ;;  %s7598_s10 = smov %s7187_s25 }
 0x2f2 PF: > { %5534 = sdivrem.u32 %s4151_s15, 24 }
 0x2f3   : > { %s5121_s26 = smul.u32 3072, %s7111_s21 }
 0x2f5   : > { %s4320_s17 = sshra.s32 %s5121_s26, 4 }
 0x2f6   : > { %s7305_s22 = scalar_lea.vmem %s6769_s12, %s4320_s17 [#allocation3]   ;;  %s7308_s27 = scalar_lea.vmem %s7098_s28, %s4320_s17  }
 0x2fb   : > { %s7310_s8 = spop.drf %5534 }
 0x2fc   : > { %p5123_p9 = scmp.le.s32.totalorder %s7310_s8, 0 }
 0x2fd   : > { %s7601_s9 = smov (!%p5123_p9), %s7308_s27  ;;  %s5776_s5 = smov (!%p5123_p9), %s7305_s22  }
 0x2fe   : > { %4734 = sbr.rel (%p5123_p9) target bundleno = 783 (0x30f), region = 284  ;;  %s5780_s30 = smov (!%p5123_p9), 0  }
 0x2ff   : > { %s5784_s18 = smov (!%p5123_p9), 0  }
 0x305 LB: >> { %v4336_v58 = vld [vmem:[%s5778_s5] sm:$0xff]  ;;  %s4342_s14 = sadd.s32 1, %s5782_s30  ;;  %s4330_s18 = sadd.s32 1, %s5786_s18   ;;  %s5786_s18 = sphi %s5784_s18, %s4330_s18   ;;  %s5782_s30 = sphi %s5780_s30, %s5781_s30   ;;  %s5778_s5 = sphi %s5776_s5, %s4347_s5   ;;  %s5774_s9 = sphi %s7601_s9, %s4348_s9  }
 0x306   : >> { %v4338_v59 = vld [vmem:[%s5778_s5 + $0x100] sm:$0xff]  ;;  %4337 = vst [vmem:[%s5774_s9] sm:$0xff] %v4336_v58  ;;  %p4343_p10 = scmp.ge.s32.totalorder %s4342_s14, %s7310_s8  ;;  %p4329_p11 = scmp.ge.s32.totalorder %s4330_s18, %s7310_s8 }
 0x307   : >> { %v4340_v60 = vld [vmem:[%s5778_s5 + $0x200] sm:$0xff]  ;;  %4339 = vst [vmem:[%s5774_s9 + $0x76c] sm:$0xff] %v4338_v59 }
 0x308   : >> { %4341 = vst [vmem:[%s5774_s9 + $0xed8] sm:$0xff] %v4340_v60  ;;  %s7626_s14 = smov (%p4343_p10, %s4342_s14), 0  ;;  %4332 = sbr.rel (!%p4329_p11) target bundleno = 773 (0x305), region = 290 }
 0x309   : >> { %s5124_s15 = sshll.u32 %s7626_s14, 3  ;;  %s5781_s30 = smov %s7626_s14  }
 0x30a   : >> { %s4347_s5 = scalar_lea.vmem %s7305_s22, %s5124_s15 [#allocation3]   ;;  %s4348_s9 = scalar_lea.vmem %s7308_s27, %s5124_s15  }
 0x30f PF: > { %4351 = sbr.rel (%p4147_p5) target bundleno = 876 (0x36c), region = 143  ;;  %s4353_s21 = ssub.s32 (!%p4147_p5), %s7100_s4, %s7104_s20 }
 0x310   : > { %s4357_s10 = sshrl.u32 (!%p4147_p5), %s7100_s4, 3  ;;  %s7330_s6 = scalar_lea.vmem (!%p4147_p5), %s6769_s12, %s4353_s21 [#allocation3] }
 0x311   : > { %s7333_s7 = scalar_lea.vmem (!%p4147_p5), %s7098_s28, %s4353_s21  ;;  %5536 = sdivrem.u32 (!%p4147_p5), %s4357_s10, 24 }
 0x31a   : > { %s7337_s11 = spop.drf %5536 }
 0x31b   : > { %p5126_p12 = scmp.le.s32.totalorder %s7337_s11, 0 }
 0x31c   : > { %s7602_s29 = smov (!%p5126_p12), %s7098_s28  ;;  %s7603_s23 = smov (!%p5126_p12), %s6769_s12 }
 0x31d   : > { %4748 = sbr.rel (%p5126_p12) target bundleno = 841 (0x349), region = 295  ;;  %s7346_s24 = smov (!%p5126_p12), 0  }
 0x31e   : > { %s7348_s25 = smov (!%p5126_p12), 0  }
 0x324 LB: >> { %v4371_v61 = vld [vmem:[%s5794_s23] sm:$0xff]  ;;  %v4373_v62 = vld [vmem:[%s5794_s23 + $0x8] sm:$0xff]  ;;  %v4375_v63 = vld [vmem:[%s5794_s23 + $0x10] sm:$0xff]  ;;  %s4515_s26 = sadd.s32 1, %s5798_s24  ;;  %s4365_s25 = sadd.s32 1, %s5802_s25   ;;  %s5802_s25 = sphi %s7348_s25, %s4365_s25   ;;  %s5798_s24 = sphi %s7346_s24, %s7606_s24   ;;  %s5794_s23 = sphi %s7603_s23, %s7605_s23   ;;  %s5790_s29 = sphi %s7602_s29, %s7604_s29  }
 0x325   : >> { %4372 = vst [vmem:[%s5790_s29] sm:$0xff] %v4371_v61  ;;  %4374 = vst [vmem:[%s5790_s29 + $0x8] sm:$0xff] %v4373_v62  ;;  %v4377_v4 = vld [vmem:[%s5794_s23 + $0x18] sm:$0xff]  ;;  %v4379_v0 = vld [vmem:[%s5794_s23 + $0x20] sm:$0xff]  ;;  %p4516_p13 = scmp.ge.s32.totalorder %s4515_s26, %s7337_s11  ;;  %p4364_p0 = scmp.ge.s32.totalorder %s4365_s25, %s7337_s11 }
 0x326   : >> { %4376 = vst [vmem:[%s5790_s29 + $0x10] sm:$0xff] %v4375_v63  ;;  %v4381_v1 = vld [vmem:[%s5794_s23 + $0x28] sm:$0xff]  ;;  %4378 = vst [vmem:[%s5790_s29 + $0x18] sm:$0xff] %v4377_v4  ;;  %v4383_v2 = vld [vmem:[%s5794_s23 + $0x30] sm:$0xff] }
 0x327   : >> { %4380 = vst [vmem:[%s5790_s29 + $0x20] sm:$0xff] %v4379_v0  ;;  %4382 = vst [vmem:[%s5790_s29 + $0x28] sm:$0xff] %v4381_v1  ;;  %v4385_v3 = vld [vmem:[%s5794_s23 + $0x38] sm:$0xff]  ;;  %v4387_v5 = vld [vmem:[%s5794_s23 + $0x40] sm:$0xff]  ;;  %s7628_s26 = smov (%p4516_p13, %s4515_s26), 0 }
 0x328   : >> { %4384 = vst [vmem:[%s5790_s29 + $0x30] sm:$0xff] %v4383_v2  ;;  %4386 = vst [vmem:[%s5790_s29 + $0x38] sm:$0xff] %v4385_v3  ;;  %v4389_v6 = vld [vmem:[%s5794_s23 + $0x48] sm:$0xff]  ;;  %v4391_v7 = vld [vmem:[%s5794_s23 + $0x50] sm:$0xff]  ;;  %s4518_s17 = smul.u32 192, %s7628_s26  ;;  %s7606_s24 = smov %s7628_s26 }
 0x329   : >> { %4388 = vst [vmem:[%s5790_s29 + $0x40] sm:$0xff] %v4387_v5  ;;  %v4393_v8 = vld [vmem:[%s5794_s23 + $0x58] sm:$0xff]  ;;  %4390 = vst [vmem:[%s5790_s29 + $0x48] sm:$0xff] %v4389_v6  ;;  %v4395_v9 = vld [vmem:[%s5794_s23 + $0x60] sm:$0xff] }
 0x32a   : >> { %4392 = vst [vmem:[%s5790_s29 + $0x50] sm:$0xff] %v4391_v7  ;;  %4394 = vst [vmem:[%s5790_s29 + $0x58] sm:$0xff] %v4393_v8  ;;  %v4397_v10 = vld [vmem:[%s5794_s23 + $0x68] sm:$0xff]  ;;  %v4399_v11 = vld [vmem:[%s5794_s23 + $0x70] sm:$0xff]  ;;  %s7410_s22 = scalar_lea.vmem %s6769_s12, %s4518_s17 [#allocation3]   ;;  %s7413_s27 = scalar_lea.vmem %s7098_s28, %s4518_s17  }
 0x32b   : >> { %4396 = vst [vmem:[%s5790_s29 + $0x60] sm:$0xff] %v4395_v9  ;;  %4398 = vst [vmem:[%s5790_s29 + $0x68] sm:$0xff] %v4397_v10  ;;  %v4401_v12 = vld [vmem:[%s5794_s23 + $0x78] sm:$0xff]  ;;  %v4403_v13 = vld [vmem:[%s5794_s23 + $0x80] sm:$0xff] }
 0x32c   : >> { %4400 = vst [vmem:[%s5790_s29 + $0x70] sm:$0xff] %v4399_v11  ;;  %v4405_v15 = vld [vmem:[%s5794_s23 + $0x88] sm:$0xff]  ;;  %4402 = vst [vmem:[%s5790_s29 + $0x78] sm:$0xff] %v4401_v12  ;;  %v4407_v16 = vld [vmem:[%s5794_s23 + $0x90] sm:$0xff] }
 0x32d   : >> { %4404 = vst [vmem:[%s5790_s29 + $0x80] sm:$0xff] %v4403_v13  ;;  %4406 = vst [vmem:[%s5790_s29 + $0x88] sm:$0xff] %v4405_v15  ;;  %v4409_v17 = vld [vmem:[%s5794_s23 + $0x98] sm:$0xff]  ;;  %v4411_v19 = vld [vmem:[%s5794_s23 + $0xa0] sm:$0xff] }
 0x32e   : >> { %4408 = vst [vmem:[%s5790_s29 + $0x90] sm:$0xff] %v4407_v16  ;;  %4410 = vst [vmem:[%s5790_s29 + $0x98] sm:$0xff] %v4409_v17  ;;  %v4413_v22 = vld [vmem:[%s5794_s23 + $0xa8] sm:$0xff]  ;;  %v4415_v25 = vld [vmem:[%s5794_s23 + $0xb0] sm:$0xff] }
 0x32f   : >> { %4412 = vst [vmem:[%s5790_s29 + $0xa0] sm:$0xff] %v4411_v19  ;;  %v4417_v26 = vld [vmem:[%s5794_s23 + $0xb8] sm:$0xff]  ;;  %4414 = vst [vmem:[%s5790_s29 + $0xa8] sm:$0xff] %v4413_v22  ;;  %v4419_v27 = vld [vmem:[%s5794_s23 + $0x100] sm:$0xff] }
 0x330   : >> { %4416 = vst [vmem:[%s5790_s29 + $0xb0] sm:$0xff] %v4415_v25  ;;  %4418 = vst [vmem:[%s5790_s29 + $0xb8] sm:$0xff] %v4417_v26  ;;  %v4421_v29 = vld [vmem:[%s5794_s23 + $0x108] sm:$0xff]  ;;  %v4423_v21 = vld [vmem:[%s5794_s23 + $0x110] sm:$0xff] }
 0x331   : >> { %4420 = vst [vmem:[%s5790_s29 + $0x76c] sm:$0xff] %v4419_v27  ;;  %4422 = vst [vmem:[%s5790_s29 + $0x774] sm:$0xff] %v4421_v29  ;;  %v4425_v23 = vld [vmem:[%s5794_s23 + $0x118] sm:$0xff]  ;;  %v4427_v20 = vld [vmem:[%s5794_s23 + $0x120] sm:$0xff] }
 0x332   : >> { %4424 = vst [vmem:[%s5790_s29 + $0x77c] sm:$0xff] %v4423_v21  ;;  %v4429_v14 = vld [vmem:[%s5794_s23 + $0x128] sm:$0xff]  ;;  %4426 = vst [vmem:[%s5790_s29 + $0x784] sm:$0xff] %v4425_v23  ;;  %v4431_v24 = vld [vmem:[%s5794_s23 + $0x130] sm:$0xff] }
 0x333   : >> { %4428 = vst [vmem:[%s5790_s29 + $0x78c] sm:$0xff] %v4427_v20  ;;  %4430 = vst [vmem:[%s5790_s29 + $0x794] sm:$0xff] %v4429_v14  ;;  %v4433_v52 = vld [vmem:[%s5794_s23 + $0x138] sm:$0xff]  ;;  %v4435_v18 = vld [vmem:[%s5794_s23 + $0x140] sm:$0xff] }
 0x334   : >> { %4432 = vst [vmem:[%s5790_s29 + $0x79c] sm:$0xff] %v4431_v24  ;;  %4434 = vst [vmem:[%s5790_s29 + $0x7a4] sm:$0xff] %v4433_v52  ;;  %v4437_v31 = vld [vmem:[%s5794_s23 + $0x148] sm:$0xff]  ;;  %v4439_v32 = vld [vmem:[%s5794_s23 + $0x150] sm:$0xff] }
 0x335   : >> { %4436 = vst [vmem:[%s5790_s29 + $0x7ac] sm:$0xff] %v4435_v18  ;;  %v4441_v33 = vld [vmem:[%s5794_s23 + $0x158] sm:$0xff]  ;;  %4438 = vst [vmem:[%s5790_s29 + $0x7b4] sm:$0xff] %v4437_v31  ;;  %v4443_v34 = vld [vmem:[%s5794_s23 + $0x160] sm:$0xff] }
 0x336   : >> { %4440 = vst [vmem:[%s5790_s29 + $0x7bc] sm:$0xff] %v4439_v32  ;;  %4442 = vst [vmem:[%s5790_s29 + $0x7c4] sm:$0xff] %v4441_v33  ;;  %v4445_v35 = vld [vmem:[%s5794_s23 + $0x168] sm:$0xff]  ;;  %v4447_v36 = vld [vmem:[%s5794_s23 + $0x170] sm:$0xff] }
 0x337   : >> { %4444 = vst [vmem:[%s5790_s29 + $0x7cc] sm:$0xff] %v4443_v34  ;;  %4446 = vst [vmem:[%s5790_s29 + $0x7d4] sm:$0xff] %v4445_v35  ;;  %v4449_v37 = vld [vmem:[%s5794_s23 + $0x178] sm:$0xff]  ;;  %v4451_v30 = vld [vmem:[%s5794_s23 + $0x180] sm:$0xff] }
 0x338   : >> { %4448 = vst [vmem:[%s5790_s29 + $0x7dc] sm:$0xff] %v4447_v36  ;;  %v4453_v38 = vld [vmem:[%s5794_s23 + $0x188] sm:$0xff]  ;;  %4450 = vst [vmem:[%s5790_s29 + $0x7e4] sm:$0xff] %v4449_v37  ;;  %v4455_v39 = vld [vmem:[%s5794_s23 + $0x190] sm:$0xff] }
 0x339   : >> { %4452 = vst [vmem:[%s5790_s29 + $0x7ec] sm:$0xff] %v4451_v30  ;;  %4454 = vst [vmem:[%s5790_s29 + $0x7f4] sm:$0xff] %v4453_v38  ;;  %v4457_v40 = vld [vmem:[%s5794_s23 + $0x198] sm:$0xff]  ;;  %v4459_v28 = vld [vmem:[%s5794_s23 + $0x1a0] sm:$0xff] }
 0x33a   : >> { %4456 = vst [vmem:[%s5790_s29 + $0x7fc] sm:$0xff] %v4455_v39  ;;  %4458 = vst [vmem:[%s5790_s29 + $0x804] sm:$0xff] %v4457_v40  ;;  %v4461_v41 = vld [vmem:[%s5794_s23 + $0x1a8] sm:$0xff]  ;;  %v4463_v42 = vld [vmem:[%s5794_s23 + $0x1b0] sm:$0xff] }
 0x33b   : >> { %4460 = vst [vmem:[%s5790_s29 + $0x80c] sm:$0xff] %v4459_v28  ;;  %v4465_v43 = vld [vmem:[%s5794_s23 + $0x1b8] sm:$0xff]  ;;  %4462 = vst [vmem:[%s5790_s29 + $0x814] sm:$0xff] %v4461_v41  ;;  %v4467_v44 = vld [vmem:[%s5794_s23 + $0x200] sm:$0xff] }
 0x33c   : >> { %4464 = vst [vmem:[%s5790_s29 + $0x81c] sm:$0xff] %v4463_v42  ;;  %4466 = vst [vmem:[%s5790_s29 + $0x824] sm:$0xff] %v4465_v43  ;;  %v4469_v45 = vld [vmem:[%s5794_s23 + $0x208] sm:$0xff]  ;;  %v4471_v46 = vld [vmem:[%s5794_s23 + $0x210] sm:$0xff] }
 0x33d   : >> { %4468 = vst [vmem:[%s5790_s29 + $0xed8] sm:$0xff] %v4467_v44  ;;  %4470 = vst [vmem:[%s5790_s29 + $0xee0] sm:$0xff] %v4469_v45  ;;  %v4473_v47 = vld [vmem:[%s5794_s23 + $0x218] sm:$0xff]  ;;  %v4475_v48 = vld [vmem:[%s5794_s23 + $0x220] sm:$0xff] }
 0x33e   : >> { %4472 = vst [vmem:[%s5790_s29 + $0xee8] sm:$0xff] %v4471_v46  ;;  %v4477_v57 = vld [vmem:[%s5794_s23 + $0x228] sm:$0xff]  ;;  %4474 = vst [vmem:[%s5790_s29 + $0xef0] sm:$0xff] %v4473_v47  ;;  %v4479_v49 = vld [vmem:[%s5794_s23 + $0x230] sm:$0xff] }
 0x33f   : >> { %4476 = vst [vmem:[%s5790_s29 + $0xef8] sm:$0xff] %v4475_v48  ;;  %4478 = vst [vmem:[%s5790_s29 + $0xf00] sm:$0xff] %v4477_v57  ;;  %v4481_v50 = vld [vmem:[%s5794_s23 + $0x238] sm:$0xff]  ;;  %v4483_v51 = vld [vmem:[%s5794_s23 + $0x240] sm:$0xff] }
 0x340   : >> { %4480 = vst [vmem:[%s5790_s29 + $0xf08] sm:$0xff] %v4479_v49  ;;  %4482 = vst [vmem:[%s5790_s29 + $0xf10] sm:$0xff] %v4481_v50  ;;  %v4485_v53 = vld [vmem:[%s5794_s23 + $0x248] sm:$0xff]  ;;  %v4487_v54 = vld [vmem:[%s5794_s23 + $0x250] sm:$0xff] }
 0x341   : >> { %4484 = vst [vmem:[%s5790_s29 + $0xf18] sm:$0xff] %v4483_v51  ;;  %v4489_v55 = vld [vmem:[%s5794_s23 + $0x258] sm:$0xff]  ;;  %4486 = vst [vmem:[%s5790_s29 + $0xf20] sm:$0xff] %v4485_v53  ;;  %v4491_v56 = vld [vmem:[%s5794_s23 + $0x260] sm:$0xff] }
 0x342   : >> { %4488 = vst [vmem:[%s5790_s29 + $0xf28] sm:$0xff] %v4487_v54  ;;  %4490 = vst [vmem:[%s5790_s29 + $0xf30] sm:$0xff] %v4489_v55  ;;  %v4493_v58 = vld [vmem:[%s5794_s23 + $0x268] sm:$0xff]  ;;  %v4495_v59 = vld [vmem:[%s5794_s23 + $0x270] sm:$0xff]  ;;  %4367 = sbr.rel (!%p4364_p0) target bundleno = 804 (0x324), region = 301 }
 0x343   : >> { %4492 = vst [vmem:[%s5790_s29 + $0xf38] sm:$0xff] %v4491_v56  ;;  %4494 = vst [vmem:[%s5790_s29 + $0xf40] sm:$0xff] %v4493_v58  ;;  %v4497_v60 = vld [vmem:[%s5794_s23 + $0x278] sm:$0xff]  ;;  %v4499_v61 = vld [vmem:[%s5794_s23 + $0x280] sm:$0xff] }
 0x344   : >> { %4496 = vst [vmem:[%s5790_s29 + $0xf48] sm:$0xff] %v4495_v59  ;;  %v4501_v62 = vld [vmem:[%s5794_s23 + $0x288] sm:$0xff]  ;;  %4498 = vst [vmem:[%s5790_s29 + $0xf50] sm:$0xff] %v4497_v60  ;;  %v4503_v63 = vld [vmem:[%s5794_s23 + $0x290] sm:$0xff] }
 0x345   : >> { %4500 = vst [vmem:[%s5790_s29 + $0xf58] sm:$0xff] %v4499_v61  ;;  %4502 = vst [vmem:[%s5790_s29 + $0xf60] sm:$0xff] %v4501_v62  ;;  %v4505_v4 = vld [vmem:[%s5794_s23 + $0x298] sm:$0xff]  ;;  %v4507_v0 = vld [vmem:[%s5794_s23 + $0x2a0] sm:$0xff] }
 0x346   : >> { %4504 = vst [vmem:[%s5790_s29 + $0xf68] sm:$0xff] %v4503_v63  ;;  %4506 = vst [vmem:[%s5790_s29 + $0xf70] sm:$0xff] %v4505_v4  ;;  %v4509_v1 = vld [vmem:[%s5794_s23 + $0x2a8] sm:$0xff]  ;;  %v4511_v2 = vld [vmem:[%s5794_s23 + $0x2b0] sm:$0xff] }
 0x347   : >> { %4508 = vst [vmem:[%s5790_s29 + $0xf78] sm:$0xff] %v4507_v0  ;;  %v4513_v3 = vld [vmem:[%s5794_s23 + $0x2b8] sm:$0xff]  ;;  %4510 = vst [vmem:[%s5790_s29 + $0xf80] sm:$0xff] %v4509_v1  ;;  %s7605_s23 = smov %s7410_s22 }
 0x348   : >> { %4512 = vst [vmem:[%s5790_s29 + $0xf88] sm:$0xff] %v4511_v2  ;;  %4514 = vst [vmem:[%s5790_s29 + $0xf90] sm:$0xff] %v4513_v3  ;;  %s7604_s29 = smov %s7413_s27 }
 0x349 PF: > { %5538 = sdivrem.u32 %s4357_s10, 24 }
 0x34a   : > { %s5127_s8 = smul.u32 3072, %s7337_s11 }
 0x34c   : > { %s4526_s9 = sshra.s32 %s5127_s8, 4 }
 0x34d   : > { %s7531_s5 = scalar_lea.vmem %s6769_s12, %s4526_s9 [#allocation3]   ;;  %s7534_s30 = scalar_lea.vmem %s7098_s28, %s4526_s9  }
 0x352   : > { %s7536_s18 = spop.drf %5538 }
 0x353   : > { %p5129_p1 = scmp.le.s32.totalorder %s7536_s18, 0 }
 0x354   : > { %s7607_s14 = smov (!%p5129_p1), %s7534_s30  ;;  %s5808_s15 = smov (!%p5129_p1), %s7531_s5  }
 0x355   : > { %4762 = sbr.rel (%p5129_p1) target bundleno = 870 (0x366), region = 306  ;;  %s5812_s21 = smov (!%p5129_p1), 0  }
 0x356   : > { %s5816_s29 = smov (!%p5129_p1), 0  }
 0x35c LB: >> { %v4542_v5 = vld [vmem:[%s5810_s15] sm:$0xff]  ;;  %s4548_s10 = sadd.s32 1, %s5814_s21  ;;  %s4536_s29 = sadd.s32 1, %s5818_s29   ;;  %s5818_s29 = sphi %s5816_s29, %s4536_s29   ;;  %s5814_s21 = sphi %s5812_s21, %s5813_s21   ;;  %s5810_s15 = sphi %s5808_s15, %s4553_s15   ;;  %s5806_s14 = sphi %s7607_s14, %s4554_s14  }
 0x35d   : >> { %v4544_v6 = vld [vmem:[%s5810_s15 + $0x100] sm:$0xff]  ;;  %4543 = vst [vmem:[%s5806_s14] sm:$0xff] %v4542_v5  ;;  %p4549_p2 = scmp.ge.s32.totalorder %s4548_s10, %s7536_s18  ;;  %p4535_p3 = scmp.ge.s32.totalorder %s4536_s29, %s7536_s18 }
 0x35e   : >> { %v4546_v7 = vld [vmem:[%s5810_s15 + $0x200] sm:$0xff]  ;;  %4545 = vst [vmem:[%s5806_s14 + $0x76c] sm:$0xff] %v4544_v6 }
 0x35f   : >> { %4547 = vst [vmem:[%s5806_s14 + $0xed8] sm:$0xff] %v4546_v7  ;;  %s7630_s10 = smov (%p4549_p2, %s4548_s10), 0  ;;  %4538 = sbr.rel (!%p4535_p3) target bundleno = 860 (0x35c), region = 312 }
 0x360   : >> { %s5130_s11 = sshll.u32 %s7630_s10, 3  ;;  %s5813_s21 = smov %s7630_s10  }
 0x361   : >> { %s4553_s15 = scalar_lea.vmem %s7531_s5, %s5130_s11 [#allocation3]   ;;  %s4554_s14 = scalar_lea.vmem %s7534_s30, %s5130_s11  }
 0x366 PF: > { %s5824_s23 = smov 0  }
 0x367   : > { %s4555_s24 = sshllo.u32 %s5824_s23, %s7104_s20 }
 0x368   : > { %v4564_v8 = vld [vmem:[%s7330_s6] sm:%s4555_s24] }
 0x369   : > { %v4566_v9 = vld [vmem:[%s7330_s6 + $0x100] sm:%s4555_s24]  ;;  %4565 = vst [vmem:[%s7333_s7] sm:%s4555_s24] %v4564_v8 }
 0x36a   : > { %4567 = vst [vmem:[%s7333_s7 + $0x76c] sm:%s4555_s24] %v4566_v9  ;;  %v4568_v10 = vld [vmem:[%s7330_s6 + $0x200] sm:%s4555_s24] }
 0x36b   : > { %4569 = vst [vmem:[%s7333_s7 + $0xed8] sm:%s4555_s24] %v4568_v10 }
 0x36c PF: > { %p5132_p5 = scmp.ge.u32.totalorder %s7100_s4, 8 }
 0x36d   : > { %s5825_s25 = smov (!%p5132_p5), 0  }
 0x36e   : > { %4130 = sbr.rel (%p5132_p5) target bundleno = 885 (0x375), region = 114  ;;  %s4131_s20 = sshllo.u32 (!%p5132_p5), %s5825_s25, %s7100_s4 }
 0x36f   : > { %v4140_v11 = vld [vmem:[%s6769_s12] sm:%s4131_s20] (!%p5132_p5) }
 0x370   : > { %v4142_v12 = vld [vmem:[%s6769_s12 + $0x100] sm:%s4131_s20] (!%p5132_p5)  ;;  %4141 = vst [vmem:[%s7098_s28] sm:%s4131_s20] (!%p5132_p5), %v4140_v11 }
 0x371   : > { %4143 = vst [vmem:[%s7098_s28 + $0x76c] sm:%s4131_s20] (!%p5132_p5), %v4142_v12  ;;  %v4144_v13 = vld [vmem:[%s6769_s12 + $0x200] sm:%s4131_s20] (!%p5132_p5) }
 0x372   : > { %4145 = vst [vmem:[%s7098_s28 + $0xed8] sm:%s4131_s20] (!%p5132_p5), %v4144_v13 }
 0x375 PF: > { %p10_p4 = scmp.ge.s32.totalorder %s5865_s16, 10   ;;  %s7608_s12 = smov %s5686_s13 }
 0x376   : > { %s7609_s13 = smov %s5875_s19  ;;  %s7610_s14 = smov %s5865_s16 }
 0x377   :  { %12 = sbr.rel (!%p10_p4) target bundleno = 2 (0x2), region = 323 }

// kernel: lenet_forward.6
= control target key start
LH: loop header
LB: loop body
LE: loop exit
PB: predicated region body
PF: predicated region fallthrough
CT: control target
= control target key end

     0   :  { %s2200_s6 = smov 0   ;;  %s2202_s7 = smov 0   ;;  %s3367_s0 = inlined_call_operand.vmem [shape: bf16[9,8,17120], index: 0, kind: input, shape index: {}]   ;;  %s3368_s1 = inlined_call_operand.vmem [shape: bf16[8,17120], index: 1, kind: output, shape index: {}]  }
   0x1   :  { %s2204_s8 = smov 0  }
   0x2 LB: > { %s2216_s9 = sadd.s32 4294967295, %s2056_s8   ;;  %s2219_s10 = sadd.s32 1, %s2056_s8   ;;  %s2056_s8 = sphi %s2204_s8, %s3398_s8   ;;  %s2052_s7 = sphi %s2202_s7, %s3397_s7   ;;  %s2048_s6 = sphi %s2200_s6, %s3396_s6  }
   0x3   : > { %s15_s11 = ssub.s32 %s2056_s8, %s2219_s10  ;;  %s18_s12 = sadd.s32 1, %s2052_s7 }
   0x4   : > { %p16_p0 = scmp.eq.s32.totalorder %s15_s11, 0  ;;  %p25_p1 = scmp.ne.s32.totalorder %s2052_s7, %s2048_s6 }
   0x5   : > { %p26_p2 = scmp.eq.s32.totalorder %s2056_s8, 0  ;;  %p55_p3 = scmp.eq.s32.totalorder %s2216_s9, 4 }
   0x6   : > { %s2229_s13 = scalar_select %p16_p0, %s2052_s7, %s18_s12  }
   0x7   : > { %p27_p4 = por %p26_p2, %p25_p1  ;;  %p2231_p5 = por %p55_p3, %p25_p1 }
   0x8   : > { %p1553_p6 = scmp.ge.s32.totalorder %s2056_s8, 5 }
   0xa   : > { %77 = sbr.rel (%p1553_p6) target bundleno = 210 (0xd2), region = 16 }
  0x11   : > { %80 = sbr.rel (!%p27_p4) target bundleno = 210 (0xd2), region = 20  ;;  %s82_s15 = sand.u32 (%p27_p4), 1, %s2052_s7  }
  0x12   : > { %s1554_s16 = sshll.u32 (%p27_p4), %s2056_s8, 5  ;;  %s1620_s17 = smul.u32 (%p27_p4), 1152, %s82_s15 }
  0x13   : > { %s86_s18 = ssub.s32 (%p27_p4), 134, %s1554_s16  ;;  %s1610_s19 = sshll.u32 (%p27_p4), %s2056_s8, 7 }
  0x14   : > { %p87_p7 = scmp.lt.s32.totalorder (%p27_p4), %s86_s18, 32  ;;  %s2242_s22 = scalar_lea.vmem (%p27_p4), %s3367_s0, %s1610_s19  }
  0x15   : > { %s2246_s25 = scalar_lea.vmem (%p27_p4), [#allocation2], %s1620_s17  }
  0x18   : > { %s3400_s18 = smov (!%p87_p7, %s86_s18), 32 }
  0x19   : > { %s89_s23 = smul.u32 576, %s3400_s18  ;;  %s2244_s24 = sshll.u32 %s3400_s18, 2 }
  0x1b   : > { %p1558_p8 = scmp.eq.s32.totalorder %s89_s23, 0 }
  0x1c   : > { %p97_p9 = scmp.lt.u32.totalorder (!%p1558_p8), %s2244_s24, 8 }
  0x1d   : > { %96 = sbr.rel (%p1558_p8) target bundleno = 210 (0xd2), region = 24 }
  0x24   : > { %100 = sbr.rel (%p97_p9) target bundleno = 197 (0xc5), region = 28  ;;  %s2250_s26 = sand.u32 (!%p97_p9), 7, %s2244_s24  }
  0x25   : > { %p132_p10 = scmp.eq.s32.totalorder (!%p97_p9), %s2250_s26, 0  ;;  %p1559_p11 = scmp.ne.s32.totalorder (!%p97_p9), %s2250_s26, 0 }
  0x2b   : > { %135 = sbr.rel (%p1559_p11) target bundleno = 114 (0x72), region = 43  ;;  %s136_s27 = sshrl.u32 (!%p1559_p11), %s2244_s24, 3 }
  0x2c   : > { %s2257_s28 = sshrl.u32 (!%p1559_p11), %s136_s27, 3 }
  0x2d   : > { %p1560_p12 = scmp.le.s32.totalorder (!%p1559_p11), %s2257_s28, 0 }
  0x32   : > { %1423 = sbr.rel (%p1560_p12) target bundleno = 94 (0x5e), region = 221  ;;  %s3370_s29 = smov (!%p1560_p12), %s2246_s25 }
  0x33   : > { %s3371_s30 = smov (!%p1560_p12), %s2242_s22  ;;  %s2266_s2 = smov (!%p1560_p12), 0  }
  0x34   : > { %s2268_s3 = smov (!%p1560_p12), 0  }
  0x39 LB: >> { %v149_v0 = vld [vmem:[%s2064_s30] sm:$0xff]  ;;  %v151_v1 = vld [vmem:[%s2064_s30 + $0x8] sm:$0xff]  ;;  %v153_v2 = vld [vmem:[%s2064_s30 + $0x10] sm:$0xff]  ;;  %s293_s4 = sadd.s32 1, %s2068_s2  ;;  %s143_s3 = sadd.s32 1, %s2072_s3   ;;  %s2072_s3 = sphi %s2268_s3, %s143_s3   ;;  %s2068_s2 = sphi %s2266_s2, %s3374_s2   ;;  %s2064_s30 = sphi %s3371_s30, %s3373_s30   ;;  %s2060_s29 = sphi %s3370_s29, %s3372_s29  }
  0x3a   : >> { %150 = vst [vmem:[%s2060_s29] sm:$0xff] %v149_v0  ;;  %152 = vst [vmem:[%s2060_s29 + $0x8] sm:$0xff] %v151_v1  ;;  %v155_v3 = vld [vmem:[%s2064_s30 + $0x18] sm:$0xff]  ;;  %v157_v4 = vld [vmem:[%s2064_s30 + $0x20] sm:$0xff]  ;;  %p294_p13 = scmp.ge.s32.totalorder %s293_s4, %s2257_s28  ;;  %p142_p0 = scmp.ge.s32.totalorder %s143_s3, %s2257_s28 }
  0x3b   : >> { %154 = vst [vmem:[%s2060_s29 + $0x10] sm:$0xff] %v153_v2  ;;  %v159_v5 = vld [vmem:[%s2064_s30 + $0x28] sm:$0xff]  ;;  %156 = vst [vmem:[%s2060_s29 + $0x18] sm:$0xff] %v155_v3  ;;  %v161_v6 = vld [vmem:[%s2064_s30 + $0x30] sm:$0xff] }
  0x3c   : >> { %158 = vst [vmem:[%s2060_s29 + $0x20] sm:$0xff] %v157_v4  ;;  %160 = vst [vmem:[%s2060_s29 + $0x28] sm:$0xff] %v159_v5  ;;  %v163_v7 = vld [vmem:[%s2064_s30 + $0x38] sm:$0xff]  ;;  %v167_v9 = vld [vmem:[%s2064_s30 + $0x220] sm:$0xff]  ;;  %s3402_s4 = smov (%p294_p13, %s293_s4), 0 }
  0x3d   : >> { %v165_v8 = vld [vmem:[%s2064_s30 + $0x218] sm:$0xff]  ;;  %162 = vst [vmem:[%s2060_s29 + $0x30] sm:$0xff] %v161_v6  ;;  %164 = vst [vmem:[%s2060_s29 + $0x38] sm:$0xff] %v163_v7  ;;  %v169_v10 = vld [vmem:[%s2064_s30 + $0x228] sm:$0xff]  ;;  %s1561_s5 = sshll.u32 %s3402_s4, 6  ;;  %s3374_s2 = smov %s3402_s4 }
  0x3e   : >> { %166 = vst [vmem:[%s2060_s29 + $0x80] sm:$0xff] %v165_v8  ;;  %v171_v11 = vld [vmem:[%s2064_s30 + $0x230] sm:$0xff]  ;;  %168 = vst [vmem:[%s2060_s29 + $0x88] sm:$0xff] %v167_v9  ;;  %v173_v12 = vld [vmem:[%s2064_s30 + $0x238] sm:$0xff]  ;;  %s2324_s11 = scalar_lea.vmem %s2242_s22, %s1561_s5   ;;  %s2327_s12 = scalar_lea.vmem %s2246_s25, %s1561_s5 [#allocation2]  }
  0x3f   : >> { %170 = vst [vmem:[%s2060_s29 + $0x90] sm:$0xff] %v169_v10  ;;  %172 = vst [vmem:[%s2060_s29 + $0x98] sm:$0xff] %v171_v11  ;;  %v175_v13 = vld [vmem:[%s2064_s30 + $0x240] sm:$0xff]  ;;  %v177_v14 = vld [vmem:[%s2064_s30 + $0x248] sm:$0xff] }
  0x40   : >> { %174 = vst [vmem:[%s2060_s29 + $0xa0] sm:$0xff] %v173_v12  ;;  %176 = vst [vmem:[%s2060_s29 + $0xa8] sm:$0xff] %v175_v13  ;;  %v179_v15 = vld [vmem:[%s2064_s30 + $0x250] sm:$0xff]  ;;  %v183_v17 = vld [vmem:[%s2064_s30 + $0x438] sm:$0xff] }
  0x41   : >> { %178 = vst [vmem:[%s2060_s29 + $0xb0] sm:$0xff] %v177_v14  ;;  %v181_v16 = vld [vmem:[%s2064_s30 + $0x430] sm:$0xff]  ;;  %180 = vst [vmem:[%s2060_s29 + $0xb8] sm:$0xff] %v179_v15  ;;  %v185_v18 = vld [vmem:[%s2064_s30 + $0x440] sm:$0xff] }
  0x42   : >> { %182 = vst [vmem:[%s2060_s29 + $0x100] sm:$0xff] %v181_v16  ;;  %184 = vst [vmem:[%s2060_s29 + $0x108] sm:$0xff] %v183_v17  ;;  %v187_v19 = vld [vmem:[%s2064_s30 + $0x448] sm:$0xff]  ;;  %v189_v20 = vld [vmem:[%s2064_s30 + $0x450] sm:$0xff] }
  0x43   : >> { %186 = vst [vmem:[%s2060_s29 + $0x110] sm:$0xff] %v185_v18  ;;  %188 = vst [vmem:[%s2060_s29 + $0x118] sm:$0xff] %v187_v19  ;;  %v191_v21 = vld [vmem:[%s2064_s30 + $0x458] sm:$0xff]  ;;  %v193_v22 = vld [vmem:[%s2064_s30 + $0x460] sm:$0xff] }
  0x44   : >> { %190 = vst [vmem:[%s2060_s29 + $0x120] sm:$0xff] %v189_v20  ;;  %v195_v23 = vld [vmem:[%s2064_s30 + $0x468] sm:$0xff]  ;;  %192 = vst [vmem:[%s2060_s29 + $0x128] sm:$0xff] %v191_v21  ;;  %v199_v25 = vld [vmem:[%s2064_s30 + $0x650] sm:$0xff] }
  0x45   : >> { %194 = vst [vmem:[%s2060_s29 + $0x130] sm:$0xff] %v193_v22  ;;  %196 = vst [vmem:[%s2060_s29 + $0x138] sm:$0xff] %v195_v23  ;;  %v197_v24 = vld [vmem:[%s2064_s30 + $0x648] sm:$0xff]  ;;  %v201_v26 = vld [vmem:[%s2064_s30 + $0x658] sm:$0xff] }
  0x46   : >> { %198 = vst [vmem:[%s2060_s29 + $0x180] sm:$0xff] %v197_v24  ;;  %200 = vst [vmem:[%s2060_s29 + $0x188] sm:$0xff] %v199_v25  ;;  %v203_v27 = vld [vmem:[%s2064_s30 + $0x660] sm:$0xff]  ;;  %v205_v28 = vld [vmem:[%s2064_s30 + $0x668] sm:$0xff] }
  0x47   : >> { %202 = vst [vmem:[%s2060_s29 + $0x190] sm:$0xff] %v201_v26  ;;  %v207_v29 = vld [vmem:[%s2064_s30 + $0x670] sm:$0xff]  ;;  %204 = vst [vmem:[%s2060_s29 + $0x198] sm:$0xff] %v203_v27  ;;  %v209_v30 = vld [vmem:[%s2064_s30 + $0x678] sm:$0xff] }
  0x48   : >> { %206 = vst [vmem:[%s2060_s29 + $0x1a0] sm:$0xff] %v205_v28  ;;  %208 = vst [vmem:[%s2060_s29 + $0x1a8] sm:$0xff] %v207_v29  ;;  %v211_v31 = vld [vmem:[%s2064_s30 + $0x680] sm:$0xff]  ;;  %v215_v33 = vld [vmem:[%s2064_s30 + $0x868] sm:$0xff] }
  0x49   : >> { %v213_v32 = vld [vmem:[%s2064_s30 + $0x860] sm:$0xff]  ;;  %210 = vst [vmem:[%s2060_s29 + $0x1b0] sm:$0xff] %v209_v30  ;;  %212 = vst [vmem:[%s2060_s29 + $0x1b8] sm:$0xff] %v211_v31  ;;  %v217_v34 = vld [vmem:[%s2064_s30 + $0x870] sm:$0xff] }
  0x4a   : >> { %214 = vst [vmem:[%s2060_s29 + $0x200] sm:$0xff] %v213_v32  ;;  %v219_v35 = vld [vmem:[%s2064_s30 + $0x878] sm:$0xff]  ;;  %216 = vst [vmem:[%s2060_s29 + $0x208] sm:$0xff] %v215_v33  ;;  %v221_v36 = vld [vmem:[%s2064_s30 + $0x880] sm:$0xff] }
  0x4b   : >> { %218 = vst [vmem:[%s2060_s29 + $0x210] sm:$0xff] %v217_v34  ;;  %220 = vst [vmem:[%s2060_s29 + $0x218] sm:$0xff] %v219_v35  ;;  %v223_v37 = vld [vmem:[%s2064_s30 + $0x888] sm:$0xff]  ;;  %v225_v38 = vld [vmem:[%s2064_s30 + $0x890] sm:$0xff] }
  0x4c   : >> { %222 = vst [vmem:[%s2060_s29 + $0x220] sm:$0xff] %v221_v36  ;;  %224 = vst [vmem:[%s2060_s29 + $0x228] sm:$0xff] %v223_v37  ;;  %v227_v39 = vld [vmem:[%s2064_s30 + $0x898] sm:$0xff]  ;;  %v231_v41 = vld [vmem:[%s2064_s30 + $0xa80] sm:$0xff] }
  0x4d   : >> { %226 = vst [vmem:[%s2060_s29 + $0x230] sm:$0xff] %v225_v38  ;;  %v229_v40 = vld [vmem:[%s2064_s30 + $0xa78] sm:$0xff]  ;;  %228 = vst [vmem:[%s2060_s29 + $0x238] sm:$0xff] %v227_v39  ;;  %v233_v42 = vld [vmem:[%s2064_s30 + $0xa88] sm:$0xff] }
  0x4e   : >> { %230 = vst [vmem:[%s2060_s29 + $0x280] sm:$0xff] %v229_v40  ;;  %232 = vst [vmem:[%s2060_s29 + $0x288] sm:$0xff] %v231_v41  ;;  %v235_v43 = vld [vmem:[%s2064_s30 + $0xa90] sm:$0xff]  ;;  %v237_v44 = vld [vmem:[%s2064_s30 + $0xa98] sm:$0xff] }
  0x4f   : >> { %234 = vst [vmem:[%s2060_s29 + $0x290] sm:$0xff] %v233_v42  ;;  %236 = vst [vmem:[%s2060_s29 + $0x298] sm:$0xff] %v235_v43  ;;  %v239_v45 = vld [vmem:[%s2064_s30 + $0xaa0] sm:$0xff]  ;;  %v241_v46 = vld [vmem:[%s2064_s30 + $0xaa8] sm:$0xff] }
  0x50   : >> { %238 = vst [vmem:[%s2060_s29 + $0x2a0] sm:$0xff] %v237_v44  ;;  %v243_v47 = vld [vmem:[%s2064_s30 + $0xab0] sm:$0xff]  ;;  %240 = vst [vmem:[%s2060_s29 + $0x2a8] sm:$0xff] %v239_v45  ;;  %v247_v49 = vld [vmem:[%s2064_s30 + $0xc98] sm:$0xff] }
  0x51   : >> { %242 = vst [vmem:[%s2060_s29 + $0x2b0] sm:$0xff] %v241_v46  ;;  %244 = vst [vmem:[%s2060_s29 + $0x2b8] sm:$0xff] %v243_v47  ;;  %v245_v48 = vld [vmem:[%s2064_s30 + $0xc90] sm:$0xff]  ;;  %v249_v50 = vld [vmem:[%s2064_s30 + $0xca0] sm:$0xff] }
  0x52   : >> { %246 = vst [vmem:[%s2060_s29 + $0x300] sm:$0xff] %v245_v48  ;;  %248 = vst [vmem:[%s2060_s29 + $0x308] sm:$0xff] %v247_v49  ;;  %v251_v51 = vld [vmem:[%s2064_s30 + $0xca8] sm:$0xff]  ;;  %v253_v52 = vld [vmem:[%s2064_s30 + $0xcb0] sm:$0xff] }
  0x53   : >> { %250 = vst [vmem:[%s2060_s29 + $0x310] sm:$0xff] %v249_v50  ;;  %v255_v53 = vld [vmem:[%s2064_s30 + $0xcb8] sm:$0xff]  ;;  %252 = vst [vmem:[%s2060_s29 + $0x318] sm:$0xff] %v251_v51  ;;  %v257_v54 = vld [vmem:[%s2064_s30 + $0xcc0] sm:$0xff] }
  0x54   : >> { %254 = vst [vmem:[%s2060_s29 + $0x320] sm:$0xff] %v253_v52  ;;  %256 = vst [vmem:[%s2060_s29 + $0x328] sm:$0xff] %v255_v53  ;;  %v259_v55 = vld [vmem:[%s2064_s30 + $0xcc8] sm:$0xff]  ;;  %v263_v57 = vld [vmem:[%s2064_s30 + $0xeb0] sm:$0xff] }
  0x55   : >> { %v261_v56 = vld [vmem:[%s2064_s30 + $0xea8] sm:$0xff]  ;;  %258 = vst [vmem:[%s2060_s29 + $0x330] sm:$0xff] %v257_v54  ;;  %260 = vst [vmem:[%s2060_s29 + $0x338] sm:$0xff] %v259_v55  ;;  %v265_v58 = vld [vmem:[%s2064_s30 + $0xeb8] sm:$0xff] }
  0x56   : >> { %262 = vst [vmem:[%s2060_s29 + $0x380] sm:$0xff] %v261_v56  ;;  %v267_v59 = vld [vmem:[%s2064_s30 + $0xec0] sm:$0xff]  ;;  %264 = vst [vmem:[%s2060_s29 + $0x388] sm:$0xff] %v263_v57  ;;  %v269_v60 = vld [vmem:[%s2064_s30 + $0xec8] sm:$0xff] }
  0x57   : >> { %266 = vst [vmem:[%s2060_s29 + $0x390] sm:$0xff] %v265_v58  ;;  %268 = vst [vmem:[%s2060_s29 + $0x398] sm:$0xff] %v267_v59  ;;  %v271_v61 = vld [vmem:[%s2064_s30 + $0xed0] sm:$0xff]  ;;  %v273_v62 = vld [vmem:[%s2064_s30 + $0xed8] sm:$0xff]  ;;  %145 = sbr.rel (!%p142_p0) target bundleno = 57 (0x39), region = 227 }
  0x58   : >> { %270 = vst [vmem:[%s2060_s29 + $0x3a0] sm:$0xff] %v269_v60  ;;  %272 = vst [vmem:[%s2060_s29 + $0x3a8] sm:$0xff] %v271_v61  ;;  %v275_v63 = vld [vmem:[%s2064_s30 + $0xee0] sm:$0xff]  ;;  %v279_v1 = vld [vmem:[%s2064_s30 + $0x10c8] sm:$0xff] }
  0x59   : >> { %274 = vst [vmem:[%s2060_s29 + $0x3b0] sm:$0xff] %v273_v62  ;;  %v277_v0 = vld [vmem:[%s2064_s30 + $0x10c0] sm:$0xff]  ;;  %276 = vst [vmem:[%s2060_s29 + $0x3b8] sm:$0xff] %v275_v63  ;;  %v281_v2 = vld [vmem:[%s2064_s30 + $0x10d0] sm:$0xff] }
  0x5a   : >> { %278 = vst [vmem:[%s2060_s29 + $0x400] sm:$0xff] %v277_v0  ;;  %280 = vst [vmem:[%s2060_s29 + $0x408] sm:$0xff] %v279_v1  ;;  %v283_v3 = vld [vmem:[%s2064_s30 + $0x10d8] sm:$0xff]  ;;  %v285_v4 = vld [vmem:[%s2064_s30 + $0x10e0] sm:$0xff] }
  0x5b   : >> { %282 = vst [vmem:[%s2060_s29 + $0x410] sm:$0xff] %v281_v2  ;;  %284 = vst [vmem:[%s2060_s29 + $0x418] sm:$0xff] %v283_v3  ;;  %v287_v5 = vld [vmem:[%s2064_s30 + $0x10e8] sm:$0xff]  ;;  %v289_v6 = vld [vmem:[%s2064_s30 + $0x10f0] sm:$0xff] }
  0x5c   : >> { %286 = vst [vmem:[%s2060_s29 + $0x420] sm:$0xff] %v285_v4  ;;  %v291_v7 = vld [vmem:[%s2064_s30 + $0x10f8] sm:$0xff]  ;;  %288 = vst [vmem:[%s2060_s29 + $0x428] sm:$0xff] %v287_v5  ;;  %s3373_s30 = smov %s2324_s11 }
  0x5d   : >> { %290 = vst [vmem:[%s2060_s29 + $0x430] sm:$0xff] %v289_v6  ;;  %292 = vst [vmem:[%s2060_s29 + $0x438] sm:$0xff] %v291_v7  ;;  %s3372_s29 = smov %s2327_s12 }
  0x5e PF: > { %s2449_s15 = sand.u32 7, %s136_s27   ;;  %s1611_s16 = sshll.u32 %s2257_s28, 10 }
  0x5f   : > { %s304_s17 = sshra.s32 %s1611_s16, 4  ;;  %p1566_p1 = scmp.le.s32.totalorder %s2449_s15, 0 }
  0x60   : > { %s2453_s18 = scalar_lea.vmem %s2242_s22, %s304_s17   ;;  %s2456_s19 = scalar_lea.vmem %s2246_s25, %s304_s17 [#allocation2]  }
  0x61   : > { %1437 = sbr.rel (%p1566_p1) target bundleno = 114 (0x72), region = 232  ;;  %s3375_s20 = smov (!%p1566_p1), %s2456_s19 }
  0x62   : > { %s3376_s21 = smov (!%p1566_p1), %s2453_s18  ;;  %s2465_s23 = smov (!%p1566_p1), 0  }
  0x63   : > { %s2467_s29 = smov (!%p1566_p1), 0  }
  0x68 LB: >> { %v320_v8 = vld [vmem:[%s2080_s21] sm:$0xff]  ;;  %v322_v9 = vld [vmem:[%s2080_s21 + $0x218] sm:$0xff]  ;;  %v324_v10 = vld [vmem:[%s2080_s21 + $0x430] sm:$0xff]  ;;  %s338_s27 = sadd.s32 1, %s2084_s23  ;;  %s314_s29 = sadd.s32 1, %s2088_s29   ;;  %s2088_s29 = sphi %s2467_s29, %s314_s29   ;;  %s2084_s23 = sphi %s2465_s23, %s3377_s23   ;;  %s2080_s21 = sphi %s3376_s21, %s343_s21   ;;  %s2076_s20 = sphi %s3375_s20, %s344_s20  }
  0x69   : >> { %321 = vst [vmem:[%s2076_s20] sm:$0xff] %v320_v8  ;;  %323 = vst [vmem:[%s2076_s20 + $0x80] sm:$0xff] %v322_v9  ;;  %v326_v11 = vld [vmem:[%s2080_s21 + $0x648] sm:$0xff]  ;;  %v328_v12 = vld [vmem:[%s2080_s21 + $0x860] sm:$0xff]  ;;  %p339_p2 = scmp.ge.s32.totalorder %s338_s27, %s2449_s15  ;;  %p313_p3 = scmp.ge.s32.totalorder %s314_s29, %s2449_s15 }
  0x6a   : >> { %325 = vst [vmem:[%s2076_s20 + $0x100] sm:$0xff] %v324_v10  ;;  %v330_v13 = vld [vmem:[%s2080_s21 + $0xa78] sm:$0xff]  ;;  %327 = vst [vmem:[%s2076_s20 + $0x180] sm:$0xff] %v326_v11  ;;  %v332_v14 = vld [vmem:[%s2080_s21 + $0xc90] sm:$0xff] }
  0x6b   : >> { %329 = vst [vmem:[%s2076_s20 + $0x200] sm:$0xff] %v328_v12  ;;  %331 = vst [vmem:[%s2076_s20 + $0x280] sm:$0xff] %v330_v13  ;;  %v334_v15 = vld [vmem:[%s2080_s21 + $0xea8] sm:$0xff]  ;;  %v336_v16 = vld [vmem:[%s2080_s21 + $0x10c0] sm:$0xff]  ;;  %s3404_s27 = smov (%p339_p2, %s338_s27), 0  ;;  %316 = sbr.rel (!%p313_p3) target bundleno = 104 (0x68), region = 238 }
  0x6c   : >> { %333 = vst [vmem:[%s2076_s20 + $0x300] sm:$0xff] %v332_v14  ;;  %335 = vst [vmem:[%s2076_s20 + $0x380] sm:$0xff] %v334_v15  ;;  %s1567_s28 = sshll.u32 %s3404_s27, 3  ;;  %s3377_s23 = smov %s3404_s27 }
  0x6d   : >> { %337 = vst [vmem:[%s2076_s20 + $0x400] sm:$0xff] %v336_v16  ;;  %s343_s21 = scalar_lea.vmem %s2453_s18, %s1567_s28   ;;  %s344_s20 = scalar_lea.vmem %s2456_s19, %s1567_s28 [#allocation2]  }
  0x72 PF: > { %347 = sbr.rel (%p132_p10) target bundleno = 197 (0xc5), region = 61  ;;  %s349_s30 = ssub.s32 (!%p132_p10), %s2244_s24, %s2250_s26 }
  0x73   : > { %s353_s2 = sshrl.u32 (!%p132_p10), %s2244_s24, 3  ;;  %s2494_s3 = scalar_lea.vmem (!%p132_p10), %s2242_s22, %s349_s30 }
  0x74   : > { %s2497_s4 = scalar_lea.vmem (!%p132_p10), %s2246_s25, %s349_s30 [#allocation2]  ;;  %s2501_s5 = sshrl.u32 (!%p132_p10), %s353_s2, 3 }
  0x75   : > { %p1569_p4 = scmp.le.s32.totalorder (!%p132_p10), %s2501_s5, 0 }
  0x79   : > { %1451 = sbr.rel (%p1569_p4) target bundleno = 165 (0xa5), region = 243  ;;  %s3378_s11 = smov (!%p1569_p4), %s2246_s25 }
  0x7a   : > { %s3379_s12 = smov (!%p1569_p4), %s2242_s22  ;;  %s2510_s15 = smov (!%p1569_p4), 0  }
  0x7b   : > { %s2512_s16 = smov (!%p1569_p4), 0  }
  0x80 LB: >> { %v366_v17 = vld [vmem:[%s2096_s12] sm:$0xff]  ;;  %v368_v18 = vld [vmem:[%s2096_s12 + $0x8] sm:$0xff]  ;;  %v370_v19 = vld [vmem:[%s2096_s12 + $0x10] sm:$0xff]  ;;  %s510_s17 = sadd.s32 1, %s2100_s15  ;;  %s360_s16 = sadd.s32 1, %s2104_s16   ;;  %s2104_s16 = sphi %s2512_s16, %s360_s16   ;;  %s2100_s15 = sphi %s2510_s15, %s3382_s15   ;;  %s2096_s12 = sphi %s3379_s12, %s3381_s12   ;;  %s2092_s11 = sphi %s3378_s11, %s3380_s11  }
  0x81   : >> { %367 = vst [vmem:[%s2092_s11] sm:$0xff] %v366_v17  ;;  %369 = vst [vmem:[%s2092_s11 + $0x8] sm:$0xff] %v368_v18  ;;  %v372_v20 = vld [vmem:[%s2096_s12 + $0x18] sm:$0xff]  ;;  %v374_v21 = vld [vmem:[%s2096_s12 + $0x20] sm:$0xff]  ;;  %p511_p6 = scmp.ge.s32.totalorder %s510_s17, %s2501_s5  ;;  %p359_p7 = scmp.ge.s32.totalorder %s360_s16, %s2501_s5 }
  0x82   : >> { %371 = vst [vmem:[%s2092_s11 + $0x10] sm:$0xff] %v370_v19  ;;  %v376_v22 = vld [vmem:[%s2096_s12 + $0x28] sm:$0xff]  ;;  %373 = vst [vmem:[%s2092_s11 + $0x18] sm:$0xff] %v372_v20  ;;  %v378_v23 = vld [vmem:[%s2096_s12 + $0x30] sm:$0xff] }
  0x83   : >> { %375 = vst [vmem:[%s2092_s11 + $0x20] sm:$0xff] %v374_v21  ;;  %377 = vst [vmem:[%s2092_s11 + $0x28] sm:$0xff] %v376_v22  ;;  %v380_v24 = vld [vmem:[%s2096_s12 + $0x38] sm:$0xff]  ;;  %v384_v26 = vld [vmem:[%s2096_s12 + $0x220] sm:$0xff]  ;;  %s3406_s17 = smov (%p511_p6, %s510_s17), 0 }
  0x84   : >> { %v382_v25 = vld [vmem:[%s2096_s12 + $0x218] sm:$0xff]  ;;  %379 = vst [vmem:[%s2092_s11 + $0x30] sm:$0xff] %v378_v23  ;;  %381 = vst [vmem:[%s2092_s11 + $0x38] sm:$0xff] %v380_v24  ;;  %v386_v27 = vld [vmem:[%s2096_s12 + $0x228] sm:$0xff]  ;;  %s1570_s18 = sshll.u32 %s3406_s17, 6  ;;  %s3382_s15 = smov %s3406_s17 }
  0x85   : >> { %383 = vst [vmem:[%s2092_s11 + $0x80] sm:$0xff] %v382_v25  ;;  %v388_v28 = vld [vmem:[%s2096_s12 + $0x230] sm:$0xff]  ;;  %385 = vst [vmem:[%s2092_s11 + $0x88] sm:$0xff] %v384_v26  ;;  %v390_v29 = vld [vmem:[%s2096_s12 + $0x238] sm:$0xff]  ;;  %s2568_s19 = scalar_lea.vmem %s2242_s22, %s1570_s18   ;;  %s2571_s20 = scalar_lea.vmem %s2246_s25, %s1570_s18 [#allocation2]  }
  0x86   : >> { %387 = vst [vmem:[%s2092_s11 + $0x90] sm:$0xff] %v386_v27  ;;  %389 = vst [vmem:[%s2092_s11 + $0x98] sm:$0xff] %v388_v28  ;;  %v392_v30 = vld [vmem:[%s2096_s12 + $0x240] sm:$0xff]  ;;  %v394_v31 = vld [vmem:[%s2096_s12 + $0x248] sm:$0xff] }
  0x87   : >> { %391 = vst [vmem:[%s2092_s11 + $0xa0] sm:$0xff] %v390_v29  ;;  %393 = vst [vmem:[%s2092_s11 + $0xa8] sm:$0xff] %v392_v30  ;;  %v396_v32 = vld [vmem:[%s2096_s12 + $0x250] sm:$0xff]  ;;  %v400_v34 = vld [vmem:[%s2096_s12 + $0x438] sm:$0xff] }
  0x88   : >> { %395 = vst [vmem:[%s2092_s11 + $0xb0] sm:$0xff] %v394_v31  ;;  %v398_v33 = vld [vmem:[%s2096_s12 + $0x430] sm:$0xff]  ;;  %397 = vst [vmem:[%s2092_s11 + $0xb8] sm:$0xff] %v396_v32  ;;  %v402_v35 = vld [vmem:[%s2096_s12 + $0x440] sm:$0xff] }
  0x89   : >> { %399 = vst [vmem:[%s2092_s11 + $0x100] sm:$0xff] %v398_v33  ;;  %401 = vst [vmem:[%s2092_s11 + $0x108] sm:$0xff] %v400_v34  ;;  %v404_v36 = vld [vmem:[%s2096_s12 + $0x448] sm:$0xff]  ;;  %v406_v37 = vld [vmem:[%s2096_s12 + $0x450] sm:$0xff] }
  0x8a   : >> { %403 = vst [vmem:[%s2092_s11 + $0x110] sm:$0xff] %v402_v35  ;;  %405 = vst [vmem:[%s2092_s11 + $0x118] sm:$0xff] %v404_v36  ;;  %v408_v38 = vld [vmem:[%s2096_s12 + $0x458] sm:$0xff]  ;;  %v410_v39 = vld [vmem:[%s2096_s12 + $0x460] sm:$0xff] }
  0x8b   : >> { %407 = vst [vmem:[%s2092_s11 + $0x120] sm:$0xff] %v406_v37  ;;  %v412_v40 = vld [vmem:[%s2096_s12 + $0x468] sm:$0xff]  ;;  %409 = vst [vmem:[%s2092_s11 + $0x128] sm:$0xff] %v408_v38  ;;  %v416_v42 = vld [vmem:[%s2096_s12 + $0x650] sm:$0xff] }
  0x8c   : >> { %411 = vst [vmem:[%s2092_s11 + $0x130] sm:$0xff] %v410_v39  ;;  %413 = vst [vmem:[%s2092_s11 + $0x138] sm:$0xff] %v412_v40  ;;  %v414_v41 = vld [vmem:[%s2096_s12 + $0x648] sm:$0xff]  ;;  %v418_v43 = vld [vmem:[%s2096_s12 + $0x658] sm:$0xff] }
  0x8d   : >> { %415 = vst [vmem:[%s2092_s11 + $0x180] sm:$0xff] %v414_v41  ;;  %417 = vst [vmem:[%s2092_s11 + $0x188] sm:$0xff] %v416_v42  ;;  %v420_v44 = vld [vmem:[%s2096_s12 + $0x660] sm:$0xff]  ;;  %v422_v45 = vld [vmem:[%s2096_s12 + $0x668] sm:$0xff] }
  0x8e   : >> { %419 = vst [vmem:[%s2092_s11 + $0x190] sm:$0xff] %v418_v43  ;;  %v424_v46 = vld [vmem:[%s2096_s12 + $0x670] sm:$0xff]  ;;  %421 = vst [vmem:[%s2092_s11 + $0x198] sm:$0xff] %v420_v44  ;;  %v426_v47 = vld [vmem:[%s2096_s12 + $0x678] sm:$0xff] }
  0x8f   : >> { %423 = vst [vmem:[%s2092_s11 + $0x1a0] sm:$0xff] %v422_v45  ;;  %425 = vst [vmem:[%s2092_s11 + $0x1a8] sm:$0xff] %v424_v46  ;;  %v428_v48 = vld [vmem:[%s2096_s12 + $0x680] sm:$0xff]  ;;  %v432_v50 = vld [vmem:[%s2096_s12 + $0x868] sm:$0xff] }
  0x90   : >> { %v430_v49 = vld [vmem:[%s2096_s12 + $0x860] sm:$0xff]  ;;  %427 = vst [vmem:[%s2092_s11 + $0x1b0] sm:$0xff] %v426_v47  ;;  %429 = vst [vmem:[%s2092_s11 + $0x1b8] sm:$0xff] %v428_v48  ;;  %v434_v51 = vld [vmem:[%s2096_s12 + $0x870] sm:$0xff] }
  0x91   : >> { %431 = vst [vmem:[%s2092_s11 + $0x200] sm:$0xff] %v430_v49  ;;  %v436_v52 = vld [vmem:[%s2096_s12 + $0x878] sm:$0xff]  ;;  %433 = vst [vmem:[%s2092_s11 + $0x208] sm:$0xff] %v432_v50  ;;  %v438_v53 = vld [vmem:[%s2096_s12 + $0x880] sm:$0xff] }
  0x92   : >> { %435 = vst [vmem:[%s2092_s11 + $0x210] sm:$0xff] %v434_v51  ;;  %437 = vst [vmem:[%s2092_s11 + $0x218] sm:$0xff] %v436_v52  ;;  %v440_v54 = vld [vmem:[%s2096_s12 + $0x888] sm:$0xff]  ;;  %v442_v55 = vld [vmem:[%s2096_s12 + $0x890] sm:$0xff] }
  0x93   : >> { %439 = vst [vmem:[%s2092_s11 + $0x220] sm:$0xff] %v438_v53  ;;  %441 = vst [vmem:[%s2092_s11 + $0x228] sm:$0xff] %v440_v54  ;;  %v444_v56 = vld [vmem:[%s2096_s12 + $0x898] sm:$0xff]  ;;  %v448_v58 = vld [vmem:[%s2096_s12 + $0xa80] sm:$0xff] }
  0x94   : >> { %443 = vst [vmem:[%s2092_s11 + $0x230] sm:$0xff] %v442_v55  ;;  %v446_v57 = vld [vmem:[%s2096_s12 + $0xa78] sm:$0xff]  ;;  %445 = vst [vmem:[%s2092_s11 + $0x238] sm:$0xff] %v444_v56  ;;  %v450_v59 = vld [vmem:[%s2096_s12 + $0xa88] sm:$0xff] }
  0x95   : >> { %447 = vst [vmem:[%s2092_s11 + $0x280] sm:$0xff] %v446_v57  ;;  %449 = vst [vmem:[%s2092_s11 + $0x288] sm:$0xff] %v448_v58  ;;  %v452_v60 = vld [vmem:[%s2096_s12 + $0xa90] sm:$0xff]  ;;  %v454_v61 = vld [vmem:[%s2096_s12 + $0xa98] sm:$0xff] }
  0x96   : >> { %451 = vst [vmem:[%s2092_s11 + $0x290] sm:$0xff] %v450_v59  ;;  %453 = vst [vmem:[%s2092_s11 + $0x298] sm:$0xff] %v452_v60  ;;  %v456_v62 = vld [vmem:[%s2096_s12 + $0xaa0] sm:$0xff]  ;;  %v458_v63 = vld [vmem:[%s2096_s12 + $0xaa8] sm:$0xff] }
  0x97   : >> { %455 = vst [vmem:[%s2092_s11 + $0x2a0] sm:$0xff] %v454_v61  ;;  %v460_v0 = vld [vmem:[%s2096_s12 + $0xab0] sm:$0xff]  ;;  %457 = vst [vmem:[%s2092_s11 + $0x2a8] sm:$0xff] %v456_v62  ;;  %v464_v2 = vld [vmem:[%s2096_s12 + $0xc98] sm:$0xff] }
  0x98   : >> { %459 = vst [vmem:[%s2092_s11 + $0x2b0] sm:$0xff] %v458_v63  ;;  %461 = vst [vmem:[%s2092_s11 + $0x2b8] sm:$0xff] %v460_v0  ;;  %v462_v1 = vld [vmem:[%s2096_s12 + $0xc90] sm:$0xff]  ;;  %v466_v3 = vld [vmem:[%s2096_s12 + $0xca0] sm:$0xff] }
  0x99   : >> { %463 = vst [vmem:[%s2092_s11 + $0x300] sm:$0xff] %v462_v1  ;;  %465 = vst [vmem:[%s2092_s11 + $0x308] sm:$0xff] %v464_v2  ;;  %v468_v4 = vld [vmem:[%s2096_s12 + $0xca8] sm:$0xff]  ;;  %v470_v5 = vld [vmem:[%s2096_s12 + $0xcb0] sm:$0xff] }
  0x9a   : >> { %467 = vst [vmem:[%s2092_s11 + $0x310] sm:$0xff] %v466_v3  ;;  %v472_v6 = vld [vmem:[%s2096_s12 + $0xcb8] sm:$0xff]  ;;  %469 = vst [vmem:[%s2092_s11 + $0x318] sm:$0xff] %v468_v4  ;;  %v474_v7 = vld [vmem:[%s2096_s12 + $0xcc0] sm:$0xff] }
  0x9b   : >> { %471 = vst [vmem:[%s2092_s11 + $0x320] sm:$0xff] %v470_v5  ;;  %473 = vst [vmem:[%s2092_s11 + $0x328] sm:$0xff] %v472_v6  ;;  %v476_v8 = vld [vmem:[%s2096_s12 + $0xcc8] sm:$0xff]  ;;  %v480_v10 = vld [vmem:[%s2096_s12 + $0xeb0] sm:$0xff] }
  0x9c   : >> { %v478_v9 = vld [vmem:[%s2096_s12 + $0xea8] sm:$0xff]  ;;  %475 = vst [vmem:[%s2092_s11 + $0x330] sm:$0xff] %v474_v7  ;;  %477 = vst [vmem:[%s2092_s11 + $0x338] sm:$0xff] %v476_v8  ;;  %v482_v11 = vld [vmem:[%s2096_s12 + $0xeb8] sm:$0xff] }
  0x9d   : >> { %479 = vst [vmem:[%s2092_s11 + $0x380] sm:$0xff] %v478_v9  ;;  %v484_v12 = vld [vmem:[%s2096_s12 + $0xec0] sm:$0xff]  ;;  %481 = vst [vmem:[%s2092_s11 + $0x388] sm:$0xff] %v480_v10  ;;  %v486_v13 = vld [vmem:[%s2096_s12 + $0xec8] sm:$0xff] }
  0x9e   : >> { %483 = vst [vmem:[%s2092_s11 + $0x390] sm:$0xff] %v482_v11  ;;  %485 = vst [vmem:[%s2092_s11 + $0x398] sm:$0xff] %v484_v12  ;;  %v488_v14 = vld [vmem:[%s2096_s12 + $0xed0] sm:$0xff]  ;;  %v490_v15 = vld [vmem:[%s2096_s12 + $0xed8] sm:$0xff]  ;;  %362 = sbr.rel (!%p359_p7) target bundleno = 128 (0x80), region = 249 }
  0x9f   : >> { %487 = vst [vmem:[%s2092_s11 + $0x3a0] sm:$0xff] %v486_v13  ;;  %489 = vst [vmem:[%s2092_s11 + $0x3a8] sm:$0xff] %v488_v14  ;;  %v492_v16 = vld [vmem:[%s2096_s12 + $0xee0] sm:$0xff]  ;;  %v496_v18 = vld [vmem:[%s2096_s12 + $0x10c8] sm:$0xff] }
  0xa0   : >> { %491 = vst [vmem:[%s2092_s11 + $0x3b0] sm:$0xff] %v490_v15  ;;  %v494_v17 = vld [vmem:[%s2096_s12 + $0x10c0] sm:$0xff]  ;;  %493 = vst [vmem:[%s2092_s11 + $0x3b8] sm:$0xff] %v492_v16  ;;  %v498_v19 = vld [vmem:[%s2096_s12 + $0x10d0] sm:$0xff] }
  0xa1   : >> { %495 = vst [vmem:[%s2092_s11 + $0x400] sm:$0xff] %v494_v17  ;;  %497 = vst [vmem:[%s2092_s11 + $0x408] sm:$0xff] %v496_v18  ;;  %v500_v20 = vld [vmem:[%s2096_s12 + $0x10d8] sm:$0xff]  ;;  %v502_v21 = vld [vmem:[%s2096_s12 + $0x10e0] sm:$0xff] }
  0xa2   : >> { %499 = vst [vmem:[%s2092_s11 + $0x410] sm:$0xff] %v498_v19  ;;  %501 = vst [vmem:[%s2092_s11 + $0x418] sm:$0xff] %v500_v20  ;;  %v504_v22 = vld [vmem:[%s2096_s12 + $0x10e8] sm:$0xff]  ;;  %v506_v23 = vld [vmem:[%s2096_s12 + $0x10f0] sm:$0xff] }
  0xa3   : >> { %503 = vst [vmem:[%s2092_s11 + $0x420] sm:$0xff] %v502_v21  ;;  %v508_v24 = vld [vmem:[%s2096_s12 + $0x10f8] sm:$0xff]  ;;  %505 = vst [vmem:[%s2092_s11 + $0x428] sm:$0xff] %v504_v22  ;;  %s3381_s12 = smov %s2568_s19 }
  0xa4   : >> { %507 = vst [vmem:[%s2092_s11 + $0x430] sm:$0xff] %v506_v23  ;;  %509 = vst [vmem:[%s2092_s11 + $0x438] sm:$0xff] %v508_v24  ;;  %s3380_s11 = smov %s2571_s20 }
  0xa5 PF: > { %s2693_s21 = sand.u32 7, %s353_s2   ;;  %s1613_s23 = sshll.u32 %s2501_s5, 10 }
  0xa6   : > { %s521_s29 = sshra.s32 %s1613_s23, 4  ;;  %p1575_p8 = scmp.le.s32.totalorder %s2693_s21, 0 }
  0xa7   : > { %s2697_s27 = scalar_lea.vmem %s2242_s22, %s521_s29   ;;  %s2700_s28 = scalar_lea.vmem %s2246_s25, %s521_s29 [#allocation2]  }
  0xa8   : > { %1465 = sbr.rel (%p1575_p8) target bundleno = 185 (0xb9), region = 254  ;;  %s3383_s30 = smov (!%p1575_p8), %s2700_s28 }
  0xa9   : > { %s3384_s11 = smov (!%p1575_p8), %s2697_s27  ;;  %s2709_s12 = smov (!%p1575_p8), 0  }
  0xaa   : > { %s2711_s15 = smov (!%p1575_p8), 0  }
  0xaf LB: >> { %v537_v25 = vld [vmem:[%s2112_s11] sm:$0xff]  ;;  %v539_v26 = vld [vmem:[%s2112_s11 + $0x218] sm:$0xff]  ;;  %v541_v27 = vld [vmem:[%s2112_s11 + $0x430] sm:$0xff]  ;;  %s555_s2 = sadd.s32 1, %s2116_s12  ;;  %s531_s15 = sadd.s32 1, %s2120_s15   ;;  %s2120_s15 = sphi %s2711_s15, %s531_s15   ;;  %s2116_s12 = sphi %s2709_s12, %s3385_s12   ;;  %s2112_s11 = sphi %s3384_s11, %s560_s11   ;;  %s2108_s30 = sphi %s3383_s30, %s561_s30  }
  0xb0   : >> { %538 = vst [vmem:[%s2108_s30] sm:$0xff] %v537_v25  ;;  %540 = vst [vmem:[%s2108_s30 + $0x80] sm:$0xff] %v539_v26  ;;  %v543_v28 = vld [vmem:[%s2112_s11 + $0x648] sm:$0xff]  ;;  %v545_v29 = vld [vmem:[%s2112_s11 + $0x860] sm:$0xff]  ;;  %p556_p9 = scmp.ge.s32.totalorder %s555_s2, %s2693_s21  ;;  %p530_p10 = scmp.ge.s32.totalorder %s531_s15, %s2693_s21 }
  0xb1   : >> { %542 = vst [vmem:[%s2108_s30 + $0x100] sm:$0xff] %v541_v27  ;;  %v547_v30 = vld [vmem:[%s2112_s11 + $0xa78] sm:$0xff]  ;;  %544 = vst [vmem:[%s2108_s30 + $0x180] sm:$0xff] %v543_v28  ;;  %v549_v31 = vld [vmem:[%s2112_s11 + $0xc90] sm:$0xff] }
  0xb2   : >> { %546 = vst [vmem:[%s2108_s30 + $0x200] sm:$0xff] %v545_v29  ;;  %548 = vst [vmem:[%s2108_s30 + $0x280] sm:$0xff] %v547_v30  ;;  %v551_v32 = vld [vmem:[%s2112_s11 + $0xea8] sm:$0xff]  ;;  %v553_v33 = vld [vmem:[%s2112_s11 + $0x10c0] sm:$0xff]  ;;  %s3408_s2 = smov (%p556_p9, %s555_s2), 0  ;;  %533 = sbr.rel (!%p530_p10) target bundleno = 175 (0xaf), region = 260 }
  0xb3   : >> { %550 = vst [vmem:[%s2108_s30 + $0x300] sm:$0xff] %v549_v31  ;;  %552 = vst [vmem:[%s2108_s30 + $0x380] sm:$0xff] %v551_v32  ;;  %s1576_s5 = sshll.u32 %s3408_s2, 3  ;;  %s3385_s12 = smov %s3408_s2 }
  0xb4   : >> { %554 = vst [vmem:[%s2108_s30 + $0x400] sm:$0xff] %v553_v33  ;;  %s560_s11 = scalar_lea.vmem %s2697_s27, %s1576_s5   ;;  %s561_s30 = scalar_lea.vmem %s2700_s28, %s1576_s5 [#allocation2]  }
  0xb9 PF: > { %s2186_s16 = smov 0  }
  0xba   : > { %s562_s17 = sshllo.u32 %s2186_s16, %s2250_s26 }
  0xbb   : > { %v571_v34 = vld [vmem:[%s2494_s3] sm:%s562_s17]  ;;  %v573_v35 = vld [vmem:[%s2494_s3 + $0x218] sm:%s562_s17] }
  0xbc   : > { %572 = vst [vmem:[%s2497_s4] sm:%s562_s17] %v571_v34  ;;  %574 = vst [vmem:[%s2497_s4 + $0x80] sm:%s562_s17] %v573_v35 }
  0xbd   : > { %v575_v36 = vld [vmem:[%s2494_s3 + $0x430] sm:%s562_s17]  ;;  %v577_v37 = vld [vmem:[%s2494_s3 + $0x648] sm:%s562_s17] }
  0xbe   : > { %576 = vst [vmem:[%s2497_s4 + $0x100] sm:%s562_s17] %v575_v36  ;;  %578 = vst [vmem:[%s2497_s4 + $0x180] sm:%s562_s17] %v577_v37 }
  0xbf   : > { %v579_v38 = vld [vmem:[%s2494_s3 + $0x860] sm:%s562_s17]  ;;  %v581_v39 = vld [vmem:[%s2494_s3 + $0xa78] sm:%s562_s17] }
  0xc0   : > { %580 = vst [vmem:[%s2497_s4 + $0x200] sm:%s562_s17] %v579_v38  ;;  %582 = vst [vmem:[%s2497_s4 + $0x280] sm:%s562_s17] %v581_v39 }
  0xc1   : > { %v583_v40 = vld [vmem:[%s2494_s3 + $0xc90] sm:%s562_s17]  ;;  %v585_v41 = vld [vmem:[%s2494_s3 + $0xea8] sm:%s562_s17] }
  0xc2   : > { %584 = vst [vmem:[%s2497_s4 + $0x300] sm:%s562_s17] %v583_v40  ;;  %586 = vst [vmem:[%s2497_s4 + $0x380] sm:%s562_s17] %v585_v41 }
  0xc3   : > { %v587_v42 = vld [vmem:[%s2494_s3 + $0x10c0] sm:%s562_s17] }
  0xc4   : > { %588 = vst [vmem:[%s2497_s4 + $0x400] sm:%s562_s17] %v587_v42 }
  0xc5 PF: > { %p1578_p11 = scmp.ge.u32.totalorder %s2244_s24, 8 }
  0xc6   : > { %s2187_s26 = smov (!%p1578_p11), 0  }
  0xc7   : > { %103 = sbr.rel (%p1578_p11) target bundleno = 210 (0xd2), region = 32  ;;  %s104_s3 = sshllo.u32 (!%p1578_p11), %s2187_s26, %s2244_s24 }
  0xc8   : > { %v113_v43 = vld [vmem:[%s2242_s22] sm:%s104_s3] (!%p1578_p11)  ;;  %v115_v44 = vld [vmem:[%s2242_s22 + $0x218] sm:%s104_s3] (!%p1578_p11) }
  0xc9   : > { %114 = vst [vmem:[%s2246_s25] sm:%s104_s3] (!%p1578_p11), %v113_v43  ;;  %116 = vst [vmem:[%s2246_s25 + $0x80] sm:%s104_s3] (!%p1578_p11), %v115_v44 }
  0xca   : > { %v117_v45 = vld [vmem:[%s2242_s22 + $0x430] sm:%s104_s3] (!%p1578_p11)  ;;  %v119_v46 = vld [vmem:[%s2242_s22 + $0x648] sm:%s104_s3] (!%p1578_p11) }
  0xcb   : > { %118 = vst [vmem:[%s2246_s25 + $0x100] sm:%s104_s3] (!%p1578_p11), %v117_v45  ;;  %120 = vst [vmem:[%s2246_s25 + $0x180] sm:%s104_s3] (!%p1578_p11), %v119_v46 }
  0xcc   : > { %v121_v47 = vld [vmem:[%s2242_s22 + $0x860] sm:%s104_s3] (!%p1578_p11)  ;;  %v123_v48 = vld [vmem:[%s2242_s22 + $0xa78] sm:%s104_s3] (!%p1578_p11) }
  0xcd   : > { %122 = vst [vmem:[%s2246_s25 + $0x200] sm:%s104_s3] (!%p1578_p11), %v121_v47  ;;  %124 = vst [vmem:[%s2246_s25 + $0x280] sm:%s104_s3] (!%p1578_p11), %v123_v48 }
  0xce   : > { %v125_v49 = vld [vmem:[%s2242_s22 + $0xc90] sm:%s104_s3]  ;;  %v127_v50 = vld [vmem:[%s2242_s22 + $0xea8] sm:%s104_s3] }
  0xcf   : > { %126 = vst [vmem:[%s2246_s25 + $0x300] sm:%s104_s3] %v125_v49  ;;  %128 = vst [vmem:[%s2246_s25 + $0x380] sm:%s104_s3] %v127_v50 }
  0xd0   : > { %v129_v51 = vld [vmem:[%s2242_s22 + $0x10c0] sm:%s104_s3] }
  0xd1   : > { %130 = vst [vmem:[%s2246_s25 + $0x400] sm:%s104_s3] %v129_v51 }
  0xd2 PF: > { %p1579_p12 = scmp.ge.s32.totalorder %s2056_s8, 1  ;;  %p591_p13 = scmp.lt.s32.totalorder %s2056_s8, 6 }
  0xd4   : > { %p592_p0 = pnand %p1579_p12, %p591_p13 }
  0xd5   : > { %s598_s24 = sand.u32 (!%p592_p0), 1, %s2048_s6  }
  0xd6   : > { %595 = sbr.rel (%p592_p0) target bundleno = 444 (0x1bc), region = 86  ;;  %s2803_s8 = sshll.u32 (!%p592_p0), %s598_s24, 7 }
  0xd7   : > { %s1621_s4 = smul.u32 (!%p592_p0), 1152, %s598_s24  ;;  %s2824_s6 = scalar_lea.vmem (!%p592_p0), [#allocation3], %s2803_s8  }
  0xd9   : > { %s2776_s18 = scalar_lea.vmem (!%p592_p0), [#allocation2], %s1621_s4 }
  0xda   : > { %v626_v52 = vld [vmem:[%s2776_s18] sm:$0xff] (!%p592_p0)  ;;  %v627_v58 = vld [vmem:[%s2776_s18 + $0x8] sm:$0xff] (!%p592_p0)  ;;  %v628_v3 = vld [vmem:[%s2776_s18 + $0x10] sm:$0xff] (!%p592_p0) }
  0xdb   : > { %v642_v53 = vld [vmem:[%s2776_s18 + $0x80] sm:$0xff] (!%p592_p0)  ;;  %v643_v59 = vld [vmem:[%s2776_s18 + $0x88] sm:$0xff] (!%p592_p0)  ;;  %v644_v4 = vld [vmem:[%s2776_s18 + $0x90] sm:$0xff] (!%p592_p0) }
  0xdc   : > { %v658_v54 = vld [vmem:[%s2776_s18 + $0x100] sm:$0xff] (!%p592_p0)  ;;  %v770_v55 = vmax.bf16 (!%p592_p0), %v642_v53, %v626_v52  ;;  %v659_v60 = vld [vmem:[%s2776_s18 + $0x108] sm:$0xff] (!%p592_p0)  ;;  %v778_v62 = vmax.bf16 (!%p592_p0), %v643_v59, %v627_v58  ;;  %v660_v5 = vld [vmem:[%s2776_s18 + $0x110] sm:$0xff] (!%p592_p0)  ;;  %v786_v8 = vmax.bf16 (!%p592_p0), %v644_v4, %v628_v3 }
  0xdd   : > { %v674_v56 = vld [vmem:[%s2776_s18 + $0x180] sm:$0xff]  ;;  %v675_v1 = vld [vmem:[%s2776_s18 + $0x188] sm:$0xff]  ;;  %v676_v12 = vld [vmem:[%s2776_s18 + $0x190] sm:$0xff]  ;;  %s1582_s22 = sshll.u32 (%p2231_p5), %s2216_s9, 5  ;;  %s1615_s25 = sshll.u32 (%p2231_p5), %s2216_s9, 7 }
  0xde   : > { %v771_v57 = vmax.bf16 %v770_v55, %v658_v54  ;;  %v690_v61 = vld [vmem:[%s2776_s18 + $0x200] sm:$0xff]  ;;  %v779_v2 = vmax.bf16 %v778_v62, %v659_v60  ;;  %v691_v7 = vld [vmem:[%s2776_s18 + $0x208] sm:$0xff]  ;;  %v787_v14 = vmax.bf16 %v786_v8, %v660_v5  ;;  %v629_v15 = vld [vmem:[%s2776_s18 + $0x18] sm:$0xff]  ;;  %s922_s19 = ssub.s32 (%p2231_p5), 134, %s1582_s22  ;;  %s2952_s23 = scalar_lea.vmem (%p2231_p5), %s3368_s1, %s1615_s25  }
  0xdf   : > { %v706_v63 = vld [vmem:[%s2776_s18 + $0x280] sm:$0xff]  ;;  %v707_v10 = vld [vmem:[%s2776_s18 + $0x288] sm:$0xff]  ;;  %v645_v16 = vld [vmem:[%s2776_s18 + $0x98] sm:$0xff]  ;;  %p923_p1 = scmp.lt.s32.totalorder (%p2231_p5), %s922_s19, 32 }
  0xe0   : > { %v772_v0 = vmax.bf16 %v771_v57, %v674_v56  ;;  %v722_v9 = vld [vmem:[%s2776_s18 + $0x300] sm:$0xff]  ;;  %v780_v11 = vmax.bf16 %v779_v2, %v675_v1  ;;  %v661_v17 = vld [vmem:[%s2776_s18 + $0x118] sm:$0xff]  ;;  %v692_v21 = vld [vmem:[%s2776_s18 + $0x210] sm:$0xff]  ;;  %v794_v22 = vmax.bf16 %v645_v16, %v629_v15  ;;  %v788_v26 = vmax.bf16 %v787_v14, %v676_v12 }
  0xe1   : > { %v738_v18 = vld [vmem:[%s2776_s18 + $0x380] sm:$0xff]  ;;  %v723_v24 = vld [vmem:[%s2776_s18 + $0x308] sm:$0xff]  ;;  %v708_v25 = vld [vmem:[%s2776_s18 + $0x290] sm:$0xff] }
  0xe2   : > { %v773_v6 = vmax.bf16 %v772_v0, %v690_v61  ;;  %v754_v19 = vld [vmem:[%s2776_s18 + $0x400] sm:$0xff]  ;;  %v781_v20 = vmax.bf16 %v780_v11, %v691_v7  ;;  %v677_v27 = vld [vmem:[%s2776_s18 + $0x198] sm:$0xff]  ;;  %v795_v29 = vmax.bf16 %v794_v22, %v661_v17  ;;  %v739_v34 = vld [vmem:[%s2776_s18 + $0x388] sm:$0xff]  ;;  %v789_v36 = vmax.bf16 %v788_v26, %v692_v21 }
  0xe3   : > { %v630_v30 = vld [vmem:[%s2776_s18 + $0x20] sm:$0xff]  ;;  %v755_v35 = vld [vmem:[%s2776_s18 + $0x408] sm:$0xff]  ;;  %v693_v37 = vld [vmem:[%s2776_s18 + $0x218] sm:$0xff] }
  0xe4   : > { %v774_v13 = vmax.bf16 %v773_v6, %v706_v63  ;;  %v782_v28 = vmax.bf16 %v781_v20, %v707_v10  ;;  %v646_v31 = vld [vmem:[%s2776_s18 + $0xa0] sm:$0xff]  ;;  %v724_v40 = vld [vmem:[%s2776_s18 + $0x310] sm:$0xff]  ;;  %v709_v41 = vld [vmem:[%s2776_s18 + $0x298] sm:$0xff]  ;;  %v796_v42 = vmax.bf16 %v795_v29, %v677_v27  ;;  %v790_v45 = vmax.bf16 %v789_v36, %v708_v25 }
  0xe5   : > { %v662_v32 = vld [vmem:[%s2776_s18 + $0x120] sm:$0xff]  ;;  %v802_v38 = vmax.bf16 %v646_v31, %v630_v30  ;;  %v631_v47 = vld [vmem:[%s2776_s18 + $0x28] sm:$0xff]  ;;  %v740_v51 = vld [vmem:[%s2776_s18 + $0x390] sm:$0xff] }
  0xe6   : > { %v775_v23 = vmax.bf16 %v774_v13, %v722_v9  ;;  %v783_v39 = vmax.bf16 %v782_v28, %v723_v24  ;;  %v678_v43 = vld [vmem:[%s2776_s18 + $0x1a0] sm:$0xff]  ;;  %v647_v48 = vld [vmem:[%s2776_s18 + $0xa8] sm:$0xff]  ;;  %v756_v52 = vld [vmem:[%s2776_s18 + $0x410] sm:$0xff]  ;;  %v797_v53 = vmax.bf16 %v796_v42, %v693_v37  ;;  %v791_v56 = vmax.bf16 %v790_v45, %v724_v40 }
  0xe7   : > { %v803_v46 = vmax.bf16 %v802_v38, %v662_v32  ;;  %v663_v49 = vld [vmem:[%s2776_s18 + $0x128] sm:$0xff]  ;;  %v694_v54 = vld [vmem:[%s2776_s18 + $0x220] sm:$0xff]  ;;  %v810_v55 = vmax.bf16 %v647_v48, %v631_v47  ;;  %v725_v57 = vld [vmem:[%s2776_s18 + $0x318] sm:$0xff] }
  0xe8   : > { %v776_v33 = vmax.bf16 %v775_v23, %v738_v18  ;;  %v784_v50 = vmax.bf16 %v783_v39, %v739_v34  ;;  %v710_v58 = vld [vmem:[%s2776_s18 + $0x2a0] sm:$0xff]  ;;  %v679_v60 = vld [vmem:[%s2776_s18 + $0x1a8] sm:$0xff]  ;;  %v798_v62 = vmax.bf16 %v797_v53, %v709_v41  ;;  %v632_v0 = vld [vmem:[%s2776_s18 + $0x30] sm:$0xff]  ;;  %v792_v3 = vmax.bf16 %v791_v56, %v740_v51 }
  0xe9   : > { %v804_v59 = vmax.bf16 %v803_v46, %v678_v43  ;;  %v811_v63 = vmax.bf16 %v810_v55, %v663_v49  ;;  %v648_v1 = vld [vmem:[%s2776_s18 + $0xb0] sm:$0xff]  ;;  %v741_v4 = vld [vmem:[%s2776_s18 + $0x398] sm:$0xff]  ;;  %v695_v7 = vld [vmem:[%s2776_s18 + $0x228] sm:$0xff] }
  0xea   : > { %v777_v44 = vmax.bf16 %v776_v33, %v754_v19  ;;  %v785_v61 = vmax.bf16 %v784_v50, %v755_v35  ;;  %v664_v2 = vld [vmem:[%s2776_s18 + $0x130] sm:$0xff]  ;;  %v757_v5 = vld [vmem:[%s2776_s18 + $0x418] sm:$0xff]  ;;  %v818_v8 = vmax.bf16 %v648_v1, %v632_v0  ;;  %v799_v9 = vmax.bf16 %v798_v62, %v725_v57  ;;  %v726_v10 = vld [vmem:[%s2776_s18 + $0x320] sm:$0xff] }
  0xeb   : > { %v805_v6 = vmax.bf16 %v804_v59, %v694_v54  ;;  %v711_v11 = vld [vmem:[%s2776_s18 + $0x2a8] sm:$0xff]  ;;  %v812_v12 = vmax.bf16 %v811_v63, %v679_v60  ;;  %v680_v13 = vld [vmem:[%s2776_s18 + $0x1b0] sm:$0xff]  ;;  %v793_v14 = vmax.bf16 %v792_v3, %v756_v52  ;;  %v633_v17 = vld [vmem:[%s2776_s18 + $0x38] sm:$0xff] }
  0xec   : > { %898 = vst [vmem:[%s2824_s6] sm:$0xff] %v777_v44  ;;  %899 = vst [vmem:[%s2824_s6 + $0x8] sm:$0xff] %v785_v61  ;;  %v819_v16 = vmax.bf16 %v818_v8, %v664_v2  ;;  %v649_v18 = vld [vmem:[%s2776_s18 + $0xb8] sm:$0xff]  ;;  %v800_v20 = vmax.bf16 %v799_v9, %v741_v4  ;;  %v742_v21 = vld [vmem:[%s2776_s18 + $0x3a0] sm:$0xff] }
  0xed   : > { %v806_v15 = vmax.bf16 %v805_v6, %v710_v58  ;;  %v665_v19 = vld [vmem:[%s2776_s18 + $0x138] sm:$0xff]  ;;  %v758_v22 = vld [vmem:[%s2776_s18 + $0x420] sm:$0xff]  ;;  %v813_v23 = vmax.bf16 %v812_v12, %v695_v7  ;;  %v696_v24 = vld [vmem:[%s2776_s18 + $0x230] sm:$0xff]  ;;  %v826_v25 = vmax.bf16 %v649_v18, %v633_v17  ;;  %900 = vst [vmem:[%s2824_s6 + $0x10] sm:$0xff] %v793_v14 }
  0xee   : > { %v727_v27 = vld [vmem:[%s2776_s18 + $0x328] sm:$0xff]  ;;  %v712_v28 = vld [vmem:[%s2776_s18 + $0x2b0] sm:$0xff]  ;;  %v820_v29 = vmax.bf16 %v819_v16, %v680_v13  ;;  %v681_v30 = vld [vmem:[%s2776_s18 + $0x1b8] sm:$0xff]  ;;  %v801_v31 = vmax.bf16 %v800_v20, %v757_v5 }
  0xef   : > { %v807_v26 = vmax.bf16 %v806_v15, %v726_v10  ;;  %v814_v32 = vmax.bf16 %v813_v23, %v711_v11  ;;  %v827_v33 = vmax.bf16 %v826_v25, %v665_v19  ;;  %v634_v34 = vld [vmem:[%s2776_s18 + $0x40] sm:$0xff]  ;;  %v743_v38 = vld [vmem:[%s2776_s18 + $0x3a8] sm:$0xff]  ;;  %v697_v41 = vld [vmem:[%s2776_s18 + $0x238] sm:$0xff] }
  0xf0   : > { %v650_v35 = vld [vmem:[%s2776_s18 + $0xc0] sm:$0xff]  ;;  %v759_v39 = vld [vmem:[%s2776_s18 + $0x428] sm:$0xff]  ;;  %v821_v40 = vmax.bf16 %v820_v29, %v696_v24  ;;  %901 = vst [vmem:[%s2824_s6 + $0x18] sm:$0xff] %v801_v31  ;;  %v728_v44 = vld [vmem:[%s2776_s18 + $0x330] sm:$0xff] }
  0xf1   : > { %v666_v36 = vld [vmem:[%s2776_s18 + $0x140] sm:$0xff]  ;;  %v808_v37 = vmax.bf16 %v807_v26, %v742_v21  ;;  %v834_v42 = vmax.bf16 %v650_v35, %v634_v34  ;;  %v815_v43 = vmax.bf16 %v814_v32, %v727_v27  ;;  %v713_v45 = vld [vmem:[%s2776_s18 + $0x2b8] sm:$0xff]  ;;  %v828_v46 = vmax.bf16 %v827_v33, %v681_v30  ;;  %v635_v51 = vld [vmem:[%s2776_s18 + $0x48] sm:$0xff] }
  0xf2   : > { %v682_v47 = vld [vmem:[%s2776_s18 + $0x1c0] sm:$0xff]  ;;  %v822_v49 = vmax.bf16 %v821_v40, %v712_v28  ;;  %v651_v52 = vld [vmem:[%s2776_s18 + $0xc8] sm:$0xff]  ;;  %v744_v55 = vld [vmem:[%s2776_s18 + $0x3b0] sm:$0xff] }
  0xf3   : > { %v809_v48 = vmax.bf16 %v808_v37, %v758_v22  ;;  %v835_v50 = vmax.bf16 %v834_v42, %v666_v36  ;;  %v667_v53 = vld [vmem:[%s2776_s18 + $0x148] sm:$0xff]  ;;  %v816_v54 = vmax.bf16 %v815_v43, %v743_v38  ;;  %v760_v56 = vld [vmem:[%s2776_s18 + $0x430] sm:$0xff]  ;;  %v829_v57 = vmax.bf16 %v828_v46, %v697_v41  ;;  %v698_v58 = vld [vmem:[%s2776_s18 + $0x240] sm:$0xff] }
  0xf4   : > { %v842_v59 = vmax.bf16 %v651_v52, %v635_v51  ;;  %v823_v60 = vmax.bf16 %v822_v49, %v728_v44  ;;  %v729_v61 = vld [vmem:[%s2776_s18 + $0x338] sm:$0xff]  ;;  %v714_v62 = vld [vmem:[%s2776_s18 + $0x2c0] sm:$0xff]  ;;  %v683_v0 = vld [vmem:[%s2776_s18 + $0x1c8] sm:$0xff] }
  0xf5   : > { %902 = vst [vmem:[%s2824_s6 + $0x20] sm:$0xff] %v809_v48  ;;  %v836_v63 = vmax.bf16 %v835_v50, %v682_v47  ;;  %v817_v1 = vmax.bf16 %v816_v54, %v759_v39  ;;  %v830_v2 = vmax.bf16 %v829_v57, %v713_v45  ;;  %v636_v4 = vld [vmem:[%s2776_s18 + $0x50] sm:$0xff]  ;;  %v745_v8 = vld [vmem:[%s2776_s18 + $0x3b8] sm:$0xff]  ;;  %v699_v11 = vld [vmem:[%s2776_s18 + $0x248] sm:$0xff] }
  0xf6   : > { %v843_v3 = vmax.bf16 %v842_v59, %v667_v53  ;;  %v652_v5 = vld [vmem:[%s2776_s18 + $0xd0] sm:$0xff]  ;;  %v824_v7 = vmax.bf16 %v823_v60, %v744_v55  ;;  %v761_v9 = vld [vmem:[%s2776_s18 + $0x438] sm:$0xff]  ;;  %v730_v14 = vld [vmem:[%s2776_s18 + $0x340] sm:$0xff] }
  0xf7   : > { %v668_v6 = vld [vmem:[%s2776_s18 + $0x150] sm:$0xff]  ;;  %v837_v10 = vmax.bf16 %v836_v63, %v698_v58  ;;  %v850_v12 = vmax.bf16 %v652_v5, %v636_v4  ;;  %903 = vst [vmem:[%s2824_s6 + $0x28] sm:$0xff] %v817_v1  ;;  %v831_v13 = vmax.bf16 %v830_v2, %v729_v61  ;;  %v715_v15 = vld [vmem:[%s2776_s18 + $0x2c8] sm:$0xff]  ;;  %v637_v21 = vld [vmem:[%s2776_s18 + $0x58] sm:$0xff] }
  0xf8   : > { %v844_v16 = vmax.bf16 %v843_v3, %v683_v0  ;;  %v684_v17 = vld [vmem:[%s2776_s18 + $0x1d0] sm:$0xff]  ;;  %v825_v18 = vmax.bf16 %v824_v7, %v760_v56  ;;  %v653_v22 = vld [vmem:[%s2776_s18 + $0xd8] sm:$0xff]  ;;  %v746_v25 = vld [vmem:[%s2776_s18 + $0x3c0] sm:$0xff] }
  0xf9   : > { %v838_v19 = vmax.bf16 %v837_v10, %v714_v62  ;;  %v851_v20 = vmax.bf16 %v850_v12, %v668_v6  ;;  %v669_v23 = vld [vmem:[%s2776_s18 + $0x158] sm:$0xff]  ;;  %v832_v24 = vmax.bf16 %v831_v13, %v745_v8  ;;  %v762_v26 = vld [vmem:[%s2776_s18 + $0x440] sm:$0xff]  ;;  %v700_v28 = vld [vmem:[%s2776_s18 + $0x250] sm:$0xff]  ;;  %v858_v29 = vmax.bf16 %v653_v22, %v637_v21 }
  0xfa   : > { %v845_v27 = vmax.bf16 %v844_v16, %v699_v11  ;;  %904 = vst [vmem:[%s2824_s6 + $0x30] sm:$0xff] %v825_v18  ;;  %v731_v31 = vld [vmem:[%s2776_s18 + $0x348] sm:$0xff]  ;;  %v716_v32 = vld [vmem:[%s2776_s18 + $0x2d0] sm:$0xff]  ;;  %v685_v34 = vld [vmem:[%s2776_s18 + $0x1d8] sm:$0xff] }
  0xfb   : > { %v839_v30 = vmax.bf16 %v838_v19, %v730_v14  ;;  %v852_v33 = vmax.bf16 %v851_v20, %v684_v17  ;;  %v833_v35 = vmax.bf16 %v832_v24, %v761_v9  ;;  %v859_v37 = vmax.bf16 %v858_v29, %v669_v23  ;;  %v638_v38 = vld [vmem:[%s2776_s18 + $0x60] sm:$0xff]  ;;  %v747_v42 = vld [vmem:[%s2776_s18 + $0x3c8] sm:$0xff]  ;;  %v701_v45 = vld [vmem:[%s2776_s18 + $0x258] sm:$0xff] }
  0xfc   : > { %v846_v36 = vmax.bf16 %v845_v27, %v715_v15  ;;  %v654_v39 = vld [vmem:[%s2776_s18 + $0xe0] sm:$0xff]  ;;  %v763_v43 = vld [vmem:[%s2776_s18 + $0x448] sm:$0xff]  ;;  %v732_v48 = vld [vmem:[%s2776_s18 + $0x350] sm:$0xff] }
  0xfd   : > { %v670_v40 = vld [vmem:[%s2776_s18 + $0x160] sm:$0xff]  ;;  %v840_v41 = vmax.bf16 %v839_v30, %v746_v25  ;;  %v853_v44 = vmax.bf16 %v852_v33, %v700_v28  ;;  %v866_v46 = vmax.bf16 %v654_v39, %v638_v38  ;;  %905 = vst [vmem:[%s2824_s6 + $0x38] sm:$0xff] %v833_v35  ;;  %v717_v49 = vld [vmem:[%s2776_s18 + $0x2d8] sm:$0xff]  ;;  %v860_v50 = vmax.bf16 %v859_v37, %v685_v34  ;;  %v639_v55 = vld [vmem:[%s2776_s18 + $0x68] sm:$0xff] }
  0xfe   : > { %v847_v47 = vmax.bf16 %v846_v36, %v731_v31  ;;  %v686_v51 = vld [vmem:[%s2776_s18 + $0x1e0] sm:$0xff]  ;;  %v655_v56 = vld [vmem:[%s2776_s18 + $0xe8] sm:$0xff]  ;;  %v748_v59 = vld [vmem:[%s2776_s18 + $0x3d0] sm:$0xff] }
  0xff   : > { %v841_v52 = vmax.bf16 %v840_v41, %v762_v26  ;;  %v854_v53 = vmax.bf16 %v853_v44, %v716_v32  ;;  %v867_v54 = vmax.bf16 %v866_v46, %v670_v40  ;;  %v671_v57 = vld [vmem:[%s2776_s18 + $0x168] sm:$0xff]  ;;  %v764_v60 = vld [vmem:[%s2776_s18 + $0x450] sm:$0xff]  ;;  %v861_v61 = vmax.bf16 %v860_v50, %v701_v45  ;;  %v702_v62 = vld [vmem:[%s2776_s18 + $0x260] sm:$0xff] }
 0x100   : > { %v848_v58 = vmax.bf16 %v847_v47, %v747_v42  ;;  %v874_v63 = vmax.bf16 %v655_v56, %v639_v55  ;;  %v733_v1 = vld [vmem:[%s2776_s18 + $0x358] sm:$0xff]  ;;  %v718_v2 = vld [vmem:[%s2776_s18 + $0x2e0] sm:$0xff]  ;;  %v687_v4 = vld [vmem:[%s2776_s18 + $0x1e8] sm:$0xff] }
 0x101   : > { %906 = vst [vmem:[%s2824_s6 + $0x40] sm:$0xff] %v841_v52  ;;  %v855_v0 = vmax.bf16 %v854_v53, %v732_v48  ;;  %v868_v3 = vmax.bf16 %v867_v54, %v686_v51  ;;  %v862_v6 = vmax.bf16 %v861_v61, %v717_v49  ;;  %v640_v8 = vld [vmem:[%s2776_s18 + $0x70] sm:$0xff]  ;;  %v749_v12 = vld [vmem:[%s2776_s18 + $0x3d8] sm:$0xff]  ;;  %v703_v15 = vld [vmem:[%s2776_s18 + $0x268] sm:$0xff] }
 0x102   : > { %v849_v5 = vmax.bf16 %v848_v58, %v763_v43  ;;  %v875_v7 = vmax.bf16 %v874_v63, %v671_v57  ;;  %v656_v9 = vld [vmem:[%s2776_s18 + $0xf0] sm:$0xff]  ;;  %v765_v13 = vld [vmem:[%s2776_s18 + $0x458] sm:$0xff]  ;;  %v734_v18 = vld [vmem:[%s2776_s18 + $0x360] sm:$0xff] }
 0x103   : > { %v672_v10 = vld [vmem:[%s2776_s18 + $0x170] sm:$0xff]  ;;  %v856_v11 = vmax.bf16 %v855_v0, %v748_v59  ;;  %v869_v14 = vmax.bf16 %v868_v3, %v702_v62  ;;  %v882_v16 = vmax.bf16 %v656_v9, %v640_v8  ;;  %v863_v17 = vmax.bf16 %v862_v6, %v733_v1  ;;  %v719_v19 = vld [vmem:[%s2776_s18 + $0x2e8] sm:$0xff]  ;;  %v641_v25 = vld [vmem:[%s2776_s18 + $0x78] sm:$0xff] }
 0x104   : > { %907 = vst [vmem:[%s2824_s6 + $0x48] sm:$0xff] %v849_v5  ;;  %v876_v20 = vmax.bf16 %v875_v7, %v687_v4  ;;  %v688_v21 = vld [vmem:[%s2776_s18 + $0x1f0] sm:$0xff]  ;;  %v657_v26 = vld [vmem:[%s2776_s18 + $0xf8] sm:$0xff]  ;;  %v750_v29 = vld [vmem:[%s2776_s18 + $0x3e0] sm:$0xff] }
 0x105   : > { %v857_v22 = vmax.bf16 %v856_v11, %v764_v60  ;;  %v870_v23 = vmax.bf16 %v869_v14, %v718_v2  ;;  %v883_v24 = vmax.bf16 %v882_v16, %v672_v10  ;;  %v673_v27 = vld [vmem:[%s2776_s18 + $0x178] sm:$0xff]  ;;  %v864_v28 = vmax.bf16 %v863_v17, %v749_v12  ;;  %v704_v31 = vld [vmem:[%s2776_s18 + $0x270] sm:$0xff]  ;;  %v735_v34 = vld [vmem:[%s2776_s18 + $0x368] sm:$0xff] }
 0x106   : > { %v877_v30 = vmax.bf16 %v876_v20, %v703_v15  ;;  %v890_v32 = vmax.bf16 %v657_v26, %v641_v25  ;;  %v689_v36 = vld [vmem:[%s2776_s18 + $0x1f8] sm:$0xff]  ;;  %v766_v38 = vld [vmem:[%s2776_s18 + $0x460] sm:$0xff]  ;;  %v720_v40 = vld [vmem:[%s2776_s18 + $0x2f0] sm:$0xff] }
 0x107   : > { %908 = vst [vmem:[%s2824_s6 + $0x50] sm:$0xff] %v857_v22  ;;  %v871_v33 = vmax.bf16 %v870_v23, %v734_v18  ;;  %v884_v35 = vmax.bf16 %v883_v24, %v688_v21  ;;  %v865_v37 = vmax.bf16 %v864_v28, %v765_v13  ;;  %v751_v43 = vld [vmem:[%s2776_s18 + $0x3e8] sm:$0xff]  ;;  %v705_v45 = vld [vmem:[%s2776_s18 + $0x278] sm:$0xff]  ;;  %v736_v47 = vld [vmem:[%s2776_s18 + $0x370] sm:$0xff] }
 0x108   : > { %v878_v39 = vmax.bf16 %v877_v30, %v719_v19  ;;  %v891_v41 = vmax.bf16 %v890_v32, %v673_v27  ;;  %v767_v50 = vld [vmem:[%s2776_s18 + $0x468] sm:$0xff]  ;;  %v721_v52 = vld [vmem:[%s2776_s18 + $0x2f8] sm:$0xff]  ;;  %v752_v54 = vld [vmem:[%s2776_s18 + $0x3f0] sm:$0xff] }
 0x109   : > { %v872_v42 = vmax.bf16 %v871_v33, %v750_v29  ;;  %v885_v44 = vmax.bf16 %v884_v35, %v704_v31  ;;  %909 = vst [vmem:[%s2824_s6 + $0x58] sm:$0xff] %v865_v37  ;;  %v737_v57 = vld [vmem:[%s2776_s18 + $0x378] sm:$0xff]  ;;  %v768_v59 = vld [vmem:[%s2776_s18 + $0x470] sm:$0xff] }
 0x10a   : > { %v879_v46 = vmax.bf16 %v878_v39, %v735_v34  ;;  %v892_v48 = vmax.bf16 %v891_v41, %v689_v36  ;;  %v753_v62 = vld [vmem:[%s2776_s18 + $0x3f8] sm:$0xff] }
 0x10b   : > { %v873_v49 = vmax.bf16 %v872_v42, %v766_v38  ;;  %v886_v51 = vmax.bf16 %v885_v44, %v720_v40  ;;  %v769_v1 = vld [vmem:[%s2776_s18 + $0x478] sm:$0xff] }
 0x10c   : > { %v880_v53 = vmax.bf16 %v879_v46, %v751_v43  ;;  %v893_v55 = vmax.bf16 %v892_v48, %v705_v45 }
 0x10d   : > { %910 = vst [vmem:[%s2824_s6 + $0x60] sm:$0xff] %v873_v49  ;;  %v887_v56 = vmax.bf16 %v886_v51, %v736_v47 }
 0x10e   : > { %v881_v58 = vmax.bf16 %v880_v53, %v767_v50  ;;  %v894_v60 = vmax.bf16 %v893_v55, %v721_v52 }
 0x10f   : > { %v888_v61 = vmax.bf16 %v887_v56, %v752_v54 }
 0x110   : > { %911 = vst [vmem:[%s2824_s6 + $0x68] sm:$0xff] %v881_v58  ;;  %v895_v63 = vmax.bf16 %v894_v60, %v737_v57  ;;  %920 = sbr.rel (!%p2231_p5) target bundleno = 444 (0x1bc), region = 94 }
 0x111   : > { %v889_v0 = vmax.bf16 %v888_v61, %v768_v59 }
 0x112   : > { %v896_v2 = vmax.bf16 %v895_v63, %v753_v62 }
 0x113   : > { %912 = vst [vmem:[%s2824_s6 + $0x70] sm:$0xff] %v889_v0 }
 0x114   : > { %v897_v3 = vmax.bf16 %v896_v2, %v769_v1 }
 0x116   : > { %913 = vst [vmem:[%s2824_s6 + $0x78] sm:$0xff] %v897_v3 }
 0x117   : > { %s3410_s19 = smov (!%p923_p1, %s922_s19), 32 }
 0x118   : > { %s1583_s29 = sshll.u32 %s3410_s19, 6  ;;  %s2954_s27 = sshll.u32 %s3410_s19, 2 }
 0x119   : > { %p1587_p2 = scmp.eq.s32.totalorder %s1583_s29, 0 }
 0x11a   : > { %p933_p3 = scmp.lt.u32.totalorder (!%p1587_p2), %s2954_s27, 8 }
 0x11b   : > { %932 = sbr.rel (%p1587_p2) target bundleno = 444 (0x1bc), region = 98 }
 0x122   : > { %936 = sbr.rel (%p933_p3) target bundleno = 435 (0x1b3), region = 102  ;;  %s2958_s14 = sand.u32 (!%p933_p3), 7, %s2954_s27  }
 0x123   : > { %p952_p5 = scmp.eq.s32.totalorder (!%p933_p3), %s2958_s14, 0  ;;  %p1588_p4 = scmp.ne.s32.totalorder (!%p933_p3), %s2958_s14, 0 }
 0x129   : > { %955 = sbr.rel (%p1588_p4) target bundleno = 364 (0x16c), region = 117  ;;  %s956_s9 = sshrl.u32 (!%p1588_p4), %s2954_s27, 3 }
 0x12a   : > { %s2965_s28 = sshrl.u32 (!%p1588_p4), %s956_s9, 6 }
 0x12b   : > { %p1589_p6 = scmp.le.s32.totalorder (!%p1588_p4), %s2965_s28, 0 }
 0x130   : > { %1479 = sbr.rel (%p1589_p6) target bundleno = 344 (0x158), region = 265  ;;  %s3386_s30 = smov (!%p1589_p6), %s2952_s23 }
 0x131   : > { %s3387_s11 = smov (!%p1589_p6), %s2824_s6  ;;  %s2974_s12 = smov (!%p1589_p6), 0  }
 0x132   : > { %s2976_s15 = smov (!%p1589_p6), 0  }
 0x137 LB: >> { %v969_v4 = vld [vmem:[%s2128_s11] sm:$0xff]  ;;  %v971_v5 = vld [vmem:[%s2128_s11 + $0x8] sm:$0xff]  ;;  %v973_v6 = vld [vmem:[%s2128_s11 + $0x10] sm:$0xff]  ;;  %s1097_s2 = sadd.s32 1, %s2132_s12  ;;  %s963_s15 = sadd.s32 1, %s2136_s15   ;;  %s2136_s15 = sphi %s2976_s15, %s963_s15   ;;  %s2132_s12 = sphi %s2974_s12, %s3390_s12   ;;  %s2128_s11 = sphi %s3387_s11, %s3389_s11   ;;  %s2124_s30 = sphi %s3386_s30, %s3388_s30  }
 0x138   : >> { %970 = vst [vmem:[%s2124_s30] sm:$0xff] %v969_v4  ;;  %972 = vst [vmem:[%s2124_s30 + $0x8] sm:$0xff] %v971_v5  ;;  %v975_v7 = vld [vmem:[%s2128_s11 + $0x18] sm:$0xff]  ;;  %v977_v8 = vld [vmem:[%s2128_s11 + $0x20] sm:$0xff]  ;;  %p1098_p7 = scmp.ge.s32.totalorder %s1097_s2, %s2965_s28  ;;  %p962_p8 = scmp.ge.s32.totalorder %s963_s15, %s2965_s28 }
 0x139   : >> { %974 = vst [vmem:[%s2124_s30 + $0x10] sm:$0xff] %v973_v6  ;;  %v979_v9 = vld [vmem:[%s2128_s11 + $0x28] sm:$0xff]  ;;  %976 = vst [vmem:[%s2124_s30 + $0x18] sm:$0xff] %v975_v7  ;;  %v981_v10 = vld [vmem:[%s2128_s11 + $0x30] sm:$0xff] }
 0x13a   : >> { %978 = vst [vmem:[%s2124_s30 + $0x20] sm:$0xff] %v977_v8  ;;  %980 = vst [vmem:[%s2124_s30 + $0x28] sm:$0xff] %v979_v9  ;;  %v983_v11 = vld [vmem:[%s2128_s11 + $0x38] sm:$0xff]  ;;  %v985_v12 = vld [vmem:[%s2128_s11 + $0x40] sm:$0xff]  ;;  %s3412_s2 = smov (%p1098_p7, %s1097_s2), 0 }
 0x13b   : >> { %982 = vst [vmem:[%s2124_s30 + $0x30] sm:$0xff] %v981_v10  ;;  %984 = vst [vmem:[%s2124_s30 + $0x38] sm:$0xff] %v983_v11  ;;  %v987_v13 = vld [vmem:[%s2128_s11 + $0x48] sm:$0xff]  ;;  %v989_v14 = vld [vmem:[%s2128_s11 + $0x50] sm:$0xff]  ;;  %s1590_s5 = sshll.u32 %s3412_s2, 9  ;;  %s3390_s12 = smov %s3412_s2 }
 0x13c   : >> { %986 = vst [vmem:[%s2124_s30 + $0x40] sm:$0xff] %v985_v12  ;;  %v991_v15 = vld [vmem:[%s2128_s11 + $0x58] sm:$0xff]  ;;  %988 = vst [vmem:[%s2124_s30 + $0x48] sm:$0xff] %v987_v13  ;;  %v993_v16 = vld [vmem:[%s2128_s11 + $0x60] sm:$0xff]  ;;  %s3032_s16 = scalar_lea.vmem %s2824_s6, %s1590_s5 [#allocation3]   ;;  %s3035_s17 = scalar_lea.vmem %s2952_s23, %s1590_s5  }
 0x13d   : >> { %990 = vst [vmem:[%s2124_s30 + $0x50] sm:$0xff] %v989_v14  ;;  %992 = vst [vmem:[%s2124_s30 + $0x58] sm:$0xff] %v991_v15  ;;  %v995_v17 = vld [vmem:[%s2128_s11 + $0x68] sm:$0xff]  ;;  %v997_v18 = vld [vmem:[%s2128_s11 + $0x70] sm:$0xff] }
 0x13e   : >> { %994 = vst [vmem:[%s2124_s30 + $0x60] sm:$0xff] %v993_v16  ;;  %996 = vst [vmem:[%s2124_s30 + $0x68] sm:$0xff] %v995_v17  ;;  %v999_v19 = vld [vmem:[%s2128_s11 + $0x78] sm:$0xff]  ;;  %v1001_v20 = vld [vmem:[%s2128_s11 + $0x80] sm:$0xff] }
 0x13f   : >> { %998 = vst [vmem:[%s2124_s30 + $0x70] sm:$0xff] %v997_v18  ;;  %v1003_v21 = vld [vmem:[%s2128_s11 + $0x88] sm:$0xff]  ;;  %1000 = vst [vmem:[%s2124_s30 + $0x78] sm:$0xff] %v999_v19  ;;  %v1005_v22 = vld [vmem:[%s2128_s11 + $0x90] sm:$0xff] }
 0x140   : >> { %1002 = vst [vmem:[%s2124_s30 + $0x80] sm:$0xff] %v1001_v20  ;;  %1004 = vst [vmem:[%s2124_s30 + $0x88] sm:$0xff] %v1003_v21  ;;  %v1007_v23 = vld [vmem:[%s2128_s11 + $0x98] sm:$0xff]  ;;  %v1009_v24 = vld [vmem:[%s2128_s11 + $0xa0] sm:$0xff] }
 0x141   : >> { %1006 = vst [vmem:[%s2124_s30 + $0x90] sm:$0xff] %v1005_v22  ;;  %1008 = vst [vmem:[%s2124_s30 + $0x98] sm:$0xff] %v1007_v23  ;;  %v1011_v25 = vld [vmem:[%s2128_s11 + $0xa8] sm:$0xff]  ;;  %v1013_v26 = vld [vmem:[%s2128_s11 + $0xb0] sm:$0xff] }
 0x142   : >> { %1010 = vst [vmem:[%s2124_s30 + $0xa0] sm:$0xff] %v1009_v24  ;;  %v1015_v27 = vld [vmem:[%s2128_s11 + $0xb8] sm:$0xff]  ;;  %1012 = vst [vmem:[%s2124_s30 + $0xa8] sm:$0xff] %v1011_v25  ;;  %v1017_v28 = vld [vmem:[%s2128_s11 + $0xc0] sm:$0xff] }
 0x143   : >> { %1014 = vst [vmem:[%s2124_s30 + $0xb0] sm:$0xff] %v1013_v26  ;;  %1016 = vst [vmem:[%s2124_s30 + $0xb8] sm:$0xff] %v1015_v27  ;;  %v1019_v29 = vld [vmem:[%s2128_s11 + $0xc8] sm:$0xff]  ;;  %v1021_v30 = vld [vmem:[%s2128_s11 + $0xd0] sm:$0xff] }
 0x144   : >> { %1018 = vst [vmem:[%s2124_s30 + $0xc0] sm:$0xff] %v1017_v28  ;;  %1020 = vst [vmem:[%s2124_s30 + $0xc8] sm:$0xff] %v1019_v29  ;;  %v1023_v31 = vld [vmem:[%s2128_s11 + $0xd8] sm:$0xff]  ;;  %v1025_v32 = vld [vmem:[%s2128_s11 + $0xe0] sm:$0xff] }
 0x145   : >> { %1022 = vst [vmem:[%s2124_s30 + $0xd0] sm:$0xff] %v1021_v30  ;;  %v1027_v33 = vld [vmem:[%s2128_s11 + $0xe8] sm:$0xff]  ;;  %1024 = vst [vmem:[%s2124_s30 + $0xd8] sm:$0xff] %v1023_v31  ;;  %v1029_v34 = vld [vmem:[%s2128_s11 + $0xf0] sm:$0xff] }
 0x146   : >> { %1026 = vst [vmem:[%s2124_s30 + $0xe0] sm:$0xff] %v1025_v32  ;;  %1028 = vst [vmem:[%s2124_s30 + $0xe8] sm:$0xff] %v1027_v33  ;;  %v1031_v35 = vld [vmem:[%s2128_s11 + $0xf8] sm:$0xff]  ;;  %v1033_v36 = vld [vmem:[%s2128_s11 + $0x100] sm:$0xff] }
 0x147   : >> { %1030 = vst [vmem:[%s2124_s30 + $0xf0] sm:$0xff] %v1029_v34  ;;  %1032 = vst [vmem:[%s2124_s30 + $0xf8] sm:$0xff] %v1031_v35  ;;  %v1035_v37 = vld [vmem:[%s2128_s11 + $0x108] sm:$0xff]  ;;  %v1037_v38 = vld [vmem:[%s2128_s11 + $0x110] sm:$0xff] }
 0x148   : >> { %1034 = vst [vmem:[%s2124_s30 + $0x100] sm:$0xff] %v1033_v36  ;;  %v1039_v39 = vld [vmem:[%s2128_s11 + $0x118] sm:$0xff]  ;;  %1036 = vst [vmem:[%s2124_s30 + $0x108] sm:$0xff] %v1035_v37  ;;  %v1041_v40 = vld [vmem:[%s2128_s11 + $0x120] sm:$0xff] }
 0x149   : >> { %1038 = vst [vmem:[%s2124_s30 + $0x110] sm:$0xff] %v1037_v38  ;;  %1040 = vst [vmem:[%s2124_s30 + $0x118] sm:$0xff] %v1039_v39  ;;  %v1043_v41 = vld [vmem:[%s2128_s11 + $0x128] sm:$0xff]  ;;  %v1045_v42 = vld [vmem:[%s2128_s11 + $0x130] sm:$0xff] }
 0x14a   : >> { %1042 = vst [vmem:[%s2124_s30 + $0x120] sm:$0xff] %v1041_v40  ;;  %1044 = vst [vmem:[%s2124_s30 + $0x128] sm:$0xff] %v1043_v41  ;;  %v1047_v43 = vld [vmem:[%s2128_s11 + $0x138] sm:$0xff]  ;;  %v1049_v44 = vld [vmem:[%s2128_s11 + $0x140] sm:$0xff] }
 0x14b   : >> { %1046 = vst [vmem:[%s2124_s30 + $0x130] sm:$0xff] %v1045_v42  ;;  %v1051_v45 = vld [vmem:[%s2128_s11 + $0x148] sm:$0xff]  ;;  %1048 = vst [vmem:[%s2124_s30 + $0x138] sm:$0xff] %v1047_v43  ;;  %v1053_v46 = vld [vmem:[%s2128_s11 + $0x150] sm:$0xff] }
 0x14c   : >> { %1050 = vst [vmem:[%s2124_s30 + $0x140] sm:$0xff] %v1049_v44  ;;  %1052 = vst [vmem:[%s2124_s30 + $0x148] sm:$0xff] %v1051_v45  ;;  %v1055_v47 = vld [vmem:[%s2128_s11 + $0x158] sm:$0xff]  ;;  %v1057_v48 = vld [vmem:[%s2128_s11 + $0x160] sm:$0xff] }
 0x14d   : >> { %1054 = vst [vmem:[%s2124_s30 + $0x150] sm:$0xff] %v1053_v46  ;;  %1056 = vst [vmem:[%s2124_s30 + $0x158] sm:$0xff] %v1055_v47  ;;  %v1059_v49 = vld [vmem:[%s2128_s11 + $0x168] sm:$0xff]  ;;  %v1061_v50 = vld [vmem:[%s2128_s11 + $0x170] sm:$0xff] }
 0x14e   : >> { %1058 = vst [vmem:[%s2124_s30 + $0x160] sm:$0xff] %v1057_v48  ;;  %v1063_v51 = vld [vmem:[%s2128_s11 + $0x178] sm:$0xff]  ;;  %1060 = vst [vmem:[%s2124_s30 + $0x168] sm:$0xff] %v1059_v49  ;;  %v1065_v52 = vld [vmem:[%s2128_s11 + $0x180] sm:$0xff] }
 0x14f   : >> { %1062 = vst [vmem:[%s2124_s30 + $0x170] sm:$0xff] %v1061_v50  ;;  %1064 = vst [vmem:[%s2124_s30 + $0x178] sm:$0xff] %v1063_v51  ;;  %v1067_v53 = vld [vmem:[%s2128_s11 + $0x188] sm:$0xff]  ;;  %v1069_v54 = vld [vmem:[%s2128_s11 + $0x190] sm:$0xff] }
 0x150   : >> { %1066 = vst [vmem:[%s2124_s30 + $0x180] sm:$0xff] %v1065_v52  ;;  %1068 = vst [vmem:[%s2124_s30 + $0x188] sm:$0xff] %v1067_v53  ;;  %v1071_v55 = vld [vmem:[%s2128_s11 + $0x198] sm:$0xff]  ;;  %v1073_v56 = vld [vmem:[%s2128_s11 + $0x1a0] sm:$0xff] }
 0x151   : >> { %1070 = vst [vmem:[%s2124_s30 + $0x190] sm:$0xff] %v1069_v54  ;;  %v1075_v57 = vld [vmem:[%s2128_s11 + $0x1a8] sm:$0xff]  ;;  %1072 = vst [vmem:[%s2124_s30 + $0x198] sm:$0xff] %v1071_v55  ;;  %v1077_v58 = vld [vmem:[%s2128_s11 + $0x1b0] sm:$0xff]  ;;  %965 = sbr.rel (!%p962_p8) target bundleno = 311 (0x137), region = 271 }
 0x152   : >> { %1074 = vst [vmem:[%s2124_s30 + $0x1a0] sm:$0xff] %v1073_v56  ;;  %1076 = vst [vmem:[%s2124_s30 + $0x1a8] sm:$0xff] %v1075_v57  ;;  %v1079_v59 = vld [vmem:[%s2128_s11 + $0x1b8] sm:$0xff]  ;;  %v1081_v60 = vld [vmem:[%s2128_s11 + $0x1c0] sm:$0xff] }
 0x153   : >> { %1078 = vst [vmem:[%s2124_s30 + $0x1b0] sm:$0xff] %v1077_v58  ;;  %1080 = vst [vmem:[%s2124_s30 + $0x1b8] sm:$0xff] %v1079_v59  ;;  %v1083_v61 = vld [vmem:[%s2128_s11 + $0x1c8] sm:$0xff]  ;;  %v1085_v62 = vld [vmem:[%s2128_s11 + $0x1d0] sm:$0xff] }
 0x154   : >> { %1082 = vst [vmem:[%s2124_s30 + $0x1c0] sm:$0xff] %v1081_v60  ;;  %v1087_v63 = vld [vmem:[%s2128_s11 + $0x1d8] sm:$0xff]  ;;  %1084 = vst [vmem:[%s2124_s30 + $0x1c8] sm:$0xff] %v1083_v61  ;;  %v1089_v0 = vld [vmem:[%s2128_s11 + $0x1e0] sm:$0xff] }
 0x155   : >> { %1086 = vst [vmem:[%s2124_s30 + $0x1d0] sm:$0xff] %v1085_v62  ;;  %1088 = vst [vmem:[%s2124_s30 + $0x1d8] sm:$0xff] %v1087_v63  ;;  %v1091_v1 = vld [vmem:[%s2128_s11 + $0x1e8] sm:$0xff]  ;;  %v1093_v2 = vld [vmem:[%s2128_s11 + $0x1f0] sm:$0xff] }
 0x156   : >> { %1090 = vst [vmem:[%s2124_s30 + $0x1e0] sm:$0xff] %v1089_v0  ;;  %1092 = vst [vmem:[%s2124_s30 + $0x1e8] sm:$0xff] %v1091_v1  ;;  %v1095_v3 = vld [vmem:[%s2128_s11 + $0x1f8] sm:$0xff]  ;;  %s3389_s11 = smov %s3032_s16 }
 0x157   : >> { %1094 = vst [vmem:[%s2124_s30 + $0x1f0] sm:$0xff] %v1093_v2  ;;  %1096 = vst [vmem:[%s2124_s30 + $0x1f8] sm:$0xff] %v1095_v3  ;;  %s3388_s30 = smov %s3035_s17 }
 0x158 PF: > { %s3141_s26 = sand.u32 63, %s956_s9   ;;  %s1616_s3 = sshll.u32 %s2965_s28, 13 }
 0x159   : > { %s1108_s24 = sshra.s32 %s1616_s3, 4  ;;  %p1595_p9 = scmp.le.s32.totalorder %s3141_s26, 0 }
 0x15a   : > { %s1109_s4 = scalar_lea.vmem %s2824_s6, %s1108_s24 [#allocation3]   ;;  %s1112_s18 = scalar_lea.vmem %s2952_s23, %s1108_s24  }
 0x15b   : > { %1493 = sbr.rel (%p1595_p9) target bundleno = 364 (0x16c), region = 276  ;;  %s2138_s8 = smov (!%p1595_p9), %s1112_s18  }
 0x15c   : > { %s2142_s22 = smov (!%p1595_p9), %s1109_s4   ;;  %s2146_s25 = smov (!%p1595_p9), 0  }
 0x15d   : > { %s2150_s19 = smov (!%p1595_p9), 0  }
 0x162 LB: >> { %v1124_v4 = vld [vmem:[%s2144_s22] sm:$0xff]  ;;  %s1126_s20 = sadd.s32 1, %s2148_s25  ;;  %s1118_s19 = sadd.s32 1, %s2152_s19   ;;  %s2152_s19 = sphi %s2150_s19, %s1118_s19   ;;  %s2148_s25 = sphi %s2146_s25, %s2147_s25   ;;  %s2144_s22 = sphi %s2142_s22, %s1131_s22   ;;  %s2140_s8 = sphi %s2138_s8, %s1132_s8  }
 0x163   : >> { %1125 = vst [vmem:[%s2140_s8] sm:$0xff] %v1124_v4  ;;  %p1127_p10 = scmp.ge.s32.totalorder %s1126_s20, %s3141_s26  ;;  %p1117_p11 = scmp.ge.s32.totalorder %s1118_s19, %s3141_s26 }
 0x165   : >> { %s3414_s20 = smov (%p1127_p10, %s1126_s20), 0  ;;  %1120 = sbr.rel (!%p1117_p11) target bundleno = 354 (0x162), region = 282 }
 0x166   : >> { %s1596_s21 = sshll.u32 %s3414_s20, 3  ;;  %s2147_s25 = smov %s3414_s20  }
 0x167   : >> { %s1131_s22 = scalar_lea.vmem %s1109_s4, %s1596_s21 [#allocation3]   ;;  %s1132_s8 = scalar_lea.vmem %s1112_s18, %s1596_s21  }
 0x16c PF: > { %1135 = sbr.rel (%p952_p5) target bundleno = 435 (0x1b3), region = 135  ;;  %s3153_s29 = ssub.s32 (!%p952_p5), %s2954_s27, %s2958_s14 }
 0x16d   : > { %s1141_s9 = sshrl.u32 (!%p952_p5), %s2954_s27, 3  ;;  %s1138_s28 = scalar_lea.vmem (!%p952_p5), %s2824_s6, %s3153_s29 [#allocation3] }
 0x16e   : > { %s1140_s30 = scalar_lea.vmem (!%p952_p5), %s2952_s23, %s3153_s29  ;;  %s3162_s11 = sshrl.u32 (!%p952_p5), %s1141_s9, 6 }
 0x16f   : > { %p1598_p12 = scmp.le.s32.totalorder (!%p952_p5), %s3162_s11, 0 }
 0x173   : > { %1507 = sbr.rel (%p1598_p12) target bundleno = 411 (0x19b), region = 287  ;;  %s3391_s12 = smov (!%p1598_p12), %s2952_s23 }
 0x174   : > { %s3392_s15 = smov (!%p1598_p12), %s2824_s6  ;;  %s3171_s2 = smov (!%p1598_p12), 0  }
 0x175   : > { %s3173_s5 = smov (!%p1598_p12), 0  }
 0x17a LB: >> { %v1154_v5 = vld [vmem:[%s2160_s15] sm:$0xff]  ;;  %v1156_v6 = vld [vmem:[%s2160_s15 + $0x8] sm:$0xff]  ;;  %v1158_v7 = vld [vmem:[%s2160_s15 + $0x10] sm:$0xff]  ;;  %s1282_s16 = sadd.s32 1, %s2164_s2  ;;  %s1148_s5 = sadd.s32 1, %s2168_s5   ;;  %s2168_s5 = sphi %s3173_s5, %s1148_s5   ;;  %s2164_s2 = sphi %s3171_s2, %s3395_s2   ;;  %s2160_s15 = sphi %s3392_s15, %s3394_s15   ;;  %s2156_s12 = sphi %s3391_s12, %s3393_s12  }
 0x17b   : >> { %1155 = vst [vmem:[%s2156_s12] sm:$0xff] %v1154_v5  ;;  %1157 = vst [vmem:[%s2156_s12 + $0x8] sm:$0xff] %v1156_v6  ;;  %v1160_v8 = vld [vmem:[%s2160_s15 + $0x18] sm:$0xff]  ;;  %v1162_v9 = vld [vmem:[%s2160_s15 + $0x20] sm:$0xff]  ;;  %p1283_p13 = scmp.ge.s32.totalorder %s1282_s16, %s3162_s11  ;;  %p1147_p0 = scmp.ge.s32.totalorder %s1148_s5, %s3162_s11 }
 0x17c   : >> { %1159 = vst [vmem:[%s2156_s12 + $0x10] sm:$0xff] %v1158_v7  ;;  %v1164_v10 = vld [vmem:[%s2160_s15 + $0x28] sm:$0xff]  ;;  %1161 = vst [vmem:[%s2156_s12 + $0x18] sm:$0xff] %v1160_v8  ;;  %v1166_v11 = vld [vmem:[%s2160_s15 + $0x30] sm:$0xff] }
 0x17d   : >> { %1163 = vst [vmem:[%s2156_s12 + $0x20] sm:$0xff] %v1162_v9  ;;  %1165 = vst [vmem:[%s2156_s12 + $0x28] sm:$0xff] %v1164_v10  ;;  %v1168_v12 = vld [vmem:[%s2160_s15 + $0x38] sm:$0xff]  ;;  %v1170_v13 = vld [vmem:[%s2160_s15 + $0x40] sm:$0xff]  ;;  %s3416_s16 = smov (%p1283_p13, %s1282_s16), 0 }
 0x17e   : >> { %1167 = vst [vmem:[%s2156_s12 + $0x30] sm:$0xff] %v1166_v11  ;;  %1169 = vst [vmem:[%s2156_s12 + $0x38] sm:$0xff] %v1168_v12  ;;  %v1172_v14 = vld [vmem:[%s2160_s15 + $0x48] sm:$0xff]  ;;  %v1174_v15 = vld [vmem:[%s2160_s15 + $0x50] sm:$0xff]  ;;  %s1599_s17 = sshll.u32 %s3416_s16, 9  ;;  %s3395_s2 = smov %s3416_s16 }
 0x17f   : >> { %1171 = vst [vmem:[%s2156_s12 + $0x40] sm:$0xff] %v1170_v13  ;;  %v1176_v16 = vld [vmem:[%s2160_s15 + $0x58] sm:$0xff]  ;;  %1173 = vst [vmem:[%s2156_s12 + $0x48] sm:$0xff] %v1172_v14  ;;  %v1178_v17 = vld [vmem:[%s2160_s15 + $0x60] sm:$0xff]  ;;  %s3229_s26 = scalar_lea.vmem %s2824_s6, %s1599_s17 [#allocation3]   ;;  %s3232_s3 = scalar_lea.vmem %s2952_s23, %s1599_s17  }
 0x180   : >> { %1175 = vst [vmem:[%s2156_s12 + $0x50] sm:$0xff] %v1174_v15  ;;  %1177 = vst [vmem:[%s2156_s12 + $0x58] sm:$0xff] %v1176_v16  ;;  %v1180_v18 = vld [vmem:[%s2160_s15 + $0x68] sm:$0xff]  ;;  %v1182_v19 = vld [vmem:[%s2160_s15 + $0x70] sm:$0xff] }
 0x181   : >> { %1179 = vst [vmem:[%s2156_s12 + $0x60] sm:$0xff] %v1178_v17  ;;  %1181 = vst [vmem:[%s2156_s12 + $0x68] sm:$0xff] %v1180_v18  ;;  %v1184_v20 = vld [vmem:[%s2160_s15 + $0x78] sm:$0xff]  ;;  %v1186_v21 = vld [vmem:[%s2160_s15 + $0x80] sm:$0xff] }
 0x182   : >> { %1183 = vst [vmem:[%s2156_s12 + $0x70] sm:$0xff] %v1182_v19  ;;  %v1188_v22 = vld [vmem:[%s2160_s15 + $0x88] sm:$0xff]  ;;  %1185 = vst [vmem:[%s2156_s12 + $0x78] sm:$0xff] %v1184_v20  ;;  %v1190_v23 = vld [vmem:[%s2160_s15 + $0x90] sm:$0xff] }
 0x183   : >> { %1187 = vst [vmem:[%s2156_s12 + $0x80] sm:$0xff] %v1186_v21  ;;  %1189 = vst [vmem:[%s2156_s12 + $0x88] sm:$0xff] %v1188_v22  ;;  %v1192_v24 = vld [vmem:[%s2160_s15 + $0x98] sm:$0xff]  ;;  %v1194_v25 = vld [vmem:[%s2160_s15 + $0xa0] sm:$0xff] }
 0x184   : >> { %1191 = vst [vmem:[%s2156_s12 + $0x90] sm:$0xff] %v1190_v23  ;;  %1193 = vst [vmem:[%s2156_s12 + $0x98] sm:$0xff] %v1192_v24  ;;  %v1196_v26 = vld [vmem:[%s2160_s15 + $0xa8] sm:$0xff]  ;;  %v1198_v27 = vld [vmem:[%s2160_s15 + $0xb0] sm:$0xff] }
 0x185   : >> { %1195 = vst [vmem:[%s2156_s12 + $0xa0] sm:$0xff] %v1194_v25  ;;  %v1200_v28 = vld [vmem:[%s2160_s15 + $0xb8] sm:$0xff]  ;;  %1197 = vst [vmem:[%s2156_s12 + $0xa8] sm:$0xff] %v1196_v26  ;;  %v1202_v29 = vld [vmem:[%s2160_s15 + $0xc0] sm:$0xff] }
 0x186   : >> { %1199 = vst [vmem:[%s2156_s12 + $0xb0] sm:$0xff] %v1198_v27  ;;  %1201 = vst [vmem:[%s2156_s12 + $0xb8] sm:$0xff] %v1200_v28  ;;  %v1204_v30 = vld [vmem:[%s2160_s15 + $0xc8] sm:$0xff]  ;;  %v1206_v31 = vld [vmem:[%s2160_s15 + $0xd0] sm:$0xff] }
 0x187   : >> { %1203 = vst [vmem:[%s2156_s12 + $0xc0] sm:$0xff] %v1202_v29  ;;  %1205 = vst [vmem:[%s2156_s12 + $0xc8] sm:$0xff] %v1204_v30  ;;  %v1208_v32 = vld [vmem:[%s2160_s15 + $0xd8] sm:$0xff]  ;;  %v1210_v33 = vld [vmem:[%s2160_s15 + $0xe0] sm:$0xff] }
 0x188   : >> { %1207 = vst [vmem:[%s2156_s12 + $0xd0] sm:$0xff] %v1206_v31  ;;  %v1212_v34 = vld [vmem:[%s2160_s15 + $0xe8] sm:$0xff]  ;;  %1209 = vst [vmem:[%s2156_s12 + $0xd8] sm:$0xff] %v1208_v32  ;;  %v1214_v35 = vld [vmem:[%s2160_s15 + $0xf0] sm:$0xff] }
 0x189   : >> { %1211 = vst [vmem:[%s2156_s12 + $0xe0] sm:$0xff] %v1210_v33  ;;  %1213 = vst [vmem:[%s2156_s12 + $0xe8] sm:$0xff] %v1212_v34  ;;  %v1216_v36 = vld [vmem:[%s2160_s15 + $0xf8] sm:$0xff]  ;;  %v1218_v37 = vld [vmem:[%s2160_s15 + $0x100] sm:$0xff] }
 0x18a   : >> { %1215 = vst [vmem:[%s2156_s12 + $0xf0] sm:$0xff] %v1214_v35  ;;  %1217 = vst [vmem:[%s2156_s12 + $0xf8] sm:$0xff] %v1216_v36  ;;  %v1220_v38 = vld [vmem:[%s2160_s15 + $0x108] sm:$0xff]  ;;  %v1222_v39 = vld [vmem:[%s2160_s15 + $0x110] sm:$0xff] }
 0x18b   : >> { %1219 = vst [vmem:[%s2156_s12 + $0x100] sm:$0xff] %v1218_v37  ;;  %v1224_v40 = vld [vmem:[%s2160_s15 + $0x118] sm:$0xff]  ;;  %1221 = vst [vmem:[%s2156_s12 + $0x108] sm:$0xff] %v1220_v38  ;;  %v1226_v41 = vld [vmem:[%s2160_s15 + $0x120] sm:$0xff] }
 0x18c   : >> { %1223 = vst [vmem:[%s2156_s12 + $0x110] sm:$0xff] %v1222_v39  ;;  %1225 = vst [vmem:[%s2156_s12 + $0x118] sm:$0xff] %v1224_v40  ;;  %v1228_v42 = vld [vmem:[%s2160_s15 + $0x128] sm:$0xff]  ;;  %v1230_v43 = vld [vmem:[%s2160_s15 + $0x130] sm:$0xff] }
 0x18d   : >> { %1227 = vst [vmem:[%s2156_s12 + $0x120] sm:$0xff] %v1226_v41  ;;  %1229 = vst [vmem:[%s2156_s12 + $0x128] sm:$0xff] %v1228_v42  ;;  %v1232_v44 = vld [vmem:[%s2160_s15 + $0x138] sm:$0xff]  ;;  %v1234_v45 = vld [vmem:[%s2160_s15 + $0x140] sm:$0xff] }
 0x18e   : >> { %1231 = vst [vmem:[%s2156_s12 + $0x130] sm:$0xff] %v1230_v43  ;;  %v1236_v46 = vld [vmem:[%s2160_s15 + $0x148] sm:$0xff]  ;;  %1233 = vst [vmem:[%s2156_s12 + $0x138] sm:$0xff] %v1232_v44  ;;  %v1238_v47 = vld [vmem:[%s2160_s15 + $0x150] sm:$0xff] }
 0x18f   : >> { %1235 = vst [vmem:[%s2156_s12 + $0x140] sm:$0xff] %v1234_v45  ;;  %1237 = vst [vmem:[%s2156_s12 + $0x148] sm:$0xff] %v1236_v46  ;;  %v1240_v48 = vld [vmem:[%s2160_s15 + $0x158] sm:$0xff]  ;;  %v1242_v49 = vld [vmem:[%s2160_s15 + $0x160] sm:$0xff] }
 0x190   : >> { %1239 = vst [vmem:[%s2156_s12 + $0x150] sm:$0xff] %v1238_v47  ;;  %1241 = vst [vmem:[%s2156_s12 + $0x158] sm:$0xff] %v1240_v48  ;;  %v1244_v50 = vld [vmem:[%s2160_s15 + $0x168] sm:$0xff]  ;;  %v1246_v51 = vld [vmem:[%s2160_s15 + $0x170] sm:$0xff] }
 0x191   : >> { %1243 = vst [vmem:[%s2156_s12 + $0x160] sm:$0xff] %v1242_v49  ;;  %v1248_v52 = vld [vmem:[%s2160_s15 + $0x178] sm:$0xff]  ;;  %1245 = vst [vmem:[%s2156_s12 + $0x168] sm:$0xff] %v1244_v50  ;;  %v1250_v53 = vld [vmem:[%s2160_s15 + $0x180] sm:$0xff] }
 0x192   : >> { %1247 = vst [vmem:[%s2156_s12 + $0x170] sm:$0xff] %v1246_v51  ;;  %1249 = vst [vmem:[%s2156_s12 + $0x178] sm:$0xff] %v1248_v52  ;;  %v1252_v54 = vld [vmem:[%s2160_s15 + $0x188] sm:$0xff]  ;;  %v1254_v55 = vld [vmem:[%s2160_s15 + $0x190] sm:$0xff] }
 0x193   : >> { %1251 = vst [vmem:[%s2156_s12 + $0x180] sm:$0xff] %v1250_v53  ;;  %1253 = vst [vmem:[%s2156_s12 + $0x188] sm:$0xff] %v1252_v54  ;;  %v1256_v56 = vld [vmem:[%s2160_s15 + $0x198] sm:$0xff]  ;;  %v1258_v57 = vld [vmem:[%s2160_s15 + $0x1a0] sm:$0xff] }
 0x194   : >> { %1255 = vst [vmem:[%s2156_s12 + $0x190] sm:$0xff] %v1254_v55  ;;  %v1260_v58 = vld [vmem:[%s2160_s15 + $0x1a8] sm:$0xff]  ;;  %1257 = vst [vmem:[%s2156_s12 + $0x198] sm:$0xff] %v1256_v56  ;;  %v1262_v59 = vld [vmem:[%s2160_s15 + $0x1b0] sm:$0xff]  ;;  %1150 = sbr.rel (!%p1147_p0) target bundleno = 378 (0x17a), region = 293 }
 0x195   : >> { %1259 = vst [vmem:[%s2156_s12 + $0x1a0] sm:$0xff] %v1258_v57  ;;  %1261 = vst [vmem:[%s2156_s12 + $0x1a8] sm:$0xff] %v1260_v58  ;;  %v1264_v60 = vld [vmem:[%s2160_s15 + $0x1b8] sm:$0xff]  ;;  %v1266_v61 = vld [vmem:[%s2160_s15 + $0x1c0] sm:$0xff] }
 0x196   : >> { %1263 = vst [vmem:[%s2156_s12 + $0x1b0] sm:$0xff] %v1262_v59  ;;  %1265 = vst [vmem:[%s2156_s12 + $0x1b8] sm:$0xff] %v1264_v60  ;;  %v1268_v62 = vld [vmem:[%s2160_s15 + $0x1c8] sm:$0xff]  ;;  %v1270_v63 = vld [vmem:[%s2160_s15 + $0x1d0] sm:$0xff] }
 0x197   : >> { %1267 = vst [vmem:[%s2156_s12 + $0x1c0] sm:$0xff] %v1266_v61  ;;  %v1272_v0 = vld [vmem:[%s2160_s15 + $0x1d8] sm:$0xff]  ;;  %1269 = vst [vmem:[%s2156_s12 + $0x1c8] sm:$0xff] %v1268_v62  ;;  %v1274_v1 = vld [vmem:[%s2160_s15 + $0x1e0] sm:$0xff] }
 0x198   : >> { %1271 = vst [vmem:[%s2156_s12 + $0x1d0] sm:$0xff] %v1270_v63  ;;  %1273 = vst [vmem:[%s2156_s12 + $0x1d8] sm:$0xff] %v1272_v0  ;;  %v1276_v2 = vld [vmem:[%s2160_s15 + $0x1e8] sm:$0xff]  ;;  %v1278_v3 = vld [vmem:[%s2160_s15 + $0x1f0] sm:$0xff] }
 0x199   : >> { %1275 = vst [vmem:[%s2156_s12 + $0x1e0] sm:$0xff] %v1274_v1  ;;  %1277 = vst [vmem:[%s2156_s12 + $0x1e8] sm:$0xff] %v1276_v2  ;;  %v1280_v4 = vld [vmem:[%s2160_s15 + $0x1f8] sm:$0xff]  ;;  %s3394_s15 = smov %s3229_s26 }
 0x19a   : >> { %1279 = vst [vmem:[%s2156_s12 + $0x1f0] sm:$0xff] %v1278_v3  ;;  %1281 = vst [vmem:[%s2156_s12 + $0x1f8] sm:$0xff] %v1280_v4  ;;  %s3393_s12 = smov %s3232_s3 }
 0x19b PF: > { %s3338_s24 = sand.u32 63, %s1141_s9   ;;  %s1618_s4 = sshll.u32 %s3162_s11, 13 }
 0x19c   : > { %s1293_s18 = sshra.s32 %s1618_s4, 4  ;;  %p1604_p1 = scmp.le.s32.totalorder %s3338_s24, 0 }
 0x19d   : > { %s1294_s8 = scalar_lea.vmem %s2824_s6, %s1293_s18 [#allocation3]   ;;  %s1297_s22 = scalar_lea.vmem %s2952_s23, %s1293_s18  }
 0x19e   : > { %1521 = sbr.rel (%p1604_p1) target bundleno = 431 (0x1af), region = 298  ;;  %s2170_s25 = smov (!%p1604_p1), %s1297_s22  }
 0x19f   : > { %s2174_s19 = smov (!%p1604_p1), %s1294_s8   ;;  %s2178_s20 = smov (!%p1604_p1), 0  }
 0x1a0   : > { %s2182_s21 = smov (!%p1604_p1), 0  }
 0x1a5 LB: >> { %v1309_v5 = vld [vmem:[%s2176_s19] sm:$0xff]  ;;  %s1311_s9 = sadd.s32 1, %s2180_s20  ;;  %s1303_s21 = sadd.s32 1, %s2184_s21   ;;  %s2184_s21 = sphi %s2182_s21, %s1303_s21   ;;  %s2180_s20 = sphi %s2178_s20, %s2179_s20   ;;  %s2176_s19 = sphi %s2174_s19, %s1316_s19   ;;  %s2172_s25 = sphi %s2170_s25, %s1317_s25  }
 0x1a6   : >> { %1310 = vst [vmem:[%s2172_s25] sm:$0xff] %v1309_v5  ;;  %p1312_p2 = scmp.ge.s32.totalorder %s1311_s9, %s3338_s24  ;;  %p1302_p3 = scmp.ge.s32.totalorder %s1303_s21, %s3338_s24 }
 0x1a8   : >> { %s3418_s9 = smov (%p1312_p2, %s1311_s9), 0  ;;  %1305 = sbr.rel (!%p1302_p3) target bundleno = 421 (0x1a5), region = 304 }
 0x1a9   : >> { %s1605_s11 = sshll.u32 %s3418_s9, 3  ;;  %s2179_s20 = smov %s3418_s9  }
 0x1aa   : >> { %s1316_s19 = scalar_lea.vmem %s1294_s8, %s1605_s11 [#allocation3]   ;;  %s1317_s25 = scalar_lea.vmem %s1297_s22, %s1605_s11  }
 0x1af PF: > { %s2188_s12 = smov 0  }
 0x1b0   : > { %s1318_s15 = sshllo.u32 %s2188_s12, %s2958_s14 }
 0x1b1   : > { %v1327_v6 = vld [vmem:[%s1138_s28] sm:%s1318_s15] }
 0x1b2   : > { %1328 = vst [vmem:[%s1140_s30] sm:%s1318_s15] %v1327_v6 }
 0x1b3 PF: > { %p1607_p5 = scmp.ge.u32.totalorder %s2954_s27, 8 }
 0x1b4   : > { %s2189_s2 = smov (!%p1607_p5), 0  }
 0x1b5   : > { %939 = sbr.rel (%p1607_p5) target bundleno = 444 (0x1bc), region = 106  ;;  %s940_s5 = sshllo.u32 (!%p1607_p5), %s2189_s2, %s2954_s27 }
 0x1b6   : > { %v949_v7 = vld [vmem:[%s2824_s6] sm:%s940_s5] (!%p1607_p5) }
 0x1b7   : > { %950 = vst [vmem:[%s2952_s23] sm:%s940_s5] (!%p1607_p5), %v949_v7 }
 0x1bc PF: > { %p8_p4 = scmp.ge.s32.totalorder %s2219_s10, 7   ;;  %s3396_s6 = smov %s2052_s7 }
 0x1bd   : > { %s3397_s7 = smov %s2229_s13  ;;  %s3398_s8 = smov %s2219_s10 }
 0x1be   :  { %10 = sbr.rel (!%p8_p4) target bundleno = 2 (0x2), region = 315 }

// kernel: lenet_forward.7
= control target key start
LH: loop header
LB: loop body
LE: loop exit
PB: predicated region body
PF: predicated region fallthrough
CT: control target
= control target key end

     0   :  { %vm1527_vm0 = vcmask 949248   ;;  %vm1540_vm1 = vcmask 1041408   ;;  %s4199_s1 = inlined_call_operand.vmem [shape: bf16[500,810], index: 1, kind: input, shape index: {}]   ;;  %s4200_s0 = inlined_call_operand.vmem [shape: bf16[50,500], index: 0, kind: input, shape index: {}]   ;;  %s4201_s2 = inlined_call_operand.vmem [shape: f32[50,1], index: 2, kind: input, shape index: {}]   ;;  %s4202_s3 = inlined_call_operand.vmem [shape: bf16[50,810], index: 3, kind: output, shape index: {}]  }
   0x1   :  { %v2847_v0 = vld [vmem:[%s4199_s1 + $0x4] ss:$28 sps:$4 sm:$0xff]   ;;  %v2849_v1 = vld [vmem:[%s4199_s1 + $0xc] ss:$28 sps:$4 sm:$0xff]   ;;  %v2853_v4 = vld [vmem:[%s4199_s1 + $0x3c] ss:$28 sps:$4 sm:$0xff]  }
   0x2   :  { %1562 = vmatprep.subr.bf16.mxu0 %v2847_v0  ;;  %v2851_v2 = vld [vmem:[%s4199_s1] ss:$28 sps:$4 sm:$0xff]   ;;  %v2852_v3 = vld [vmem:[%s4199_s1 + $0x8] ss:$28 sps:$4 sm:$0xff]   ;;  %1704 = vmatprep.subr.bf16.mxu1 %v2849_v1  ;;  %v2857_v6 = vld [vmem:[%s4199_s1 + $0x38] ss:$28 sps:$4 sm:$0xff]  }
   0x3   :  { %1563 = vmatpush1.bf16.msra.mxu0 %v2851_v2  ;;  %1705 = vmatpush1.bf16.msra.mxu1 %v2852_v3  ;;  %v2855_v5 = vld [vmem:[%s4199_s1 + $0x44] ss:$28 sps:$4 sm:$0xff]   ;;  %v2859_v8 = vld [vmem:[%s4199_s1 + $0x74] ss:$28 sps:$4 sm:$0xff]   ;;  %v2861_v9 = vld [vmem:[%s4199_s1 + $0x7c] ss:$28 sps:$4 sm:$0xff]  }
   0x4   :  { %1564 = vmatprep.subr.bf16.mxu0 %v2853_v4  ;;  %v2858_v7 = vld [vmem:[%s4199_s1 + $0x40] ss:$28 sps:$4 sm:$0xff]   ;;  %1706 = vmatprep.subr.bf16.mxu1 %v2855_v5  ;;  %v2863_v10 = vld [vmem:[%s4199_s1 + $0x70] ss:$28 sps:$4 sm:$0xff]   ;;  %v2864_v11 = vld [vmem:[%s4199_s1 + $0x78] ss:$28 sps:$4 sm:$0xff]  }
   0x5   :  { %v2865_v12 = vld [vmem:[%s4199_s1 + $0xac] ss:$28 sps:$4 sm:$0xff]   ;;  %v2867_v13 = vld [vmem:[%s4199_s1 + $0xb4] ss:$28 sps:$4 sm:$0xff]   ;;  %v2871_v16 = vld [vmem:[%s4199_s1 + $0xe4] ss:$28 sps:$4 sm:$0xff]  }
   0x6   :  { %v2869_v14 = vld [vmem:[%s4199_s1 + $0xa8] ss:$28 sps:$4 sm:$0xff]   ;;  %v2870_v15 = vld [vmem:[%s4199_s1 + $0xb0] ss:$28 sps:$4 sm:$0xff]   ;;  %v2875_v18 = vld [vmem:[%s4199_s1 + $0xe0] ss:$28 sps:$4 sm:$0xff]  }
   0x7   :  { %1565 = vmatpush1.bf16.msra.mxu0 %v2857_v6  ;;  %1707 = vmatpush1.bf16.msra.mxu1 %v2858_v7  ;;  %v2873_v17 = vld [vmem:[%s4199_s1 + $0xec] ss:$28 sps:$4 sm:$0xff]   ;;  %v2877_v20 = vld [vmem:[%s4199_s1 + $0x11c] ss:$28 sps:$4 sm:$0xff]   ;;  %v2879_v21 = vld [vmem:[%s4199_s1 + $0x124] ss:$28 sps:$4 sm:$0xff]  }
   0x8   :  { %1566 = vmatprep.subr.bf16.mxu0 %v2859_v8  ;;  %1708 = vmatprep.subr.bf16.mxu1 %v2861_v9  ;;  %v2876_v19 = vld [vmem:[%s4199_s1 + $0xe8] ss:$28 sps:$4 sm:$0xff]   ;;  %v2881_v22 = vld [vmem:[%s4199_s1 + $0x118] ss:$28 sps:$4 sm:$0xff]   ;;  %v2882_v23 = vld [vmem:[%s4199_s1 + $0x120] ss:$28 sps:$4 sm:$0xff]  }
   0x9   :  { %v2883_v24 = vld [vmem:[%s4199_s1 + $0x154] ss:$28 sps:$4 sm:$0xff]   ;;  %v2885_v25 = vld [vmem:[%s4199_s1 + $0x15c] ss:$28 sps:$4 sm:$0xff]   ;;  %v2889_v28 = vld [vmem:[%s4199_s1 + $0x18c] ss:$28 sps:$4 sm:$0xff]  }
   0xa   :  { %v2887_v26 = vld [vmem:[%s4199_s1 + $0x150] ss:$28 sps:$4 sm:$0xff]   ;;  %v2888_v27 = vld [vmem:[%s4199_s1 + $0x158] ss:$28 sps:$4 sm:$0xff]   ;;  %v2893_v30 = vld [vmem:[%s4199_s1 + $0x188] ss:$28 sps:$4 sm:$0xff]  }
   0xb   :  { %1567 = vmatpush1.bf16.msra.mxu0 %v2863_v10  ;;  %1709 = vmatpush1.bf16.msra.mxu1 %v2864_v11  ;;  %v2891_v29 = vld [vmem:[%s4199_s1 + $0x194] ss:$28 sps:$4 sm:$0xff]   ;;  %v2895_v32 = vld [vmem:[%s4199_s1 + $0x1c4] ss:$28 sps:$4 sm:$0xff]   ;;  %v2897_v33 = vld [vmem:[%s4199_s1 + $0x1cc] ss:$28 sps:$4 sm:$0xff]  }
   0xc   :  { %1568 = vmatprep.subr.bf16.mxu0 %v2865_v12  ;;  %1710 = vmatprep.subr.bf16.mxu1 %v2867_v13  ;;  %v2894_v31 = vld [vmem:[%s4199_s1 + $0x190] ss:$28 sps:$4 sm:$0xff]   ;;  %v2899_v34 = vld [vmem:[%s4199_s1 + $0x1c0] ss:$28 sps:$4 sm:$0xff]   ;;  %v2900_v35 = vld [vmem:[%s4199_s1 + $0x1c8] ss:$28 sps:$4 sm:$0xff]  }
   0xd   :  { %v2901_v36 = vld [vmem:[%s4199_s1 + $0x1fc] ss:$28 sps:$4 sm:$0xff]   ;;  %v2903_v37 = vld [vmem:[%s4199_s1 + $0x204] ss:$28 sps:$4 sm:$0xff]   ;;  %v2907_v40 = vld [vmem:[%s4199_s1 + $0x234] ss:$28 sps:$4 sm:$0xff]  }
   0xe   :  { %v2905_v38 = vld [vmem:[%s4199_s1 + $0x1f8] ss:$28 sps:$4 sm:$0xff]   ;;  %v2906_v39 = vld [vmem:[%s4199_s1 + $0x200] ss:$28 sps:$4 sm:$0xff]   ;;  %v2911_v42 = vld [vmem:[%s4199_s1 + $0x230] ss:$28 sps:$4 sm:$0xff]  }
   0xf   :  { %1569 = vmatpush1.bf16.msra.mxu0 %v2869_v14  ;;  %1711 = vmatpush1.bf16.msra.mxu1 %v2870_v15  ;;  %v2909_v41 = vld [vmem:[%s4199_s1 + $0x23c] ss:$28 sps:$4 sm:$0xff]   ;;  %v2913_v44 = vld [vmem:[%s4199_s1 + $0x26c] ss:$28 sps:$4 sm:$0xff]   ;;  %v2915_v45 = vld [vmem:[%s4199_s1 + $0x274] ss:$28 sps:$4 sm:$0xff]  }
  0x10   :  { %1570 = vmatprep.subr.bf16.mxu0 %v2871_v16  ;;  %1712 = vmatprep.subr.bf16.mxu1 %v2873_v17  ;;  %v2912_v43 = vld [vmem:[%s4199_s1 + $0x238] ss:$28 sps:$4 sm:$0xff]   ;;  %v2917_v46 = vld [vmem:[%s4199_s1 + $0x268] ss:$28 sps:$4 sm:$0xff]   ;;  %v2918_v48 = vld [vmem:[%s4199_s1 + $0x270] ss:$28 sps:$4 sm:$0xff]  }
  0x11   :  { %v3351_v47 = vld [vmem:[%s4200_s0 + $0x4] ss:$16 sps:$4 sm:$0xff]   ;;  %v2921_v50 = vld [vmem:[%s4199_s1 + $0x2ac] ss:$28 sps:$4 sm:$0xff]   ;;  %v2923_v51 = vld [vmem:[%s4199_s1 + $0x2a0] ss:$28 sps:$4 sm:$0xff]  }
  0x12   :  { %v2919_v49 = vld [vmem:[%s4199_s1 + $0x2a4] ss:$28 sps:$4 sm:$0xff]   ;;  %1594 = vmatprep.mubr.bf16.mxu0 %v3351_v47  ;;  %1736 = vmatprep.mubr.bf16.mxu1 %v3351_v47  ;;  %v2925_v53 = vld [vmem:[%s4199_s1 + $0x2dc] ss:$28 sps:$4 sm:$0xff]   ;;  %v2931_v57 = vld [vmem:[%s4199_s1 + $0x314] ss:$28 sps:$4 sm:$0xff]  }
  0x13   :  { %1571 = vmatpush1.bf16.msra.mxu0 %v2875_v18  ;;  %1713 = vmatpush1.bf16.msra.mxu1 %v2876_v19  ;;  %v2924_v52 = vld [vmem:[%s4199_s1 + $0x2a8] ss:$28 sps:$4 sm:$0xff]   ;;  %v2929_v55 = vld [vmem:[%s4199_s1 + $0x2d8] ss:$28 sps:$4 sm:$0xff]   ;;  %v2930_v56 = vld [vmem:[%s4199_s1 + $0x2e0] ss:$28 sps:$4 sm:$0xff]  }
  0x14   :  { %1572 = vmatprep.subr.bf16.mxu0 %v2877_v20  ;;  %1714 = vmatprep.subr.bf16.mxu1 %v2879_v21  ;;  %v2927_v54 = vld [vmem:[%s4199_s1 + $0x2e4] ss:$28 sps:$4 sm:$0xff]   ;;  %v2933_v58 = vld [vmem:[%s4199_s1 + $0x31c] ss:$28 sps:$4 sm:$0xff]   ;;  %v2935_v59 = vld [vmem:[%s4199_s1 + $0x310] ss:$28 sps:$4 sm:$0xff]  }
  0x15   :  { %v2936_v60 = vld [vmem:[%s4199_s1 + $0x318] ss:$28 sps:$4 sm:$0xff]   ;;  %v2937_v61 = vld [vmem:[%s4199_s1 + $0x34c] ss:$28 sps:$4 sm:$0xff]   ;;  %v2947_v1 = vld [vmem:[%s4199_s1 + $0x384] ss:$28 sps:$4 sm:$0xff]  }
  0x16   :  { %v2939_v62 = vld [vmem:[%s4199_s1 + $0x354] ss:$28 sps:$4 sm:$0xff]   ;;  %v2941_v63 = vld [vmem:[%s4199_s1 + $0x348] ss:$28 sps:$4 sm:$0xff]   ;;  %v2945_v3 = vld [vmem:[%s4199_s1 + $0x380] ss:$28 sps:$4 sm:$0xff]  }
  0x17   :  { %1573 = vmatpush1.bf16.msra.mxu0 %v2881_v22  ;;  %1715 = vmatpush1.bf16.msra.mxu1 %v2882_v23  ;;  %v2942_v0 = vld [vmem:[%s4199_s1 + $0x350] ss:$28 sps:$4 sm:$0xff]   ;;  %v2948_v4 = vld [vmem:[%s4199_s1 + $0x388] ss:$28 sps:$4 sm:$0xff]   ;;  %v2954_v6 = vld [vmem:[%s4199_s1 + $0x3bc] ss:$28 sps:$4 sm:$0xff]  }
  0x18   :  { %1574 = vmatprep.subr.bf16.mxu0 %v2883_v24  ;;  %1716 = vmatprep.subr.bf16.mxu1 %v2885_v25  ;;  %v2950_v2 = vld [vmem:[%s4199_s1 + $0x38c] ss:$28 sps:$4 sm:$0xff]   ;;  %v3421_v5 = vld [vmem:[%s4200_s0] ss:$16 sps:$4 sm:$0xff]   ;;  %v2952_v8 = vld [vmem:[%s4199_s1 + $0x3b8] ss:$28 sps:$4 sm:$0xff]  }
  0x19   :  { %v2957_v7 = vld [vmem:[%s4199_s1 + $0x3c4] ss:$28 sps:$4 sm:$0xff]   ;;  %v2960_v10 = vld [vmem:[%s4199_s1 + $0x3f4] ss:$28 sps:$4 sm:$0xff]   ;;  %v2963_v11 = vld [vmem:[%s4199_s1 + $0x3fc] ss:$28 sps:$4 sm:$0xff]  }
  0x1a   :  { %v2955_v9 = vld [vmem:[%s4199_s1 + $0x3c0] ss:$28 sps:$4 sm:$0xff]   ;;  %v2958_v12 = vld [vmem:[%s4199_s1 + $0x3f0] ss:$28 sps:$4 sm:$0xff]   ;;  %v2961_v13 = vld [vmem:[%s4199_s1 + $0x3f8] ss:$28 sps:$4 sm:$0xff]  }
  0x1b   :  { %1575 = vmatpush1.bf16.msra.mxu0 %v2887_v26  ;;  %1717 = vmatpush1.bf16.msra.mxu1 %v2888_v27  ;;  %v3452_v14 = vld [vmem:[%s4200_s0 + $0x24] ss:$16 sps:$4 sm:$0xff]   ;;  %v3457_v15 = vld [vmem:[%s4200_s0 + $0x20] ss:$16 sps:$4 sm:$0xff]   ;;  %v2966_v16 = vld [vmem:[%s4199_s1 + $0x42c] ss:$28 sps:$4 sm:$0xff]  }
  0x1c   :  { %1576 = vmatprep.subr.bf16.mxu0 %v2889_v28  ;;  %1718 = vmatprep.subr.bf16.mxu1 %v2891_v29  ;;  %v2969_v17 = vld [vmem:[%s4199_s1 + $0x434] ss:$28 sps:$4 sm:$0xff]   ;;  %v2964_v18 = vld [vmem:[%s4199_s1 + $0x428] ss:$28 sps:$4 sm:$0xff]   ;;  %v2970_v22 = vld [vmem:[%s4199_s1 + $0x460] ss:$28 sps:$4 sm:$0xff]  }
  0x1d   :  { %v2967_v19 = vld [vmem:[%s4199_s1 + $0x430] ss:$28 sps:$4 sm:$0xff]   ;;  %v2972_v20 = vld [vmem:[%s4199_s1 + $0x464] ss:$28 sps:$4 sm:$0xff]   ;;  %v2978_v26 = vld [vmem:[%s4199_s1 + $0x49c] ss:$28 sps:$4 sm:$0xff]  }
  0x1e   :  { %v2975_v21 = vld [vmem:[%s4199_s1 + $0x46c] ss:$28 sps:$4 sm:$0xff]   ;;  %v3487_v23 = vld [vmem:[%s4200_s0 + $0x44] ss:$16 sps:$4 sm:$0xff]   ;;  %v3495_v25 = vld [vmem:[%s4200_s0 + $0x40] ss:$16 sps:$4 sm:$0xff]  }
  0x1f   :  { %1577 = vmatpush1.bf16.msra.mxu0 %v2893_v30  ;;  %1719 = vmatpush1.bf16.msra.mxu1 %v2894_v31  ;;  %v2973_v24 = vld [vmem:[%s4199_s1 + $0x468] ss:$28 sps:$4 sm:$0xff]   ;;  %v2976_v28 = vld [vmem:[%s4199_s1 + $0x498] ss:$28 sps:$4 sm:$0xff]   ;;  %v2979_v29 = vld [vmem:[%s4199_s1 + $0x4a0] ss:$28 sps:$4 sm:$0xff]  }
  0x20   :  { %1578 = vmatprep.subr.bf16.mxu0 %v2895_v32  ;;  %1720 = vmatprep.subr.bf16.mxu1 %v2897_v33  ;;  %v2981_v27 = vld [vmem:[%s4199_s1 + $0x4a4] ss:$28 sps:$4 sm:$0xff]   ;;  %v2984_v31 = vld [vmem:[%s4199_s1 + $0x4d4] ss:$28 sps:$4 sm:$0xff]   ;;  %v2987_v32 = vld [vmem:[%s4199_s1 + $0x4dc] ss:$28 sps:$4 sm:$0xff]  }
  0x21   :  { %v27_v30 = vld [vmem:[%s4200_s0 + $0x60] sm:$0x11] }
  0x22   :  { %v3522_v33 = vcombine.high %v27_v30, %v27_v30 }
  0x23   :  { %1579 = vmatpush1.bf16.msra.mxu0 %v2899_v34  ;;  %1721 = vmatpush1.bf16.msra.mxu1 %v2900_v35  ;;  %v3186_v34 = vmov 0   ;;  %v2982_v35 = vld [vmem:[%s4199_s1 + $0x4d0] ss:$28 sps:$4 sm:$0xff]  }
  0x24   :  { %1580 = vmatprep.subr.bf16.mxu0 %v2901_v36  ;;  %1722 = vmatprep.subr.bf16.mxu1 %v2903_v37  ;;  %v3529_v36 = vcombine.low %v27_v30, %v27_v30  ;;  %v2985_v37 = vld [vmem:[%s4199_s1 + $0x4d8] ss:$28 sps:$4 sm:$0xff]   ;;  %v3062_v30 = vld [vmem:[%s4199_s1 + $0x84] ss:$28 sps:$4 sm:$0xff]  }
  0x25   :  { %2845 = vset.pattern.permute.xlu0 %v3186_v34  ;;  %2846 = vset.pattern.permute.xlu1 %v3186_v34  ;;  %v3093_v34 = vld [vmem:[%s4199_s1 + $0x248] ss:$28 sps:$4 sm:$0xff]  }
  0x27   :  { %1581 = vmatpush1.bf16.msra.mxu0 %v2905_v38  ;;  %1723 = vmatpush1.bf16.msra.mxu1 %v2906_v39  ;;  %v2990_v38 = vld [vmem:[%s4199_s1 + $0x50c] ss:$28 sps:$4 sm:$0xff]   ;;  %v2993_v39 = vld [vmem:[%s4199_s1 + $0x514] ss:$28 sps:$4 sm:$0xff]  }
  0x28   :  { %1582 = vmatprep.subr.bf16.mxu0 %v2907_v40  ;;  %1724 = vmatprep.subr.bf16.mxu1 %v2909_v41  ;;  %v3543_v40 = vld [vmem:[%s4200_s0 + $0xc] ss:$16 sps:$4 sm:$0xff]   ;;  %v2988_v41 = vld [vmem:[%s4199_s1 + $0x508] ss:$28 sps:$4 sm:$0xff]  }
  0x2b   :  { %1583 = vmatpush1.bf16.msra.mxu0 %v2911_v42  ;;  %1725 = vmatpush1.bf16.msra.mxu1 %v2912_v43  ;;  %v2991_v42 = vld [vmem:[%s4199_s1 + $0x510] ss:$28 sps:$4 sm:$0xff]   ;;  %v2996_v43 = vld [vmem:[%s4199_s1 + $0x544] ss:$28 sps:$4 sm:$0xff]  }
  0x2c   :  { %1584 = vmatprep.subr.bf16.mxu0 %v2913_v44  ;;  %1726 = vmatprep.subr.bf16.mxu1 %v2915_v45  ;;  %v2999_v44 = vld [vmem:[%s4199_s1 + $0x54c] ss:$28 sps:$4 sm:$0xff]   ;;  %v2994_v45 = vld [vmem:[%s4199_s1 + $0x540] ss:$28 sps:$4 sm:$0xff]  }
  0x2f   :  { %1585 = vmatpush1.bf16.msra.mxu0 %v2917_v46  ;;  %1727 = vmatpush1.bf16.msra.mxu1 %v2918_v48  ;;  %v2997_v46 = vld [vmem:[%s4199_s1 + $0x548] ss:$28 sps:$4 sm:$0xff]   ;;  %v3002_v48 = vld [vmem:[%s4199_s1 + $0x57c] ss:$28 sps:$4 sm:$0xff]  }
  0x30   :  { %1586 = vmatprep.subr.bf16.mxu0 %v2919_v49  ;;  %1728 = vmatprep.subr.bf16.mxu1 %v2921_v50  ;;  %v3005_v49 = vld [vmem:[%s4199_s1 + $0x584] ss:$28 sps:$4 sm:$0xff]   ;;  %v3000_v50 = vld [vmem:[%s4199_s1 + $0x578] ss:$28 sps:$4 sm:$0xff]  }
  0x33   :  { %1587 = vmatpush1.bf16.msra.mxu0 %v2923_v51  ;;  %1729 = vmatpush1.bf16.msra.mxu1 %v2924_v52  ;;  %v3003_v51 = vld [vmem:[%s4199_s1 + $0x580] ss:$28 sps:$4 sm:$0xff]   ;;  %v3011_v52 = vld [vmem:[%s4199_s1 + $0x5b4] ss:$28 sps:$4 sm:$0xff]  }
  0x34   :  { %1588 = vmatprep.subr.bf16.mxu0 %v2925_v53  ;;  %1730 = vmatprep.subr.bf16.mxu1 %v2927_v54  ;;  %v3014_v53 = vld [vmem:[%s4199_s1 + $0x5bc] ss:$28 sps:$4 sm:$0xff]   ;;  %v3009_v54 = vld [vmem:[%s4199_s1 + $0x5b0] ss:$28 sps:$4 sm:$0xff]  }
  0x37   :  { %1589 = vmatpush1.bf16.msra.mxu0 %v2929_v55  ;;  %1731 = vmatpush1.bf16.msra.mxu1 %v2930_v56  ;;  %v3012_v55 = vld [vmem:[%s4199_s1 + $0x5b8] ss:$28 sps:$4 sm:$0xff]   ;;  %v3017_v56 = vld [vmem:[%s4199_s1 + $0x5ec] ss:$28 sps:$4 sm:$0xff]  }
  0x38   :  { %1590 = vmatprep.subr.bf16.mxu0 %v2931_v57  ;;  %1732 = vmatprep.subr.bf16.mxu1 %v2933_v58  ;;  %v3020_v57 = vld [vmem:[%s4199_s1 + $0x5f4] ss:$28 sps:$4 sm:$0xff]   ;;  %v3015_v58 = vld [vmem:[%s4199_s1 + $0x5e8] ss:$28 sps:$4 sm:$0xff]  }
  0x3b   :  { %1591 = vmatpush1.bf16.msra.mxu0 %v2935_v59  ;;  %1733 = vmatpush1.bf16.msra.mxu1 %v2936_v60  ;;  %v3018_v59 = vld [vmem:[%s4199_s1 + $0x5f0] ss:$28 sps:$4 sm:$0xff]   ;;  %v3026_v60 = vld [vmem:[%s4199_s1 + $0x624] ss:$28 sps:$4 sm:$0xff]  }
  0x3c   :  { %1592 = vmatprep.subr.bf16.mxu0 %v2937_v61  ;;  %1734 = vmatprep.subr.bf16.mxu1 %v2939_v62  ;;  %v3029_v61 = vld [vmem:[%s4199_s1 + $0x62c] ss:$28 sps:$4 sm:$0xff]   ;;  %v3024_v62 = vld [vmem:[%s4199_s1 + $0x620] ss:$28 sps:$4 sm:$0xff]  }
  0x3f   :  { %1593 = vmatpush1.bf16.msra.mxu0 %v2941_v63  ;;  %1735 = vmatpush1.bf16.msra.mxu1 %v2942_v0  ;;  %v3027_v63 = vld [vmem:[%s4199_s1 + $0x628] ss:$28 sps:$4 sm:$0xff]   ;;  %v3032_v0 = vld [vmem:[%s4199_s1 + $0x65c] ss:$28 sps:$4 sm:$0xff]  }
  0x40   :  { %1633 = vmatprep.subr.bf16.mxu0 %v2947_v1  ;;  %1775 = vmatprep.subr.bf16.mxu1 %v2950_v2  ;;  %v3035_v1 = vld [vmem:[%s4199_s1 + $0x664] ss:$28 sps:$4 sm:$0xff]   ;;  %v3030_v2 = vld [vmem:[%s4199_s1 + $0x658] ss:$28 sps:$4 sm:$0xff]  }
  0x42   :  { %1595 = vmatmul.mubr.bf16.vlgmr.msra.gmra.mrb[0].mxu0 %v3421_v5  ;;  %1737 = vmatmul.mubr.bf16.vlgmr.msra.gmra.mrb[0].mxu1 %v3421_v5 }
  0x43   :  { %1634 = vmatpush1.bf16.msra.mxu0 %v2945_v3  ;;  %1776 = vmatpush1.bf16.msra.mxu1 %v2948_v4  ;;  %v3033_v3 = vld [vmem:[%s4199_s1 + $0x660] ss:$28 sps:$4 sm:$0xff]   ;;  %v3040_v4 = vld [vmem:[%s4199_s1 + $0x694] ss:$28 sps:$4 sm:$0xff]  }
  0x44   :  { %1635 = vmatprep.subr.bf16.mxu0 %v2954_v6  ;;  %1777 = vmatprep.subr.bf16.mxu1 %v2957_v7  ;;  %v3043_v6 = vld [vmem:[%s4199_s1 + $0x69c] ss:$28 sps:$4 sm:$0xff]   ;;  %v277_v7 = vld [vmem:[%s4199_s1 + $0x6c8] sm:$0x33] }
  0x45   :  { %1604 = vmatprep.mubr.bf16.mxu0 %v3452_v14  ;;  %1746 = vmatprep.mubr.bf16.mxu1 %v3452_v14 }
  0x47   :  { %1636 = vmatpush1.bf16.msra.mxu0 %v2952_v8  ;;  %1778 = vmatpush1.bf16.msra.mxu1 %v2955_v9  ;;  %v278_v8 = vld [vmem:[%s4199_s1 + $0x6d0] sm:$0x33] }
  0x48   :  { %1637 = vmatprep.subr.bf16.mxu0 %v2960_v10  ;;  %1779 = vmatprep.subr.bf16.mxu1 %v2963_v11  ;;  %v3038_v9 = vld [vmem:[%s4199_s1 + $0x690] ss:$28 sps:$4 sm:$0xff]   ;;  %v3041_v10 = vld [vmem:[%s4199_s1 + $0x698] ss:$28 sps:$4 sm:$0xff]   ;;  %v2591_v11 = vcombine.low %v277_v7, %v277_v7 }
  0x4a   :  { %1605 = vmatmul.mubr.bf16.gmra.mrb[4].mxu0 %v3457_v15  ;;  %1747 = vmatmul.mubr.bf16.gmra.mrb[4].mxu1 %v3457_v15 }
  0x4b   :  { %1638 = vmatpush1.bf16.msra.mxu0 %v2958_v12  ;;  %1780 = vmatpush1.bf16.msra.mxu1 %v2961_v13  ;;  %v2592_v12 = vcombine.high %v277_v7, %v277_v7  ;;  %v2594_v13 = vcombine.high %v278_v8, %v278_v8  ;;  %v3123_v7 = vld [vmem:[%s4199_s1 + $0x558] ss:$28 sps:$4 sm:$0xff]  }
  0x4c   :  { %1639 = vmatprep.subr.bf16.mxu0 %v2966_v16  ;;  %1781 = vmatprep.subr.bf16.mxu1 %v2969_v17  ;;  %v2593_v16 = vcombine.low %v278_v8, %v278_v8  ;;  %v1542_v17 = vsel %vm1540_vm1, %v2591_v11, 0  ;;  %v3085_v8 = vld [vmem:[%s4199_s1 + $0x1d0] ss:$28 sps:$4 sm:$0xff]   ;;  %v3124_v11 = vld [vmem:[%s4199_s1 + $0x398] ss:$28 sps:$4 sm:$0xff]  }
  0x4d   :  { %1614 = vmatprep.mubr.bf16.mxu0 %v3487_v23  ;;  %1756 = vmatprep.mubr.bf16.mxu1 %v3487_v23 }
  0x4f   :  { %1640 = vmatpush1.bf16.msra.mxu0 %v2964_v18  ;;  %1782 = vmatpush1.bf16.msra.mxu1 %v2967_v19  ;;  %v1548_v18 = vsel %vm1540_vm1, %v2593_v16, 0  ;;  %v3654_v19 = vld [vmem:[%s4200_s0 + $0x8] ss:$16 sps:$4 sm:$0xff]   ;;  %v287_v16 = vld [vmem:[%s4201_s2 + $0x30] sm:$0x3] }
  0x50   :  { %1641 = vmatprep.subr.bf16.mxu0 %v2972_v20  ;;  %1783 = vmatprep.subr.bf16.mxu1 %v2975_v21  ;;  %v3053_v20 = vld [vmem:[%s4199_s1 + $0x14] ss:$28 sps:$4 sm:$0xff]  }
  0x51   :  { %v3083_v21 = vld [vmem:[%s4199_s1 + $0x1d8] ss:$28 sps:$4 sm:$0xff]  }
  0x52   :  { %1615 = vmatmul.mubr.bf16.gmra.mrb[8].mxu0 %v3495_v25  ;;  %1757 = vmatmul.mubr.bf16.gmra.mrb[8].mxu1 %v3495_v25 }
  0x53   :  { %1642 = vmatpush1.bf16.msra.mxu0 %v2970_v22  ;;  %1784 = vmatpush1.bf16.msra.mxu1 %v2973_v24  ;;  %v3051_v22 = vld [vmem:[%s4199_s1 + $0x10] ss:$28 sps:$4 sm:$0xff]  }
  0x54   :  { %1643 = vmatprep.subr.bf16.mxu0 %v2978_v26  ;;  %1785 = vmatprep.subr.bf16.mxu1 %v2981_v27  ;;  %v3056_v24 = vld [vmem:[%s4199_s1 + $0x4c] ss:$28 sps:$4 sm:$0xff]   ;;  %v3084_v27 = vld [vmem:[%s4199_s1 + $0x18] ss:$28 sps:$4 sm:$0xff]  }
  0x55   :  { %1624 = vmatprep.mubr.bf16.mxu0 %v3522_v33  ;;  %1766 = vmatprep.mubr.bf16.mxu1 %v3522_v33  ;;  %v3671_v26 = vld [vmem:[%s4200_s0 + $0x2c] ss:$16 sps:$4 sm:$0xff]  }
  0x57   :  { %1644 = vmatpush1.bf16.msra.mxu0 %v2976_v28  ;;  %1786 = vmatpush1.bf16.msra.mxu1 %v2979_v29  ;;  %v3088_v28 = vld [vmem:[%s4199_s1 + $0x210] ss:$28 sps:$4 sm:$0xff]   ;;  %v3054_v29 = vld [vmem:[%s4199_s1 + $0x48] ss:$28 sps:$4 sm:$0xff]  }
  0x58   :  { %1645 = vmatprep.subr.bf16.mxu0 %v2984_v31  ;;  %1787 = vmatprep.subr.bf16.mxu1 %v2987_v32  ;;  %v3692_v31 = vld [vmem:[%s4200_s0 + $0x28] ss:$16 sps:$4 sm:$0xff]   ;;  %v3089_v32 = vld [vmem:[%s4199_s1 + $0x50] ss:$28 sps:$4 sm:$0xff]  }
  0x5a   :  { %1625 = vmatmul.mubr.bf16.gmra.mrb[12].mxu0 %v3529_v36  ;;  %1767 = vmatmul.mubr.bf16.gmra.mrb[12].mxu1 %v3529_v36 }
  0x5b   :  { %1646 = vmatpush1.bf16.msra.mxu0 %v2982_v35  ;;  %1788 = vmatpush1.bf16.msra.mxu1 %v2985_v37  ;;  %v3060_v35 = vld [vmem:[%s4199_s1 + $0x80] ss:$28 sps:$4 sm:$0xff]  }
  0x5c   :  { %1647 = vmatprep.subr.bf16.mxu0 %v2990_v38  ;;  %1789 = vmatprep.subr.bf16.mxu1 %v2993_v39  ;;  %v3065_v37 = vld [vmem:[%s4199_s1 + $0xbc] ss:$28 sps:$4 sm:$0xff]   ;;  %v3094_v39 = vld [vmem:[%s4199_s1 + $0x88] ss:$28 sps:$4 sm:$0xff]  }
  0x5d   :  { %2599 = vmatprep.mubr.msk.bf16.mxu0 %vm1527_vm0, %v3543_v40  ;;  %2604 = vmatprep.mubr.msk.bf16.mxu1 %vm1527_vm0, %v3543_v40  ;;  %v3711_v38 = vld [vmem:[%s4200_s0 + $0x4c] ss:$16 sps:$4 sm:$0xff]  }
  0x5f   :  { %1648 = vmatpush1.bf16.msra.mxu0 %v2988_v41  ;;  %1790 = vmatpush1.bf16.msra.mxu1 %v2991_v42  ;;  %v3063_v41 = vld [vmem:[%s4199_s1 + $0xb8] ss:$28 sps:$4 sm:$0xff]   ;;  %v3098_v42 = vld [vmem:[%s4199_s1 + $0x280] ss:$28 sps:$4 sm:$0xff]  }
  0x60   :  { %1649 = vmatprep.subr.bf16.mxu0 %v2996_v43  ;;  %1791 = vmatprep.subr.bf16.mxu1 %v2999_v44  ;;  %v3071_v43 = vld [vmem:[%s4199_s1 + $0xf4] ss:$28 sps:$4 sm:$0xff]   ;;  %v28_v44 = vld [vmem:[%s4200_s0 + $0x68] sm:$0x11] }
  0x63   :  { %1650 = vmatpush1.bf16.msra.mxu0 %v2994_v45  ;;  %1792 = vmatpush1.bf16.msra.mxu1 %v2997_v46  ;;  %v3099_v45 = vld [vmem:[%s4199_s1 + $0xc0] ss:$28 sps:$4 sm:$0xff]   ;;  %v3103_v46 = vld [vmem:[%s4199_s1 + $0x2b8] ss:$28 sps:$4 sm:$0xff]  }
  0x64   :  { %1651 = vmatprep.subr.bf16.mxu0 %v3002_v48  ;;  %1793 = vmatprep.subr.bf16.mxu1 %v3005_v49  ;;  %v3743_v48 = vld [vmem:[%s4200_s0 + $0x48] ss:$16 sps:$4 sm:$0xff]   ;;  %v3069_v49 = vld [vmem:[%s4199_s1 + $0xf0] ss:$28 sps:$4 sm:$0xff]  }
  0x67   :  { %1652 = vmatpush1.bf16.msra.mxu0 %v3000_v50  ;;  %1794 = vmatpush1.bf16.msra.mxu1 %v3003_v51  ;;  %v3748_v50 = vcombine.high %v28_v44, %v28_v44  ;;  %v3074_v51 = vld [vmem:[%s4199_s1 + $0x12c] ss:$28 sps:$4 sm:$0xff]  }
  0x68   :  { %1653 = vmatprep.subr.bf16.mxu0 %v3011_v52  ;;  %1795 = vmatprep.subr.bf16.mxu1 %v3014_v53  ;;  %v3104_v52 = vld [vmem:[%s4199_s1 + $0xf8] ss:$28 sps:$4 sm:$0xff]   ;;  %v3108_v53 = vld [vmem:[%s4199_s1 + $0x2f0] ss:$28 sps:$4 sm:$0xff]  }
  0x6b   :  { %1654 = vmatpush1.bf16.msra.mxu0 %v3009_v54  ;;  %1796 = vmatpush1.bf16.msra.mxu1 %v3012_v55  ;;  %v3072_v54 = vld [vmem:[%s4199_s1 + $0x128] ss:$28 sps:$4 sm:$0xff]  }
  0x6c   :  { %1655 = vmatprep.subr.bf16.mxu0 %v3017_v56  ;;  %1797 = vmatprep.subr.bf16.mxu1 %v3020_v57  ;;  %v281_v55 = vld [vmem:[%s4201_s2] sm:$0xff]  ;;  %v3109_v57 = vld [vmem:[%s4199_s1 + $0x130] ss:$28 sps:$4 sm:$0xff]  }
  0x6d   :  { %v3079_v56 = vld [vmem:[%s4199_s1 + $0x164] ss:$28 sps:$4 sm:$0xff]   ;;  %290 = vperm.xlu0 %2845, %v281_v55   ;;  %v3125_v55 = vld [vmem:[%s4199_s1 + $0x390] ss:$28 sps:$4 sm:$0xff]  }
  0x6f   :  { %1656 = vmatpush1.bf16.msra.mxu0 %v3015_v58  ;;  %1798 = vmatpush1.bf16.msra.mxu1 %v3018_v59  ;;  %v3113_v58 = vld [vmem:[%s4199_s1 + $0x328] ss:$28 sps:$4 sm:$0xff]   ;;  %v3780_v59 = vcombine.low %v28_v44, %v28_v44 }
  0x70   :  { %1657 = vmatprep.subr.bf16.mxu0 %v3026_v60  ;;  %1799 = vmatprep.subr.bf16.mxu1 %v3029_v61  ;;  %v3077_v60 = vld [vmem:[%s4199_s1 + $0x160] ss:$28 sps:$4 sm:$0xff]   ;;  %v3153_v44 = vld [vmem:[%s4199_s1 + $0x6a8] ss:$28 sps:$4 sm:$0xff]  }
  0x71   :  { %v3082_v61 = vld [vmem:[%s4199_s1 + $0x19c] ss:$28 sps:$4 sm:$0xff]  }
  0x73   :  { %1658 = vmatpush1.bf16.msra.mxu0 %v3024_v62  ;;  %1800 = vmatpush1.bf16.msra.mxu1 %v3027_v63  ;;  %v3114_v62 = vld [vmem:[%s4199_s1 + $0x168] ss:$28 sps:$4 sm:$0xff]   ;;  %v283_v63 = vld [vmem:[%s4201_s2 + $0x10] sm:$0xff] }
  0x74   :  { %1659 = vmatprep.subr.bf16.mxu0 %v3032_v0  ;;  %1801 = vmatprep.subr.bf16.mxu1 %v3035_v1  ;;  %v3118_v0 = vld [vmem:[%s4199_s1 + $0x360] ss:$28 sps:$4 sm:$0xff]   ;;  %v3080_v1 = vld [vmem:[%s4199_s1 + $0x198] ss:$28 sps:$4 sm:$0xff]  }
  0x75   :  { %300 = vperm.xlu1 %2846, %v283_v63   ;;  %v3150_v63 = vld [vmem:[%s4199_s1 + $0x4a8] ss:$28 sps:$4 sm:$0xff]  }
  0x77   :  { %1660 = vmatpush1.bf16.msra.mxu0 %v3030_v2  ;;  %1802 = vmatpush1.bf16.msra.mxu1 %v3033_v3  ;;  %v3087_v2 = vld [vmem:[%s4199_s1 + $0x1d4] ss:$28 sps:$4 sm:$0xff]   ;;  %v282_v3 = vld [vmem:[%s4201_s2 + $0x8] sm:$0xff] }
  0x78   :  { %1661 = vmatprep.subr.bf16.mxu0 %v3040_v4  ;;  %1803 = vmatprep.subr.bf16.mxu1 %v3043_v6  ;;  %v284_v4 = vld [vmem:[%s4201_s2 + $0x18] sm:$0xff] }
  0x79   :  { %v3119_v6 = vld [vmem:[%s4199_s1 + $0x1a0] ss:$28 sps:$4 sm:$0xff]   ;;  %295 = vperm.xlu0 %2845, %v282_v3   ;;  %305 = vperm.xlu1 %2846, %v284_v4   ;;  %v3166_v3 = vld [vmem:[%s4199_s1 + $0x588] ss:$28 sps:$4 sm:$0xff]  }
  0x7a   :  { %v3169_v4 = vld [vmem:[%s4199_s1 + $0x5c0] ss:$28 sps:$4 sm:$0xff]  }
  0x7b   :  { %1662 = vmatpush1.bf16.msra.mxu0 %v3038_v9  ;;  %1804 = vmatpush1.bf16.msra.mxu1 %v3041_v10  ;;  %v285_v9 = vld [vmem:[%s4201_s2 + $0x20] sm:$0xff]  ;;  %v286_v10 = vld [vmem:[%s4201_s2 + $0x28] sm:$0xff] }
  0x7c   :  { %2598 = vmatprep.subr.msk.bf16.mxu0 %vm1540_vm1, %v2592_v12  ;;  %2603 = vmatprep.subr.msk.bf16.mxu1 %vm1540_vm1, %v2594_v13  ;;  %v3128_v12 = vld [vmem:[%s4199_s1 + $0x590] ss:$28 sps:$4 sm:$0xff]   ;;  %v3090_v13 = vld [vmem:[%s4199_s1 + $0x208] ss:$28 sps:$4 sm:$0xff]  }
  0x7d   :  { %310 = vperm.xlu0 %2845, %v285_v9   ;;  %315 = vperm.xlu1 %2846, %v286_v10   ;;  %v3175_v9 = vld [vmem:[%s4199_s1 + $0x630] ss:$28 sps:$4 sm:$0xff]  }
  0x7e   :  { %v3180_v10 = vld [vmem:[%s4199_s1 + $0x66c] ss:$28 sps:$4 sm:$0xff]  }
  0x7f   :  { %1664 = vmatpush1.bf16.msra.mxu0 %v1542_v17  ;;  %1806 = vmatpush1.bf16.msra.mxu1 %v1548_v18  ;;  %v3097_v17 = vld [vmem:[%s4199_s1 + $0x244] ss:$28 sps:$4 sm:$0xff]   ;;  %v3129_v18 = vld [vmem:[%s4199_s1 + $0x3d0] ss:$28 sps:$4 sm:$0xff]  }
  0x80   :  { %1846 = vmatprep.subr.bf16.mxu0 %v3053_v20  ;;  %2673 = vmatprep.subr.bf16.mxu1 %v3083_v21  ;;  %v3133_v20 = vld [vmem:[%s4199_s1 + $0x5c8] ss:$28 sps:$4 sm:$0xff]   ;;  %v3095_v21 = vld [vmem:[%s4199_s1 + $0x240] ss:$28 sps:$4 sm:$0xff]  }
  0x81   :  { %320 = vperm.xlu0 %2845, %v287_v16  }
  0x82   :  { %1666 = vmatmul.mubr.bf16.vlgmr.msra.gmra.mrb[0].mxu0 %v3654_v19  ;;  %1808 = vmatmul.mubr.bf16.vlgmr.msra.gmra.mrb[0].mxu1 %v3654_v19 }
  0x83   :  { %1847 = vmatpush1.bf16.msra.mxu0 %v3051_v22  ;;  %2600 = vmatprep.mubr.msk.bf16.mxu0 %vm1527_vm0, %v3671_v26  ;;  %v3102_v22 = vld [vmem:[%s4199_s1 + $0x27c] ss:$28 sps:$4 sm:$0xff]  }
  0x84   :  { %1848 = vmatprep.subr.bf16.mxu0 %v3056_v24  ;;  %2674 = vmatpush3.bf16.msra.mxu1 %v3084_v27  ;;  %v3134_v24 = vld [vmem:[%s4199_s1 + $0x408] ss:$28 sps:$4 sm:$0xff]   ;;  %v3138_v27 = vld [vmem:[%s4199_s1 + $0x600] ss:$28 sps:$4 sm:$0xff]  }
  0x85   :  { %2675 = vmatprep.subr.bf16.mxu1 %v3088_v28  ;;  %2605 = vmatprep.mubr.msk.bf16.mxu1 %vm1527_vm0, %v3671_v26  ;;  %v3100_v28 = vld [vmem:[%s4199_s1 + $0x278] ss:$28 sps:$4 sm:$0xff]  }
  0x87   :  { %1849 = vmatpush1.bf16.msra.mxu0 %v3054_v29  ;;  %v3107_v29 = vld [vmem:[%s4199_s1 + $0x2b4] ss:$28 sps:$4 sm:$0xff]  }
  0x88   :  { %1850 = vmatprep.subr.bf16.mxu0 %v3062_v30  ;;  %2676 = vmatpush3.bf16.msra.mxu1 %v3089_v32  ;;  %v3139_v30 = vld [vmem:[%s4199_s1 + $0x440] ss:$28 sps:$4 sm:$0xff]   ;;  %v3143_v32 = vld [vmem:[%s4199_s1 + $0x638] ss:$28 sps:$4 sm:$0xff]  }
  0x89   :  { %2677 = vmatprep.subr.bf16.mxu1 %v3093_v34  ;;  %v3105_v34 = vld [vmem:[%s4199_s1 + $0x2b0] ss:$28 sps:$4 sm:$0xff]  }
  0x8a   :  { %1676 = vmatmul.mubr.bf16.gmra.mrb[4].mxu0 %v3692_v31  ;;  %1818 = vmatmul.mubr.bf16.gmra.mrb[4].mxu1 %v3692_v31 }
  0x8b   :  { %1851 = vmatpush1.bf16.msra.mxu0 %v3060_v35  ;;  %2601 = vmatprep.mubr.msk.bf16.mxu0 %vm1527_vm0, %v3711_v38  ;;  %v3112_v35 = vld [vmem:[%s4199_s1 + $0x2ec] ss:$28 sps:$4 sm:$0xff]  }
  0x8c   :  { %1852 = vmatprep.subr.bf16.mxu0 %v3065_v37  ;;  %2678 = vmatpush3.bf16.msra.mxu1 %v3094_v39  ;;  %v3144_v37 = vld [vmem:[%s4199_s1 + $0x478] ss:$28 sps:$4 sm:$0xff]   ;;  %v3148_v39 = vld [vmem:[%s4199_s1 + $0x670] ss:$28 sps:$4 sm:$0xff]  }
  0x8d   :  { %2679 = vmatprep.subr.bf16.mxu1 %v3098_v42  ;;  %2606 = vmatprep.mubr.msk.bf16.mxu1 %vm1527_vm0, %v3711_v38  ;;  %v3117_v42 = vld [vmem:[%s4199_s1 + $0x324] ss:$28 sps:$4 sm:$0xff]  }
  0x8f   :  { %1853 = vmatpush1.bf16.msra.mxu0 %v3063_v41  ;;  %v3110_v41 = vld [vmem:[%s4199_s1 + $0x2e8] ss:$28 sps:$4 sm:$0xff]  }
  0x90   :  { %1854 = vmatprep.subr.bf16.mxu0 %v3071_v43  ;;  %2680 = vmatpush3.bf16.msra.mxu1 %v3099_v45  ;;  %v3149_v43 = vld [vmem:[%s4199_s1 + $0x4b0] ss:$28 sps:$4 sm:$0xff]   ;;  %v3115_v45 = vld [vmem:[%s4199_s1 + $0x320] ss:$28 sps:$4 sm:$0xff]  }
  0x91   :  { %2681 = vmatprep.subr.bf16.mxu1 %v3103_v46  ;;  %v3122_v46 = vld [vmem:[%s4199_s1 + $0x35c] ss:$28 sps:$4 sm:$0xff]  }
  0x92   :  { %1686 = vmatmul.mubr.bf16.gmra.mrb[8].mxu0 %v3743_v48  ;;  %1828 = vmatmul.mubr.bf16.gmra.mrb[8].mxu1 %v3743_v48 }
  0x93   :  { %1855 = vmatpush1.bf16.msra.mxu0 %v3069_v49  ;;  %2602 = vmatprep.mubr.msk.bf16.mxu0 %vm1527_vm0, %v3748_v50  ;;  %v3154_v49 = vld [vmem:[%s4199_s1 + $0x4e8] ss:$28 sps:$4 sm:$0xff]  }
  0x94   :  { %1856 = vmatprep.subr.bf16.mxu0 %v3074_v51  ;;  %2682 = vmatpush3.bf16.msra.mxu1 %v3104_v52  ;;  %v3158_v51 = vld [vmem:[%s4199_s1 + $0x6e0] ss:$0 sps:$4 sm:$0x33]   ;;  %v3120_v52 = vld [vmem:[%s4199_s1 + $0x358] ss:$28 sps:$4 sm:$0xff]  }
  0x95   :  { %2683 = vmatprep.subr.bf16.mxu1 %v3108_v53  ;;  %2607 = vmatprep.mubr.msk.bf16.mxu1 %vm1527_vm0, %v3748_v50  ;;  %v3127_v53 = vld [vmem:[%s4199_s1 + $0x394] ss:$28 sps:$4 sm:$0xff]  }
  0x97   :  { %1857 = vmatpush1.bf16.msra.mxu0 %v3072_v54  ;;  %v3159_v54 = vld [vmem:[%s4199_s1 + $0x520] ss:$28 sps:$4 sm:$0xff]  }
  0x98   :  { %1858 = vmatprep.subr.bf16.mxu0 %v3079_v56  ;;  %2684 = vmatpush3.bf16.msra.mxu1 %v3109_v57  ;;  %v3132_v56 = vld [vmem:[%s4199_s1 + $0x3cc] ss:$28 sps:$4 sm:$0xff]  }
  0x99   :  { %2685 = vmatprep.subr.bf16.mxu1 %v3113_v58  ;;  %v3130_v57 = vld [vmem:[%s4199_s1 + $0x3c8] ss:$28 sps:$4 sm:$0xff]  }
  0x9a   :  { %1696 = vmatmul.mubr.bf16.gmra.mrb[12].mxu0 %v3780_v59  ;;  %1838 = vmatmul.mubr.bf16.gmra.mrb[12].mxu1 %v3780_v59  ;;  %v3137_v58 = vld [vmem:[%s4199_s1 + $0x404] ss:$28 sps:$4 sm:$0xff]  }
  0x9b   :  { %1859 = vmatpush1.bf16.msra.mxu0 %v3077_v60  ;;  %2020 = vmatprep.mubr.bf16.mxu1 %v3351_v47  ;;  %v3142_v60 = vld [vmem:[%s4199_s1 + $0x43c] ss:$28 sps:$4 sm:$0xff]  }
  0x9c   :  { %1860 = vmatprep.subr.bf16.mxu0 %v3082_v61  ;;  %2686 = vmatpush3.bf16.msra.mxu1 %v3114_v62  ;;  %v3140_v61 = vld [vmem:[%s4199_s1 + $0x438] ss:$28 sps:$4 sm:$0xff]   ;;  %v3152_v62 = vld [vmem:[%s4199_s1 + $0x4ac] ss:$28 sps:$4 sm:$0xff]  }
  0x9d   :  { %2687 = vmatprep.subr.bf16.mxu1 %v3118_v0  ;;  %1878 = vmatprep.mubr.bf16.mxu0 %v3351_v47  ;;  %v3092_v47 = vld [vmem:[%s4199_s1 + $0x20c] ss:$28 sps:$4 sm:$0xff]   ;;  %v3162_v0 = vld [vmem:[%s4199_s1 + $0x51c] ss:$28 sps:$4 sm:$0xff]  }
  0x9f   :  { %1861 = vmatpush1.bf16.msra.mxu0 %v3080_v1  ;;  %v3160_v1 = vld [vmem:[%s4199_s1 + $0x518] ss:$28 sps:$4 sm:$0xff]  }
  0xa0   :  { %1862 = vmatprep.subr.bf16.mxu0 %v3087_v2  ;;  %2688 = vmatpush3.bf16.msra.mxu1 %v3119_v6  ;;  %v3168_v2 = vld [vmem:[%s4199_s1 + $0x58c] ss:$28 sps:$4 sm:$0xff]   ;;  %v3174_v6 = vld [vmem:[%s4199_s1 + $0x5fc] ss:$28 sps:$4 sm:$0xff]  }
  0xa1   :  { %2713 = vmatprep.subr.bf16.mxu1 %v3123_v7  ;;  %v3172_v7 = vld [vmem:[%s4199_s1 + $0x5f8] ss:$28 sps:$4 sm:$0xff]  }
  0xa3   :  { %1863 = vmatpush1.bf16.msra.mxu0 %v3085_v8  ;;  %2021 = vmatmul.mubr.bf16.vlgmr.msra.gmra.mrb[16].mxu1 %v3421_v5  ;;  %v3177_v8 = vld [vmem:[%s4199_s1 + $0x634] ss:$28 sps:$4 sm:$0xff]  }
  0xa4   :  { %1864 = vmatprep.subr.bf16.mxu0 %v3092_v47  ;;  %2714 = vmatpush3.bf16.msra.mxu1 %v3124_v11  ;;  %v3178_v47 = vld [vmem:[%s4199_s1 + $0x668] ss:$28 sps:$4 sm:$0xff]  }
  0xa5   :  { %2715 = vmatprep.subr.bf16.mxu1 %v3128_v12  ;;  %2028 = vmatprep.mubr.bf16.mxu1 %v3452_v14  ;;  %v3183_v11 = vld [vmem:[%s4199_s1 + $0x6a4] ss:$28 sps:$4 sm:$0xff]   ;;  %v279_v12 = vld [vmem:[%s4199_s1 + $0x6d8] sm:$0x33] }
  0xa6   :  { %v2596_v16 = vcombine.high %v279_v12, %v279_v12 }
  0xa7   :  { %1865 = vmatpush1.bf16.msra.mxu0 %v3090_v13  ;;  %v3181_v13 = vld [vmem:[%s4199_s1 + $0x6a0] ss:$28 sps:$4 sm:$0xff]  }
  0xa8   :  { %1866 = vmatprep.subr.bf16.mxu0 %v3097_v17  ;;  %2716 = vmatpush3.bf16.msra.mxu1 %v3129_v18  ;;  %v2595_v17 = vcombine.low %v279_v12, %v279_v12 }
  0xa9   :  { %2717 = vmatprep.subr.bf16.mxu1 %v3133_v20 }
  0xaa   :  { %v1554_v18 = vsel %vm1540_vm1, %v2595_v17, 0 }
  0xab   :  { %1867 = vmatpush1.bf16.msra.mxu0 %v3095_v21  ;;  %2029 = vmatmul.mubr.bf16.gmra.mrb[20].mxu1 %v3457_v15 }
  0xac   :  { %1868 = vmatprep.subr.bf16.mxu0 %v3102_v22  ;;  %2718 = vmatpush3.bf16.msra.mxu1 %v3134_v24 }
  0xad   :  { %2719 = vmatprep.subr.bf16.mxu1 %v3138_v27  ;;  %2036 = vmatprep.mubr.bf16.mxu1 %v3487_v23 }
  0xaf   :  { %1869 = vmatpush1.bf16.msra.mxu0 %v3100_v28 }
  0xb0   :  { %1870 = vmatprep.subr.bf16.mxu0 %v3107_v29  ;;  %2720 = vmatpush3.bf16.msra.mxu1 %v3139_v30 }
  0xb1   :  { %2721 = vmatprep.subr.bf16.mxu1 %v3143_v32 }
  0xb3   :  { %1871 = vmatpush1.bf16.msra.mxu0 %v3105_v34  ;;  %2037 = vmatmul.mubr.bf16.gmra.mrb[24].mxu1 %v3495_v25 }
  0xb4   :  { %1872 = vmatprep.subr.bf16.mxu0 %v3112_v35  ;;  %2722 = vmatpush3.bf16.msra.mxu1 %v3144_v37 }
  0xb5   :  { %2723 = vmatprep.subr.bf16.mxu1 %v3148_v39  ;;  %2044 = vmatprep.mubr.bf16.mxu1 %v3522_v33 }
  0xb7   :  { %1873 = vmatpush1.bf16.msra.mxu0 %v3110_v41 }
  0xb8   :  { %1874 = vmatprep.subr.bf16.mxu0 %v3117_v42  ;;  %2724 = vmatpush3.bf16.msra.mxu1 %v3149_v43 }
  0xb9   :  { %2725 = vmatprep.subr.bf16.mxu1 %v3153_v44 }
  0xbb   :  { %1875 = vmatpush1.bf16.msra.mxu0 %v3115_v45  ;;  %2045 = vmatmul.mubr.bf16.gmra.mrb[28].mxu1 %v3529_v36 }
  0xbc   :  { %1876 = vmatprep.subr.bf16.mxu0 %v3122_v46  ;;  %2726 = vmatpush3.bf16.msra.mxu1 %v3154_v49 }
  0xbd   :  { %2843 = vmatprep.subr.msk.bf16.mxu1 %vm1540_vm1, %v3158_v51  ;;  %2613 = vmatprep.mubr.msk.bf16.mxu1 %vm1527_vm0, %v3543_v40 }
  0xbf   :  { %1877 = vmatpush1.bf16.msra.mxu0 %v3120_v52 }
  0xc0   :  { %1917 = vmatprep.subr.bf16.mxu0 %v3127_v53  ;;  %2728 = vmatpush3.bf16.msra.mxu1 %v3159_v54 }
  0xc2   :  { %1879 = vmatmul.mubr.bf16.vlgmr.msra.gmra.mrb[16].mxu0 %v3421_v5  ;;  %v3135_v5 = vld [vmem:[%s4199_s1 + $0x400] ss:$28 sps:$4 sm:$0xff]  }
  0xc3   :  { %1918 = vmatpush1.bf16.msra.mxu0 %v3125_v55  ;;  %2085 = vmatmul.mubr.bf16.vlgmr.msra.gmra.mrb[32].mxu1 %v3654_v19 }
  0xc4   :  { %1919 = vmatprep.subr.bf16.mxu0 %v3132_v56  ;;  %2614 = vmatprep.mubr.msk.bf16.mxu1 %vm1527_vm0, %v3671_v26 }
  0xc5   :  { %1888 = vmatprep.mubr.bf16.mxu0 %v3452_v14  ;;  %v3147_v14 = vld [vmem:[%s4199_s1 + $0x474] ss:$28 sps:$4 sm:$0xff]  }
  0xc7   :  { %1920 = vmatpush1.bf16.msra.mxu0 %v3130_v57 }
  0xc8   :  { %1921 = vmatprep.subr.bf16.mxu0 %v3137_v58 }
  0xca   :  { %1889 = vmatmul.mubr.bf16.gmra.mrb[20].mxu0 %v3457_v15  ;;  %v3145_v15 = vld [vmem:[%s4199_s1 + $0x470] ss:$28 sps:$4 sm:$0xff]  }
  0xcb   :  { %1922 = vmatpush1.bf16.msra.mxu0 %v3135_v5  ;;  %2093 = vmatmul.mubr.bf16.gmra.mrb[36].mxu1 %v3692_v31 }
  0xcc   :  { %1923 = vmatprep.subr.bf16.mxu0 %v3142_v60  ;;  %2615 = vmatprep.mubr.msk.bf16.mxu1 %vm1527_vm0, %v3711_v38 }
  0xcd   :  { %1898 = vmatprep.mubr.bf16.mxu0 %v3487_v23  ;;  %v3157_v23 = vld [vmem:[%s4199_s1 + $0x4e4] ss:$28 sps:$4 sm:$0xff]  }
  0xcf   :  { %1924 = vmatpush1.bf16.msra.mxu0 %v3140_v61 }
  0xd0   :  { %1925 = vmatprep.subr.bf16.mxu0 %v3147_v14 }
  0xd2   :  { %1899 = vmatmul.mubr.bf16.gmra.mrb[24].mxu0 %v3495_v25  ;;  %v3155_v25 = vld [vmem:[%s4199_s1 + $0x4e0] ss:$28 sps:$4 sm:$0xff]  }
  0xd3   :  { %1926 = vmatpush1.bf16.msra.mxu0 %v3145_v15  ;;  %2101 = vmatmul.mubr.bf16.gmra.mrb[40].mxu1 %v3743_v48 }
  0xd4   :  { %1927 = vmatprep.subr.bf16.mxu0 %v3152_v62  ;;  %2616 = vmatprep.mubr.msk.bf16.mxu1 %vm1527_vm0, %v3748_v50 }
  0xd5   :  { %1908 = vmatprep.mubr.bf16.mxu0 %v3522_v33  ;;  %v3165_v33 = vld [vmem:[%s4199_s1 + $0x554] ss:$28 sps:$4 sm:$0xff]  }
  0xd7   :  { %1928 = vmatpush1.bf16.msra.mxu0 %v3150_v63 }
  0xd8   :  { %1929 = vmatprep.subr.bf16.mxu0 %v3157_v23 }
  0xda   :  { %1909 = vmatmul.mubr.bf16.gmra.mrb[28].mxu0 %v3529_v36  ;;  %v3163_v36 = vld [vmem:[%s4199_s1 + $0x550] ss:$28 sps:$4 sm:$0xff]  }
  0xdb   :  { %1930 = vmatpush1.bf16.msra.mxu0 %v3155_v25  ;;  %2109 = vmatmul.mubr.bf16.gmra.mrb[44].mxu1 %v3780_v59 }
  0xdc   :  { %1931 = vmatprep.subr.bf16.mxu0 %v3162_v0  ;;  %2609 = vmatprep.mubr.msk.bf16.mxu0 %vm1527_vm0, %v3543_v40  ;;  %v3171_v40 = vld [vmem:[%s4199_s1 + $0x5c4] ss:$28 sps:$4 sm:$0xff]  }
  0xdf   :  { %1932 = vmatpush1.bf16.msra.mxu0 %v3160_v1 }
  0xe0   :  { %1933 = vmatprep.subr.bf16.mxu0 %v3165_v33 }
  0xe3   :  { %1934 = vmatpush1.bf16.msra.mxu0 %v3163_v36 }
  0xe4   :  { %1935 = vmatprep.subr.bf16.mxu0 %v3168_v2 }
  0xe7   :  { %1936 = vmatpush1.bf16.msra.mxu0 %v3166_v3 }
  0xe8   :  { %1937 = vmatprep.subr.bf16.mxu0 %v3171_v40 }
  0xeb   :  { %1938 = vmatpush1.bf16.msra.mxu0 %v3169_v4 }
  0xec   :  { %1939 = vmatprep.subr.bf16.mxu0 %v3174_v6  ;;  %v4052_v20 = vpop.permute.xlu0 %290 }
  0xef   :  { %1940 = vmatpush1.bf16.msra.mxu0 %v3172_v7 }
  0xf0   :  { %1941 = vmatprep.subr.bf16.mxu0 %v3177_v8 }
  0xf3   :  { %1942 = vmatpush1.bf16.msra.mxu0 %v3175_v9 }
  0xf4   :  { %1943 = vmatprep.subr.bf16.mxu0 %v3180_v10 }
  0xf7   :  { %1944 = vmatpush1.bf16.msra.mxu0 %v3178_v47 }
  0xf8   :  { %1945 = vmatprep.subr.bf16.mxu0 %v3183_v11  ;;  %v4054_v21 = vpop.permute.xlu0 %295 }
  0xfb   :  { %1946 = vmatpush1.bf16.msra.mxu0 %v3181_v13 }
  0xfc   :  { %2608 = vmatprep.subr.msk.bf16.mxu0 %vm1540_vm1, %v2596_v16  ;;  %v4088_v10 = vpop.permute.xlu0 %310 }
  0xff   :  { %1948 = vmatpush1.bf16.msra.mxu0 %v1554_v18 }
 0x102   :  { %1950 = vmatmul.mubr.bf16.vlgmr.msra.gmra.mrb[16].mxu0 %v3654_v19  ;;  %v4056_v19 = vpop.permute.xlu1 %300 }
 0x103   :  { %2610 = vmatprep.mubr.msk.bf16.mxu0 %vm1527_vm0, %v3671_v26 }
 0x106   :  { %v4066_v53 = vpop.permute.xlu1 %305 }
 0x10a   :  { %1960 = vmatmul.mubr.bf16.gmra.mrb[20].mxu0 %v3692_v31  ;;  %v4090_v12 = vpop.permute.xlu1 %315 }
 0x10b   :  { %2611 = vmatprep.mubr.msk.bf16.mxu0 %vm1527_vm0, %v3711_v38 }
 0x112   :  { %1970 = vmatmul.mubr.bf16.gmra.mrb[24].mxu0 %v3743_v48 }
 0x113   :  { %2612 = vmatprep.mubr.msk.bf16.mxu0 %vm1527_vm0, %v3748_v50 }
 0x11a   :  { %1980 = vmatmul.mubr.bf16.gmra.mrb[28].mxu0 %v3780_v59 }
 0x155   :  { %v1667_v22 = vpop.f32.mrb[0].mxu0  ;;  %v1809_v26 = vpop.f32.mrb[0].mxu1 }
 0x156   :  { %v2753_v31 = vadd.f32 %v1667_v22, %v4052_v20  ;;  %v2767_v24 = vadd.f32 %v1809_v26, %v4052_v20  ;;  %v1669_v38 = vpop.f32.mrb[1].mxu0  ;;  %v1811_v27 = vpop.f32.mrb[1].mxu1 }
 0x157   :  { %v2754_v48 = vadd.f32 %v1669_v38, %v4052_v20  ;;  %v2768_v50 = vadd.f32 %v1811_v27, %v4052_v20  ;;  %v1671_v28 = vpop.f32.mrb[2].mxu0  ;;  %v1813_v59 = vpop.f32.mrb[2].mxu1 }
 0x158   :  { %v2116_v29 = vmax.f32 %v2753_v31, 0.0  ;;  %v2118_v30 = vmax.f32 %v2767_v24, 0.0  ;;  %v2755_v32 = vadd.f32 %v1671_v28, %v4054_v21  ;;  %v2769_v34 = vadd.f32 %v1813_v59, %v4054_v21  ;;  %v1673_v35 = vpop.f32.mrb[3].mxu0  ;;  %v1815_v37 = vpop.f32.mrb[3].mxu1 }
 0x159   :  { %v2117_v39 = vmax.f32 %v2754_v48, 0.0  ;;  %v2119_v41 = vmax.f32 %v2768_v50, 0.0  ;;  %v2756_v42 = vadd.f32 %v1673_v35, %v4054_v21  ;;  %v2770_v43 = vadd.f32 %v1815_v37, %v4054_v21 }
 0x15a   :  { %v2123_v44 = vmax.f32 %v2755_v32, 0.0  ;;  %v2125_v45 = vmax.f32 %v2769_v34, 0.0 }
 0x15b   :  { %v2645_v46 = vpack.c.bf16 %v2117_v39, %v2116_v29  ;;  %v2646_v49 = vpack.c.bf16 %v2119_v41, %v2118_v30  ;;  %v2124_v51 = vmax.f32 %v2756_v42, 0.0  ;;  %v2126_v52 = vmax.f32 %v2770_v43, 0.0 }
 0x15d   :  { %2326 = vst [vmem:[%s4202_s3] sm:$0xff] %v2645_v46  ;;  %2327 = vst [vmem:[%s4202_s3 + $0x8] sm:$0xff] %v2646_v49  ;;  %v2649_v54 = vpack.c.bf16 %v2124_v51, %v2123_v44  ;;  %v2650_v55 = vpack.c.bf16 %v2126_v52, %v2125_v45  ;;  %v1677_v56 = vpop.f32.mrb[4].mxu0  ;;  %v1819_v57 = vpop.f32.mrb[4].mxu1 }
 0x15e   :  { %v2757_v58 = vadd.f32 %v1677_v56, %v4056_v19  ;;  %v1679_v5 = vpop.f32.mrb[5].mxu0  ;;  %v2771_v60 = vadd.f32 %v1819_v57, %v4056_v19  ;;  %v1821_v61 = vpop.f32.mrb[5].mxu1 }
 0x15f   :  { %2330 = vst [vmem:[%s4202_s3 + $0x1c] sm:$0xff] %v2649_v54  ;;  %2331 = vst [vmem:[%s4202_s3 + $0x24] sm:$0xff] %v2650_v55  ;;  %v2758_v14 = vadd.f32 %v1679_v5, %v4056_v19  ;;  %v1681_v15 = vpop.f32.mrb[6].mxu0  ;;  %v2772_v62 = vadd.f32 %v1821_v61, %v4056_v19  ;;  %v1823_v63 = vpop.f32.mrb[6].mxu1 }
 0x160   :  { %v2130_v23 = vmax.f32 %v2757_v58, 0.0  ;;  %v2759_v25 = vadd.f32 %v1681_v15, %v4066_v53  ;;  %v1683_v0 = vpop.f32.mrb[7].mxu0  ;;  %v2132_v1 = vmax.f32 %v2771_v60, 0.0  ;;  %v2773_v33 = vadd.f32 %v1823_v63, %v4066_v53  ;;  %v1825_v36 = vpop.f32.mrb[7].mxu1 }
 0x161   :  { %v2131_v2 = vmax.f32 %v2758_v14, 0.0  ;;  %v2760_v3 = vadd.f32 %v1683_v0, %v4066_v53  ;;  %v2133_v40 = vmax.f32 %v2772_v62, 0.0  ;;  %v2774_v4 = vadd.f32 %v1825_v36, %v4066_v53  ;;  %v4112_v46 = vpop.permute.xlu0 %320 }
 0x162   :  { %v2137_v6 = vmax.f32 %v2759_v25, 0.0  ;;  %v2139_v7 = vmax.f32 %v2773_v33, 0.0 }
 0x163   :  { %v2653_v8 = vpack.c.bf16 %v2131_v2, %v2130_v23  ;;  %v2138_v9 = vmax.f32 %v2760_v3, 0.0  ;;  %v2654_v47 = vpack.c.bf16 %v2133_v40, %v2132_v1  ;;  %v2140_v11 = vmax.f32 %v2774_v4, 0.0 }
 0x165   :  { %2334 = vst [vmem:[%s4202_s3 + $0x38] sm:$0xff] %v2653_v8  ;;  %v2657_v13 = vpack.c.bf16 %v2138_v9, %v2137_v6  ;;  %v1687_v16 = vpop.f32.mrb[8].mxu0  ;;  %2335 = vst [vmem:[%s4202_s3 + $0x40] sm:$0xff] %v2654_v47  ;;  %v2658_v17 = vpack.c.bf16 %v2140_v11, %v2139_v7  ;;  %v1829_v18 = vpop.f32.mrb[8].mxu1 }
 0x166   :  { %v2761_v22 = vadd.f32 %v1687_v16, %v4088_v10  ;;  %v1689_v26 = vpop.f32.mrb[9].mxu0  ;;  %v2775_v31 = vadd.f32 %v1829_v18, %v4088_v10  ;;  %v1831_v24 = vpop.f32.mrb[9].mxu1 }
 0x167   :  { %2338 = vst [vmem:[%s4202_s3 + $0x54] sm:$0xff] %v2657_v13  ;;  %v2762_v38 = vadd.f32 %v1689_v26, %v4088_v10  ;;  %v1691_v27 = vpop.f32.mrb[10].mxu0  ;;  %2339 = vst [vmem:[%s4202_s3 + $0x5c] sm:$0xff] %v2658_v17  ;;  %v2776_v48 = vadd.f32 %v1831_v24, %v4088_v10  ;;  %v1833_v50 = vpop.f32.mrb[10].mxu1 }
 0x168   :  { %v2144_v28 = vmax.f32 %v2761_v22, 0.0  ;;  %v2763_v59 = vadd.f32 %v1691_v27, %v4090_v12  ;;  %v1693_v29 = vpop.f32.mrb[11].mxu0  ;;  %v2146_v30 = vmax.f32 %v2775_v31, 0.0  ;;  %v2777_v32 = vadd.f32 %v1833_v50, %v4090_v12  ;;  %v1835_v34 = vpop.f32.mrb[11].mxu1 }
 0x169   :  { %v2145_v35 = vmax.f32 %v2762_v38, 0.0  ;;  %v2764_v37 = vadd.f32 %v1693_v29, %v4090_v12  ;;  %v2147_v39 = vmax.f32 %v2776_v48, 0.0  ;;  %v2778_v41 = vadd.f32 %v1835_v34, %v4090_v12 }
 0x16a   :  { %v2151_v42 = vmax.f32 %v2763_v59, 0.0  ;;  %v2153_v43 = vmax.f32 %v2777_v32, 0.0 }
 0x16b   :  { %v2661_v44 = vpack.c.bf16 %v2145_v35, %v2144_v28  ;;  %v2152_v45 = vmax.f32 %v2764_v37, 0.0  ;;  %v2662_v49 = vpack.c.bf16 %v2147_v39, %v2146_v30  ;;  %v2154_v51 = vmax.f32 %v2778_v41, 0.0 }
 0x16d   :  { %2342 = vst [vmem:[%s4202_s3 + $0x70] sm:$0xff] %v2661_v44  ;;  %v2665_v52 = vpack.c.bf16 %v2152_v45, %v2151_v42  ;;  %v1697_v54 = vpop.f32.mrb[12].mxu0  ;;  %2343 = vst [vmem:[%s4202_s3 + $0x78] sm:$0xff] %v2662_v49  ;;  %v2666_v55 = vpack.c.bf16 %v2154_v51, %v2153_v43  ;;  %v1839_v56 = vpop.f32.mrb[12].mxu1 }
 0x16e   :  { %v2765_v57 = vadd.f32 %v1697_v54, %v4112_v46  ;;  %v1699_v58 = vpop.f32.mrb[13].mxu0  ;;  %v2779_v5 = vadd.f32 %v1839_v56, %v4112_v46  ;;  %v1841_v60 = vpop.f32.mrb[13].mxu1 }
 0x16f   :  { %2346 = vst [vmem:[%s4202_s3 + $0x8c] sm:$0xff] %v2665_v52  ;;  %v2766_v61 = vadd.f32 %v1699_v58, %v4112_v46  ;;  %v1701_v14 = vpop.f32.mrb[14].mxu0  ;;  %2347 = vst [vmem:[%s4202_s3 + $0x94] sm:$0xff] %v2666_v55  ;;  %v2780_v15 = vadd.f32 %v1841_v60, %v4112_v46  ;;  %v1843_v62 = vpop.f32.mrb[14].mxu1 }
 0x170   :  { %v2158_v63 = vmax.f32 %v2765_v57, 0.0  ;;  %v1702_v23 = vpop.f32.mrb[15].mxu0  ;;  %v2160_v25 = vmax.f32 %v2779_v5, 0.0  ;;  %v1844_v0 = vpop.f32.mrb[15].mxu1 }
 0x171   :  { %v2159_v1 = vmax.f32 %v2766_v61, 0.0  ;;  %v2161_v33 = vmax.f32 %v2780_v15, 0.0 }
 0x173   :  { %v2669_v36 = vpack.c.bf16 %v2159_v1, %v2158_v63  ;;  %v2670_v2 = vpack.c.bf16 %v2161_v33, %v2160_v25 }
 0x175   :  { %2350 = vst [vmem:[%s4202_s3 + $0xa8] sm:$0x11] %v2669_v36  ;;  %2351 = vst [vmem:[%s4202_s3 + $0xb0] sm:$0x11] %v2670_v2 }
 0x176   :  { %v2689_v3 = vpop.f32.mrb[16].mxu1 }
 0x177   :  { %v2690_v40 = vpop.f32.mrb[17].mxu1 }
 0x178   :  { %v2691_v4 = vadd.f32 %v2690_v40, %v2689_v3  ;;  %v2692_v6 = vpop.f32.mrb[18].mxu1 }
 0x179   :  { %v2693_v7 = vpop.f32.mrb[19].mxu1 }
 0x17a   :  { %v2694_v8 = vadd.f32 %v2693_v7, %v2692_v6  ;;  %v2023_v29 = vadd.f32 %v2691_v4, %v4052_v20 }
 0x17c   :  { %v2026_v34 = vadd.f32 %v2694_v8, %v4054_v21 }
 0x17e   :  { %v2695_v9 = vpop.f32.mrb[20].mxu1 }
 0x17f   :  { %v2696_v47 = vpop.f32.mrb[21].mxu1 }
 0x180   :  { %v2697_v11 = vadd.f32 %v2696_v47, %v2695_v9  ;;  %v2698_v13 = vpop.f32.mrb[22].mxu1 }
 0x181   :  { %v2699_v16 = vpop.f32.mrb[23].mxu1 }
 0x182   :  { %v2700_v17 = vadd.f32 %v2699_v16, %v2698_v13  ;;  %v2031_v45 = vadd.f32 %v2697_v11, %v4056_v19 }
 0x184   :  { %v2034_v55 = vadd.f32 %v2700_v17, %v4066_v53 }
 0x186   :  { %v2701_v18 = vpop.f32.mrb[24].mxu1 }
 0x187   :  { %v2702_v22 = vpop.f32.mrb[25].mxu1 }
 0x188   :  { %v2703_v26 = vadd.f32 %v2702_v22, %v2701_v18  ;;  %v2704_v31 = vpop.f32.mrb[26].mxu1 }
 0x189   :  { %v2705_v24 = vpop.f32.mrb[27].mxu1 }
 0x18a   :  { %v2706_v38 = vadd.f32 %v2705_v24, %v2704_v31  ;;  %v2039_v62 = vadd.f32 %v2703_v26, %v4088_v10 }
 0x18c   :  { %v2042_v1 = vadd.f32 %v2706_v38, %v4090_v12 }
 0x18e   :  { %v2707_v27 = vpop.f32.mrb[28].mxu1 }
 0x18f   :  { %v2708_v48 = vpop.f32.mrb[29].mxu1 }
 0x190   :  { %v2709_v50 = vadd.f32 %v2708_v48, %v2707_v27  ;;  %v2710_v28 = vpop.f32.mrb[30].mxu1 }
 0x191   :  { %v2711_v59 = vpop.f32.mrb[31].mxu1 }
 0x192   :  { %v2047_v8 = vadd.f32 %v2709_v50, %v4112_v46 }
 0x196   :  { %v2729_v30 = vpop.f32.mrb[32].mxu1 }
 0x197   :  { %v2730_v32 = vpop.f32.mrb[33].mxu1 }
 0x198   :  { %v2731_v35 = vadd.f32 %v2730_v32, %v2729_v30  ;;  %v2732_v37 = vpop.f32.mrb[34].mxu1 }
 0x199   :  { %v2733_v39 = vpop.f32.mrb[35].mxu1 }
 0x19a   :  { %v2087_v41 = vadd.f32 %v2731_v35, %v2023_v29  ;;  %v2734_v42 = vadd.f32 %v2733_v39, %v2732_v37 }
 0x19c   :  { %v2122_v43 = vmax.f32 %v2087_v41, 0.0  ;;  %v2090_v44 = vadd.f32 %v2734_v42, %v2026_v34 }
 0x19e   :  { %v2648_v49 = vpack.c.bf16 %v2122_v43, %v2122_v43  ;;  %v2129_v51 = vmax.f32 %v2090_v44, 0.0  ;;  %v2735_v52 = vpop.f32.mrb[36].mxu1 }
 0x19f   :  { %v2736_v54 = vpop.f32.mrb[37].mxu1 }
 0x1a0   :  { %2329 = vst [vmem:[%s4202_s3 + $0x18] sm:$0xf] %v2648_v49  ;;  %v2652_v56 = vpack.c.bf16 %v2129_v51, %v2129_v51  ;;  %v2737_v57 = vadd.f32 %v2736_v54, %v2735_v52  ;;  %v2738_v58 = vpop.f32.mrb[38].mxu1 }
 0x1a1   :  { %v2739_v5 = vpop.f32.mrb[39].mxu1 }
 0x1a2   :  { %2333 = vst [vmem:[%s4202_s3 + $0x34] sm:$0xf] %v2652_v56  ;;  %v2095_v60 = vadd.f32 %v2737_v57, %v2031_v45  ;;  %v2740_v61 = vadd.f32 %v2739_v5, %v2738_v58 }
 0x1a4   :  { %v2136_v14 = vmax.f32 %v2095_v60, 0.0  ;;  %v2098_v15 = vadd.f32 %v2740_v61, %v2034_v55 }
 0x1a6   :  { %v2656_v63 = vpack.c.bf16 %v2136_v14, %v2136_v14  ;;  %v2143_v23 = vmax.f32 %v2098_v15, 0.0  ;;  %v2741_v25 = vpop.f32.mrb[40].mxu1 }
 0x1a7   :  { %v2742_v0 = vpop.f32.mrb[41].mxu1 }
 0x1a8   :  { %2337 = vst [vmem:[%s4202_s3 + $0x50] sm:$0xf] %v2656_v63  ;;  %v2660_v33 = vpack.c.bf16 %v2143_v23, %v2143_v23  ;;  %v2743_v36 = vadd.f32 %v2742_v0, %v2741_v25  ;;  %v2744_v2 = vpop.f32.mrb[42].mxu1 }
 0x1a9   :  { %v2745_v3 = vpop.f32.mrb[43].mxu1 }
 0x1aa   :  { %2341 = vst [vmem:[%s4202_s3 + $0x6c] sm:$0xf] %v2660_v33  ;;  %v2103_v40 = vadd.f32 %v2743_v36, %v2039_v62  ;;  %v2746_v4 = vadd.f32 %v2745_v3, %v2744_v2 }
 0x1ac   :  { %v2150_v6 = vmax.f32 %v2103_v40, 0.0  ;;  %v2106_v7 = vadd.f32 %v2746_v4, %v2042_v1 }
 0x1ae   :  { %v2664_v9 = vpack.c.bf16 %v2150_v6, %v2150_v6  ;;  %v2157_v47 = vmax.f32 %v2106_v7, 0.0  ;;  %v2747_v11 = vpop.f32.mrb[44].mxu1 }
 0x1af   :  { %v2748_v13 = vpop.f32.mrb[45].mxu1 }
 0x1b0   :  { %2345 = vst [vmem:[%s4202_s3 + $0x88] sm:$0xf] %v2664_v9  ;;  %v2668_v16 = vpack.c.bf16 %v2157_v47, %v2157_v47  ;;  %v2749_v17 = vadd.f32 %v2748_v13, %v2747_v11  ;;  %v2750_v18 = vpop.f32.mrb[46].mxu1 }
 0x1b1   :  { %v2751_v22 = vpop.f32.mrb[47].mxu1 }
 0x1b2   :  { %2349 = vst [vmem:[%s4202_s3 + $0xa4] sm:$0xf] %v2668_v16  ;;  %v2111_v26 = vadd.f32 %v2749_v17, %v2047_v8 }
 0x1b4   :  { %v2164_v31 = vmax.f32 %v2111_v26, 0.0 }
 0x1b6   :  { %v2672_v24 = vpack.c.bf16 %v2164_v31, %v2164_v31 }
 0x1b8   :  { %2353 = vst [vmem:[%s4202_s3 + $0xc0] sm:$0x1] %v2672_v24 }
 0x1d5   :  { %v1951_v38 = vpop.f32.mrb[16].mxu0 }
 0x1d6   :  { %v2781_v27 = vadd.f32 %v1951_v38, %v4052_v20  ;;  %v1953_v48 = vpop.f32.mrb[17].mxu0 }
 0x1d7   :  { %v2782_v50 = vadd.f32 %v1953_v48, %v4052_v20  ;;  %v1955_v28 = vpop.f32.mrb[18].mxu0 }
 0x1d8   :  { %v2120_v59 = vmax.f32 %v2781_v27, 0.0  ;;  %v2783_v29 = vadd.f32 %v1955_v28, %v4054_v21  ;;  %v1957_v30 = vpop.f32.mrb[19].mxu0 }
 0x1d9   :  { %v2121_v32 = vmax.f32 %v2782_v50, 0.0  ;;  %v2784_v34 = vadd.f32 %v1957_v30, %v4054_v21 }
 0x1da   :  { %v2127_v35 = vmax.f32 %v2783_v29, 0.0 }
 0x1db   :  { %v2647_v37 = vpack.c.bf16 %v2121_v32, %v2120_v59  ;;  %v2128_v39 = vmax.f32 %v2784_v34, 0.0 }
 0x1dd   :  { %2328 = vst [vmem:[%s4202_s3 + $0x10] sm:$0xff] %v2647_v37  ;;  %v2651_v41 = vpack.c.bf16 %v2128_v39, %v2127_v35  ;;  %v1961_v42 = vpop.f32.mrb[20].mxu0 }
 0x1de   :  { %v2785_v43 = vadd.f32 %v1961_v42, %v4056_v19  ;;  %v1963_v20 = vpop.f32.mrb[21].mxu0 }
 0x1df   :  { %2332 = vst [vmem:[%s4202_s3 + $0x2c] sm:$0xff] %v2651_v41  ;;  %v2786_v44 = vadd.f32 %v1963_v20, %v4056_v19  ;;  %v1965_v45 = vpop.f32.mrb[22].mxu0 }
 0x1e0   :  { %v2134_v21 = vmax.f32 %v2785_v43, 0.0  ;;  %v2787_v49 = vadd.f32 %v1965_v45, %v4066_v53  ;;  %v1967_v51 = vpop.f32.mrb[23].mxu0 }
 0x1e1   :  { %v2135_v52 = vmax.f32 %v2786_v44, 0.0  ;;  %v2788_v54 = vadd.f32 %v1967_v51, %v4066_v53 }
 0x1e2   :  { %v2141_v55 = vmax.f32 %v2787_v49, 0.0 }
 0x1e3   :  { %v2655_v56 = vpack.c.bf16 %v2135_v52, %v2134_v21  ;;  %v2142_v57 = vmax.f32 %v2788_v54, 0.0 }
 0x1e5   :  { %2336 = vst [vmem:[%s4202_s3 + $0x48] sm:$0xff] %v2655_v56  ;;  %v2659_v58 = vpack.c.bf16 %v2142_v57, %v2141_v55  ;;  %v1971_v5 = vpop.f32.mrb[24].mxu0 }
 0x1e6   :  { %v2789_v60 = vadd.f32 %v1971_v5, %v4088_v10  ;;  %v1973_v19 = vpop.f32.mrb[25].mxu0 }
 0x1e7   :  { %2340 = vst [vmem:[%s4202_s3 + $0x64] sm:$0xff] %v2659_v58  ;;  %v2790_v61 = vadd.f32 %v1973_v19, %v4088_v10  ;;  %v1975_v14 = vpop.f32.mrb[26].mxu0 }
 0x1e8   :  { %v2148_v53 = vmax.f32 %v2789_v60, 0.0  ;;  %v2791_v15 = vadd.f32 %v1975_v14, %v4090_v12  ;;  %v1977_v62 = vpop.f32.mrb[27].mxu0 }
 0x1e9   :  { %v2149_v63 = vmax.f32 %v2790_v61, 0.0  ;;  %v2792_v23 = vadd.f32 %v1977_v62, %v4090_v12 }
 0x1ea   :  { %v2155_v25 = vmax.f32 %v2791_v15, 0.0 }
 0x1eb   :  { %v2663_v0 = vpack.c.bf16 %v2149_v63, %v2148_v53  ;;  %v2156_v1 = vmax.f32 %v2792_v23, 0.0 }
 0x1ed   :  { %2344 = vst [vmem:[%s4202_s3 + $0x80] sm:$0xff] %v2663_v0  ;;  %v2667_v33 = vpack.c.bf16 %v2156_v1, %v2155_v25  ;;  %v1981_v36 = vpop.f32.mrb[28].mxu0 }
 0x1ee   :  { %v2793_v2 = vadd.f32 %v1981_v36, %v4112_v46  ;;  %v1983_v10 = vpop.f32.mrb[29].mxu0 }
 0x1ef   :  { %2348 = vst [vmem:[%s4202_s3 + $0x9c] sm:$0xff] %v2667_v33  ;;  %v2794_v3 = vadd.f32 %v1983_v10, %v4112_v46  ;;  %v1985_v40 = vpop.f32.mrb[30].mxu0 }
 0x1f0   :  { %v2162_v12 = vmax.f32 %v2793_v2, 0.0  ;;  %v1986_v4 = vpop.f32.mrb[31].mxu0 }
 0x1f1   :  { %v2163_v6 = vmax.f32 %v2794_v3, 0.0 }
 0x1f3   :  { %v2671_v7 = vpack.c.bf16 %v2163_v6, %v2162_v12 }
 0x1f5   :  { %2352 = vst [vmem:[%s4202_s3 + $0xb8] sm:$0x11] %v2671_v7 }

// kernel: lenet_forward.8
= control target key start
LH: loop header
LB: loop body
LE: loop exit
PB: predicated region body
PF: predicated region fallthrough
CT: control target
= control target key end

     0   :  { %vm48_vm0 = vcmask 1043456   ;;  %s179_s0 = inlined_call_operand.vmem [shape: bf16[4,8,1400], index: 0, kind: input, shape index: {}]   ;;  %s180_s1 = inlined_call_operand.vmem [shape: bf16[8,1400], index: 1, kind: output, shape index: {}]  }
   0x1   :  { %v9_v0 = vld [vmem:[%s179_s0] sm:$0xff]  ;;  %v15_v1 = vld [vmem:[%s179_s0 + $0x2c] sm:$0xff]  ;;  %v21_v2 = vld [vmem:[%s179_s0 + $0x58] sm:$0xff] }
   0x2   :  { %v27_v3 = vld [vmem:[%s179_s0 + $0x84] sm:$0xff]  ;;  %v33_v4 = vmax.bf16 %v15_v1, %v9_v0  ;;  %v16_v6 = vld [vmem:[%s179_s0 + $0x34] sm:$0xff]  ;;  %v28_v8 = vld [vmem:[%s179_s0 + $0x8c] sm:$0xff] }
   0x3   :  { %v10_v5 = vld [vmem:[%s179_s0 + $0x8] sm:$0xff]  ;;  %v22_v7 = vld [vmem:[%s179_s0 + $0x60] sm:$0xff]  ;;  %v11_v10 = vld [vmem:[%s179_s0 + $0x10] sm:$0xff] }
   0x4   :  { %v36_v9 = vmax.bf16 %v16_v6, %v10_v5  ;;  %v34_v11 = vmax.bf16 %v33_v4, %v21_v2  ;;  %v17_v12 = vld [vmem:[%s179_s0 + $0x3c] sm:$0xff]  ;;  %v23_v13 = vld [vmem:[%s179_s0 + $0x68] sm:$0xff]  ;;  %v29_v14 = vld [vmem:[%s179_s0 + $0x94] sm:$0xff] }
   0x5   :  { %v39_v16 = vmax.bf16 %v17_v12, %v11_v10  ;;  %v12_v17 = vld [vmem:[%s179_s0 + $0x18] sm:$0xff]  ;;  %v18_v18 = vld [vmem:[%s179_s0 + $0x44] sm:$0xff]  ;;  %v24_v19 = vld [vmem:[%s179_s0 + $0x70] sm:$0xff] }
   0x6   :  { %v37_v15 = vmax.bf16 %v36_v9, %v22_v7  ;;  %v35_v20 = vmax.bf16 %v34_v11, %v27_v3  ;;  %v30_v21 = vld [vmem:[%s179_s0 + $0x9c] sm:$0xff]  ;;  %v42_v22 = vmax.bf16 %v18_v18, %v12_v17  ;;  %v19_v24 = vld [vmem:[%s179_s0 + $0x4c] sm:$0xff]  ;;  %v31_v28 = vld [vmem:[%s179_s0 + $0xa4] sm:$0xff] }
   0x7   :  { %v13_v23 = vld [vmem:[%s179_s0 + $0x20] sm:$0xff]  ;;  %v40_v26 = vmax.bf16 %v39_v16, %v23_v13  ;;  %v25_v27 = vld [vmem:[%s179_s0 + $0x78] sm:$0xff]  ;;  %v14_v30 = vld [vmem:[%s179_s0 + $0x28] sm:$0xf] }
   0x8   :  { %v38_v25 = vmax.bf16 %v37_v15, %v28_v8  ;;  %v45_v29 = vmax.bf16 %v19_v24, %v13_v23  ;;  %65 = vst [vmem:[%s180_s1] sm:$0xff] %v35_v20  ;;  %v43_v31 = vmax.bf16 %v42_v22, %v24_v19  ;;  %v20_v32 = vld [vmem:[%s179_s0 + $0x54] sm:$0xf]  ;;  %v26_v33 = vld [vmem:[%s179_s0 + $0x80] sm:$0xf]  ;;  %v32_v34 = vld [vmem:[%s179_s0 + $0xac] sm:$0xf] }
   0x9   :  { %v41_v35 = vmax.bf16 %v40_v26, %v29_v14  ;;  %v51_v37 = vsel %vm48_vm0, %v14_v30, 4286644096  ;;  %v54_v38 = vsel %vm48_vm0, %v20_v32, 4286644096  ;;  %v58_v41 = vsel %vm48_vm0, %v26_v33, 4286644096 }
   0xa   :  { %66 = vst [vmem:[%s180_s1 + $0x8] sm:$0xff] %v38_v25  ;;  %v46_v36 = vmax.bf16 %v45_v29, %v25_v27  ;;  %v44_v39 = vmax.bf16 %v43_v31, %v30_v21  ;;  %v56_v40 = vmax.bf16 %v54_v38, %v51_v37  ;;  %v62_v43 = vsel %vm48_vm0, %v32_v34, 4286644096 }
   0xb   :  { %67 = vst [vmem:[%s180_s1 + $0x10] sm:$0xff] %v41_v35 }
   0xc   :  { %v47_v42 = vmax.bf16 %v46_v36, %v31_v28  ;;  %68 = vst [vmem:[%s180_s1 + $0x18] sm:$0xff] %v44_v39  ;;  %v60_v44 = vmax.bf16 %v58_v41, %v56_v40 }
   0xe   :  { %69 = vst [vmem:[%s180_s1 + $0x20] sm:$0xff] %v47_v42  ;;  %v64_v45 = vmax.bf16 %v62_v43, %v60_v44 }
  0x10   :  { %70 = vst [vmem:[%s180_s1 + $0x28] sm:$0xf] %v64_v45 }

// kernel: lenet_forward.9
= control target key start
LH: loop header
LB: loop body
LE: loop exit
PB: predicated region body
PF: predicated region fallthrough
CT: control target
= control target key end

     0   :  { %v5243_v22 = vmov 1966171168   ;;  %v746_v24 = vlaneseq  ;;  %vm3154_vm0 = vcmask 785408   ;;  %vm4046_vm1 = vcmask 812032   ;;  %s6442_s1 = inlined_call_operand.vmem [shape: bf16[5600,100], index: 1, kind: input, shape index: {}]   ;;  %s6443_s0 = inlined_call_operand.vmem [shape: bf16[2,5600], index: 0, kind: input, shape index: {}]   ;;  %s6444_s2 = inlined_call_operand.vmem [shape: f32[1,100], index: 2, kind: input, shape index: {}]   ;;  %s6445_s4 = inlined_call_operand.<no memory space> [shape: f32[1,1], index: 4, kind: input, shape index: {}]   ;;  %s6446_s3 = inlined_call_operand.vmem [shape: bf16[1,100], index: 3, kind: input, shape index: {}]   ;;  %s6447_s5 = inlined_call_operand.vmem [shape: f32[2,1], index: 5, kind: output, shape index: {}]  }
   0x1   :  { %v4886_v0 = vld [vmem:[%s6442_s1 + $0x40] sm:$0xff]   ;;  %v4890_v4 = vld [vmem:[%s6442_s1 + $0x48] sm:$0xff]   ;;  %v4894_v8 = vld [vmem:[%s6442_s1 + $0x50] sm:$0xff]   ;;  %v744_v23 = vunpack.c.l.s4 %v5243_v22  ;;  %vm4062_vm2 = vcmask 1024  }
   0x2   :  { %v4887_v1 = vld [vmem:[%s6442_s1 + $0xc0] sm:$0xff]   ;;  %4422 = vmatprep.subr.bf16.mxu0 %v4886_v0  ;;  %v4891_v5 = vld [vmem:[%s6442_s1 + $0xc8] sm:$0xff]   ;;  %v4895_v9 = vld [vmem:[%s6442_s1 + $0xd0] sm:$0xff]   ;;  %v5353_v30 = vshrl.u32 %v746_v24, 7 }
   0x3   :  { %v4888_v2 = vld [vmem:[%s6442_s1] sm:$0xff]   ;;  %4444 = vmatprep.subr.bf16.mxu1 %v4887_v1  ;;  %v4892_v6 = vld [vmem:[%s6442_s1 + $0x8] sm:$0xff]   ;;  %v4896_v10 = vld [vmem:[%s6442_s1 + $0x10] sm:$0xff]   ;;  %v745_v29 = vunpack.c.0.s8 %v744_v23 }
   0x4   :  { %v4889_v3 = vld [vmem:[%s6442_s1 + $0x80] sm:$0xff]   ;;  %4423 = vmatpush3.bf16.msra.mxu0 %v4888_v2  ;;  %v4893_v7 = vld [vmem:[%s6442_s1 + $0x88] sm:$0xff]   ;;  %v4897_v11 = vld [vmem:[%s6442_s1 + $0x90] sm:$0xff]  }
   0x5   :  { %4445 = vmatpush3.bf16.msra.mxu1 %v4889_v3  ;;  %4424 = vmatprep.subr.bf16.mxu0 %v4890_v4  ;;  %v4898_v12 = vld [vmem:[%s6442_s1 + $0x58] sm:$0xff]   ;;  %v4902_v16 = vld [vmem:[%s6442_s1 + $0x60] sm:$0xff]   ;;  %v4906_v20 = vld [vmem:[%s6442_s1 + $0x68] sm:$0xff]   ;;  %v5368_v35 = vsub.s32 %v745_v29, %v5353_v30 }
   0x6   :  { %4446 = vmatprep.subr.bf16.mxu1 %v4891_v5  ;;  %v4899_v13 = vld [vmem:[%s6442_s1 + $0xd8] sm:$0xff]   ;;  %v4903_v17 = vld [vmem:[%s6442_s1 + $0xe0] sm:$0xff]   ;;  %v4907_v21 = vld [vmem:[%s6442_s1 + $0xe8] sm:$0xff]  }
   0x7   :  { %v4900_v14 = vld [vmem:[%s6442_s1 + $0x18] sm:$0xff]   ;;  %v4904_v18 = vld [vmem:[%s6442_s1 + $0x20] sm:$0xff]   ;;  %v4908_v25 = vld [vmem:[%s6442_s1 + $0x28] sm:$0xff]  }
   0x8   :  { %4425 = vmatpush3.bf16.msra.mxu0 %v4892_v6  ;;  %v4901_v15 = vld [vmem:[%s6442_s1 + $0x98] sm:$0xff]   ;;  %v4905_v19 = vld [vmem:[%s6442_s1 + $0xa0] sm:$0xff]   ;;  %v4909_v26 = vld [vmem:[%s6442_s1 + $0xa8] sm:$0xff]  }
   0x9   :  { %4447 = vmatpush3.bf16.msra.mxu1 %v4893_v7  ;;  %4426 = vmatprep.subr.bf16.mxu0 %v4894_v8  ;;  %v4910_v27 = vld [vmem:[%s6442_s1 + $0x70] sm:$0xff]   ;;  %v4914_v33 = vld [vmem:[%s6442_s1 + $0x78] sm:$0xff]   ;;  %v23_v38 = vld [vmem:[%s6443_s0] sm:$0xff] }
   0xa   :  { %4448 = vmatprep.subr.bf16.mxu1 %v4895_v9  ;;  %v4911_v28 = vld [vmem:[%s6442_s1 + $0xf0] sm:$0xff]   ;;  %v4915_v34 = vld [vmem:[%s6442_s1 + $0xf8] sm:$0xff]   ;;  %v742_v39 = vcombine.high %v23_v38, %v23_v38  ;;  %v749_v40 = vrot.slane %v23_v38, %v5368_v35  ;;  %v4919_v41 = vld [vmem:[%s6442_s1 + $0x140] sm:$0xff]  }
   0xb   :  { %v4912_v31 = vld [vmem:[%s6442_s1 + $0x30] sm:$0xff]   ;;  %v4916_v36 = vld [vmem:[%s6442_s1 + $0x38] sm:$0xff]   ;;  %v4920_v42 = vld [vmem:[%s6442_s1 + $0x1c0] sm:$0xff]  }
   0xc   :  { %4427 = vmatpush3.bf16.msra.mxu0 %v4896_v10  ;;  %v4913_v32 = vld [vmem:[%s6442_s1 + $0xb0] sm:$0xff]   ;;  %v4917_v37 = vld [vmem:[%s6442_s1 + $0xb8] sm:$0xff]   ;;  %v757_v43 = vcombine.high %v749_v40, %v749_v40  ;;  %v765_v44 = vrot.slane %v749_v40, %v5368_v35  ;;  %v5388_v45 = vrot.slane %v742_v39, %v5368_v35  ;;  %v4921_v46 = vld [vmem:[%s6442_s1 + $0x100] sm:$0xff]  }
   0xd   :  { %4449 = vmatpush3.bf16.msra.mxu1 %v4897_v11  ;;  %4428 = vmatprep.subr.bf16.mxu0 %v4898_v12  ;;  %v4922_v48 = vld [vmem:[%s6442_s1 + $0x180] sm:$0xff]   ;;  %v4923_v51 = vld [vmem:[%s6442_s1 + $0x148] sm:$0xff]   ;;  %v4927_v58 = vld [vmem:[%s6442_s1 + $0x150] sm:$0xff]  }
   0xe   :  { %4450 = vmatprep.subr.bf16.mxu1 %v4899_v13  ;;  %v779_v47 = vrot.slane %v757_v43, %v5368_v35  ;;  %v758_v49 = vcombine.high %v5388_v45, %v5388_v45  ;;  %v787_v50 = vcombine.high %v765_v44, %v765_v44  ;;  %v4924_v53 = vld [vmem:[%s6442_s1 + $0x1c8] sm:$0xff]   ;;  %v4928_v59 = vld [vmem:[%s6442_s1 + $0x1d0] sm:$0xff]   ;;  %v4931_v62 = vld [vmem:[%s6442_s1 + $0x158] sm:$0xff]  }
   0xf   :  { %v4925_v55 = vld [vmem:[%s6442_s1 + $0x108] sm:$0xff]   ;;  %v4929_v60 = vld [vmem:[%s6442_s1 + $0x110] sm:$0xff]   ;;  %v4932_v63 = vld [vmem:[%s6442_s1 + $0x1d8] sm:$0xff]  }
  0x10   :  { %4429 = vmatpush3.bf16.msra.mxu0 %v4900_v14  ;;  %3190 = vmatprep.mubr.bf16.mxu0 %v779_v47  ;;  %v789_v52 = vcombine.high %v779_v47, %v779_v47  ;;  %v786_v54 = vrot.slane %v758_v49, %v5368_v35  ;;  %v4926_v56 = vld [vmem:[%s6442_s1 + $0x188] sm:$0xff]   ;;  %v4930_v61 = vld [vmem:[%s6442_s1 + $0x190] sm:$0xff]   ;;  %v4933_v0 = vld [vmem:[%s6442_s1 + $0x118] sm:$0xff]  }
  0x11   :  { %4451 = vmatpush3.bf16.msra.mxu1 %v4901_v15  ;;  %4430 = vmatprep.subr.bf16.mxu0 %v4902_v16  ;;  %v4934_v1 = vld [vmem:[%s6442_s1 + $0x198] sm:$0xff]   ;;  %v4935_v2 = vld [vmem:[%s6442_s1 + $0x160] sm:$0xff]   ;;  %v4939_v6 = vld [vmem:[%s6442_s1 + $0x168] sm:$0xff]  }
  0x12   :  { %4452 = vmatprep.subr.bf16.mxu1 %v4903_v17  ;;  %3230 = vmatprep.mubr.bf16.mxu1 %v789_v52  ;;  %v790_v57 = vcombine.high %v786_v54, %v786_v54  ;;  %v4936_v3 = vld [vmem:[%s6442_s1 + $0x1e0] sm:$0xff]   ;;  %v4940_v7 = vld [vmem:[%s6442_s1 + $0x1e8] sm:$0xff]   ;;  %v4943_v10 = vld [vmem:[%s6442_s1 + $0x170] sm:$0xff]  }
  0x13   :  { %v4937_v4 = vld [vmem:[%s6442_s1 + $0x120] sm:$0xff]   ;;  %v4941_v8 = vld [vmem:[%s6442_s1 + $0x128] sm:$0xff]   ;;  %v4944_v11 = vld [vmem:[%s6442_s1 + $0x1f0] sm:$0xff]  }
  0x14   :  { %4431 = vmatpush3.bf16.msra.mxu0 %v4904_v18  ;;  %v4938_v5 = vld [vmem:[%s6442_s1 + $0x1a0] sm:$0xff]   ;;  %v4942_v9 = vld [vmem:[%s6442_s1 + $0x1a8] sm:$0xff]   ;;  %v4945_v12 = vld [vmem:[%s6442_s1 + $0x130] sm:$0xff]   ;;  %v772_v18 = vrot.slane %v5388_v45, %v5368_v35 }
  0x15   :  { %4453 = vmatpush3.bf16.msra.mxu1 %v4905_v19  ;;  %4432 = vmatprep.subr.bf16.mxu0 %v4906_v20  ;;  %v4946_v13 = vld [vmem:[%s6442_s1 + $0x1b0] sm:$0xff]   ;;  %v4947_v14 = vld [vmem:[%s6442_s1 + $0x178] sm:$0xff]   ;;  %v4951_v19 = vld [vmem:[%s6442_s1 + $0x240] sm:$0xff]  }
  0x16   :  { %4454 = vmatprep.subr.bf16.mxu1 %v4907_v21  ;;  %v4948_v15 = vld [vmem:[%s6442_s1 + $0x1f8] sm:$0xff]   ;;  %v4952_v20 = vld [vmem:[%s6442_s1 + $0x2c0] sm:$0xff]   ;;  %v788_v23 = vcombine.high %v772_v18, %v772_v18  ;;  %v4955_v24 = vld [vmem:[%s6442_s1 + $0x248] sm:$0xff]  }
  0x17   :  { %v4949_v16 = vld [vmem:[%s6442_s1 + $0x138] sm:$0xff]   ;;  %v4953_v21 = vld [vmem:[%s6442_s1 + $0x200] sm:$0xff]   ;;  %v4960_v29 = vld [vmem:[%s6442_s1 + $0x2d0] sm:$0xff]  }
  0x18   :  { %4433 = vmatpush3.bf16.msra.mxu0 %v4908_v25  ;;  %v4950_v17 = vld [vmem:[%s6442_s1 + $0x1b8] sm:$0xff]   ;;  %v4954_v22 = vld [vmem:[%s6442_s1 + $0x280] sm:$0xff]   ;;  %v4956_v25 = vld [vmem:[%s6442_s1 + $0x2c8] sm:$0xff]  }
  0x19   :  { %4455 = vmatpush3.bf16.msra.mxu1 %v4909_v26  ;;  %4434 = vmatprep.subr.bf16.mxu0 %v4910_v27  ;;  %v4957_v26 = vld [vmem:[%s6442_s1 + $0x208] sm:$0xff]   ;;  %v4967_v38 = vld [vmem:[%s6442_s1 + $0x260] sm:$0xff]   ;;  %v4976_v47 = vld [vmem:[%s6442_s1 + $0x2f0] sm:$0xff]  }
  0x1a   :  { %4456 = vmatprep.subr.bf16.mxu1 %v4911_v28  ;;  %v4958_v27 = vld [vmem:[%s6442_s1 + $0x288] sm:$0xff]   ;;  %v4959_v28 = vld [vmem:[%s6442_s1 + $0x250] sm:$0xff]   ;;  %v4968_v39 = vld [vmem:[%s6442_s1 + $0x2e0] sm:$0xff]  }
  0x1b   :  { %v4969_v40 = vld [vmem:[%s6442_s1 + $0x220] sm:$0xff]   ;;  %v4972_v43 = vld [vmem:[%s6442_s1 + $0x2e8] sm:$0xff]   ;;  %v4978_v49 = vld [vmem:[%s6442_s1 + $0x2b0] sm:$0xff]  }
  0x1c   :  { %4435 = vmatpush3.bf16.msra.mxu0 %v4912_v31  ;;  %v4961_v31 = vld [vmem:[%s6442_s1 + $0x210] sm:$0xff]   ;;  %v4974_v45 = vld [vmem:[%s6442_s1 + $0x2a8] sm:$0xff]   ;;  %v4981_v52 = vld [vmem:[%s6442_s1 + $0x238] sm:$0xff]  }
  0x1d   :  { %4457 = vmatpush3.bf16.msra.mxu1 %v4913_v32  ;;  %4436 = vmatprep.subr.bf16.mxu0 %v4914_v33  ;;  %v4962_v32 = vld [vmem:[%s6442_s1 + $0x290] sm:$0xff]   ;;  %v4963_v33 = vld [vmem:[%s6442_s1 + $0x258] sm:$0xff]  }
  0x1e   :  { %4458 = vmatprep.subr.bf16.mxu1 %v4915_v34  ;;  %v4964_v34 = vld [vmem:[%s6442_s1 + $0x2d8] sm:$0xff]  }
  0x20   :  { %4437 = vmatpush3.bf16.msra.mxu0 %v4916_v36  ;;  %v4965_v36 = vld [vmem:[%s6442_s1 + $0x218] sm:$0xff]  }
  0x21   :  { %4459 = vmatpush3.bf16.msra.mxu1 %v4917_v37  ;;  %4466 = vmatprep.subr.bf16.mxu0 %v4919_v41  ;;  %v4966_v37 = vld [vmem:[%s6442_s1 + $0x298] sm:$0xff]   ;;  %v4970_v41 = vld [vmem:[%s6442_s1 + $0x2a0] sm:$0xff]  }
  0x22   :  { %4488 = vmatprep.subr.bf16.mxu1 %v4920_v42  ;;  %v4971_v42 = vld [vmem:[%s6442_s1 + $0x268] sm:$0xff]  }
  0x23   :  { %3191 = vmatmul.mubr.bf16.vlgmr.msra.gmra.mrb[0].mxu0 %v765_v44  ;;  %v4973_v44 = vld [vmem:[%s6442_s1 + $0x228] sm:$0xff]  }
  0x24   :  { %4467 = vmatpush3.bf16.msra.mxu0 %v4921_v46  ;;  %3231 = vmatmul.mubr.bf16.vlgmr.msra.gmra.mrb[0].mxu1 %v787_v50  ;;  %v4975_v46 = vld [vmem:[%s6442_s1 + $0x270] sm:$0xff]   ;;  %v4979_v50 = vld [vmem:[%s6442_s1 + $0x278] sm:$0xff]  }
  0x25   :  { %4468 = vmatprep.subr.bf16.mxu0 %v4923_v51  ;;  %4489 = vmatpush3.bf16.msra.mxu1 %v4922_v48  ;;  %v4977_v48 = vld [vmem:[%s6442_s1 + $0x230] sm:$0xff]   ;;  %v4980_v51 = vld [vmem:[%s6442_s1 + $0x2f8] sm:$0xff]  }
  0x26   :  { %3270 = vmatprep.mubr.bf16.mxu0 %v786_v54  ;;  %4490 = vmatprep.subr.bf16.mxu1 %v4924_v53  ;;  %v24_v53 = vld [vmem:[%s6443_s0 + $0x8] sm:$0xff]  ;;  %v4982_v54 = vld [vmem:[%s6442_s1 + $0x2b8] sm:$0xff]  }
  0x27   :  { %3310 = vmatprep.mubr.bf16.mxu1 %v790_v57  ;;  %v4983_v57 = vld [vmem:[%s6442_s1 + $0x340] sm:$0xff]  }
  0x28   :  { %4469 = vmatpush3.bf16.msra.mxu0 %v4925_v55  ;;  %v798_v55 = vrot.slane %v24_v53, %v5368_v35 }
  0x29   :  { %4470 = vmatprep.subr.bf16.mxu0 %v4927_v58  ;;  %4491 = vmatpush3.bf16.msra.mxu1 %v4926_v56  ;;  %v791_v56 = vcombine.high %v24_v53, %v24_v53  ;;  %v5031_v53 = vld [vmem:[%s6442_s1 + $0x498] sm:$0xff]  }
  0x2a   :  { %4492 = vmatprep.subr.bf16.mxu1 %v4928_v59  ;;  %v806_v58 = vcombine.high %v798_v55, %v798_v55  ;;  %v814_v59 = vrot.slane %v798_v55, %v5368_v35  ;;  %v5033_v55 = vld [vmem:[%s6442_s1 + $0x4e0] sm:$0xff]  }
  0x2c   :  { %4471 = vmatpush3.bf16.msra.mxu0 %v4929_v60  ;;  %v4984_v60 = vld [vmem:[%s6442_s1 + $0x3c0] sm:$0xff]  }
  0x2d   :  { %4472 = vmatprep.subr.bf16.mxu0 %v4931_v62  ;;  %4493 = vmatpush3.bf16.msra.mxu1 %v4930_v61  ;;  %v5594_v61 = vrot.slane %v791_v56, %v5368_v35  ;;  %v4985_v62 = vld [vmem:[%s6442_s1 + $0x300] sm:$0xff]  }
  0x2e   :  { %4494 = vmatprep.subr.bf16.mxu1 %v4932_v63  ;;  %v828_v63 = vrot.slane %v806_v58, %v5368_v35  ;;  %v5034_v56 = vld [vmem:[%s6442_s1 + $0x420] sm:$0xff]   ;;  %v5036_v58 = vld [vmem:[%s6442_s1 + $0x468] sm:$0xff]  }
  0x30   :  { %4473 = vmatpush3.bf16.msra.mxu0 %v4933_v0  ;;  %v4986_v0 = vld [vmem:[%s6442_s1 + $0x380] sm:$0xff]  }
  0x31   :  { %4474 = vmatprep.subr.bf16.mxu0 %v4935_v2  ;;  %4495 = vmatpush3.bf16.msra.mxu1 %v4934_v1  ;;  %v807_v1 = vcombine.high %v5594_v61, %v5594_v61  ;;  %v836_v2 = vcombine.high %v814_v59, %v814_v59 }
  0x32   :  { %4496 = vmatprep.subr.bf16.mxu1 %v4936_v3  ;;  %v4987_v3 = vld [vmem:[%s6442_s1 + $0x348] sm:$0xff]  }
  0x34   :  { %4475 = vmatpush3.bf16.msra.mxu0 %v4937_v4  ;;  %v838_v4 = vcombine.high %v828_v63, %v828_v63 }
  0x35   :  { %4476 = vmatprep.subr.bf16.mxu0 %v4939_v6  ;;  %4497 = vmatpush3.bf16.msra.mxu1 %v4938_v5  ;;  %v4988_v5 = vld [vmem:[%s6442_s1 + $0x3c8] sm:$0xff]   ;;  %v835_v6 = vrot.slane %v807_v1, %v5368_v35  ;;  %v5043_v1 = vld [vmem:[%s6442_s1 + $0x4b0] sm:$0xff]  }
  0x36   :  { %4498 = vmatprep.subr.bf16.mxu1 %v4940_v7  ;;  %v4989_v7 = vld [vmem:[%s6442_s1 + $0x308] sm:$0xff]  }
  0x38   :  { %4477 = vmatpush3.bf16.msra.mxu0 %v4941_v8  ;;  %v4990_v8 = vld [vmem:[%s6442_s1 + $0x388] sm:$0xff]  }
  0x39   :  { %4478 = vmatprep.subr.bf16.mxu0 %v4943_v10  ;;  %4499 = vmatpush3.bf16.msra.mxu1 %v4942_v9  ;;  %v839_v9 = vcombine.high %v835_v6, %v835_v6  ;;  %v4991_v10 = vld [vmem:[%s6442_s1 + $0x350] sm:$0xff]  }
  0x3a   :  { %4500 = vmatprep.subr.bf16.mxu1 %v4944_v11  ;;  %v4992_v11 = vld [vmem:[%s6442_s1 + $0x3d0] sm:$0xff]  }
  0x3c   :  { %4479 = vmatpush3.bf16.msra.mxu0 %v4945_v12  ;;  %v4993_v12 = vld [vmem:[%s6442_s1 + $0x310] sm:$0xff]  }
  0x3d   :  { %4480 = vmatprep.subr.bf16.mxu0 %v4947_v14  ;;  %4501 = vmatpush3.bf16.msra.mxu1 %v4946_v13  ;;  %v4994_v13 = vld [vmem:[%s6442_s1 + $0x390] sm:$0xff]   ;;  %v4995_v14 = vld [vmem:[%s6442_s1 + $0x358] sm:$0xff]  }
  0x3e   :  { %4502 = vmatprep.subr.bf16.mxu1 %v4948_v15  ;;  %v4996_v15 = vld [vmem:[%s6442_s1 + $0x3d8] sm:$0xff]  }
  0x40   :  { %4481 = vmatpush3.bf16.msra.mxu0 %v4949_v16  ;;  %v4997_v16 = vld [vmem:[%s6442_s1 + $0x318] sm:$0xff]  }
  0x41   :  { %4510 = vmatprep.subr.bf16.mxu0 %v4951_v19  ;;  %4503 = vmatpush3.bf16.msra.mxu1 %v4950_v17  ;;  %v4998_v17 = vld [vmem:[%s6442_s1 + $0x398] sm:$0xff]   ;;  %v5000_v19 = vld [vmem:[%s6442_s1 + $0x3e0] sm:$0xff]  }
  0x42   :  { %4532 = vmatprep.subr.bf16.mxu1 %v4952_v20  ;;  %v5001_v20 = vld [vmem:[%s6442_s1 + $0x320] sm:$0xff]  }
  0x43   :  { %3271 = vmatmul.mubr.bf16.vlgmr.msra.gmra.mrb[4].mxu0 %v772_v18  ;;  %v4999_v18 = vld [vmem:[%s6442_s1 + $0x360] sm:$0xff]  }
  0x44   :  { %4511 = vmatpush3.bf16.msra.mxu0 %v4953_v21  ;;  %3311 = vmatmul.mubr.bf16.vlgmr.msra.gmra.mrb[4].mxu1 %v788_v23  ;;  %v5002_v21 = vld [vmem:[%s6442_s1 + $0x3a0] sm:$0xff]   ;;  %v5004_v23 = vld [vmem:[%s6442_s1 + $0x3e8] sm:$0xff]  }
  0x45   :  { %4512 = vmatprep.subr.bf16.mxu0 %v4955_v24  ;;  %4533 = vmatpush3.bf16.msra.mxu1 %v4954_v22  ;;  %v5003_v22 = vld [vmem:[%s6442_s1 + $0x368] sm:$0xff]  }
  0x46   :  { %4534 = vmatprep.subr.bf16.mxu1 %v4956_v25  ;;  %3350 = vmatprep.mubr.bf16.mxu0 %v828_v63  ;;  %v5005_v24 = vld [vmem:[%s6442_s1 + $0x328] sm:$0xff]   ;;  %v5041_v63 = vld [vmem:[%s6442_s1 + $0x4f0] sm:$0xff]  }
  0x47   :  { %3390 = vmatprep.mubr.bf16.mxu1 %v838_v4  ;;  %v5006_v25 = vld [vmem:[%s6442_s1 + $0x3a8] sm:$0xff]   ;;  %v5046_v4 = vld [vmem:[%s6442_s1 + $0x438] sm:$0xff]  }
  0x48   :  { %4513 = vmatpush3.bf16.msra.mxu0 %v4957_v26  ;;  %v5007_v26 = vld [vmem:[%s6442_s1 + $0x370] sm:$0xff]  }
  0x49   :  { %4514 = vmatprep.subr.bf16.mxu0 %v4959_v28  ;;  %4535 = vmatpush3.bf16.msra.mxu1 %v4958_v27  ;;  %v5008_v27 = vld [vmem:[%s6442_s1 + $0x3f0] sm:$0xff]  }
  0x4a   :  { %4536 = vmatprep.subr.bf16.mxu1 %v4960_v29  ;;  %v5009_v28 = vld [vmem:[%s6442_s1 + $0x330] sm:$0xff]  }
  0x4b   :  { %v5010_v29 = vld [vmem:[%s6442_s1 + $0x3b0] sm:$0xff]  }
  0x4c   :  { %4515 = vmatpush3.bf16.msra.mxu0 %v4961_v31  ;;  %v5011_v31 = vld [vmem:[%s6442_s1 + $0x378] sm:$0xff]  }
  0x4d   :  { %4516 = vmatprep.subr.bf16.mxu0 %v4963_v33  ;;  %4537 = vmatpush3.bf16.msra.mxu1 %v4962_v32  ;;  %v5012_v32 = vld [vmem:[%s6442_s1 + $0x3f8] sm:$0xff]  }
  0x4e   :  { %4538 = vmatprep.subr.bf16.mxu1 %v4964_v34  ;;  %v5013_v33 = vld [vmem:[%s6442_s1 + $0x338] sm:$0xff]  }
  0x4f   :  { %v5014_v34 = vld [vmem:[%s6442_s1 + $0x3b8] sm:$0xff]  }
  0x50   :  { %4517 = vmatpush3.bf16.msra.mxu0 %v4965_v36  ;;  %v821_v36 = vrot.slane %v5594_v61, %v5368_v35  ;;  %v5039_v61 = vld [vmem:[%s6442_s1 + $0x4a8] sm:$0xff]  }
  0x51   :  { %4518 = vmatprep.subr.bf16.mxu0 %v4967_v38  ;;  %4539 = vmatpush3.bf16.msra.mxu1 %v4966_v37  ;;  %v5016_v37 = vld [vmem:[%s6442_s1 + $0x440] sm:$0xff]  }
  0x52   :  { %4540 = vmatprep.subr.bf16.mxu1 %v4968_v39  ;;  %v5017_v38 = vld [vmem:[%s6442_s1 + $0x4c0] sm:$0xff]  }
  0x53   :  { %v5018_v39 = vld [vmem:[%s6442_s1 + $0x400] sm:$0xff]  }
  0x54   :  { %4519 = vmatpush3.bf16.msra.mxu0 %v4969_v40  ;;  %v5019_v40 = vld [vmem:[%s6442_s1 + $0x480] sm:$0xff]  }
  0x55   :  { %4520 = vmatprep.subr.bf16.mxu0 %v4971_v42  ;;  %4541 = vmatpush3.bf16.msra.mxu1 %v4970_v41  ;;  %v837_v41 = vcombine.high %v821_v36, %v821_v36  ;;  %v5020_v42 = vld [vmem:[%s6442_s1 + $0x448] sm:$0xff]  }
  0x56   :  { %4542 = vmatprep.subr.bf16.mxu1 %v4972_v43  ;;  %v5021_v43 = vld [vmem:[%s6442_s1 + $0x4c8] sm:$0xff]  }
  0x58   :  { %4521 = vmatpush3.bf16.msra.mxu0 %v4973_v44  ;;  %v5022_v44 = vld [vmem:[%s6442_s1 + $0x408] sm:$0xff]  }
  0x59   :  { %4522 = vmatprep.subr.bf16.mxu0 %v4975_v46  ;;  %4543 = vmatpush3.bf16.msra.mxu1 %v4974_v45  ;;  %v5023_v45 = vld [vmem:[%s6442_s1 + $0x488] sm:$0xff]   ;;  %v5024_v46 = vld [vmem:[%s6442_s1 + $0x450] sm:$0xff]  }
  0x5a   :  { %4544 = vmatprep.subr.bf16.mxu1 %v4976_v47  ;;  %v5025_v47 = vld [vmem:[%s6442_s1 + $0x4d0] sm:$0xff]  }
  0x5c   :  { %4523 = vmatpush3.bf16.msra.mxu0 %v4977_v48  ;;  %v5026_v48 = vld [vmem:[%s6442_s1 + $0x410] sm:$0xff]  }
  0x5d   :  { %4524 = vmatprep.subr.bf16.mxu0 %v4979_v50  ;;  %4545 = vmatpush3.bf16.msra.mxu1 %v4978_v49  ;;  %v5027_v49 = vld [vmem:[%s6442_s1 + $0x490] sm:$0xff]   ;;  %v5028_v50 = vld [vmem:[%s6442_s1 + $0x458] sm:$0xff]  }
  0x5e   :  { %4546 = vmatprep.subr.bf16.mxu1 %v4980_v51  ;;  %v5029_v51 = vld [vmem:[%s6442_s1 + $0x4d8] sm:$0xff]  }
  0x60   :  { %4525 = vmatpush3.bf16.msra.mxu0 %v4981_v52  ;;  %v5030_v52 = vld [vmem:[%s6442_s1 + $0x418] sm:$0xff]  }
  0x61   :  { %4554 = vmatprep.subr.bf16.mxu0 %v4983_v57  ;;  %4547 = vmatpush3.bf16.msra.mxu1 %v4982_v54  ;;  %v5032_v54 = vld [vmem:[%s6442_s1 + $0x460] sm:$0xff]  }
  0x62   :  { %4576 = vmatprep.subr.bf16.mxu1 %v4984_v60  ;;  %v5035_v57 = vld [vmem:[%s6442_s1 + $0x4a0] sm:$0xff]   ;;  %v5038_v60 = vld [vmem:[%s6442_s1 + $0x428] sm:$0xff]  }
  0x63   :  { %3351 = vmatmul.mubr.bf16.vlgmr.msra.gmra.mrb[8].mxu0 %v814_v59  ;;  %v5037_v59 = vld [vmem:[%s6442_s1 + $0x4e8] sm:$0xff]  }
  0x64   :  { %4555 = vmatpush3.bf16.msra.mxu0 %v4985_v62  ;;  %3391 = vmatmul.mubr.bf16.vlgmr.msra.gmra.mrb[8].mxu1 %v836_v2  ;;  %v5040_v62 = vld [vmem:[%s6442_s1 + $0x470] sm:$0xff]   ;;  %v5044_v2 = vld [vmem:[%s6442_s1 + $0x478] sm:$0xff]  }
  0x65   :  { %4556 = vmatprep.subr.bf16.mxu0 %v4987_v3  ;;  %4577 = vmatpush3.bf16.msra.mxu1 %v4986_v0  ;;  %v5042_v0 = vld [vmem:[%s6442_s1 + $0x430] sm:$0xff]   ;;  %v5045_v3 = vld [vmem:[%s6442_s1 + $0x4f8] sm:$0xff]  }
  0x66   :  { %3430 = vmatprep.mubr.bf16.mxu0 %v835_v6  ;;  %4578 = vmatprep.subr.bf16.mxu1 %v4988_v5  ;;  %v25_v5 = vld [vmem:[%s6443_s0 + $0x10] sm:$0xff]  ;;  %v5047_v6 = vld [vmem:[%s6442_s1 + $0x4b8] sm:$0xff]  }
  0x67   :  { %3470 = vmatprep.mubr.bf16.mxu1 %v839_v9  ;;  %v5048_v9 = vld [vmem:[%s6442_s1 + $0x540] sm:$0xff]  }
  0x68   :  { %4557 = vmatpush3.bf16.msra.mxu0 %v4989_v7  ;;  %v847_v7 = vrot.slane %v25_v5, %v5368_v35 }
  0x69   :  { %4558 = vmatprep.subr.bf16.mxu0 %v4991_v10  ;;  %4579 = vmatpush3.bf16.msra.mxu1 %v4990_v8  ;;  %v840_v8 = vcombine.high %v25_v5, %v25_v5  ;;  %v5096_v5 = vld [vmem:[%s6442_s1 + $0x698] sm:$0xff]  }
  0x6a   :  { %4580 = vmatprep.subr.bf16.mxu1 %v4992_v11  ;;  %v855_v10 = vcombine.high %v847_v7, %v847_v7  ;;  %v863_v11 = vrot.slane %v847_v7, %v5368_v35  ;;  %v5098_v7 = vld [vmem:[%s6442_s1 + $0x6e0] sm:$0xff]  }
  0x6c   :  { %4559 = vmatpush3.bf16.msra.mxu0 %v4993_v12  ;;  %v5049_v12 = vld [vmem:[%s6442_s1 + $0x5c0] sm:$0xff]  }
  0x6d   :  { %4560 = vmatprep.subr.bf16.mxu0 %v4995_v14  ;;  %4581 = vmatpush3.bf16.msra.mxu1 %v4994_v13  ;;  %v5800_v13 = vrot.slane %v840_v8, %v5368_v35  ;;  %v5050_v14 = vld [vmem:[%s6442_s1 + $0x500] sm:$0xff]  }
  0x6e   :  { %4582 = vmatprep.subr.bf16.mxu1 %v4996_v15  ;;  %v877_v15 = vrot.slane %v855_v10, %v5368_v35  ;;  %v5099_v8 = vld [vmem:[%s6442_s1 + $0x620] sm:$0xff]   ;;  %v5101_v10 = vld [vmem:[%s6442_s1 + $0x668] sm:$0xff]  }
  0x70   :  { %4561 = vmatpush3.bf16.msra.mxu0 %v4997_v16  ;;  %v5051_v16 = vld [vmem:[%s6442_s1 + $0x580] sm:$0xff]  }
  0x71   :  { %4562 = vmatprep.subr.bf16.mxu0 %v4999_v18  ;;  %4583 = vmatpush3.bf16.msra.mxu1 %v4998_v17  ;;  %v856_v17 = vcombine.high %v5800_v13, %v5800_v13  ;;  %v885_v18 = vcombine.high %v863_v11, %v863_v11 }
  0x72   :  { %4584 = vmatprep.subr.bf16.mxu1 %v5000_v19  ;;  %v5052_v19 = vld [vmem:[%s6442_s1 + $0x548] sm:$0xff]  }
  0x74   :  { %4563 = vmatpush3.bf16.msra.mxu0 %v5001_v20  ;;  %v887_v20 = vcombine.high %v877_v15, %v877_v15 }
  0x75   :  { %4564 = vmatprep.subr.bf16.mxu0 %v5003_v22  ;;  %4585 = vmatpush3.bf16.msra.mxu1 %v5002_v21  ;;  %v5053_v21 = vld [vmem:[%s6442_s1 + $0x5c8] sm:$0xff]   ;;  %v884_v22 = vrot.slane %v856_v17, %v5368_v35  ;;  %v5108_v17 = vld [vmem:[%s6442_s1 + $0x6b0] sm:$0xff]  }
  0x76   :  { %4586 = vmatprep.subr.bf16.mxu1 %v5004_v23  ;;  %v5054_v23 = vld [vmem:[%s6442_s1 + $0x508] sm:$0xff]  }
  0x78   :  { %4565 = vmatpush3.bf16.msra.mxu0 %v5005_v24  ;;  %v5055_v24 = vld [vmem:[%s6442_s1 + $0x588] sm:$0xff]  }
  0x79   :  { %4566 = vmatprep.subr.bf16.mxu0 %v5007_v26  ;;  %4587 = vmatpush3.bf16.msra.mxu1 %v5006_v25  ;;  %v888_v25 = vcombine.high %v884_v22, %v884_v22  ;;  %v5056_v26 = vld [vmem:[%s6442_s1 + $0x550] sm:$0xff]  }
  0x7a   :  { %4588 = vmatprep.subr.bf16.mxu1 %v5008_v27  ;;  %v5057_v27 = vld [vmem:[%s6442_s1 + $0x5d0] sm:$0xff]  }
  0x7c   :  { %4567 = vmatpush3.bf16.msra.mxu0 %v5009_v28  ;;  %v5058_v28 = vld [vmem:[%s6442_s1 + $0x510] sm:$0xff]  }
  0x7d   :  { %4568 = vmatprep.subr.bf16.mxu0 %v5011_v31  ;;  %4589 = vmatpush3.bf16.msra.mxu1 %v5010_v29  ;;  %v5059_v29 = vld [vmem:[%s6442_s1 + $0x590] sm:$0xff]   ;;  %v5060_v31 = vld [vmem:[%s6442_s1 + $0x558] sm:$0xff]  }
  0x7e   :  { %4590 = vmatprep.subr.bf16.mxu1 %v5012_v32  ;;  %v5061_v32 = vld [vmem:[%s6442_s1 + $0x5d8] sm:$0xff]  }
  0x80   :  { %4569 = vmatpush3.bf16.msra.mxu0 %v5013_v33  ;;  %v5062_v33 = vld [vmem:[%s6442_s1 + $0x518] sm:$0xff]  }
  0x81   :  { %4598 = vmatprep.subr.bf16.mxu0 %v5016_v37  ;;  %4591 = vmatpush3.bf16.msra.mxu1 %v5014_v34  ;;  %v5063_v34 = vld [vmem:[%s6442_s1 + $0x598] sm:$0xff]   ;;  %v5065_v37 = vld [vmem:[%s6442_s1 + $0x5e0] sm:$0xff]  }
  0x82   :  { %4620 = vmatprep.subr.bf16.mxu1 %v5017_v38  ;;  %v5066_v38 = vld [vmem:[%s6442_s1 + $0x520] sm:$0xff]  }
  0x83   :  { %3431 = vmatmul.mubr.bf16.vlgmr.msra.gmra.mrb[12].mxu0 %v821_v36  ;;  %v5064_v36 = vld [vmem:[%s6442_s1 + $0x560] sm:$0xff]  }
  0x84   :  { %4599 = vmatpush3.bf16.msra.mxu0 %v5018_v39  ;;  %3471 = vmatmul.mubr.bf16.vlgmr.msra.gmra.mrb[12].mxu1 %v837_v41  ;;  %v5067_v39 = vld [vmem:[%s6442_s1 + $0x5a0] sm:$0xff]   ;;  %v5069_v41 = vld [vmem:[%s6442_s1 + $0x5e8] sm:$0xff]  }
  0x85   :  { %4600 = vmatprep.subr.bf16.mxu0 %v5020_v42  ;;  %4621 = vmatpush3.bf16.msra.mxu1 %v5019_v40  ;;  %v5068_v40 = vld [vmem:[%s6442_s1 + $0x568] sm:$0xff]  }
  0x86   :  { %4622 = vmatprep.subr.bf16.mxu1 %v5021_v43  ;;  %3510 = vmatprep.mubr.bf16.mxu0 %v877_v15  ;;  %v5070_v42 = vld [vmem:[%s6442_s1 + $0x528] sm:$0xff]   ;;  %v5106_v15 = vld [vmem:[%s6442_s1 + $0x6f0] sm:$0xff]  }
  0x87   :  { %3550 = vmatprep.mubr.bf16.mxu1 %v887_v20  ;;  %v5071_v43 = vld [vmem:[%s6442_s1 + $0x5a8] sm:$0xff]   ;;  %v5111_v20 = vld [vmem:[%s6442_s1 + $0x638] sm:$0xff]  }
  0x88   :  { %4601 = vmatpush3.bf16.msra.mxu0 %v5022_v44  ;;  %v5072_v44 = vld [vmem:[%s6442_s1 + $0x570] sm:$0xff]  }
  0x89   :  { %4602 = vmatprep.subr.bf16.mxu0 %v5024_v46  ;;  %4623 = vmatpush3.bf16.msra.mxu1 %v5023_v45  ;;  %v5073_v45 = vld [vmem:[%s6442_s1 + $0x5f0] sm:$0xff]  }
  0x8a   :  { %4624 = vmatprep.subr.bf16.mxu1 %v5025_v47  ;;  %v5074_v46 = vld [vmem:[%s6442_s1 + $0x530] sm:$0xff]  }
  0x8b   :  { %v5075_v47 = vld [vmem:[%s6442_s1 + $0x5b0] sm:$0xff]  }
  0x8c   :  { %4603 = vmatpush3.bf16.msra.mxu0 %v5026_v48  ;;  %v5076_v48 = vld [vmem:[%s6442_s1 + $0x578] sm:$0xff]  }
  0x8d   :  { %4604 = vmatprep.subr.bf16.mxu0 %v5028_v50  ;;  %4625 = vmatpush3.bf16.msra.mxu1 %v5027_v49  ;;  %v5077_v49 = vld [vmem:[%s6442_s1 + $0x5f8] sm:$0xff]  }
  0x8e   :  { %4626 = vmatprep.subr.bf16.mxu1 %v5029_v51  ;;  %v5078_v50 = vld [vmem:[%s6442_s1 + $0x538] sm:$0xff]  }
  0x8f   :  { %v5079_v51 = vld [vmem:[%s6442_s1 + $0x5b8] sm:$0xff]  }
  0x90   :  { %4605 = vmatpush3.bf16.msra.mxu0 %v5030_v52  ;;  %v870_v52 = vrot.slane %v5800_v13, %v5368_v35  ;;  %v5104_v13 = vld [vmem:[%s6442_s1 + $0x6a8] sm:$0xff]  }
  0x91   :  { %4606 = vmatprep.subr.bf16.mxu0 %v5032_v54  ;;  %4627 = vmatpush3.bf16.msra.mxu1 %v5031_v53  ;;  %v5081_v53 = vld [vmem:[%s6442_s1 + $0x640] sm:$0xff]  }
  0x92   :  { %4628 = vmatprep.subr.bf16.mxu1 %v5033_v55  ;;  %v5082_v54 = vld [vmem:[%s6442_s1 + $0x6c0] sm:$0xff]  }
  0x93   :  { %v5083_v55 = vld [vmem:[%s6442_s1 + $0x600] sm:$0xff]  }
  0x94   :  { %4607 = vmatpush3.bf16.msra.mxu0 %v5034_v56  ;;  %v5084_v56 = vld [vmem:[%s6442_s1 + $0x680] sm:$0xff]  }
  0x95   :  { %4608 = vmatprep.subr.bf16.mxu0 %v5036_v58  ;;  %4629 = vmatpush3.bf16.msra.mxu1 %v5035_v57  ;;  %v886_v57 = vcombine.high %v870_v52, %v870_v52  ;;  %v5085_v58 = vld [vmem:[%s6442_s1 + $0x648] sm:$0xff]  }
  0x96   :  { %4630 = vmatprep.subr.bf16.mxu1 %v5037_v59  ;;  %v5086_v59 = vld [vmem:[%s6442_s1 + $0x6c8] sm:$0xff]  }
  0x98   :  { %4609 = vmatpush3.bf16.msra.mxu0 %v5038_v60  ;;  %v5087_v60 = vld [vmem:[%s6442_s1 + $0x608] sm:$0xff]  }
  0x99   :  { %4610 = vmatprep.subr.bf16.mxu0 %v5040_v62  ;;  %4631 = vmatpush3.bf16.msra.mxu1 %v5039_v61  ;;  %v5088_v61 = vld [vmem:[%s6442_s1 + $0x688] sm:$0xff]   ;;  %v5089_v62 = vld [vmem:[%s6442_s1 + $0x650] sm:$0xff]  }
  0x9a   :  { %4632 = vmatprep.subr.bf16.mxu1 %v5041_v63  ;;  %v5090_v63 = vld [vmem:[%s6442_s1 + $0x6d0] sm:$0xff]  }
  0x9c   :  { %4611 = vmatpush3.bf16.msra.mxu0 %v5042_v0  ;;  %v5091_v0 = vld [vmem:[%s6442_s1 + $0x610] sm:$0xff]  }
  0x9d   :  { %4612 = vmatprep.subr.bf16.mxu0 %v5044_v2  ;;  %4633 = vmatpush3.bf16.msra.mxu1 %v5043_v1  ;;  %v5092_v1 = vld [vmem:[%s6442_s1 + $0x690] sm:$0xff]   ;;  %v5093_v2 = vld [vmem:[%s6442_s1 + $0x658] sm:$0xff]  }
  0x9e   :  { %4634 = vmatprep.subr.bf16.mxu1 %v5045_v3  ;;  %v5094_v3 = vld [vmem:[%s6442_s1 + $0x6d8] sm:$0xff]  }
  0xa0   :  { %4613 = vmatpush3.bf16.msra.mxu0 %v5046_v4  ;;  %v5095_v4 = vld [vmem:[%s6442_s1 + $0x618] sm:$0xff]  }
  0xa1   :  { %4642 = vmatprep.subr.bf16.mxu0 %v5048_v9  ;;  %4635 = vmatpush3.bf16.msra.mxu1 %v5047_v6  ;;  %v5097_v6 = vld [vmem:[%s6442_s1 + $0x660] sm:$0xff]  }
  0xa2   :  { %4664 = vmatprep.subr.bf16.mxu1 %v5049_v12  ;;  %v5100_v9 = vld [vmem:[%s6442_s1 + $0x6a0] sm:$0xff]   ;;  %v5103_v12 = vld [vmem:[%s6442_s1 + $0x628] sm:$0xff]  }
  0xa3   :  { %3511 = vmatmul.mubr.bf16.vlgmr.msra.gmra.mrb[16].mxu0 %v863_v11  ;;  %v5102_v11 = vld [vmem:[%s6442_s1 + $0x6e8] sm:$0xff]  }
  0xa4   :  { %4643 = vmatpush3.bf16.msra.mxu0 %v5050_v14  ;;  %3551 = vmatmul.mubr.bf16.vlgmr.msra.gmra.mrb[16].mxu1 %v885_v18  ;;  %v5105_v14 = vld [vmem:[%s6442_s1 + $0x670] sm:$0xff]   ;;  %v5109_v18 = vld [vmem:[%s6442_s1 + $0x678] sm:$0xff]  }
  0xa5   :  { %4644 = vmatprep.subr.bf16.mxu0 %v5052_v19  ;;  %4665 = vmatpush3.bf16.msra.mxu1 %v5051_v16  ;;  %v5107_v16 = vld [vmem:[%s6442_s1 + $0x630] sm:$0xff]   ;;  %v5110_v19 = vld [vmem:[%s6442_s1 + $0x6f8] sm:$0xff]  }
  0xa6   :  { %3590 = vmatprep.mubr.bf16.mxu0 %v884_v22  ;;  %4666 = vmatprep.subr.bf16.mxu1 %v5053_v21  ;;  %v26_v21 = vld [vmem:[%s6443_s0 + $0x18] sm:$0xff] }
  0xa7   :  { %3630 = vmatprep.mubr.bf16.mxu1 %v888_v25  ;;  %v896_v22 = vrot.slane %v26_v21, %v5368_v35  ;;  %v5112_v25 = vld [vmem:[%s6442_s1 + $0x6b8] sm:$0xff]  }
  0xa8   :  { %4645 = vmatpush3.bf16.msra.mxu0 %v5054_v23  ;;  %v5113_v23 = vld [vmem:[%s6442_s1 + $0x740] sm:$0xff]  }
  0xa9   :  { %4646 = vmatprep.subr.bf16.mxu0 %v5056_v26  ;;  %4667 = vmatpush3.bf16.msra.mxu1 %v5055_v24  ;;  %v889_v24 = vcombine.high %v26_v21, %v26_v21  ;;  %v904_v26 = vcombine.high %v896_v22, %v896_v22 }
  0xaa   :  { %4668 = vmatprep.subr.bf16.mxu1 %v5057_v27  ;;  %v912_v27 = vrot.slane %v896_v22, %v5368_v35  ;;  %v5150_v22 = vld [vmem:[%s6442_s1 + $0x848] sm:$0xff]  }
  0xac   :  { %4647 = vmatpush3.bf16.msra.mxu0 %v5058_v28  ;;  %v5114_v28 = vld [vmem:[%s6442_s1 + $0x7c0] sm:$0xff]  }
  0xad   :  { %4648 = vmatprep.subr.bf16.mxu0 %v5060_v31  ;;  %4669 = vmatpush3.bf16.msra.mxu1 %v5059_v29  ;;  %v6006_v29 = vrot.slane %v889_v24, %v5368_v35  ;;  %v926_v31 = vrot.slane %v904_v26, %v5368_v35  ;;  %v5151_v24 = vld [vmem:[%s6442_s1 + $0x8c8] sm:$0xff]   ;;  %v5154_v26 = vld [vmem:[%s6442_s1 + $0x850] sm:$0xff]  }
  0xae   :  { %4670 = vmatprep.subr.bf16.mxu1 %v5061_v32  ;;  %v5115_v32 = vld [vmem:[%s6442_s1 + $0x700] sm:$0xff]  }
  0xb0   :  { %4649 = vmatpush3.bf16.msra.mxu0 %v5062_v33  ;;  %v905_v33 = vcombine.high %v6006_v29, %v6006_v29 }
  0xb1   :  { %4650 = vmatprep.subr.bf16.mxu0 %v5064_v36  ;;  %4671 = vmatpush3.bf16.msra.mxu1 %v5063_v34  ;;  %v934_v34 = vcombine.high %v912_v27, %v912_v27  ;;  %v5117_v36 = vld [vmem:[%s6442_s1 + $0x748] sm:$0xff]  }
  0xb2   :  { %4672 = vmatprep.subr.bf16.mxu1 %v5065_v37  ;;  %v936_v37 = vcombine.high %v926_v31, %v926_v31 }
  0xb4   :  { %4651 = vmatpush3.bf16.msra.mxu0 %v5066_v38  ;;  %v5116_v38 = vld [vmem:[%s6442_s1 + $0x780] sm:$0xff]  }
  0xb5   :  { %4652 = vmatprep.subr.bf16.mxu0 %v5068_v40  ;;  %4673 = vmatpush3.bf16.msra.mxu1 %v5067_v39  ;;  %v933_v39 = vrot.slane %v905_v33, %v5368_v35  ;;  %v5118_v40 = vld [vmem:[%s6442_s1 + $0x7c8] sm:$0xff]   ;;  %v5159_v33 = vld [vmem:[%s6442_s1 + $0x8d8] sm:$0xff]  }
  0xb6   :  { %4674 = vmatprep.subr.bf16.mxu1 %v5069_v41  ;;  %v5119_v41 = vld [vmem:[%s6442_s1 + $0x708] sm:$0xff]  }
  0xb8   :  { %4653 = vmatpush3.bf16.msra.mxu0 %v5070_v42  ;;  %v937_v42 = vcombine.high %v933_v39, %v933_v39 }
  0xb9   :  { %4654 = vmatprep.subr.bf16.mxu0 %v5072_v44  ;;  %4675 = vmatpush3.bf16.msra.mxu1 %v5071_v43  ;;  %v5121_v43 = vld [vmem:[%s6442_s1 + $0x750] sm:$0xff]   ;;  %v5120_v44 = vld [vmem:[%s6442_s1 + $0x788] sm:$0xff]  }
  0xba   :  { %4676 = vmatprep.subr.bf16.mxu1 %v5073_v45  ;;  %v5122_v45 = vld [vmem:[%s6442_s1 + $0x7d0] sm:$0xff]  }
  0xbc   :  { %4655 = vmatpush3.bf16.msra.mxu0 %v5074_v46  ;;  %v5123_v46 = vld [vmem:[%s6442_s1 + $0x710] sm:$0xff]  }
  0xbd   :  { %4656 = vmatprep.subr.bf16.mxu0 %v5076_v48  ;;  %4677 = vmatpush3.bf16.msra.mxu1 %v5075_v47  ;;  %v5125_v47 = vld [vmem:[%s6442_s1 + $0x758] sm:$0xff]   ;;  %v5124_v48 = vld [vmem:[%s6442_s1 + $0x790] sm:$0xff]  }
  0xbe   :  { %4678 = vmatprep.subr.bf16.mxu1 %v5077_v49  ;;  %v5126_v49 = vld [vmem:[%s6442_s1 + $0x7d8] sm:$0xff]  }
  0xc0   :  { %4657 = vmatpush3.bf16.msra.mxu0 %v5078_v50  ;;  %v5127_v50 = vld [vmem:[%s6442_s1 + $0x718] sm:$0xff]  }
  0xc1   :  { %4686 = vmatprep.subr.bf16.mxu0 %v5081_v53  ;;  %4679 = vmatpush3.bf16.msra.mxu1 %v5079_v51  ;;  %v5129_v51 = vld [vmem:[%s6442_s1 + $0x760] sm:$0xff]  }
  0xc2   :  { %4708 = vmatprep.subr.bf16.mxu1 %v5082_v54  ;;  %v5130_v53 = vld [vmem:[%s6442_s1 + $0x7e0] sm:$0xff]  }
  0xc3   :  { %3591 = vmatmul.mubr.bf16.vlgmr.msra.gmra.mrb[20].mxu0 %v870_v52  ;;  %v5128_v52 = vld [vmem:[%s6442_s1 + $0x798] sm:$0xff]   ;;  %v5131_v54 = vld [vmem:[%s6442_s1 + $0x720] sm:$0xff]  }
  0xc4   :  { %4687 = vmatpush3.bf16.msra.mxu0 %v5083_v55  ;;  %3631 = vmatmul.mubr.bf16.vlgmr.msra.gmra.mrb[20].mxu1 %v886_v57  ;;  %v5133_v55 = vld [vmem:[%s6442_s1 + $0x768] sm:$0xff]  }
  0xc5   :  { %4688 = vmatprep.subr.bf16.mxu0 %v5085_v58  ;;  %4709 = vmatpush3.bf16.msra.mxu1 %v5084_v56  ;;  %v5132_v56 = vld [vmem:[%s6442_s1 + $0x7a0] sm:$0xff]   ;;  %v5134_v57 = vld [vmem:[%s6442_s1 + $0x7e8] sm:$0xff]  }
  0xc6   :  { %4710 = vmatprep.subr.bf16.mxu1 %v5086_v59  ;;  %3670 = vmatprep.mubr.bf16.mxu0 %v926_v31  ;;  %v4068_v58 = vld [vmem:[%s6444_s2] ss:$0 sm:$0xff]  ;;  %v5135_v59 = vld [vmem:[%s6442_s1 + $0x728] sm:$0xff]   ;;  %v5158_v31 = vld [vmem:[%s6442_s1 + $0x858] sm:$0xff]  }
  0xc7   :  { %3710 = vmatprep.mubr.bf16.mxu1 %v936_v37  ;;  %v5161_v37 = vld [vmem:[%s6442_s1 + $0x898] sm:$0xff]  }
  0xc8   :  { %4689 = vmatpush3.bf16.msra.mxu0 %v5087_v60 }
  0xc9   :  { %4690 = vmatprep.subr.bf16.mxu0 %v5089_v62  ;;  %4711 = vmatpush3.bf16.msra.mxu1 %v5088_v61  ;;  %v5137_v61 = vld [vmem:[%s6442_s1 + $0x770] sm:$0xff]  }
  0xca   :  { %4712 = vmatprep.subr.bf16.mxu1 %v5090_v63  ;;  %v5136_v63 = vld [vmem:[%s6442_s1 + $0x7a8] sm:$0xff]  }
  0xcc   :  { %4691 = vmatpush3.bf16.msra.mxu0 %v5091_v0 }
  0xcd   :  { %4692 = vmatprep.subr.bf16.mxu0 %v5093_v2  ;;  %4713 = vmatpush3.bf16.msra.mxu1 %v5092_v1  ;;  %v5138_v2 = vld [vmem:[%s6442_s1 + $0x7f0] sm:$0xff]  }
  0xce   :  { %4714 = vmatprep.subr.bf16.mxu1 %v5094_v3 }
  0xd0   :  { %4693 = vmatpush3.bf16.msra.mxu0 %v5095_v4  ;;  %v5139_v4 = vld [vmem:[%s6442_s1 + $0x730] sm:$0xff]  }
  0xd1   :  { %4694 = vmatprep.subr.bf16.mxu0 %v5097_v6  ;;  %4715 = vmatpush3.bf16.msra.mxu1 %v5096_v5 }
  0xd2   :  { %4716 = vmatprep.subr.bf16.mxu1 %v5098_v7 }
  0xd4   :  { %4695 = vmatpush3.bf16.msra.mxu0 %v5099_v8  ;;  %v5141_v8 = vld [vmem:[%s6442_s1 + $0x778] sm:$0xff]  }
  0xd5   :  { %4696 = vmatprep.subr.bf16.mxu0 %v5101_v10  ;;  %4717 = vmatpush3.bf16.msra.mxu1 %v5100_v9  ;;  %v5140_v10 = vld [vmem:[%s6442_s1 + $0x7b0] sm:$0xff]  }
  0xd6   :  { %4718 = vmatprep.subr.bf16.mxu1 %v5102_v11 }
  0xd8   :  { %4697 = vmatpush3.bf16.msra.mxu0 %v5103_v12  ;;  %v5142_v12 = vld [vmem:[%s6442_s1 + $0x7f8] sm:$0xff]  }
  0xd9   :  { %4698 = vmatprep.subr.bf16.mxu0 %v5105_v14  ;;  %4719 = vmatpush3.bf16.msra.mxu1 %v5104_v13  ;;  %v5143_v14 = vld [vmem:[%s6442_s1 + $0x738] sm:$0xff]  }
  0xda   :  { %4720 = vmatprep.subr.bf16.mxu1 %v5106_v15 }
  0xdc   :  { %4699 = vmatpush3.bf16.msra.mxu0 %v5107_v16  ;;  %v919_v16 = vrot.slane %v6006_v29, %v5368_v35  ;;  %v5156_v29 = vld [vmem:[%s6442_s1 + $0x810] sm:$0xff]  }
  0xdd   :  { %4700 = vmatprep.subr.bf16.mxu0 %v5109_v18  ;;  %4721 = vmatpush3.bf16.msra.mxu1 %v5108_v17  ;;  %v5146_v17 = vld [vmem:[%s6442_s1 + $0x840] sm:$0xff]   ;;  %v5144_v18 = vld [vmem:[%s6442_s1 + $0x7b8] sm:$0xff]  }
  0xde   :  { %4722 = vmatprep.subr.bf16.mxu1 %v5110_v19  ;;  %v5147_v19 = vld [vmem:[%s6442_s1 + $0x8c0] sm:$0xff]   ;;  %v935_v21 = vcombine.high %v919_v16, %v919_v16 }
  0xe0   :  { %4701 = vmatpush3.bf16.msra.mxu0 %v5111_v20  ;;  %v5148_v20 = vld [vmem:[%s6442_s1 + $0x800] sm:$0xff]  }
  0xe1   :  { %4730 = vmatprep.subr.bf16.mxu0 %v5113_v23  ;;  %4723 = vmatpush3.bf16.msra.mxu1 %v5112_v25  ;;  %v5149_v23 = vld [vmem:[%s6442_s1 + $0x880] sm:$0xff]   ;;  %v5152_v25 = vld [vmem:[%s6442_s1 + $0x808] sm:$0xff]  }
  0xe2   :  { %4752 = vmatprep.subr.bf16.mxu1 %v5114_v28  ;;  %v5155_v28 = vld [vmem:[%s6442_s1 + $0x8d0] sm:$0xff]  }
  0xe3   :  { %3671 = vmatmul.mubr.bf16.vlgmr.msra.gmra.mrb[24].mxu0 %v912_v27  ;;  %v5153_v27 = vld [vmem:[%s6442_s1 + $0x888] sm:$0xff]  }
  0xe4   :  { %4731 = vmatpush3.bf16.msra.mxu0 %v5115_v32  ;;  %3711 = vmatmul.mubr.bf16.vlgmr.msra.gmra.mrb[24].mxu1 %v934_v34  ;;  %v5157_v32 = vld [vmem:[%s6442_s1 + $0x890] sm:$0xff]   ;;  %v5160_v34 = vld [vmem:[%s6442_s1 + $0x818] sm:$0xff]  }
  0xe5   :  { %4732 = vmatprep.subr.bf16.mxu0 %v5117_v36  ;;  %4753 = vmatpush3.bf16.msra.mxu1 %v5116_v38  ;;  %v5162_v36 = vld [vmem:[%s6442_s1 + $0x860] sm:$0xff]  }
  0xe6   :  { %3750 = vmatprep.mubr.bf16.mxu0 %v933_v39  ;;  %4754 = vmatprep.subr.bf16.mxu1 %v5118_v40  ;;  %v5163_v38 = vld [vmem:[%s6442_s1 + $0x8e0] sm:$0xff]   ;;  %v5166_v40 = vld [vmem:[%s6442_s1 + $0x868] sm:$0xff]  }
  0xe7   :  { %3790 = vmatprep.mubr.bf16.mxu1 %v937_v42  ;;  %v5164_v39 = vld [vmem:[%s6442_s1 + $0x820] sm:$0xff]   ;;  %v5167_v42 = vld [vmem:[%s6442_s1 + $0x8e8] sm:$0xff]  }
  0xe8   :  { %4733 = vmatpush3.bf16.msra.mxu0 %v5119_v41  ;;  %v5165_v41 = vld [vmem:[%s6442_s1 + $0x8a0] sm:$0xff]  }
  0xe9   :  { %4734 = vmatprep.subr.bf16.mxu0 %v5121_v43  ;;  %4755 = vmatpush3.bf16.msra.mxu1 %v5120_v44  ;;  %v5168_v43 = vld [vmem:[%s6442_s1 + $0x828] sm:$0xff]  }
  0xea   :  { %4756 = vmatprep.subr.bf16.mxu1 %v5122_v45  ;;  %v5170_v45 = vld [vmem:[%s6442_s1 + $0x870] sm:$0xff]  }
  0xec   :  { %4735 = vmatpush3.bf16.msra.mxu0 %v5123_v46 }
  0xed   :  { %4736 = vmatprep.subr.bf16.mxu0 %v5125_v47  ;;  %4757 = vmatpush3.bf16.msra.mxu1 %v5124_v48  ;;  %v5169_v47 = vld [vmem:[%s6442_s1 + $0x8a8] sm:$0xff]  }
  0xee   :  { %4758 = vmatprep.subr.bf16.mxu1 %v5126_v49 }
  0xf0   :  { %4737 = vmatpush3.bf16.msra.mxu0 %v5127_v50  ;;  %v5171_v50 = vld [vmem:[%s6442_s1 + $0x8f0] sm:$0xff]  }
  0xf1   :  { %4738 = vmatprep.subr.bf16.mxu0 %v5129_v51  ;;  %4759 = vmatpush3.bf16.msra.mxu1 %v5128_v52  ;;  %v5172_v52 = vld [vmem:[%s6442_s1 + $0x830] sm:$0xff]  }
  0xf2   :  { %4760 = vmatprep.subr.bf16.mxu1 %v5130_v53 }
  0xf4   :  { %4739 = vmatpush3.bf16.msra.mxu0 %v5131_v54 }
  0xf5   :  { %4740 = vmatprep.subr.bf16.mxu0 %v5133_v55  ;;  %4761 = vmatpush3.bf16.msra.mxu1 %v5132_v56  ;;  %v5174_v56 = vld [vmem:[%s6442_s1 + $0x878] sm:$0xff]  }
  0xf6   :  { %v4438_v60 = vpop.f32.mrb[0].mxu0  ;;  %4762 = vmatprep.subr.bf16.mxu1 %v5134_v57 }
  0xf7   :  { %v4439_v62 = vpop.f32.mrb[1].mxu0  ;;  %v4460_v0 = vpop.f32.mrb[0].mxu1 }
  0xf8   :  { %v4440_v1 = vadd.f32 %v4439_v62, %v4438_v60  ;;  %v4461_v3 = vpop.f32.mrb[1].mxu1  ;;  %4741 = vmatpush3.bf16.msra.mxu0 %v5135_v59  ;;  %v4441_v13 = vpop.f32.mrb[2].mxu0  ;;  %v5175_v60 = vld [vmem:[%s6442_s1 + $0x8f8] sm:$0xff]  }
  0xf9   :  { %v4462_v6 = vadd.f32 %v4461_v3, %v4460_v0  ;;  %v4463_v7 = vpop.f32.mrb[2].mxu1  ;;  %4742 = vmatprep.subr.bf16.mxu0 %v5137_v61  ;;  %4763 = vmatpush3.bf16.msra.mxu1 %v5136_v63  ;;  %v4442_v15 = vpop.f32.mrb[3].mxu0  ;;  %v27_v61 = vld [vmem:[%s6443_s0 + $0x20] sm:$0xff]  ;;  %v5176_v63 = vld [vmem:[%s6442_s1 + $0x838] sm:$0xff]   ;;  %v5182_v13 = vld [vmem:[%s6442_s1 + $0x948] sm:$0xff]  }
  0xfa   :  { %v3193_v5 = vadd.f32 %v4440_v1, %v4068_v58  ;;  %v4464_v9 = vpop.f32.mrb[3].mxu1  ;;  %4764 = vmatprep.subr.bf16.mxu1 %v5138_v2  ;;  %v5173_v58 = vld [vmem:[%s6442_s1 + $0x8b0] sm:$0xff]   ;;  %v945_v0 = vrot.slane %v27_v61, %v5368_v35  ;;  %v938_v2 = vcombine.high %v27_v61, %v27_v61  ;;  %v5178_v3 = vld [vmem:[%s6442_s1 + $0x940] sm:$0xff]  }
  0xfb   :  { %v5181_v15 = vld [vmem:[%s6442_s1 + $0x980] sm:$0xff]  }
  0xfc   :  { %v6096_v11 = vadd.f32 %v4462_v6, %v3193_v5  ;;  %4743 = vmatpush3.bf16.msra.mxu0 %v5139_v4  ;;  %v5177_v4 = vld [vmem:[%s6442_s1 + $0x8b8] sm:$0xff]   ;;  %v953_v5 = vcombine.high %v945_v0, %v945_v0  ;;  %v961_v6 = vrot.slane %v945_v0, %v5368_v35  ;;  %v6217_v7 = vrot.slane %v938_v2, %v5368_v35  ;;  %v5212_v61 = vld [vmem:[%s6442_s1 + $0xa00] sm:$0xff]   ;;  %v5215_v2 = vld [vmem:[%s6442_s1 + $0xa08] sm:$0xff]  }
  0xfd   :  { %4744 = vmatprep.subr.bf16.mxu0 %v5141_v8  ;;  %4765 = vmatpush3.bf16.msra.mxu1 %v5140_v10  ;;  %v5179_v8 = vld [vmem:[%s6442_s1 + $0x9c0] sm:$0xff]  }
  0xfe   :  { %4766 = vmatprep.subr.bf16.mxu1 %v5142_v12  ;;  %v975_v9 = vrot.slane %v953_v5, %v5368_v35  ;;  %v5180_v10 = vld [vmem:[%s6442_s1 + $0x900] sm:$0xff]   ;;  %v983_v12 = vcombine.high %v961_v6, %v961_v6  ;;  %v5218_v5 = vld [vmem:[%s6442_s1 + $0xa10] sm:$0xff]  }
  0xff   :  { %v5213_v0 = vld [vmem:[%s6442_s1 + $0xa80] sm:$0xff]  }
 0x100   :  { %4745 = vmatpush3.bf16.msra.mxu0 %v5143_v14  ;;  %v985_v14 = vcombine.high %v975_v9, %v975_v9 }
 0x101   :  { %4774 = vmatprep.subr.bf16.mxu0 %v5146_v17  ;;  %4767 = vmatpush3.bf16.msra.mxu1 %v5144_v18  ;;  %v5183_v17 = vld [vmem:[%s6442_s1 + $0x9c8] sm:$0xff]  }
 0x102   :  { %4796 = vmatprep.subr.bf16.mxu1 %v5147_v19  ;;  %v5184_v18 = vld [vmem:[%s6442_s1 + $0x908] sm:$0xff]  }
 0x103   :  { %3751 = vmatmul.mubr.bf16.vlgmr.msra.gmra.mrb[28].mxu0 %v919_v16 }
 0x104   :  { %4775 = vmatpush3.bf16.msra.mxu0 %v5148_v20  ;;  %3791 = vmatmul.mubr.bf16.vlgmr.msra.gmra.mrb[28].mxu1 %v935_v21  ;;  %v5186_v20 = vld [vmem:[%s6442_s1 + $0x950] sm:$0xff]   ;;  %v5185_v21 = vld [vmem:[%s6442_s1 + $0x988] sm:$0xff]  }
 0x105   :  { %4776 = vmatprep.subr.bf16.mxu0 %v5150_v22  ;;  %4797 = vmatpush3.bf16.msra.mxu1 %v5149_v23  ;;  %v5187_v22 = vld [vmem:[%s6442_s1 + $0x9d0] sm:$0xff]  }
 0x106   :  { %4798 = vmatprep.subr.bf16.mxu1 %v5151_v24  ;;  %3830 = vmatprep.mubr.bf16.mxu0 %v975_v9  ;;  %v5188_v23 = vld [vmem:[%s6442_s1 + $0x910] sm:$0xff]   ;;  %v5190_v24 = vld [vmem:[%s6442_s1 + $0x958] sm:$0xff]   ;;  %v5223_v9 = vld [vmem:[%s6442_s1 + $0xa60] sm:$0xff]  }
 0x107   :  { %3870 = vmatprep.mubr.bf16.mxu1 %v985_v14  ;;  %v5227_v14 = vld [vmem:[%s6442_s1 + $0xa28] sm:$0xff]  }
 0x108   :  { %4777 = vmatpush3.bf16.msra.mxu0 %v5152_v25  ;;  %v5189_v25 = vld [vmem:[%s6442_s1 + $0x990] sm:$0xff]  }
 0x109   :  { %4778 = vmatprep.subr.bf16.mxu0 %v5154_v26  ;;  %4799 = vmatpush3.bf16.msra.mxu1 %v5153_v27  ;;  %v5191_v26 = vld [vmem:[%s6442_s1 + $0x9d8] sm:$0xff]  }
 0x10a   :  { %4800 = vmatprep.subr.bf16.mxu1 %v5155_v28  ;;  %v5192_v27 = vld [vmem:[%s6442_s1 + $0x918] sm:$0xff]   ;;  %v5194_v28 = vld [vmem:[%s6442_s1 + $0x960] sm:$0xff]  }
 0x10c   :  { %4779 = vmatpush3.bf16.msra.mxu0 %v5156_v29  ;;  %v5193_v29 = vld [vmem:[%s6442_s1 + $0x998] sm:$0xff]  }
 0x10d   :  { %4780 = vmatprep.subr.bf16.mxu0 %v5158_v31  ;;  %4801 = vmatpush3.bf16.msra.mxu1 %v5157_v32  ;;  %v5195_v31 = vld [vmem:[%s6442_s1 + $0x9e0] sm:$0xff]  }
 0x10e   :  { %4802 = vmatprep.subr.bf16.mxu1 %v5159_v33  ;;  %v5196_v32 = vld [vmem:[%s6442_s1 + $0x920] sm:$0xff]   ;;  %v5198_v33 = vld [vmem:[%s6442_s1 + $0x968] sm:$0xff]  }
 0x110   :  { %4781 = vmatpush3.bf16.msra.mxu0 %v5160_v34  ;;  %v5197_v34 = vld [vmem:[%s6442_s1 + $0x9a0] sm:$0xff]  }
 0x111   :  { %4782 = vmatprep.subr.bf16.mxu0 %v5162_v36  ;;  %4803 = vmatpush3.bf16.msra.mxu1 %v5161_v37  ;;  %v5199_v36 = vld [vmem:[%s6442_s1 + $0x9e8] sm:$0xff]  }
 0x112   :  { %4804 = vmatprep.subr.bf16.mxu1 %v5163_v38  ;;  %v5200_v37 = vld [vmem:[%s6442_s1 + $0x928] sm:$0xff]  }
 0x114   :  { %4783 = vmatpush3.bf16.msra.mxu0 %v5164_v39  ;;  %v5202_v39 = vld [vmem:[%s6442_s1 + $0x970] sm:$0xff]  }
 0x115   :  { %4784 = vmatprep.subr.bf16.mxu0 %v5166_v40  ;;  %4805 = vmatpush3.bf16.msra.mxu1 %v5165_v41  ;;  %v5201_v41 = vld [vmem:[%s6442_s1 + $0x9a8] sm:$0xff]  }
 0x116   :  { %v4482_v44 = vpop.f32.mrb[4].mxu0  ;;  %4806 = vmatprep.subr.bf16.mxu1 %v5167_v42 }
 0x117   :  { %v4483_v46 = vpop.f32.mrb[5].mxu0  ;;  %v4504_v48 = vpop.f32.mrb[4].mxu1 }
 0x118   :  { %v4484_v49 = vadd.f32 %v4483_v46, %v4482_v44  ;;  %v4505_v51 = vpop.f32.mrb[5].mxu1  ;;  %4785 = vmatpush3.bf16.msra.mxu0 %v5168_v43  ;;  %v4485_v62 = vpop.f32.mrb[6].mxu0  ;;  %v5203_v44 = vld [vmem:[%s6442_s1 + $0x9f0] sm:$0xff]  }
 0x119   :  { %v4506_v54 = vadd.f32 %v4505_v51, %v4504_v48  ;;  %v4507_v55 = vpop.f32.mrb[6].mxu1  ;;  %4786 = vmatprep.subr.bf16.mxu0 %v5170_v45  ;;  %4807 = vmatpush3.bf16.msra.mxu1 %v5169_v47  ;;  %v4486_v1 = vpop.f32.mrb[7].mxu0  ;;  %v5204_v46 = vld [vmem:[%s6442_s1 + $0x930] sm:$0xff]  }
 0x11a   :  { %v3273_v53 = vadd.f32 %v4484_v49, %v6096_v11  ;;  %v4508_v57 = vpop.f32.mrb[7].mxu1  ;;  %4808 = vmatprep.subr.bf16.mxu1 %v5171_v50  ;;  %v954_v11 = vcombine.high %v6217_v7, %v6217_v7  ;;  %v5206_v50 = vld [vmem:[%s6442_s1 + $0x978] sm:$0xff]   ;;  %v5244_v1 = vmov 0  }
 0x11c   :  { %v6197_v59 = vadd.f32 %v4506_v54, %v3273_v53  ;;  %4787 = vmatpush3.bf16.msra.mxu0 %v5172_v52  ;;  %v982_v16 = vrot.slane %v954_v11, %v5368_v35  ;;  %v5205_v52 = vld [vmem:[%s6442_s1 + $0x9b0] sm:$0xff]   ;;  %v5207_v54 = vld [vmem:[%s6442_s1 + $0x9f8] sm:$0xff]   ;;  %v5224_v11 = vld [vmem:[%s6442_s1 + $0xa20] sm:$0xff]  }
 0x11d   :  { %4788 = vmatprep.subr.bf16.mxu0 %v5174_v56  ;;  %4809 = vmatpush3.bf16.msra.mxu1 %v5173_v58  ;;  %v5208_v56 = vld [vmem:[%s6442_s1 + $0x938] sm:$0xff]   ;;  %v968_v58 = vrot.slane %v6217_v7, %v5368_v35  ;;  %v5219_v7 = vld [vmem:[%s6442_s1 + $0xa90] sm:$0xff]  }
 0x11e   :  { %4810 = vmatprep.subr.bf16.mxu1 %v5175_v60  ;;  %v986_v19 = vcombine.high %v982_v16, %v982_v16  ;;  %v5209_v60 = vld [vmem:[%s6442_s1 + $0x9b8] sm:$0xff]  }
 0x11f   :  { %v984_v62 = vcombine.high %v968_v58, %v968_v58 }
 0x120   :  { %4789 = vmatpush3.bf16.msra.mxu0 %v5176_v63  ;;  %v5214_v63 = vld [vmem:[%s6442_s1 + $0xa48] sm:$0xff]  }
 0x121   :  { %4818 = vmatprep.subr.bf16.mxu0 %v5178_v3  ;;  %4811 = vmatpush3.bf16.msra.mxu1 %v5177_v4  ;;  %v5217_v3 = vld [vmem:[%s6442_s1 + $0xa50] sm:$0xff]   ;;  %v5216_v4 = vld [vmem:[%s6442_s1 + $0xa88] sm:$0xff]  }
 0x122   :  { %4840 = vmatprep.subr.bf16.mxu1 %v5179_v8  ;;  %v5221_v8 = vld [vmem:[%s6442_s1 + $0xa18] sm:$0xff]  }
 0x123   :  { %3831 = vmatmul.mubr.bf16.vlgmr.msra.gmra.mrb[32].mxu0 %v961_v6  ;;  %v5220_v6 = vld [vmem:[%s6442_s1 + $0xa58] sm:$0xff]  }
 0x124   :  { %4819 = vmatpush3.bf16.msra.mxu0 %v5180_v10  ;;  %3871 = vmatmul.mubr.bf16.vlgmr.msra.gmra.mrb[32].mxu1 %v983_v12  ;;  %v5222_v10 = vld [vmem:[%s6442_s1 + $0xa98] sm:$0xff]   ;;  %v5226_v12 = vld [vmem:[%s6442_s1 + $0xa68] sm:$0xff]  }
 0x125   :  { %4820 = vmatprep.subr.bf16.mxu0 %v5182_v13  ;;  %4841 = vmatpush3.bf16.msra.mxu1 %v5181_v15  ;;  %v5225_v13 = vld [vmem:[%s6442_s1 + $0xaa0] sm:$0xff]   ;;  %v4069_v15 = vld.sshfl [vmem:[%s6443_s0 + $0x28] sm:$0x33 pattern:$0x75316420] }
 0x126   :  { %3910 = vmatprep.mubr.bf16.mxu0 %v982_v16  ;;  %4842 = vmatprep.subr.bf16.mxu1 %v5183_v17  ;;  %v5229_v17 = vld [vmem:[%s6442_s1 + $0xa70] sm:$0xff]  }
 0x127   :  { %3950 = vmatprep.mubr.bf16.mxu1 %v986_v19 }
 0x128   :  { %4821 = vmatpush3.bf16.msra.mxu0 %v5184_v18  ;;  %v994_v18 = vcombine.high %v4069_v15, %v4069_v15 }
 0x129   :  { %4822 = vmatprep.subr.bf16.mxu0 %v5186_v20  ;;  %4843 = vmatpush3.bf16.msra.mxu1 %v5185_v21  ;;  %v5228_v20 = vld [vmem:[%s6442_s1 + $0xaa8] sm:$0xff]  }
 0x12a   :  { %4844 = vmatprep.subr.bf16.mxu1 %v5187_v22 }
 0x12c   :  { %4823 = vmatpush3.bf16.msra.mxu0 %v5188_v23  ;;  %v5230_v23 = vld [vmem:[%s6442_s1 + $0xa30] sm:$0xff]  }
 0x12d   :  { %4824 = vmatprep.subr.bf16.mxu0 %v5190_v24  ;;  %4845 = vmatpush3.bf16.msra.mxu1 %v5189_v25  ;;  %v1008_v24 = vrot.slane %v994_v18, %v5368_v35 }
 0x12e   :  { %4846 = vmatprep.subr.bf16.mxu1 %v5191_v26 }
 0x130   :  { %4825 = vmatpush3.bf16.msra.mxu0 %v5192_v27 }
 0x131   :  { %4826 = vmatprep.subr.bf16.mxu0 %v5194_v28  ;;  %4847 = vmatpush3.bf16.msra.mxu1 %v5193_v29 }
 0x132   :  { %4848 = vmatprep.subr.bf16.mxu1 %v5195_v31 }
 0x134   :  { %4827 = vmatpush3.bf16.msra.mxu0 %v5196_v32  ;;  %v5232_v32 = vld [vmem:[%s6442_s1 + $0xa78] sm:$0xff]  }
 0x135   :  { %4828 = vmatprep.subr.bf16.mxu0 %v5198_v33  ;;  %4849 = vmatpush3.bf16.msra.mxu1 %v5197_v34  ;;  %v1010_v33 = vcombine.high %v1008_v24, %v1008_v24 }
 0x136   :  { %v4526_v38 = vpop.f32.mrb[8].mxu0  ;;  %4850 = vmatprep.subr.bf16.mxu1 %v5199_v36  ;;  %v5231_v36 = vld [vmem:[%s6442_s1 + $0xab0] sm:$0xff]  }
 0x137   :  { %v4527_v40 = vpop.f32.mrb[9].mxu0  ;;  %v4548_v42 = vpop.f32.mrb[8].mxu1 }
 0x138   :  { %v4528_v43 = vadd.f32 %v4527_v40, %v4526_v38  ;;  %v4549_v45 = vpop.f32.mrb[9].mxu1  ;;  %4829 = vmatpush3.bf16.msra.mxu0 %v5200_v37  ;;  %v4529_v55 = vpop.f32.mrb[10].mxu0  ;;  %v5233_v38 = vld [vmem:[%s6442_s1 + $0xa38] sm:$0xff]   ;;  %v1001_v40 = vrot.slane %v4069_v15, %v5368_v35  ;;  %v5237_v35 = vld [vmem:[%s6442_s1 + $0xad0] sm:$0xff]  }
 0x139   :  { %v4550_v48 = vadd.f32 %v4549_v45, %v4548_v42  ;;  %v4551_v49 = vpop.f32.mrb[10].mxu1  ;;  %4830 = vmatprep.subr.bf16.mxu0 %v5202_v39  ;;  %4851 = vmatpush3.bf16.msra.mxu1 %v5201_v41  ;;  %v4530_v57 = vpop.f32.mrb[11].mxu0  ;;  %v5234_v39 = vld [vmem:[%s6442_s1 + $0xab8] sm:$0xff]   ;;  %v5235_v41 = vld [vmem:[%s6442_s1 + $0xac0] sm:$0xff]   ;;  %v5236_v42 = vld [vmem:[%s6442_s1 + $0xac8] sm:$0xff]  }
 0x13a   :  { %v3353_v47 = vadd.f32 %v4528_v43, %v6197_v59  ;;  %v4552_v51 = vpop.f32.mrb[11].mxu1  ;;  %4852 = vmatprep.subr.bf16.mxu1 %v5203_v44  ;;  %v5211_v59 = vld [vmem:[%s6442_s1 + $0xa40] sm:$0xff]   ;;  %v5238_v43 = vld [vmem:[%s6442_s1 + $0xad8] sm:$0xff]  }
 0x13b   :  { %v5239_v44 = vld [vmem:[%s6442_s1 + $0xae0] sm:$0xff]  }
 0x13c   :  { %v6308_v53 = vadd.f32 %v4550_v48, %v3353_v47  ;;  %4831 = vmatpush3.bf16.msra.mxu0 %v5204_v46  ;;  %v5240_v47 = vld [vmem:[%s6442_s1 + $0xae8] sm:$0xff]  }
 0x13d   :  { %4832 = vmatprep.subr.bf16.mxu0 %v5206_v50  ;;  %4853 = vmatpush3.bf16.msra.mxu1 %v5205_v52 }
 0x13e   :  { %4854 = vmatprep.subr.bf16.mxu1 %v5207_v54 }
 0x140   :  { %4833 = vmatpush3.bf16.msra.mxu0 %v5208_v56  ;;  %v1009_v56 = vcombine.high %v1001_v40, %v1001_v40 }
 0x141   :  { %4862 = vmatprep.subr.bf16.mxu0 %v5211_v59  ;;  %4855 = vmatpush3.bf16.msra.mxu1 %v5209_v60 }
 0x142   :  { %3998 = vmatprep.subr.bf16.mxu1 %v5244_v1 }
 0x143   :  { %3911 = vmatmul.mubr.bf16.vlgmr.msra.gmra.mrb[36].mxu0 %v968_v58 }
 0x144   :  { %4863 = vmatpush3.bf16.msra.mxu0 %v5212_v61  ;;  %3951 = vmatmul.mubr.bf16.vlgmr.msra.gmra.mrb[36].mxu1 %v984_v62 }
 0x145   :  { %4864 = vmatprep.subr.bf16.mxu0 %v5214_v63  ;;  %3999 = vmatpush1.bf16.msra.mxu1 %v5213_v0 }
 0x146   :  { %4000 = vmatprep.subr.bf16.mxu1 %v5244_v1  ;;  %3990 = vmatprep.mubr.bf16.mxu0 %v1008_v24 }
 0x147   :  { %4420 = vmatprep.mubr.msk.bf16.mxu1 %vm3154_vm0, %v1010_v33 }
 0x148   :  { %4865 = vmatpush3.bf16.msra.mxu0 %v5215_v2 }
 0x149   :  { %4866 = vmatprep.subr.bf16.mxu0 %v5217_v3  ;;  %4001 = vmatpush1.bf16.msra.mxu1 %v5216_v4 }
 0x14a   :  { %4002 = vmatprep.subr.bf16.mxu1 %v5244_v1 }
 0x14c   :  { %4867 = vmatpush3.bf16.msra.mxu0 %v5218_v5 }
 0x14d   :  { %4868 = vmatprep.subr.bf16.mxu0 %v5220_v6  ;;  %4003 = vmatpush1.bf16.msra.mxu1 %v5219_v7 }
 0x14e   :  { %4004 = vmatprep.subr.bf16.mxu1 %v5244_v1 }
 0x150   :  { %4869 = vmatpush3.bf16.msra.mxu0 %v5221_v8 }
 0x151   :  { %4870 = vmatprep.subr.bf16.mxu0 %v5223_v9  ;;  %4005 = vmatpush1.bf16.msra.mxu1 %v5222_v10 }
 0x152   :  { %4006 = vmatprep.subr.bf16.mxu1 %v5244_v1 }
 0x154   :  { %4871 = vmatpush3.bf16.msra.mxu0 %v5224_v11 }
 0x155   :  { %4872 = vmatprep.subr.bf16.mxu0 %v5226_v12  ;;  %4007 = vmatpush1.bf16.msra.mxu1 %v5225_v13 }
 0x156   :  { %v4570_v16 = vpop.f32.mrb[12].mxu0  ;;  %4008 = vmatprep.subr.bf16.mxu1 %v5244_v1 }
 0x157   :  { %v4571_v19 = vpop.f32.mrb[13].mxu0  ;;  %v4592_v21 = vpop.f32.mrb[12].mxu1 }
 0x158   :  { %v4572_v22 = vadd.f32 %v4571_v19, %v4570_v16  ;;  %v4573_v25 = vpop.f32.mrb[14].mxu0  ;;  %v4593_v26 = vpop.f32.mrb[13].mxu1  ;;  %4873 = vmatpush3.bf16.msra.mxu0 %v5227_v14 }
 0x159   :  { %v4574_v27 = vpop.f32.mrb[15].mxu0  ;;  %v4594_v29 = vadd.f32 %v4593_v26, %v4592_v21  ;;  %v4595_v31 = vpop.f32.mrb[14].mxu1  ;;  %4874 = vmatprep.subr.bf16.mxu0 %v5229_v17  ;;  %4009 = vmatpush1.bf16.msra.mxu1 %v5228_v20  ;;  %v10_v26 = vstv %s6445_s4 }
 0x15a   :  { %v3433_v28 = vadd.f32 %v4572_v22, %v6308_v53  ;;  %v4596_v34 = vpop.f32.mrb[15].mxu1  ;;  %4010 = vmatprep.subr.bf16.mxu1 %v5244_v1  ;;  %11 = vst [vmem:[#allocation2] sm:$0x1] %v10_v26 }
 0x15c   :  { %v3473_v37 = vadd.f32 %v4594_v29, %v3433_v28  ;;  %4875 = vmatpush3.bf16.msra.mxu0 %v5230_v23 }
 0x15d   :  { %4876 = vmatprep.subr.bf16.mxu0 %v5232_v32  ;;  %4011 = vmatpush1.bf16.msra.mxu1 %v5231_v36 }
 0x15e   :  { %4012 = vmatprep.subr.bf16.mxu1 %v5244_v1 }
 0x160   :  { %4877 = vmatpush3.bf16.msra.mxu0 %v5233_v38 }
 0x161   :  { %4013 = vmatpush1.bf16.msra.mxu1 %v5234_v39 }
 0x162   :  { %4014 = vmatprep.subr.bf16.mxu1 %v5244_v1 }
 0x163   :  { %3991 = vmatmul.mubr.bf16.vlgmr.msra.gmra.mrb[40].mxu0 %v1001_v40 }
 0x165   :  { %4015 = vmatpush1.bf16.msra.mxu1 %v5235_v41 }
 0x166   :  { %4016 = vmatprep.subr.bf16.mxu1 %v5244_v1 }
 0x169   :  { %4017 = vmatpush1.bf16.msra.mxu1 %v5236_v42 }
 0x16a   :  { %4018 = vmatprep.subr.bf16.mxu1 %v5244_v1 }
 0x16d   :  { %4019 = vmatpush1.bf16.msra.mxu1 %v5237_v35 }
 0x16e   :  { %4020 = vmatprep.subr.bf16.mxu1 %v5244_v1 }
 0x171   :  { %4021 = vmatpush1.bf16.msra.mxu1 %v5238_v43 }
 0x172   :  { %4022 = vmatprep.subr.bf16.mxu1 %v5244_v1 }
 0x175   :  { %4023 = vmatpush1.bf16.msra.mxu1 %v5239_v44 }
 0x176   :  { %v4614_v45 = vpop.f32.mrb[16].mxu0  ;;  %4024 = vmatprep.subr.bf16.mxu1 %v5244_v1 }
 0x177   :  { %v4615_v46 = vpop.f32.mrb[17].mxu0  ;;  %v4636_v48 = vpop.f32.mrb[16].mxu1 }
 0x178   :  { %v4616_v49 = vadd.f32 %v4615_v46, %v4614_v45  ;;  %v4617_v50 = vpop.f32.mrb[18].mxu0  ;;  %v4637_v51 = vpop.f32.mrb[17].mxu1 }
 0x179   :  { %v4618_v52 = vpop.f32.mrb[19].mxu0  ;;  %v4638_v54 = vadd.f32 %v4637_v51, %v4636_v48  ;;  %v4639_v55 = vpop.f32.mrb[18].mxu1  ;;  %4025 = vmatpush1.bf16.msra.mxu1 %v5240_v47 }
 0x17a   :  { %v3513_v53 = vadd.f32 %v4616_v49, %v3473_v37  ;;  %v4640_v57 = vpop.f32.mrb[19].mxu1 }
 0x17c   :  { %v3553_v58 = vadd.f32 %v4638_v54, %v3513_v53  ;;  %4031 = vmatmul.mubr.bf16.vlgmr.msra.gmra.mrb[40].mxu1 %v1009_v56 }
 0x196   :  { %v4658_v59 = vpop.f32.mrb[20].mxu0 }
 0x197   :  { %v4659_v60 = vpop.f32.mrb[21].mxu0  ;;  %v4680_v61 = vpop.f32.mrb[20].mxu1 }
 0x198   :  { %v4660_v62 = vadd.f32 %v4659_v60, %v4658_v59  ;;  %v4661_v63 = vpop.f32.mrb[22].mxu0  ;;  %v4681_v0 = vpop.f32.mrb[21].mxu1 }
 0x199   :  { %v4662_v2 = vpop.f32.mrb[23].mxu0  ;;  %v4682_v1 = vadd.f32 %v4681_v0, %v4680_v61  ;;  %v4683_v4 = vpop.f32.mrb[22].mxu1  ;;  %v4039_v63 = vld [vmem:[%s6446_s3] sm:$0x1] }
 0x19a   :  { %v3593_v3 = vadd.f32 %v4660_v62, %v3553_v58  ;;  %v4684_v5 = vpop.f32.mrb[23].mxu1  ;;  %v4040_v0 = vunpack.c.l.bf16 %v4039_v63  ;;  %v4043_v2 = vsub.s32 0, %v5353_v30 }
 0x19c   :  { %v3633_v6 = vadd.f32 %v4682_v1, %v3593_v3  ;;  %v4044_v5 = vrot.slane %v4040_v0, %v4043_v2 }
 0x1b6   :  { %v4702_v7 = vpop.f32.mrb[24].mxu0 }
 0x1b7   :  { %v4703_v8 = vpop.f32.mrb[25].mxu0  ;;  %v4724_v9 = vpop.f32.mrb[24].mxu1 }
 0x1b8   :  { %v4704_v10 = vadd.f32 %v4703_v8, %v4702_v7  ;;  %v4705_v11 = vpop.f32.mrb[26].mxu0  ;;  %v4725_v12 = vpop.f32.mrb[25].mxu1 }
 0x1b9   :  { %v4706_v13 = vpop.f32.mrb[27].mxu0  ;;  %v4726_v15 = vadd.f32 %v4725_v12, %v4724_v9  ;;  %v4727_v16 = vpop.f32.mrb[26].mxu1  ;;  %v4421_v11 = vld [vmem:[#allocation2] ss:$0 sm:$0xff] }
 0x1ba   :  { %v3673_v14 = vadd.f32 %v4704_v10, %v3633_v6  ;;  %v4728_v17 = vpop.f32.mrb[27].mxu1 }
 0x1bc   :  { %v3713_v18 = vadd.f32 %v4726_v15, %v3673_v14 }
 0x1d6   :  { %v4746_v19 = vpop.f32.mrb[28].mxu0 }
 0x1d7   :  { %v4747_v20 = vpop.f32.mrb[29].mxu0  ;;  %v4768_v21 = vpop.f32.mrb[28].mxu1 }
 0x1d8   :  { %v4748_v22 = vadd.f32 %v4747_v20, %v4746_v19  ;;  %v4749_v23 = vpop.f32.mrb[30].mxu0  ;;  %v4769_v24 = vpop.f32.mrb[29].mxu1 }
 0x1d9   :  { %v4750_v25 = vpop.f32.mrb[31].mxu0  ;;  %v4770_v28 = vadd.f32 %v4769_v24, %v4768_v21  ;;  %v4771_v29 = vpop.f32.mrb[30].mxu1 }
 0x1da   :  { %v3753_v27 = vadd.f32 %v4748_v22, %v3713_v18  ;;  %v4772_v31 = vpop.f32.mrb[31].mxu1 }
 0x1dc   :  { %v3793_v32 = vadd.f32 %v4770_v28, %v3753_v27 }
 0x1f6   :  { %v4790_v33 = vpop.f32.mrb[32].mxu0 }
 0x1f7   :  { %v4791_v34 = vpop.f32.mrb[33].mxu0  ;;  %v4812_v36 = vpop.f32.mrb[32].mxu1 }
 0x1f8   :  { %v4792_v37 = vadd.f32 %v4791_v34, %v4790_v33  ;;  %v4793_v38 = vpop.f32.mrb[34].mxu0  ;;  %v4813_v39 = vpop.f32.mrb[33].mxu1 }
 0x1f9   :  { %v4794_v40 = vpop.f32.mrb[35].mxu0  ;;  %v4814_v42 = vadd.f32 %v4813_v39, %v4812_v36  ;;  %v4815_v35 = vpop.f32.mrb[34].mxu1 }
 0x1fa   :  { %v3833_v41 = vadd.f32 %v4792_v37, %v3793_v32  ;;  %v4816_v43 = vpop.f32.mrb[35].mxu1 }
 0x1fc   :  { %v3873_v44 = vadd.f32 %v4814_v42, %v3833_v41 }
 0x216   :  { %v4834_v45 = vpop.f32.mrb[36].mxu0 }
 0x217   :  { %v4835_v46 = vpop.f32.mrb[37].mxu0  ;;  %v4856_v47 = vpop.f32.mrb[36].mxu1 }
 0x218   :  { %v4836_v48 = vadd.f32 %v4835_v46, %v4834_v45  ;;  %v4837_v49 = vpop.f32.mrb[38].mxu0  ;;  %v4857_v50 = vpop.f32.mrb[37].mxu1 }
 0x219   :  { %v4838_v51 = vpop.f32.mrb[39].mxu0  ;;  %v4858_v53 = vadd.f32 %v4857_v50, %v4856_v47  ;;  %v4859_v54 = vpop.f32.mrb[38].mxu1 }
 0x21a   :  { %v3913_v52 = vadd.f32 %v4836_v48, %v3873_v44  ;;  %v4860_v55 = vpop.f32.mrb[39].mxu1 }
 0x21c   :  { %v3953_v56 = vadd.f32 %v4858_v53, %v3913_v52 }
 0x236   :  { %v4878_v57 = vpop.f32.mrb[40].mxu0 }
 0x237   :  { %v4879_v58 = vpop.f32.mrb[41].mxu0 }
 0x238   :  { %v4880_v59 = vadd.f32 %v4879_v58, %v4878_v57  ;;  %v4881_v60 = vpop.f32.mrb[42].mxu0 }
 0x239   :  { %v4882_v61 = vpop.f32.mrb[43].mxu0 }
 0x23a   :  { %v3993_v62 = vadd.f32 %v4880_v59, %v3953_v56 }
 0x24f   :  { %v4032_v3 = vpop.f32.mrb[40].mxu1 }
 0x250   :  { %v4033_v1 = vadd.f32 %v4032_v3, %v3993_v62  ;;  %v4034_v4 = vpop.f32.mrb[41].mxu1 }
 0x251   :  { %v4035_v6 = vpop.f32.mrb[42].mxu1 }
 0x252   :  { %v4038_v7 = vmax.f32 %v4033_v1, 0.0  ;;  %v4036_v8 = vpop.f32.mrb[43].mxu1 }
 0x254   :  { %v4045_v9 = vmul.f32 %v4044_v5, %v4038_v7 }
 0x256   :  { %v4047_v10 = vsel %vm4046_vm1, %v4045_v9, 0.0 }
 0x257   :  { %4048 = vadd.xlane.f32.xlu0 %v4047_v10 }
 0x2e4   :  { %v4049_v12 = vpop.xlane.xlu0 %4048 }
 0x2e5   :  { %v4057_v13 = vadd.f32 %v4421_v11, %v4049_v12 }
 0x2e7   :  { %v4058_v14 = vmul.f32 0.5, %v4057_v13 }
 0x2e9   :  { %5241 = vtanh.f32 %v4058_v14 }
 0x2f3   :  { %v5242_v15 = vpop.eup %5241 }
 0x2f4   :  { %v4060_v16 = vadd.f32 1.0, %v5242_v15 }
 0x2f6   :  { %v4061_v30 = vmul.f32 0.5, %v4060_v16 }
 0x2f8   :  { %4063 = vst.msk [vmem:[%s6447_s5] sm:$0x3] %vm4062_vm2, %v4061_v30 }

</bundles_post_ra>
